<compile_context>
chip_gen: v5e
topology: v5e:2x2
jax: 0.10.0
libtpu: 0.0.40
codegen_flags: <defaults>
</compile_context>

<pallas_src>
import functools
import math

import jax
import jax.numpy as jnp
from jax.experimental import pallas as pl
from jax.experimental.pallas import tpu as pltpu

_LANE = 128                      # channel padding quantum (lane width)
_CHUNK = 256                     # max output rows per fused dot
_VMEM_LIMIT = 64 * 1024 * 1024   # cap only; per-step usage is kept far below


def _round_up(n, m):
    return ((n + m - 1) // m) * m


def _finish(acc, bias, negative_slope, out_dtype):
    acc = acc + bias
    if negative_slope is not None:
        acc = jnp.where(acc > 0, acc, negative_slope * acc)
    return acc.astype(out_dtype)


# ----------------------------------------------------------------------------
# Layer 1: taps pre-folded into K in the wrapper; kernel = one fused matmul.
# ----------------------------------------------------------------------------
def _mm_bias_act_kernel(x_ref, w_ref, b_ref, o_ref, *, negative_slope):
    # x_ref: (1, M, Kp) bf16   w_ref: (Kp, Coutp) bf16   b_ref: (1, Coutp) f32
    m_tot = x_ref.shape[1]
    bias = b_ref[...]
    for r0 in range(0, m_tot, _CHUNK):
        ch = min(_CHUNK, m_tot - r0)
        acc = jnp.dot(x_ref[0, r0:r0 + ch, :], w_ref[...],
                      preferred_element_type=jnp.float32)
        o_ref[0, r0:r0 + ch, :] = _finish(acc, bias, negative_slope,
                                          o_ref.dtype)


def conv1_tapfolded(x_nhwc, w2d, b2d, *, negative_slope, out_dtype):
    """conv k4 s2 p1 for layer 1: wrapper-side im2col (Cin is tiny) so the
    whole conv is a single lane-dense K matmul per image."""
    N, H, W, Cin = x_nhwc.shape
    assert H % 2 == 0 and W % 2 == 0, "k=4,s=2,p=1 path assumes even H, W"
    Ho, Wo = H // 2, W // 2
    M = Ho * Wo
    Kp, Coutp = w2d.shape
    K = 16 * Cin
    assert Kp >= K and Kp % _LANE == 0 and Coutp % _LANE == 0

    xp = jnp.pad(x_nhwc, ((0, 0), (1, 1), (1, 1), (0, 0)))
    taps = [xp[:, kh:kh + H:2, kw:kw + W:2, :]
            for kh in range(4) for kw in range(4)]         # 16 x (N,Ho,Wo,Cin)
    im = jnp.concatenate(taps, axis=-1).reshape(N, M, K)
    im = jnp.pad(im, ((0, 0), (0, 0), (0, Kp - K))).astype(jnp.bfloat16)

    cost = pl.CostEstimate(
        flops=2 * N * M * Kp * Coutp, transcendentals=0,
        bytes_accessed=int(N * M * Kp * 2 + Kp * Coutp * 2 + 4 * Coutp
                           + N * M * Coutp * 2))

    out = pl.pallas_call(
        functools.partial(_mm_bias_act_kernel, negative_slope=negative_slope),
        out_shape=jax.ShapeDtypeStruct((N, M, Coutp), out_dtype),
        grid=(N,),
        in_specs=[pl.BlockSpec((1, M, Kp), lambda n: (n, 0, 0)),
                  pl.BlockSpec((Kp, Coutp), lambda n: (0, 0)),
                  pl.BlockSpec((1, Coutp), lambda n: (0, 0))],
        out_specs=pl.BlockSpec((1, M, Coutp), lambda n: (n, 0, 0)),
        compiler_params=pltpu.CompilerParams(
            dimension_semantics=("parallel",),
            vmem_limit_bytes=_VMEM_LIMIT),
        cost_estimate=cost,
    )(im, w2d, b2d)
    return out.reshape(N, Ho, Wo, Coutp)


# ----------------------------------------------------------------------------
# Layers 2..5: stacked parity slabs in, im2col in VMEM scratch, one big-K dot
# per row chunk (or a VPU reduce for the Cout=1 classifier), fused epilogue.
# ----------------------------------------------------------------------------
def _conv_tapfold_kernel(slab_ref, w_ref, b_ref, o_ref, im_ref, *, ho, wo,
                         chunk_rows, negative_slope, cout_is_one):
    # slab_ref: (G, 4, Hh, Wh, Cin) bf16  -- stacked parity slabs, G images
    # w_ref:    (16*Cin, Coutp) bf16      -- or (1, 16*Cin) when cout_is_one
    # b_ref:    (1, Coutp) f32            -- or (1, 1)
    # o_ref:    (1, G*M, Coutp)           -- or (1, G*M, 1) f32
    # im_ref:   VMEM scratch (G*M, 16*Cin) bf16
    G = slab_ref.shape[0]
    cin = slab_ref.shape[-1]
    M = ho * wo
    gm = G * M

    # Phase 1: build the im2col slab once (tap relayout decoupled from matmuls).
    for kh in range(4):
        for kw in range(4):
            p = 2 * (kh % 2) + (kw % 2)        # parity slab index
            dh, dw = kh // 2, kw // 2          # static offsets in {0, 1}
            t = kh * 4 + kw
            taps = [slab_ref[g, p, dh:dh + ho, dw:dw + wo, :].reshape(M, cin)
                    for g in range(G)]
            col = taps[0] if G == 1 else jnp.concatenate(taps, axis=0)
            im_ref[:, t * cin:(t + 1) * cin] = col

    # Phase 2: one K = 16*Cin contraction per row chunk, fused bias (+ LeakyReLU).
    bias = b_ref[...]
    if cout_is_one:
        w_row = w_ref[...].astype(jnp.float32)              # (1, K)
    for r0 in range(0, gm, chunk_rows):
        ch = min(chunk_rows, gm - r0)
        x = im_ref[r0:r0 + ch, :]
        if cout_is_one:
            # Classifier: only one useful output column -> VPU multiply + XLU
            # lane reduction instead of an MXU dot against a zero-padded weight.
            acc = jnp.sum(x.astype(jnp.float32) * w_row, axis=-1, keepdims=True)
        else:
            acc = jnp.dot(x, w_ref[...], preferred_element_type=jnp.float32)
        o_ref[0, r0:r0 + ch, :] = _finish(acc, bias, negative_slope,
                                          o_ref.dtype)


def conv_tapfolded(x_nhwc, w2d, b2d, *, negative_slope, out_dtype,
                   cout_is_one=False):
    """conv k4 s2 p1 (+bias, +optional LeakyReLU) for lane-padded Cin layers."""
    N, H, W, Cin = x_nhwc.shape
    assert H % 2 == 0 and W % 2 == 0 and Cin % _LANE == 0
    Ho, Wo = H // 2, W // 2
    Hh, Wh = Ho + 1, Wo + 1
    M = Ho * Wo
    K = 16 * Cin
    if cout_is_one:
        assert w2d.shape == (1, K)
        Coutp = 1
    else:
        assert w2d.shape[0] == K
        Coutp = w2d.shape[1]

    # Single fused pad + strided-slice pass producing the stacked parity slabs
    # (one extra activation read+write per layer, down from pad + 6-D transpose).
    # TODO(synk): parity extraction could move fully inside the kernel (strided
    # in-kernel slices of the raw NHWC tile) to drop this pass entirely; kept
    # in the wrapper for lowering safety.
    xp = jnp.pad(x_nhwc, ((0, 0), (1, 1), (1, 1), (0, 0)))
    slab = jnp.stack([xp[:, ph::2, pw::2, :] for ph in (0, 1) for pw in (0, 1)],
                     axis=1).astype(jnp.bfloat16)          # (N, 4, Hh, Wh, Cin)

    out_bytes = 4 if out_dtype == jnp.float32 else 2
    # Tiny tail layers: fold several batch elements into one grid step so the
    # MXU M dimension is filled and per-step overhead amortizes.
    bytes_per_img = (2 * 4 * Hh * Wh * Cin * 2 + M * K * 2
                     + 2 * M * Coutp * out_bytes)
    G = 1
    if M <= 16:
        for cand in range(N, 0, -1):
            if (N % cand == 0 and cand * M <= _CHUNK
                    and cand * bytes_per_img <= 8 * 1024 * 1024):
                G = cand
                break
    Ngrp = N // G
    chunk_rows = _CHUNK if Coutp <= 256 else 128   # bound f32 live values

    if cout_is_one:
        w_spec = pl.BlockSpec((1, K), lambda i: (0, 0))
        b_spec = pl.BlockSpec((1, 1), lambda i: (0, 0))
    else:
        w_spec = pl.BlockSpec((K, Coutp), lambda i: (0, 0))
        b_spec = pl.BlockSpec((1, Coutp), lambda i: (0, 0))

    cost = pl.CostEstimate(
        flops=2 * N * M * K * Coutp, transcendentals=0,
        bytes_accessed=int(N * 4 * Hh * Wh * Cin * 2 + w2d.size * 2
                           + b2d.size * 4 + N * M * Coutp * out_bytes))

    out = pl.pallas_call(
        functools.partial(_conv_tapfold_kernel, ho=Ho, wo=Wo,
                          chunk_rows=chunk_rows,
                          negative_slope=negative_slope,
                          cout_is_one=cout_is_one),
        out_shape=jax.ShapeDtypeStruct((Ngrp, G * M, Coutp), out_dtype),
        grid=(Ngrp,),
        in_specs=[pl.BlockSpec((G, 4, Hh, Wh, Cin), lambda i: (i, 0, 0, 0, 0)),
                  w_spec, b_spec],
        out_specs=pl.BlockSpec((1, G * M, Coutp), lambda i: (i, 0, 0)),
        scratch_shapes=[pltpu.VMEM((G * M, K), jnp.bfloat16)],
        compiler_params=pltpu.CompilerParams(
            dimension_semantics=("parallel",),
            vmem_limit_bytes=_VMEM_LIMIT),
        cost_estimate=cost,
    )(slab, w2d, b2d)
    return out.reshape(N, Ho, Wo, Coutp)


# ----------------------------------------------------------------------------
# Synthetic Tucker-factorized conv weights (tltorch FactorizedConv analogue).
# ----------------------------------------------------------------------------
def _tucker_conv_weight(key, cout, cin, kh=4, kw=4):
    # TODO(synk): tltorch's Tucker *decomposition of pretrained weights* (HOSVD
    # fit) has no Pallas equivalent; synthetic core/factors are reconstructed
    # to the dense conv weight, matching FactorizedConv's forward math.
    dims = (cout, cin, kh, kw)
    ranks = tuple(max(1, d // 2) for d in dims)          # rank=0.5 per mode
    kg, k0, k1, k2, k3 = jax.random.split(key, 5)
    scale = 1.0 / math.sqrt(cin * kh * kw)
    core = jax.random.normal(kg, ranks, jnp.float32) * scale
    factors = [jax.random.normal(k, (d, r), jnp.float32) / math.sqrt(r)
               for k, d, r in zip((k0, k1, k2, k3), dims, ranks)]
    w = jnp.einsum('abcd,ia->ibcd', core, factors[0])
    w = jnp.einsum('ibcd,jb->ijcd', w, factors[1])
    w = jnp.einsum('ijcd,kc->ijkd', w, factors[2])
    w = jnp.einsum('ijkd,ld->ijkl', w, factors[3])       # (Cout, Cin, 4, 4)
    return w


def init_tf_discriminator_params(key, num_classes, ndf=64):
    chans = [num_classes, ndf, ndf * 2, ndf * 4, ndf * 8, 1]
    params = []
    cin_pad = num_classes
    for i in range(5):
        key, wkey, bkey = jax.random.split(key, 3)
        cin, cout = chans[i], chans[i + 1]
        w = _tucker_conv_weight(wkey, cout, cin)          # (Cout, Cin, 4, 4)
        bound = 1.0 / math.sqrt(cin * 16)
        b = jax.random.uniform(bkey, (cout,), jnp.float32, -bound, bound)
        w = jnp.transpose(w, (2, 3, 1, 0))                # (4, 4, Cin, Cout)
        if i == 0:
            # Layer 1: weight packed as (Kp, Coutp) with K = 16*Cin zero-padded
            # to a lane multiple (matches the wrapper im2col columns).
            coutp = _round_up(cout, _LANE)
            k, kp = 16 * cin, _round_up(16 * cin, _LANE)
            w2d = jnp.pad(w.reshape(k, cout),
                          ((0, kp - k), (0, coutp - cout))).astype(jnp.bfloat16)
            b2d = jnp.pad(b, (0, coutp - cout)).reshape(1, coutp)
            cin_pad = coutp
        elif i < 4:
            # Mid layers: zero-pad Cin rows (to the previous layer's padded
            # Cout) and Cout columns; fold taps into K rows, row = t*Cin + c.
            coutp = _round_up(cout, _LANE)
            w = jnp.pad(w, ((0, 0), (0, 0), (0, cin_pad - cin),
                            (0, coutp - cout)))
            w2d = w.reshape(16 * cin_pad, coutp).astype(jnp.bfloat16)
            b2d = jnp.pad(b, (0, coutp - cout)).reshape(1, coutp)
            cin_pad = coutp
        else:
            # Classifier (Cout = 1): single weight row for the VPU reduce.
            w = jnp.pad(w, ((0, 0), (0, 0), (0, cin_pad - cin), (0, 0)))
            w2d = w.reshape(16 * cin_pad, 1).T.astype(jnp.bfloat16)   # (1, K)
            b2d = b.reshape(1, 1)
        params.append((w2d, b2d))
    return params


# ----------------------------------------------------------------------------
# Forward: fact_conv{1..4} + LeakyReLU(0.2), then fact_classifier (no act).
# ----------------------------------------------------------------------------
def tf_discriminator_forward(params, x_nchw):
    x = jnp.transpose(x_nchw, (0, 2, 3, 1))               # NCHW -> NHWC (f32)
    w, b = params[0]
    x = conv1_tapfolded(x, w, b, negative_slope=0.2, out_dtype=jnp.bfloat16)
    for w, b in params[1:4]:
        x = conv_tapfolded(x, w, b, negative_slope=0.2, out_dtype=jnp.bfloat16)
    w, b = params[4]
    x = conv_tapfolded(x, w, b, negative_slope=None, out_dtype=jnp.float32,
                       cout_is_one=True)
    return jnp.transpose(x, (0, 3, 1, 2))                  # NHWC -> NCHW


if __name__ == "__main__":
    num_classes = 4
    ndf = 8            # small ndf for the synthetic run (module default is 64)
    N, H, W = 2, 32, 32  # 32 -> 16 -> 8 -> 4 -> 2 -> 1 under five stride-2 convs

    key = jax.random.PRNGKey(0)
    kx, kp = jax.random.split(key)
    x = jax.random.normal(kx, (N, num_classes, H, W), jnp.float32)
    params = init_tf_discriminator_params(kp, num_classes, ndf)

    fwd = jax.jit(tf_discriminator_forward)
    out = jax.block_until_ready(fwd(params, x))
    assert out.shape == (N, 1, 1, 1), out.shape
    assert bool(jnp.all(jnp.isfinite(out)))
    print("KERNEL_OK")
</pallas_src>

<mosaic_0001>
module attributes {stable_mosaic.version = 11 : i64} {
  func.func @_mm_bias_act_kernel(%arg0: i32, %arg1: memref<1x256x128xbf16, #tpu.memory_space<vmem>>, %arg2: memref<128x128xbf16, #tpu.memory_space<vmem>>, %arg3: memref<1x128xf32, #tpu.memory_space<vmem>>, %arg4: memref<1x256x128xbf16, #tpu.memory_space<vmem>>) attributes {dimension_semantics = [#tpu.dimension_semantics<parallel>], iteration_bounds = array<i64: 2>, scalar_prefetch = 0 : i64, scratch_operands = 0 : i64, tpu.core_type = #tpu.core_type<tc>, window_params = [{transform_indices = @transform_0, window_bounds = array<i64: 1, 256, 128>}, {pipeline_mode = #tpu.pipeline_mode<synchronous>, transform_indices = @transform_1, window_bounds = array<i64: 128, 128>}, {pipeline_mode = #tpu.pipeline_mode<synchronous>, transform_indices = @transform_2, window_bounds = array<i64: 1, 128>}, {transform_indices = @transform_3, window_bounds = array<i64: 1, 256, 128>}]} {
    %c0 = arith.constant 0 : index
    %c0_0 = arith.constant 0 : index
    %0 = vector.load %arg3[%c0, %c0_0] : memref<1x128xf32, #tpu.memory_space<vmem>>, vector<1x128xf32>
    %c0_1 = arith.constant 0 : index
    %c0_2 = arith.constant 0 : index
    %c0_3 = arith.constant 0 : index
    %1 = vector.load %arg1[%c0_1, %c0_2, %c0_3] : memref<1x256x128xbf16, #tpu.memory_space<vmem>>, vector<1x256x128xbf16>
    %2 = vector.shape_cast %1 : vector<1x256x128xbf16> to vector<256x128xbf16>
    %c0_4 = arith.constant 0 : index
    %c0_5 = arith.constant 0 : index
    %3 = vector.load %arg2[%c0_4, %c0_5] : memref<128x128xbf16, #tpu.memory_space<vmem>>, vector<128x128xbf16>
    %cst = arith.constant dense<0.000000e+00> : vector<256x128xf32>
    %4 = tpu.matmul %2, %3, %cst {dimension_numbers = #tpu.dot_dimension_numbers<[1], [0], [0], [1], [0, 0, 1, 1], [], []>} : vector<256x128xbf16>, vector<128x128xbf16>, vector<256x128xf32> -> vector<256x128xf32>
    %5 = vector.broadcast %0 : vector<1x128xf32> to vector<256x128xf32>
    %6 = arith.addf %4, %5 : vector<256x128xf32>
    %cst_6 = arith.constant 0.000000e+00 : f32
    %7 = vector.broadcast %cst_6 : f32 to vector<256x128xf32>
    %8 = arith.cmpf ogt, %6, %7 : vector<256x128xf32>
    %cst_7 = arith.constant 2.000000e-01 : f32
    %9 = vector.broadcast %cst_7 : f32 to vector<256x128xf32>
    %10 = arith.mulf %9, %6 : vector<256x128xf32>
    %11 = arith.select %8, %6, %10 : vector<256x128xi1>, vector<256x128xf32>
    %12 = arith.truncf %11 : vector<256x128xf32> to vector<256x128xbf16>
    %c0_8 = arith.constant 0 : index
    %c0_9 = arith.constant 0 : index
    %c0_10 = arith.constant 0 : index
    %13 = vector.load %arg4[%c0_8, %c0_9, %c0_10] : memref<1x256x128xbf16, #tpu.memory_space<vmem>>, vector<1x256x128xbf16>
    %14 = vector.shape_cast %13 : vector<1x256x128xbf16> to vector<256x128xbf16>
    %15 = vector.shape_cast %12 : vector<256x128xbf16> to vector<1x256x128xbf16>
    tpu.vector_store %arg4[%c0_8, %c0_9, %c0_10], %15 {strides = array<i32>} : memref<1x256x128xbf16, #tpu.memory_space<vmem>>, vector<1x256x128xbf16>,
    return
  }
  func.func @transform_0(%arg0: i32) -> (i32, i32, i32) {
    %c0_i32 = arith.constant 0 : i32
    %c0_i32_0 = arith.constant 0 : i32
    %c0_i32_1 = arith.constant 0 : i32
    return %arg0, %c0_i32, %c0_i32_0 : i32, i32, i32
  }
  func.func @transform_1(%arg0: i32) -> (i32, i32) {
    %c0_i32 = arith.constant 0 : i32
    %c0_i32_0 = arith.constant 0 : i32
    %c0_i32_1 = arith.constant 0 : i32
    return %c0_i32, %c0_i32_0 : i32, i32
  }
  func.func @transform_2(%arg0: i32) -> (i32, i32) {
    %c0_i32 = arith.constant 0 : i32
    %c0_i32_0 = arith.constant 0 : i32
    %c0_i32_1 = arith.constant 0 : i32
    return %c0_i32, %c0_i32_0 : i32, i32
  }
  func.func @transform_3(%arg0: i32) -> (i32, i32, i32) {
    %c0_i32 = arith.constant 0 : i32
    %c0_i32_0 = arith.constant 0 : i32
    %c0_i32_1 = arith.constant 0 : i32
    return %arg0, %c0_i32, %c0_i32_0 : i32, i32, i32
  }
}

module attributes {stable_mosaic.version = 11 : i64} {
  func.func @_conv_tapfold_kernel(%arg0: i32, %arg1: memref<1x4x9x9x128xbf16, #tpu.memory_space<vmem>>, %arg2: memref<2048x128xbf16, #tpu.memory_space<vmem>>, %arg3: memref<1x128xf32, #tpu.memory_space<vmem>>, %arg4: memref<1x64x128xbf16, #tpu.memory_space<vmem>>, %arg5: memref<64x2048xbf16, #tpu.memory_space<vmem>>) attributes {dimension_semantics = [#tpu.dimension_semantics<parallel>], iteration_bounds = array<i64: 2>, scalar_prefetch = 0 : i64, scratch_operands = 1 : i64, tpu.core_type = #tpu.core_type<tc>, window_params = [{transform_indices = @transform_0, window_bounds = array<i64: 1, 4, 9, 9, 128>}, {pipeline_mode = #tpu.pipeline_mode<synchronous>, transform_indices = @transform_1, window_bounds = array<i64: 2048, 128>}, {pipeline_mode = #tpu.pipeline_mode<synchronous>, transform_indices = @transform_2, window_bounds = array<i64: 1, 128>}, {transform_indices = @transform_3, window_bounds = array<i64: 1, 64, 128>}]} {
    %c0 = arith.constant 0 : index
    %c0_0 = arith.constant 0 : index
    %c0_1 = arith.constant 0 : index
    %c0_2 = arith.constant 0 : index
    %c0_3 = arith.constant 0 : index
    %0 = vector.load %arg1[%c0, %c0_0, %c0_1, %c0_2, %c0_3] : memref<1x4x9x9x128xbf16, #tpu.memory_space<vmem>>, vector<1x1x8x8x128xbf16>
    %1 = vector.shape_cast %0 : vector<1x1x8x8x128xbf16> to vector<8x8x128xbf16>
    %2 = vector.shape_cast %1 : vector<8x8x128xbf16> to vector<64x128xbf16>
    %c0_4 = arith.constant 0 : index
    %c0_5 = arith.constant 0 : index
    %3 = vector.load %arg5[%c0_4, %c0_5] : memref<64x2048xbf16, #tpu.memory_space<vmem>>, vector<64x128xbf16>
    tpu.vector_store %arg5[%c0_4, %c0_5], %2 {strides = array<i32>} : memref<64x2048xbf16, #tpu.memory_space<vmem>>, vector<64x128xbf16>,
    %c0_6 = arith.constant 0 : index
    %c1 = arith.constant 1 : index
    %c0_7 = arith.constant 0 : index
    %c0_8 = arith.constant 0 : index
    %c0_9 = arith.constant 0 : index
    %4 = vector.load %arg1[%c0_6, %c1, %c0_7, %c0_8, %c0_9] : memref<1x4x9x9x128xbf16, #tpu.memory_space<vmem>>, vector<1x1x8x8x128xbf16>
    %5 = vector.shape_cast %4 : vector<1x1x8x8x128xbf16> to vector<8x8x128xbf16>
    %6 = vector.shape_cast %5 : vector<8x8x128xbf16> to vector<64x128xbf16>
    %c0_10 = arith.constant 0 : index
    %c128 = arith.constant 128 : index
    %7 = vector.load %arg5[%c0_10, %c128] : memref<64x2048xbf16, #tpu.memory_space<vmem>>, vector<64x128xbf16>
    tpu.vector_store %arg5[%c0_10, %c128], %6 {strides = array<i32>} : memref<64x2048xbf16, #tpu.memory_space<vmem>>, vector<64x128xbf16>,
    %c0_11 = arith.constant 0 : index
    %c0_12 = arith.constant 0 : index
    %c0_13 = arith.constant 0 : index
    %c1_14 = arith.constant 1 : index
    %c0_15 = arith.constant 0 : index
    %8 = vector.load %arg1[%c0_11, %c0_12, %c0_13, %c1_14, %c0_15] : memref<1x4x9x9x128xbf16, #tpu.memory_space<vmem>>, vector<1x1x8x8x128xbf16>
    %9 = vector.shape_cast %8 : vector<1x1x8x8x128xbf16> to vector<8x8x128xbf16>
    %10 = vector.shape_cast %9 : vector<8x8x128xbf16> to vector<64x128xbf16>
    %c0_16 = arith.constant 0 : index
    %c256 = arith.constant 256 : index
    %11 = vector.load %arg5[%c0_16, %c256] : memref<64x2048xbf16, #tpu.memory_space<vmem>>, vector<64x128xbf16>
    tpu.vector_store %arg5[%c0_16, %c256], %10 {strides = array<i32>} : memref<64x2048xbf16, #tpu.memory_space<vmem>>, vector<64x128xbf16>,
    %c0_17 = arith.constant 0 : index
    %c1_18 = arith.constant 1 : index
    %c0_19 = arith.constant 0 : index
    %c1_20 = arith.constant 1 : index
    %c0_21 = arith.constant 0 : index
    %12 = vector.load %arg1[%c0_17, %c1_18, %c0_19, %c1_20, %c0_21] : memref<1x4x9x9x128xbf16, #tpu.memory_space<vmem>>, vector<1x1x8x8x128xbf16>
    %13 = vector.shape_cast %12 : vector<1x1x8x8x128xbf16> to vector<8x8x128xbf16>
    %14 = vector.shape_cast %13 : vector<8x8x128xbf16> to vector<64x128xbf16>
    %c0_22 = arith.constant 0 : index
    %c384 = arith.constant 384 : index
    %15 = vector.load %arg5[%c0_22, %c384] : memref<64x2048xbf16, #tpu.memory_space<vmem>>, vector<64x128xbf16>
    tpu.vector_store %arg5[%c0_22, %c384], %14 {strides = array<i32>} : memref<64x2048xbf16, #tpu.memory_space<vmem>>, vector<64x128xbf16>,
    %c0_23 = arith.constant 0 : index
    %c2 = arith.constant 2 : index
    %c0_24 = arith.constant 0 : index
    %c0_25 = arith.constant 0 : index
    %c0_26 = arith.constant 0 : index
    %16 = vector.load %arg1[%c0_23, %c2, %c0_24, %c0_25, %c0_26] : memref<1x4x9x9x128xbf16, #tpu.memory_space<vmem>>, vector<1x1x8x8x128xbf16>
    %17 = vector.shape_cast %16 : vector<1x1x8x8x128xbf16> to vector<8x8x128xbf16>
    %18 = vector.shape_cast %17 : vector<8x8x128xbf16> to vector<64x128xbf16>
    %c0_27 = arith.constant 0 : index
    %c512 = arith.constant 512 : index
    %19 = vector.load %arg5[%c0_27, %c512] : memref<64x2048xbf16, #tpu.memory_space<vmem>>, vector<64x128xbf16>
    tpu.vector_store %arg5[%c0_27, %c512], %18 {strides = array<i32>} : memref<64x2048xbf16, #tpu.memory_space<vmem>>, vector<64x128xbf16>,
    %c0_28 = arith.constant 0 : index
    %c3 = arith.constant 3 : index
    %c0_29 = arith.constant 0 : index
    %c0_30 = arith.constant 0 : index
    %c0_31 = arith.constant 0 : index
    %20 = vector.load %arg1[%c0_28, %c3, %c0_29, %c0_30, %c0_31] : memref<1x4x9x9x128xbf16, #tpu.memory_space<vmem>>, vector<1x1x8x8x128xbf16>
    %21 = vector.shape_cast %20 : vector<1x1x8x8x128xbf16> to vector<8x8x128xbf16>
    %22 = vector.shape_cast %21 : vector<8x8x128xbf16> to vector<64x128xbf16>
    %c0_32 = arith.constant 0 : index
    %c640 = arith.constant 640 : index
    %23 = vector.load %arg5[%c0_32, %c640] : memref<64x2048xbf16, #tpu.memory_space<vmem>>, vector<64x128xbf16>
    tpu.vector_store %arg5[%c0_32, %c640], %22 {strides = array<i32>} : memref<64x2048xbf16, #tpu.memory_space<vmem>>, vector<64x128xbf16>,
    %c0_33 = arith.constant 0 : index
    %c2_34 = arith.constant 2 : index
    %c0_35 = arith.constant 0 : index
    %c1_36 = arith.constant 1 : index
    %c0_37 = arith.constant 0 : index
    %24 = vector.load %arg1[%c0_33, %c2_34, %c0_35, %c1_36, %c0_37] : memref<1x4x9x9x128xbf16, #tpu.memory_space<vmem>>, vector<1x1x8x8x128xbf16>
    %25 = vector.shape_cast %24 : vector<1x1x8x8x128xbf16> to vector<8x8x128xbf16>
    %26 = vector.shape_cast %25 : vector<8x8x128xbf16> to vector<64x128xbf16>
    %c0_38 = arith.constant 0 : index
    %c768 = arith.constant 768 : index
    %27 = vector.load %arg5[%c0_38, %c768] : memref<64x2048xbf16, #tpu.memory_space<vmem>>, vector<64x128xbf16>
    tpu.vector_store %arg5[%c0_38, %c768], %26 {strides = array<i32>} : memref<64x2048xbf16, #tpu.memory_space<vmem>>, vector<64x128xbf16>,
    %c0_39 = arith.constant 0 : index
    %c3_40 = arith.constant 3 : index
    %c0_41 = arith.constant 0 : index
    %c1_42 = arith.constant 1 : index
    %c0_43 = arith.constant 0 : index
    %28 = vector.load %arg1[%c0_39, %c3_40, %c0_41, %c1_42, %c0_43] : memref<1x4x9x9x128xbf16, #tpu.memory_space<vmem>>, vector<1x1x8x8x128xbf16>
    %29 = vector.shape_cast %28 : vector<1x1x8x8x128xbf16> to vector<8x8x128xbf16>
    %30 = vector.shape_cast %29 : vector<8x8x128xbf16> to vector<64x128xbf16>
    %c0_44 = arith.constant 0 : index
    %c896 = arith.constant 896 : index
    %31 = vector.load %arg5[%c0_44, %c896] : memref<64x2048xbf16, #tpu.memory_space<vmem>>, vector<64x128xbf16>
    tpu.vector_store %arg5[%c0_44, %c896], %30 {strides = array<i32>} : memref<64x2048xbf16, #tpu.memory_space<vmem>>, vector<64x128xbf16>,
    %c0_45 = arith.constant 0 : index
    %c0_46 = arith.constant 0 : index
    %c1_47 = arith.constant 1 : index
    %c0_48 = arith.constant 0 : index
    %c0_49 = arith.constant 0 : index
    %32 = vector.load %arg1[%c0_45, %c0_46, %c1_47, %c0_48, %c0_49] : memref<1x4x9x9x128xbf16, #tpu.memory_space<vmem>>, vector<1x1x8x8x128xbf16>
    %33 = vector.shape_cast %32 : vector<1x1x8x8x128xbf16> to vector<8x8x128xbf16>
    %34 = vector.shape_cast %33 : vector<8x8x128xbf16> to vector<64x128xbf16>
    %c0_50 = arith.constant 0 : index
    %c1024 = arith.constant 1024 : index
    %35 = vector.load %arg5[%c0_50, %c1024] : memref<64x2048xbf16, #tpu.memory_space<vmem>>, vector<64x128xbf16>
    tpu.vector_store %arg5[%c0_50, %c1024], %34 {strides = array<i32>} : memref<64x2048xbf16, #tpu.memory_space<vmem>>, vector<64x128xbf16>,
    %c0_51 = arith.constant 0 : index
    %c1_52 = arith.constant 1 : index
    %c1_53 = arith.constant 1 : index
    %c0_54 = arith.constant 0 : index
    %c0_55 = arith.constant 0 : index
    %36 = vector.load %arg1[%c0_51, %c1_52, %c1_53, %c0_54, %c0_55] : memref<1x4x9x9x128xbf16, #tpu.memory_space<vmem>>, vector<1x1x8x8x128xbf16>
    %37 = vector.shape_cast %36 : vector<1x1x8x8x128xbf16> to vector<8x8x128xbf16>
    %38 = vector.shape_cast %37 : vector<8x8x128xbf16> to vector<64x128xbf16>
    %c0_56 = arith.constant 0 : index
    %c1152 = arith.constant 1152 : index
    %39 = vector.load %arg5[%c0_56, %c1152] : memref<64x2048xbf16, #tpu.memory_space<vmem>>, vector<64x128xbf16>
    tpu.vector_store %arg5[%c0_56, %c1152], %38 {strides = array<i32>} : memref<64x2048xbf16, #tpu.memory_space<vmem>>, vector<64x128xbf16>,
    %c0_57 = arith.constant 0 : index
    %c0_58 = arith.constant 0 : index
    %c1_59 = arith.constant 1 : index
    %c1_60 = arith.constant 1 : index
    %c0_61 = arith.constant 0 : index
    %40 = vector.load %arg1[%c0_57, %c0_58, %c1_59, %c1_60, %c0_61] : memref<1x4x9x9x128xbf16, #tpu.memory_space<vmem>>, vector<1x1x8x8x128xbf16>
    %41 = vector.shape_cast %40 : vector<1x1x8x8x128xbf16> to vector<8x8x128xbf16>
    %42 = vector.shape_cast %41 : vector<8x8x128xbf16> to vector<64x128xbf16>
    %c0_62 = arith.constant 0 : index
    %c1280 = arith.constant 1280 : index
    %43 = vector.load %arg5[%c0_62, %c1280] : memref<64x2048xbf16, #tpu.memory_space<vmem>>, vector<64x128xbf16>
    tpu.vector_store %arg5[%c0_62, %c1280], %42 {strides = array<i32>} : memref<64x2048xbf16, #tpu.memory_space<vmem>>, vector<64x128xbf16>,
    %c0_63 = arith.constant 0 : index
    %c1_64 = arith.constant 1 : index
    %c1_65 = arith.constant 1 : index
    %c1_66 = arith.constant 1 : index
    %c0_67 = arith.constant 0 : index
    %44 = vector.load %arg1[%c0_63, %c1_64, %c1_65, %c1_66, %c0_67] : memref<1x4x9x9x128xbf16, #tpu.memory_space<vmem>>, vector<1x1x8x8x128xbf16>
    %45 = vector.shape_cast %44 : vector<1x1x8x8x128xbf16> to vector<8x8x128xbf16>
    %46 = vector.shape_cast %45 : vector<8x8x128xbf16> to vector<64x128xbf16>
    %c0_68 = arith.constant 0 : index
    %c1408 = arith.constant 1408 : index
    %47 = vector.load %arg5[%c0_68, %c1408] : memref<64x2048xbf16, #tpu.memory_space<vmem>>, vector<64x128xbf16>
    tpu.vector_store %arg5[%c0_68, %c1408], %46 {strides = array<i32>} : memref<64x2048xbf16, #tpu.memory_space<vmem>>, vector<64x128xbf16>,
    %c0_69 = arith.constant 0 : index
    %c2_70 = arith.constant 2 : index
    %c1_71 = arith.constant 1 : index
    %c0_72 = arith.constant 0 : index
    %c0_73 = arith.constant 0 : index
    %48 = vector.load %arg1[%c0_69, %c2_70, %c1_71, %c0_72, %c0_73] : memref<1x4x9x9x128xbf16, #tpu.memory_space<vmem>>, vector<1x1x8x8x128xbf16>
    %49 = vector.shape_cast %48 : vector<1x1x8x8x128xbf16> to vector<8x8x128xbf16>
    %50 = vector.shape_cast %49 : vector<8x8x128xbf16> to vector<64x128xbf16>
    %c0_74 = arith.constant 0 : index
    %c1536 = arith.constant 1536 : index
    %51 = vector.load %arg5[%c0_74, %c1536] : memref<64x2048xbf16, #tpu.memory_space<vmem>>, vector<64x128xbf16>
    tpu.vector_store %arg5[%c0_74, %c1536], %50 {strides = array<i32>} : memref<64x2048xbf16, #tpu.memory_space<vmem>>, vector<64x128xbf16>,
    %c0_75 = arith.constant 0 : index
    %c3_76 = arith.constant 3 : index
    %c1_77 = arith.constant 1 : index
    %c0_78 = arith.constant 0 : index
    %c0_79 = arith.constant 0 : index
    %52 = vector.load %arg1[%c0_75, %c3_76, %c1_77, %c0_78, %c0_79] : memref<1x4x9x9x128xbf16, #tpu.memory_space<vmem>>, vector<1x1x8x8x128xbf16>
    %53 = vector.shape_cast %52 : vector<1x1x8x8x128xbf16> to vector<8x8x128xbf16>
    %54 = vector.shape_cast %53 : vector<8x8x128xbf16> to vector<64x128xbf16>
    %c0_80 = arith.constant 0 : index
    %c1664 = arith.constant 1664 : index
    %55 = vector.load %arg5[%c0_80, %c1664] : memref<64x2048xbf16, #tpu.memory_space<vmem>>, vector<64x128xbf16>
    tpu.vector_store %arg5[%c0_80, %c1664], %54 {strides = array<i32>} : memref<64x2048xbf16, #tpu.memory_space<vmem>>, vector<64x128xbf16>,
    %c0_81 = arith.constant 0 : index
    %c2_82 = arith.constant 2 : index
    %c1_83 = arith.constant 1 : index
    %c1_84 = arith.constant 1 : index
    %c0_85 = arith.constant 0 : index
    %56 = vector.load %arg1[%c0_81, %c2_82, %c1_83, %c1_84, %c0_85] : memref<1x4x9x9x128xbf16, #tpu.memory_space<vmem>>, vector<1x1x8x8x128xbf16>
    %57 = vector.shape_cast %56 : vector<1x1x8x8x128xbf16> to vector<8x8x128xbf16>
    %58 = vector.shape_cast %57 : vector<8x8x128xbf16> to vector<64x128xbf16>
    %c0_86 = arith.constant 0 : index
    %c1792 = arith.constant 1792 : index
    %59 = vector.load %arg5[%c0_86, %c1792] : memref<64x2048xbf16, #tpu.memory_space<vmem>>, vector<64x128xbf16>
    tpu.vector_store %arg5[%c0_86, %c1792], %58 {strides = array<i32>} : memref<64x2048xbf16, #tpu.memory_space<vmem>>, vector<64x128xbf16>,
    %c0_87 = arith.constant 0 : index
    %c3_88 = arith.constant 3 : index
    %c1_89 = arith.constant 1 : index
    %c1_90 = arith.constant 1 : index
    %c0_91 = arith.constant 0 : index
    %60 = vector.load %arg1[%c0_87, %c3_88, %c1_89, %c1_90, %c0_91] : memref<1x4x9x9x128xbf16, #tpu.memory_space<vmem>>, vector<1x1x8x8x128xbf16>
    %61 = vector.shape_cast %60 : vector<1x1x8x8x128xbf16> to vector<8x8x128xbf16>
    %62 = vector.shape_cast %61 : vector<8x8x128xbf16> to vector<64x128xbf16>
    %c0_92 = arith.constant 0 : index
    %c1920 = arith.constant 1920 : index
    %63 = vector.load %arg5[%c0_92, %c1920] : memref<64x2048xbf16, #tpu.memory_space<vmem>>, vector<64x128xbf16>
    tpu.vector_store %arg5[%c0_92, %c1920], %62 {strides = array<i32>} : memref<64x2048xbf16, #tpu.memory_space<vmem>>, vector<64x128xbf16>,
    %c0_93 = arith.constant 0 : index
    %c0_94 = arith.constant 0 : index
    %64 = vector.load %arg3[%c0_93, %c0_94] : memref<1x128xf32, #tpu.memory_space<vmem>>, vector<1x128xf32>
    %c0_95 = arith.constant 0 : index
    %c0_96 = arith.constant 0 : index
    %65 = vector.load %arg5[%c0_95, %c0_96] : memref<64x2048xbf16, #tpu.memory_space<vmem>>, vector<64x2048xbf16>
    %c0_97 = arith.constant 0 : index
    %c0_98 = arith.constant 0 : index
    %66 = vector.load %arg2[%c0_97, %c0_98] : memref<2048x128xbf16, #tpu.memory_space<vmem>>, vector<2048x128xbf16>
    %cst = arith.constant dense<0.000000e+00> : vector<64x128xf32>
    %67 = tpu.matmul %65, %66, %cst {dimension_numbers = #tpu.dot_dimension_numbers<[1], [0], [0], [1], [0, 0, 1, 1], [], []>} : vector<64x2048xbf16>, vector<2048x128xbf16>, vector<64x128xf32> -> vector<64x128xf32>
    %68 = vector.broadcast %64 : vector<1x128xf32> to vector<64x128xf32>
    %69 = arith.addf %67, %68 : vector<64x128xf32>
    %cst_99 = arith.constant 0.000000e+00 : f32
    %70 = vector.broadcast %cst_99 : f32 to vector<64x128xf32>
    %71 = arith.cmpf ogt, %69, %70 : vector<64x128xf32>
    %cst_100 = arith.constant 2.000000e-01 : f32
    %72 = vector.broadcast %cst_100 : f32 to vector<64x128xf32>
    %73 = arith.mulf %72, %69 : vector<64x128xf32>
    %74 = arith.select %71, %69, %73 : vector<64x128xi1>, vector<64x128xf32>
    %75 = arith.truncf %74 : vector<64x128xf32> to vector<64x128xbf16>
    %c0_101 = arith.constant 0 : index
    %c0_102 = arith.constant 0 : index
    %c0_103 = arith.constant 0 : index
    %76 = vector.load %arg4[%c0_101, %c0_102, %c0_103] : memref<1x64x128xbf16, #tpu.memory_space<vmem>>, vector<1x64x128xbf16>
    %77 = vector.shape_cast %76 : vector<1x64x128xbf16> to vector<64x128xbf16>
    %78 = vector.shape_cast %75 : vector<64x128xbf16> to vector<1x64x128xbf16>
    tpu.vector_store %arg4[%c0_101, %c0_102, %c0_103], %78 {strides = array<i32>} : memref<1x64x128xbf16, #tpu.memory_space<vmem>>, vector<1x64x128xbf16>,
    return
  }
  func.func @transform_0(%arg0: i32) -> (i32, i32, i32, i32, i32) {
    %c0_i32 = arith.constant 0 : i32
    %c0_i32_0 = arith.constant 0 : i32
    %c0_i32_1 = arith.constant 0 : i32
    %c0_i32_2 = arith.constant 0 : i32
    %c0_i32_3 = arith.constant 0 : i32
    return %arg0, %c0_i32, %c0_i32_0, %c0_i32_1, %c0_i32_2 : i32, i32, i32, i32, i32
  }
  func.func @transform_1(%arg0: i32) -> (i32, i32) {
    %c0_i32 = arith.constant 0 : i32
    %c0_i32_0 = arith.constant 0 : i32
    %c0_i32_1 = arith.constant 0 : i32
    return %c0_i32, %c0_i32_0 : i32, i32
  }
  func.func @transform_2(%arg0: i32) -> (i32, i32) {
    %c0_i32 = arith.constant 0 : i32
    %c0_i32_0 = arith.constant 0 : i32
    %c0_i32_1 = arith.constant 0 : i32
    return %c0_i32, %c0_i32_0 : i32, i32
  }
  func.func @transform_3(%arg0: i32) -> (i32, i32, i32) {
    %c0_i32 = arith.constant 0 : i32
    %c0_i32_0 = arith.constant 0 : i32
    %c0_i32_1 = arith.constant 0 : i32
    return %arg0, %c0_i32, %c0_i32_0 : i32, i32, i32
  }
}

module attributes {stable_mosaic.version = 11 : i64} {
  func.func @_conv_tapfold_kernel(%arg0: i32, %arg1: memref<2x4x5x5x128xbf16, #tpu.memory_space<vmem>>, %arg2: memref<2048x128xbf16, #tpu.memory_space<vmem>>, %arg3: memref<1x128xf32, #tpu.memory_space<vmem>>, %arg4: memref<1x32x128xbf16, #tpu.memory_space<vmem>>, %arg5: memref<32x2048xbf16, #tpu.memory_space<vmem>>) attributes {dimension_semantics = [#tpu.dimension_semantics<parallel>], iteration_bounds = array<i64: 1>, scalar_prefetch = 0 : i64, scratch_operands = 1 : i64, tpu.core_type = #tpu.core_type<tc>, window_params = [{transform_indices = @transform_0, window_bounds = array<i64: 2, 4, 5, 5, 128>}, {pipeline_mode = #tpu.pipeline_mode<synchronous>, transform_indices = @transform_1, window_bounds = array<i64: 2048, 128>}, {pipeline_mode = #tpu.pipeline_mode<synchronous>, transform_indices = @transform_2, window_bounds = array<i64: 1, 128>}, {transform_indices = @transform_3, window_bounds = array<i64: 1, 32, 128>}]} {
    %c0 = arith.constant 0 : index
    %c0_0 = arith.constant 0 : index
    %c0_1 = arith.constant 0 : index
    %c0_2 = arith.constant 0 : index
    %c0_3 = arith.constant 0 : index
    %0 = vector.load %arg1[%c0, %c0_0, %c0_1, %c0_2, %c0_3] : memref<2x4x5x5x128xbf16, #tpu.memory_space<vmem>>, vector<1x1x4x4x128xbf16>
    %1 = vector.shape_cast %0 : vector<1x1x4x4x128xbf16> to vector<4x4x128xbf16>
    %2 = vector.shape_cast %1 : vector<4x4x128xbf16> to vector<16x128xbf16>
    %c1 = arith.constant 1 : index
    %c0_4 = arith.constant 0 : index
    %c0_5 = arith.constant 0 : index
    %c0_6 = arith.constant 0 : index
    %c0_7 = arith.constant 0 : index
    %3 = vector.load %arg1[%c1, %c0_4, %c0_5, %c0_6, %c0_7] : memref<2x4x5x5x128xbf16, #tpu.memory_space<vmem>>, vector<1x1x4x4x128xbf16>
    %4 = vector.shape_cast %3 : vector<1x1x4x4x128xbf16> to vector<4x4x128xbf16>
    %5 = vector.shape_cast %4 : vector<4x4x128xbf16> to vector<16x128xbf16>
    %6 = tpu.concatenate %2, %5 in 0 : vector<16x128xbf16>, vector<16x128xbf16> -> vector<32x128xbf16>
    %c0_8 = arith.constant 0 : index
    %c0_9 = arith.constant 0 : index
    %7 = vector.load %arg5[%c0_8, %c0_9] : memref<32x2048xbf16, #tpu.memory_space<vmem>>, vector<32x128xbf16>
    tpu.vector_store %arg5[%c0_8, %c0_9], %6 {strides = array<i32>} : memref<32x2048xbf16, #tpu.memory_space<vmem>>, vector<32x128xbf16>,
    %c0_10 = arith.constant 0 : index
    %c1_11 = arith.constant 1 : index
    %c0_12 = arith.constant 0 : index
    %c0_13 = arith.constant 0 : index
    %c0_14 = arith.constant 0 : index
    %8 = vector.load %arg1[%c0_10, %c1_11, %c0_12, %c0_13, %c0_14] : memref<2x4x5x5x128xbf16, #tpu.memory_space<vmem>>, vector<1x1x4x4x128xbf16>
    %9 = vector.shape_cast %8 : vector<1x1x4x4x128xbf16> to vector<4x4x128xbf16>
    %10 = vector.shape_cast %9 : vector<4x4x128xbf16> to vector<16x128xbf16>
    %c1_15 = arith.constant 1 : index
    %c1_16 = arith.constant 1 : index
    %c0_17 = arith.constant 0 : index
    %c0_18 = arith.constant 0 : index
    %c0_19 = arith.constant 0 : index
    %11 = vector.load %arg1[%c1_15, %c1_16, %c0_17, %c0_18, %c0_19] : memref<2x4x5x5x128xbf16, #tpu.memory_space<vmem>>, vector<1x1x4x4x128xbf16>
    %12 = vector.shape_cast %11 : vector<1x1x4x4x128xbf16> to vector<4x4x128xbf16>
    %13 = vector.shape_cast %12 : vector<4x4x128xbf16> to vector<16x128xbf16>
    %14 = tpu.concatenate %10, %13 in 0 : vector<16x128xbf16>, vector<16x128xbf16> -> vector<32x128xbf16>
    %c0_20 = arith.constant 0 : index
    %c128 = arith.constant 128 : index
    %15 = vector.load %arg5[%c0_20, %c128] : memref<32x2048xbf16, #tpu.memory_space<vmem>>, vector<32x128xbf16>
    tpu.vector_store %arg5[%c0_20, %c128], %14 {strides = array<i32>} : memref<32x2048xbf16, #tpu.memory_space<vmem>>, vector<32x128xbf16>,
    %c0_21 = arith.constant 0 : index
    %c0_22 = arith.constant 0 : index
    %c0_23 = arith.constant 0 : index
    %c1_24 = arith.constant 1 : index
    %c0_25 = arith.constant 0 : index
    %16 = vector.load %arg1[%c0_21, %c0_22, %c0_23, %c1_24, %c0_25] : memref<2x4x5x5x128xbf16, #tpu.memory_space<vmem>>, vector<1x1x4x4x128xbf16>
    %17 = vector.shape_cast %16 : vector<1x1x4x4x128xbf16> to vector<4x4x128xbf16>
    %18 = vector.shape_cast %17 : vector<4x4x128xbf16> to vector<16x128xbf16>
    %c1_26 = arith.constant 1 : index
    %c0_27 = arith.constant 0 : index
    %c0_28 = arith.constant 0 : index
    %c1_29 = arith.constant 1 : index
    %c0_30 = arith.constant 0 : index
    %19 = vector.load %arg1[%c1_26, %c0_27, %c0_28, %c1_29, %c0_30] : memref<2x4x5x5x128xbf16, #tpu.memory_space<vmem>>, vector<1x1x4x4x128xbf16>
    %20 = vector.shape_cast %19 : vector<1x1x4x4x128xbf16> to vector<4x4x128xbf16>
    %21 = vector.shape_cast %20 : vector<4x4x128xbf16> to vector<16x128xbf16>
    %22 = tpu.concatenate %18, %21 in 0 : vector<16x128xbf16>, vector<16x128xbf16> -> vector<32x128xbf16>
    %c0_31 = arith.constant 0 : index
    %c256 = arith.constant 256 : index
    %23 = vector.load %arg5[%c0_31, %c256] : memref<32x2048xbf16, #tpu.memory_space<vmem>>, vector<32x128xbf16>
    tpu.vector_store %arg5[%c0_31, %c256], %22 {strides = array<i32>} : memref<32x2048xbf16, #tpu.memory_space<vmem>>, vector<32x128xbf16>,
    %c0_32 = arith.constant 0 : index
    %c1_33 = arith.constant 1 : index
    %c0_34 = arith.constant 0 : index
    %c1_35 = arith.constant 1 : index
    %c0_36 = arith.constant 0 : index
    %24 = vector.load %arg1[%c0_32, %c1_33, %c0_34, %c1_35, %c0_36] : memref<2x4x5x5x128xbf16, #tpu.memory_space<vmem>>, vector<1x1x4x4x128xbf16>
    %25 = vector.shape_cast %24 : vector<1x1x4x4x128xbf16> to vector<4x4x128xbf16>
    %26 = vector.shape_cast %25 : vector<4x4x128xbf16> to vector<16x128xbf16>
    %c1_37 = arith.constant 1 : index
    %c1_38 = arith.constant 1 : index
    %c0_39 = arith.constant 0 : index
    %c1_40 = arith.constant 1 : index
    %c0_41 = arith.constant 0 : index
    %27 = vector.load %arg1[%c1_37, %c1_38, %c0_39, %c1_40, %c0_41] : memref<2x4x5x5x128xbf16, #tpu.memory_space<vmem>>, vector<1x1x4x4x128xbf16>
    %28 = vector.shape_cast %27 : vector<1x1x4x4x128xbf16> to vector<4x4x128xbf16>
    %29 = vector.shape_cast %28 : vector<4x4x128xbf16> to vector<16x128xbf16>
    %30 = tpu.concatenate %26, %29 in 0 : vector<16x128xbf16>, vector<16x128xbf16> -> vector<32x128xbf16>
    %c0_42 = arith.constant 0 : index
    %c384 = arith.constant 384 : index
    %31 = vector.load %arg5[%c0_42, %c384] : memref<32x2048xbf16, #tpu.memory_space<vmem>>, vector<32x128xbf16>
    tpu.vector_store %arg5[%c0_42, %c384], %30 {strides = array<i32>} : memref<32x2048xbf16, #tpu.memory_space<vmem>>, vector<32x128xbf16>,
    %c0_43 = arith.constant 0 : index
    %c2 = arith.constant 2 : index
    %c0_44 = arith.constant 0 : index
    %c0_45 = arith.constant 0 : index
    %c0_46 = arith.constant 0 : index
    %32 = vector.load %arg1[%c0_43, %c2, %c0_44, %c0_45, %c0_46] : memref<2x4x5x5x128xbf16, #tpu.memory_space<vmem>>, vector<1x1x4x4x128xbf16>
    %33 = vector.shape_cast %32 : vector<1x1x4x4x128xbf16> to vector<4x4x128xbf16>
    %34 = vector.shape_cast %33 : vector<4x4x128xbf16> to vector<16x128xbf16>
    %c1_47 = arith.constant 1 : index
    %c2_48 = arith.constant 2 : index
    %c0_49 = arith.constant 0 : index
    %c0_50 = arith.constant 0 : index
    %c0_51 = arith.constant 0 : index
    %35 = vector.load %arg1[%c1_47, %c2_48, %c0_49, %c0_50, %c0_51] : memref<2x4x5x5x128xbf16, #tpu.memory_space<vmem>>, vector<1x1x4x4x128xbf16>
    %36 = vector.shape_cast %35 : vector<1x1x4x4x128xbf16> to vector<4x4x128xbf16>
    %37 = vector.shape_cast %36 : vector<4x4x128xbf16> to vector<16x128xbf16>
    %38 = tpu.concatenate %34, %37 in 0 : vector<16x128xbf16>, vector<16x128xbf16> -> vector<32x128xbf16>
    %c0_52 = arith.constant 0 : index
    %c512 = arith.constant 512 : index
    %39 = vector.load %arg5[%c0_52, %c512] : memref<32x2048xbf16, #tpu.memory_space<vmem>>, vector<32x128xbf16>
    tpu.vector_store %arg5[%c0_52, %c512], %38 {strides = array<i32>} : memref<32x2048xbf16, #tpu.memory_space<vmem>>, vector<32x128xbf16>,
    %c0_53 = arith.constant 0 : index
    %c3 = arith.constant 3 : index
    %c0_54 = arith.constant 0 : index
    %c0_55 = arith.constant 0 : index
    %c0_56 = arith.constant 0 : index
    %40 = vector.load %arg1[%c0_53, %c3, %c0_54, %c0_55, %c0_56] : memref<2x4x5x5x128xbf16, #tpu.memory_space<vmem>>, vector<1x1x4x4x128xbf16>
    %41 = vector.shape_cast %40 : vector<1x1x4x4x128xbf16> to vector<4x4x128xbf16>
    %42 = vector.shape_cast %41 : vector<4x4x128xbf16> to vector<16x128xbf16>
    %c1_57 = arith.constant 1 : index
    %c3_58 = arith.constant 3 : index
    %c0_59 = arith.constant 0 : index
    %c0_60 = arith.constant 0 : index
    %c0_61 = arith.constant 0 : index
    %43 = vector.load %arg1[%c1_57, %c3_58, %c0_59, %c0_60, %c0_61] : memref<2x4x5x5x128xbf16, #tpu.memory_space<vmem>>, vector<1x1x4x4x128xbf16>
    %44 = vector.shape_cast %43 : vector<1x1x4x4x128xbf16> to vector<4x4x128xbf16>
    %45 = vector.shape_cast %44 : vector<4x4x128xbf16> to vector<16x128xbf16>
    %46 = tpu.concatenate %42, %45 in 0 : vector<16x128xbf16>, vector<16x128xbf16> -> vector<32x128xbf16>
    %c0_62 = arith.constant 0 : index
    %c640 = arith.constant 640 : index
    %47 = vector.load %arg5[%c0_62, %c640] : memref<32x2048xbf16, #tpu.memory_space<vmem>>, vector<32x128xbf16>
    tpu.vector_store %arg5[%c0_62, %c640], %46 {strides = array<i32>} : memref<32x2048xbf16, #tpu.memory_space<vmem>>, vector<32x128xbf16>,
    %c0_63 = arith.constant 0 : index
    %c2_64 = arith.constant 2 : index
    %c0_65 = arith.constant 0 : index
    %c1_66 = arith.constant 1 : index
    %c0_67 = arith.constant 0 : index
    %48 = vector.load %arg1[%c0_63, %c2_64, %c0_65, %c1_66, %c0_67] : memref<2x4x5x5x128xbf16, #tpu.memory_space<vmem>>, vector<1x1x4x4x128xbf16>
    %49 = vector.shape_cast %48 : vector<1x1x4x4x128xbf16> to vector<4x4x128xbf16>
    %50 = vector.shape_cast %49 : vector<4x4x128xbf16> to vector<16x128xbf16>
    %c1_68 = arith.constant 1 : index
    %c2_69 = arith.constant 2 : index
    %c0_70 = arith.constant 0 : index
    %c1_71 = arith.constant 1 : index
    %c0_72 = arith.constant 0 : index
    %51 = vector.load %arg1[%c1_68, %c2_69, %c0_70, %c1_71, %c0_72] : memref<2x4x5x5x128xbf16, #tpu.memory_space<vmem>>, vector<1x1x4x4x128xbf16>
    %52 = vector.shape_cast %51 : vector<1x1x4x4x128xbf16> to vector<4x4x128xbf16>
    %53 = vector.shape_cast %52 : vector<4x4x128xbf16> to vector<16x128xbf16>
    %54 = tpu.concatenate %50, %53 in 0 : vector<16x128xbf16>, vector<16x128xbf16> -> vector<32x128xbf16>
    %c0_73 = arith.constant 0 : index
    %c768 = arith.constant 768 : index
    %55 = vector.load %arg5[%c0_73, %c768] : memref<32x2048xbf16, #tpu.memory_space<vmem>>, vector<32x128xbf16>
    tpu.vector_store %arg5[%c0_73, %c768], %54 {strides = array<i32>} : memref<32x2048xbf16, #tpu.memory_space<vmem>>, vector<32x128xbf16>,
    %c0_74 = arith.constant 0 : index
    %c3_75 = arith.constant 3 : index
    %c0_76 = arith.constant 0 : index
    %c1_77 = arith.constant 1 : index
    %c0_78 = arith.constant 0 : index
    %56 = vector.load %arg1[%c0_74, %c3_75, %c0_76, %c1_77, %c0_78] : memref<2x4x5x5x128xbf16, #tpu.memory_space<vmem>>, vector<1x1x4x4x128xbf16>
    %57 = vector.shape_cast %56 : vector<1x1x4x4x128xbf16> to vector<4x4x128xbf16>
    %58 = vector.shape_cast %57 : vector<4x4x128xbf16> to vector<16x128xbf16>
    %c1_79 = arith.constant 1 : index
    %c3_80 = arith.constant 3 : index
    %c0_81 = arith.constant 0 : index
    %c1_82 = arith.constant 1 : index
    %c0_83 = arith.constant 0 : index
    %59 = vector.load %arg1[%c1_79, %c3_80, %c0_81, %c1_82, %c0_83] : memref<2x4x5x5x128xbf16, #tpu.memory_space<vmem>>, vector<1x1x4x4x128xbf16>
    %60 = vector.shape_cast %59 : vector<1x1x4x4x128xbf16> to vector<4x4x128xbf16>
    %61 = vector.shape_cast %60 : vector<4x4x128xbf16> to vector<16x128xbf16>
    %62 = tpu.concatenate %58, %61 in 0 : vector<16x128xbf16>, vector<16x128xbf16> -> vector<32x128xbf16>
    %c0_84 = arith.constant 0 : index
    %c896 = arith.constant 896 : index
    %63 = vector.load %arg5[%c0_84, %c896] : memref<32x2048xbf16, #tpu.memory_space<vmem>>, vector<32x128xbf16>
    tpu.vector_store %arg5[%c0_84, %c896], %62 {strides = array<i32>} : memref<32x2048xbf16, #tpu.memory_space<vmem>>, vector<32x128xbf16>,
    %c0_85 = arith.constant 0 : index
    %c0_86 = arith.constant 0 : index
    %c1_87 = arith.constant 1 : index
    %c0_88 = arith.constant 0 : index
    %c0_89 = arith.constant 0 : index
    %64 = vector.load %arg1[%c0_85, %c0_86, %c1_87, %c0_88, %c0_89] : memref<2x4x5x5x128xbf16, #tpu.memory_space<vmem>>, vector<1x1x4x4x128xbf16>
    %65 = vector.shape_cast %64 : vector<1x1x4x4x128xbf16> to vector<4x4x128xbf16>
    %66 = vector.shape_cast %65 : vector<4x4x128xbf16> to vector<16x128xbf16>
    %c1_90 = arith.constant 1 : index
    %c0_91 = arith.constant 0 : index
    %c1_92 = arith.constant 1 : index
    %c0_93 = arith.constant 0 : index
    %c0_94 = arith.constant 0 : index
    %67 = vector.load %arg1[%c1_90, %c0_91, %c1_92, %c0_93, %c0_94] : memref<2x4x5x5x128xbf16, #tpu.memory_space<vmem>>, vector<1x1x4x4x128xbf16>
    %68 = vector.shape_cast %67 : vector<1x1x4x4x128xbf16> to vector<4x4x128xbf16>
    %69 = vector.shape_cast %68 : vector<4x4x128xbf16> to vector<16x128xbf16>
    %70 = tpu.concatenate %66, %69 in 0 : vector<16x128xbf16>, vector<16x128xbf16> -> vector<32x128xbf16>
    %c0_95 = arith.constant 0 : index
    %c1024 = arith.constant 1024 : index
    %71 = vector.load %arg5[%c0_95, %c1024] : memref<32x2048xbf16, #tpu.memory_space<vmem>>, vector<32x128xbf16>
    tpu.vector_store %arg5[%c0_95, %c1024], %70 {strides = array<i32>} : memref<32x2048xbf16, #tpu.memory_space<vmem>>, vector<32x128xbf16>,
    %c0_96 = arith.constant 0 : index
    %c1_97 = arith.constant 1 : index
    %c1_98 = arith.constant 1 : index
    %c0_99 = arith.constant 0 : index
    %c0_100 = arith.constant 0 : index
    %72 = vector.load %arg1[%c0_96, %c1_97, %c1_98, %c0_99, %c0_100] : memref<2x4x5x5x128xbf16, #tpu.memory_space<vmem>>, vector<1x1x4x4x128xbf16>
    %73 = vector.shape_cast %72 : vector<1x1x4x4x128xbf16> to vector<4x4x128xbf16>
    %74 = vector.shape_cast %73 : vector<4x4x128xbf16> to vector<16x128xbf16>
    %c1_101 = arith.constant 1 : index
    %c1_102 = arith.constant 1 : index
    %c1_103 = arith.constant 1 : index
    %c0_104 = arith.constant 0 : index
    %c0_105 = arith.constant 0 : index
    %75 = vector.load %arg1[%c1_101, %c1_102, %c1_103, %c0_104, %c0_105] : memref<2x4x5x5x128xbf16, #tpu.memory_space<vmem>>, vector<1x1x4x4x128xbf16>
    %76 = vector.shape_cast %75 : vector<1x1x4x4x128xbf16> to vector<4x4x128xbf16>
    %77 = vector.shape_cast %76 : vector<4x4x128xbf16> to vector<16x128xbf16>
    %78 = tpu.concatenate %74, %77 in 0 : vector<16x128xbf16>, vector<16x128xbf16> -> vector<32x128xbf16>
    %c0_106 = arith.constant 0 : index
    %c1152 = arith.constant 1152 : index
    %79 = vector.load %arg5[%c0_106, %c1152] : memref<32x2048xbf16, #tpu.memory_space<vmem>>, vector<32x128xbf16>
    tpu.vector_store %arg5[%c0_106, %c1152], %78 {strides = array<i32>} : memref<32x2048xbf16, #tpu.memory_space<vmem>>, vector<32x128xbf16>,
    %c0_107 = arith.constant 0 : index
    %c0_108 = arith.constant 0 : index
    %c1_109 = arith.constant 1 : index
    %c1_110 = arith.constant 1 : index
    %c0_111 = arith.constant 0 : index
    %80 = vector.load %arg1[%c0_107, %c0_108, %c1_109, %c1_110, %c0_111] : memref<2x4x5x5x128xbf16, #tpu.memory_space<vmem>>, vector<1x1x4x4x128xbf16>
    %81 = vector.shape_cast %80 : vector<1x1x4x4x128xbf16> to vector<4x4x128xbf16>
    %82 = vector.shape_cast %81 : vector<4x4x128xbf16> to vector<16x128xbf16>
    %c1_112 = arith.constant 1 : index
    %c0_113 = arith.constant 0 : index
    %c1_114 = arith.constant 1 : index
    %c1_115 = arith.constant 1 : index
    %c0_116 = arith.constant 0 : index
    %83 = vector.load %arg1[%c1_112, %c0_113, %c1_114, %c1_115, %c0_116] : memref<2x4x5x5x128xbf16, #tpu.memory_space<vmem>>, vector<1x1x4x4x128xbf16>
    %84 = vector.shape_cast %83 : vector<1x1x4x4x128xbf16> to vector<4x4x128xbf16>
    %85 = vector.shape_cast %84 : vector<4x4x128xbf16> to vector<16x128xbf16>
    %86 = tpu.concatenate %82, %85 in 0 : vector<16x128xbf16>, vector<16x128xbf16> -> vector<32x128xbf16>
    %c0_117 = arith.constant 0 : index
    %c1280 = arith.constant 1280 : index
    %87 = vector.load %arg5[%c0_117, %c1280] : memref<32x2048xbf16, #tpu.memory_space<vmem>>, vector<32x128xbf16>
    tpu.vector_store %arg5[%c0_117, %c1280], %86 {strides = array<i32>} : memref<32x2048xbf16, #tpu.memory_space<vmem>>, vector<32x128xbf16>,
    %c0_118 = arith.constant 0 : index
    %c1_119 = arith.constant 1 : index
    %c1_120 = arith.constant 1 : index
    %c1_121 = arith.constant 1 : index
    %c0_122 = arith.constant 0 : index
    %88 = vector.load %arg1[%c0_118, %c1_119, %c1_120, %c1_121, %c0_122] : memref<2x4x5x5x128xbf16, #tpu.memory_space<vmem>>, vector<1x1x4x4x128xbf16>
    %89 = vector.shape_cast %88 : vector<1x1x4x4x128xbf16> to vector<4x4x128xbf16>
    %90 = vector.shape_cast %89 : vector<4x4x128xbf16> to vector<16x128xbf16>
    %c1_123 = arith.constant 1 : index
    %c1_124 = arith.constant 1 : index
    %c1_125 = arith.constant 1 : index
    %c1_126 = arith.constant 1 : index
    %c0_127 = arith.constant 0 : index
    %91 = vector.load %arg1[%c1_123, %c1_124, %c1_125, %c1_126, %c0_127] : memref<2x4x5x5x128xbf16, #tpu.memory_space<vmem>>, vector<1x1x4x4x128xbf16>
    %92 = vector.shape_cast %91 : vector<1x1x4x4x128xbf16> to vector<4x4x128xbf16>
    %93 = vector.shape_cast %92 : vector<4x4x128xbf16> to vector<16x128xbf16>
    %94 = tpu.concatenate %90, %93 in 0 : vector<16x128xbf16>, vector<16x128xbf16> -> vector<32x128xbf16>
    %c0_128 = arith.constant 0 : index
    %c1408 = arith.constant 1408 : index
    %95 = vector.load %arg5[%c0_128, %c1408] : memref<32x2048xbf16, #tpu.memory_space<vmem>>, vector<32x128xbf16>
    tpu.vector_store %arg5[%c0_128, %c1408], %94 {strides = array<i32>} : memref<32x2048xbf16, #tpu.memory_space<vmem>>, vector<32x128xbf16>,
    %c0_129 = arith.constant 0 : index
    %c2_130 = arith.constant 2 : index
    %c1_131 = arith.constant 1 : index
    %c0_132 = arith.constant 0 : index
    %c0_133 = arith.constant 0 : index
    %96 = vector.load %arg1[%c0_129, %c2_130, %c1_131, %c0_132, %c0_133] : memref<2x4x5x5x128xbf16, #tpu.memory_space<vmem>>, vector<1x1x4x4x128xbf16>
    %97 = vector.shape_cast %96 : vector<1x1x4x4x128xbf16> to vector<4x4x128xbf16>
    %98 = vector.shape_cast %97 : vector<4x4x128xbf16> to vector<16x128xbf16>
    %c1_134 = arith.constant 1 : index
    %c2_135 = arith.constant 2 : index
    %c1_136 = arith.constant 1 : index
    %c0_137 = arith.constant 0 : index
    %c0_138 = arith.constant 0 : index
    %99 = vector.load %arg1[%c1_134, %c2_135, %c1_136, %c0_137, %c0_138] : memref<2x4x5x5x128xbf16, #tpu.memory_space<vmem>>, vector<1x1x4x4x128xbf16>
    %100 = vector.shape_cast %99 : vector<1x1x4x4x128xbf16> to vector<4x4x128xbf16>
    %101 = vector.shape_cast %100 : vector<4x4x128xbf16> to vector<16x128xbf16>
    %102 = tpu.concatenate %98, %101 in 0 : vector<16x128xbf16>, vector<16x128xbf16> -> vector<32x128xbf16>
    %c0_139 = arith.constant 0 : index
    %c1536 = arith.constant 1536 : index
    %103 = vector.load %arg5[%c0_139, %c1536] : memref<32x2048xbf16, #tpu.memory_space<vmem>>, vector<32x128xbf16>
    tpu.vector_store %arg5[%c0_139, %c1536], %102 {strides = array<i32>} : memref<32x2048xbf16, #tpu.memory_space<vmem>>, vector<32x128xbf16>,
    %c0_140 = arith.constant 0 : index
    %c3_141 = arith.constant 3 : index
    %c1_142 = arith.constant 1 : index
    %c0_143 = arith.constant 0 : index
    %c0_144 = arith.constant 0 : index
    %104 = vector.load %arg1[%c0_140, %c3_141, %c1_142, %c0_143, %c0_144] : memref<2x4x5x5x128xbf16, #tpu.memory_space<vmem>>, vector<1x1x4x4x128xbf16>
    %105 = vector.shape_cast %104 : vector<1x1x4x4x128xbf16> to vector<4x4x128xbf16>
    %106 = vector.shape_cast %105 : vector<4x4x128xbf16> to vector<16x128xbf16>
    %c1_145 = arith.constant 1 : index
    %c3_146 = arith.constant 3 : index
    %c1_147 = arith.constant 1 : index
    %c0_148 = arith.constant 0 : index
    %c0_149 = arith.constant 0 : index
    %107 = vector.load %arg1[%c1_145, %c3_146, %c1_147, %c0_148, %c0_149] : memref<2x4x5x5x128xbf16, #tpu.memory_space<vmem>>, vector<1x1x4x4x128xbf16>
    %108 = vector.shape_cast %107 : vector<1x1x4x4x128xbf16> to vector<4x4x128xbf16>
    %109 = vector.shape_cast %108 : vector<4x4x128xbf16> to vector<16x128xbf16>
    %110 = tpu.concatenate %106, %109 in 0 : vector<16x128xbf16>, vector<16x128xbf16> -> vector<32x128xbf16>
    %c0_150 = arith.constant 0 : index
    %c1664 = arith.constant 1664 : index
    %111 = vector.load %arg5[%c0_150, %c1664] : memref<32x2048xbf16, #tpu.memory_space<vmem>>, vector<32x128xbf16>
    tpu.vector_store %arg5[%c0_150, %c1664], %110 {strides = array<i32>} : memref<32x2048xbf16, #tpu.memory_space<vmem>>, vector<32x128xbf16>,
    %c0_151 = arith.constant 0 : index
    %c2_152 = arith.constant 2 : index
    %c1_153 = arith.constant 1 : index
    %c1_154 = arith.constant 1 : index
    %c0_155 = arith.constant 0 : index
    %112 = vector.load %arg1[%c0_151, %c2_152, %c1_153, %c1_154, %c0_155] : memref<2x4x5x5x128xbf16, #tpu.memory_space<vmem>>, vector<1x1x4x4x128xbf16>
    %113 = vector.shape_cast %112 : vector<1x1x4x4x128xbf16> to vector<4x4x128xbf16>
    %114 = vector.shape_cast %113 : vector<4x4x128xbf16> to vector<16x128xbf16>
    %c1_156 = arith.constant 1 : index
    %c2_157 = arith.constant 2 : index
    %c1_158 = arith.constant 1 : index
    %c1_159 = arith.constant 1 : index
    %c0_160 = arith.constant 0 : index
    %115 = vector.load %arg1[%c1_156, %c2_157, %c1_158, %c1_159, %c0_160] : memref<2x4x5x5x128xbf16, #tpu.memory_space<vmem>>, vector<1x1x4x4x128xbf16>
    %116 = vector.shape_cast %115 : vector<1x1x4x4x128xbf16> to vector<4x4x128xbf16>
    %117 = vector.shape_cast %116 : vector<4x4x128xbf16> to vector<16x128xbf16>
    %118 = tpu.concatenate %114, %117 in 0 : vector<16x128xbf16>, vector<16x128xbf16> -> vector<32x128xbf16>
    %c0_161 = arith.constant 0 : index
    %c1792 = arith.constant 1792 : index
    %119 = vector.load %arg5[%c0_161, %c1792] : memref<32x2048xbf16, #tpu.memory_space<vmem>>, vector<32x128xbf16>
    tpu.vector_store %arg5[%c0_161, %c1792], %118 {strides = array<i32>} : memref<32x2048xbf16, #tpu.memory_space<vmem>>, vector<32x128xbf16>,
    %c0_162 = arith.constant 0 : index
    %c3_163 = arith.constant 3 : index
    %c1_164 = arith.constant 1 : index
    %c1_165 = arith.constant 1 : index
    %c0_166 = arith.constant 0 : index
    %120 = vector.load %arg1[%c0_162, %c3_163, %c1_164, %c1_165, %c0_166] : memref<2x4x5x5x128xbf16, #tpu.memory_space<vmem>>, vector<1x1x4x4x128xbf16>
    %121 = vector.shape_cast %120 : vector<1x1x4x4x128xbf16> to vector<4x4x128xbf16>
    %122 = vector.shape_cast %121 : vector<4x4x128xbf16> to vector<16x128xbf16>
    %c1_167 = arith.constant 1 : index
    %c3_168 = arith.constant 3 : index
    %c1_169 = arith.constant 1 : index
    %c1_170 = arith.constant 1 : index
    %c0_171 = arith.constant 0 : index
    %123 = vector.load %arg1[%c1_167, %c3_168, %c1_169, %c1_170, %c0_171] : memref<2x4x5x5x128xbf16, #tpu.memory_space<vmem>>, vector<1x1x4x4x128xbf16>
    %124 = vector.shape_cast %123 : vector<1x1x4x4x128xbf16> to vector<4x4x128xbf16>
    %125 = vector.shape_cast %124 : vector<4x4x128xbf16> to vector<16x128xbf16>
    %126 = tpu.concatenate %122, %125 in 0 : vector<16x128xbf16>, vector<16x128xbf16> -> vector<32x128xbf16>
    %c0_172 = arith.constant 0 : index
    %c1920 = arith.constant 1920 : index
    %127 = vector.load %arg5[%c0_172, %c1920] : memref<32x2048xbf16, #tpu.memory_space<vmem>>, vector<32x128xbf16>
    tpu.vector_store %arg5[%c0_172, %c1920], %126 {strides = array<i32>} : memref<32x2048xbf16, #tpu.memory_space<vmem>>, vector<32x128xbf16>,
    %c0_173 = arith.constant 0 : index
    %c0_174 = arith.constant 0 : index
    %128 = vector.load %arg3[%c0_173, %c0_174] : memref<1x128xf32, #tpu.memory_space<vmem>>, vector<1x128xf32>
    %c0_175 = arith.constant 0 : index
    %c0_176 = arith.constant 0 : index
    %129 = vector.load %arg5[%c0_175, %c0_176] : memref<32x2048xbf16, #tpu.memory_space<vmem>>, vector<32x2048xbf16>
    %c0_177 = arith.constant 0 : index
    %c0_178 = arith.constant 0 : index
    %130 = vector.load %arg2[%c0_177, %c0_178] : memref<2048x128xbf16, #tpu.memory_space<vmem>>, vector<2048x128xbf16>
    %cst = arith.constant dense<0.000000e+00> : vector<32x128xf32>
    %131 = tpu.matmul %129, %130, %cst {dimension_numbers = #tpu.dot_dimension_numbers<[1], [0], [0], [1], [0, 0, 1, 1], [], []>} : vector<32x2048xbf16>, vector<2048x128xbf16>, vector<32x128xf32> -> vector<32x128xf32>
    %132 = vector.broadcast %128 : vector<1x128xf32> to vector<32x128xf32>
    %133 = arith.addf %131, %132 : vector<32x128xf32>
    %cst_179 = arith.constant 0.000000e+00 : f32
    %134 = vector.broadcast %cst_179 : f32 to vector<32x128xf32>
    %135 = arith.cmpf ogt, %133, %134 : vector<32x128xf32>
    %cst_180 = arith.constant 2.000000e-01 : f32
    %136 = vector.broadcast %cst_180 : f32 to vector<32x128xf32>
    %137 = arith.mulf %136, %133 : vector<32x128xf32>
    %138 = arith.select %135, %133, %137 : vector<32x128xi1>, vector<32x128xf32>
    %139 = arith.truncf %138 : vector<32x128xf32> to vector<32x128xbf16>
    %c0_181 = arith.constant 0 : index
    %c0_182 = arith.constant 0 : index
    %c0_183 = arith.constant 0 : index
    %140 = vector.load %arg4[%c0_181, %c0_182, %c0_183] : memref<1x32x128xbf16, #tpu.memory_space<vmem>>, vector<1x32x128xbf16>
    %141 = vector.shape_cast %140 : vector<1x32x128xbf16> to vector<32x128xbf16>
    %142 = vector.shape_cast %139 : vector<32x128xbf16> to vector<1x32x128xbf16>
    tpu.vector_store %arg4[%c0_181, %c0_182, %c0_183], %142 {strides = array<i32>} : memref<1x32x128xbf16, #tpu.memory_space<vmem>>, vector<1x32x128xbf16>,
    return
  }
  func.func @transform_0(%arg0: i32) -> (i32, i32, i32, i32, i32) {
    %c0_i32 = arith.constant 0 : i32
    %c0_i32_0 = arith.constant 0 : i32
    %c0_i32_1 = arith.constant 0 : i32
    %c0_i32_2 = arith.constant 0 : i32
    %c0_i32_3 = arith.constant 0 : i32
    return %arg0, %c0_i32, %c0_i32_0, %c0_i32_1, %c0_i32_2 : i32, i32, i32, i32, i32
  }
  func.func @transform_1(%arg0: i32) -> (i32, i32) {
    %c0_i32 = arith.constant 0 : i32
    %c0_i32_0 = arith.constant 0 : i32
    %c0_i32_1 = arith.constant 0 : i32
    return %c0_i32, %c0_i32_0 : i32, i32
  }
  func.func @transform_2(%arg0: i32) -> (i32, i32) {
    %c0_i32 = arith.constant 0 : i32
    %c0_i32_0 = arith.constant 0 : i32
    %c0_i32_1 = arith.constant 0 : i32
    return %c0_i32, %c0_i32_0 : i32, i32
  }
  func.func @transform_3(%arg0: i32) -> (i32, i32, i32) {
    %c0_i32 = arith.constant 0 : i32
    %c0_i32_0 = arith.constant 0 : i32
    %c0_i32_1 = arith.constant 0 : i32
    return %arg0, %c0_i32, %c0_i32_0 : i32, i32, i32
  }
}

module attributes {stable_mosaic.version = 11 : i64} {
  func.func @_conv_tapfold_kernel(%arg0: i32, %arg1: memref<2x4x3x3x128xbf16, #tpu.memory_space<vmem>>, %arg2: memref<2048x128xbf16, #tpu.memory_space<vmem>>, %arg3: memref<1x128xf32, #tpu.memory_space<vmem>>, %arg4: memref<1x8x128xbf16, #tpu.memory_space<vmem>>, %arg5: memref<8x2048xbf16, #tpu.memory_space<vmem>>) attributes {dimension_semantics = [#tpu.dimension_semantics<parallel>], iteration_bounds = array<i64: 1>, scalar_prefetch = 0 : i64, scratch_operands = 1 : i64, tpu.core_type = #tpu.core_type<tc>, window_params = [{transform_indices = @transform_0, window_bounds = array<i64: 2, 4, 3, 3, 128>}, {pipeline_mode = #tpu.pipeline_mode<synchronous>, transform_indices = @transform_1, window_bounds = array<i64: 2048, 128>}, {pipeline_mode = #tpu.pipeline_mode<synchronous>, transform_indices = @transform_2, window_bounds = array<i64: 1, 128>}, {transform_indices = @transform_3, window_bounds = array<i64: 1, 8, 128>}]} {
    %c0 = arith.constant 0 : index
    %c0_0 = arith.constant 0 : index
    %c0_1 = arith.constant 0 : index
    %c0_2 = arith.constant 0 : index
    %c0_3 = arith.constant 0 : index
    %0 = vector.load %arg1[%c0, %c0_0, %c0_1, %c0_2, %c0_3] : memref<2x4x3x3x128xbf16, #tpu.memory_space<vmem>>, vector<1x1x2x2x128xbf16>
    %1 = vector.shape_cast %0 : vector<1x1x2x2x128xbf16> to vector<2x2x128xbf16>
    %2 = vector.shape_cast %1 : vector<2x2x128xbf16> to vector<4x128xbf16>
    %c1 = arith.constant 1 : index
    %c0_4 = arith.constant 0 : index
    %c0_5 = arith.constant 0 : index
    %c0_6 = arith.constant 0 : index
    %c0_7 = arith.constant 0 : index
    %3 = vector.load %arg1[%c1, %c0_4, %c0_5, %c0_6, %c0_7] : memref<2x4x3x3x128xbf16, #tpu.memory_space<vmem>>, vector<1x1x2x2x128xbf16>
    %4 = vector.shape_cast %3 : vector<1x1x2x2x128xbf16> to vector<2x2x128xbf16>
    %5 = vector.shape_cast %4 : vector<2x2x128xbf16> to vector<4x128xbf16>
    %6 = tpu.concatenate %2, %5 in 0 : vector<4x128xbf16>, vector<4x128xbf16> -> vector<8x128xbf16>
    %c0_8 = arith.constant 0 : index
    %c0_9 = arith.constant 0 : index
    %7 = vector.load %arg5[%c0_8, %c0_9] : memref<8x2048xbf16, #tpu.memory_space<vmem>>, vector<8x128xbf16>
    tpu.vector_store %arg5[%c0_8, %c0_9], %6 {strides = array<i32>} : memref<8x2048xbf16, #tpu.memory_space<vmem>>, vector<8x128xbf16>,
    %c0_10 = arith.constant 0 : index
    %c1_11 = arith.constant 1 : index
    %c0_12 = arith.constant 0 : index
    %c0_13 = arith.constant 0 : index
    %c0_14 = arith.constant 0 : index
    %8 = vector.load %arg1[%c0_10, %c1_11, %c0_12, %c0_13, %c0_14] : memref<2x4x3x3x128xbf16, #tpu.memory_space<vmem>>, vector<1x1x2x2x128xbf16>
    %9 = vector.shape_cast %8 : vector<1x1x2x2x128xbf16> to vector<2x2x128xbf16>
    %10 = vector.shape_cast %9 : vector<2x2x128xbf16> to vector<4x128xbf16>
    %c1_15 = arith.constant 1 : index
    %c1_16 = arith.constant 1 : index
    %c0_17 = arith.constant 0 : index
    %c0_18 = arith.constant 0 : index
    %c0_19 = arith.constant 0 : index
    %11 = vector.load %arg1[%c1_15, %c1_16, %c0_17, %c0_18, %c0_19] : memref<2x4x3x3x128xbf16, #tpu.memory_space<vmem>>, vector<1x1x2x2x128xbf16>
    %12 = vector.shape_cast %11 : vector<1x1x2x2x128xbf16> to vector<2x2x128xbf16>
    %13 = vector.shape_cast %12 : vector<2x2x128xbf16> to vector<4x128xbf16>
    %14 = tpu.concatenate %10, %13 in 0 : vector<4x128xbf16>, vector<4x128xbf16> -> vector<8x128xbf16>
    %c0_20 = arith.constant 0 : index
    %c128 = arith.constant 128 : index
    %15 = vector.load %arg5[%c0_20, %c128] : memref<8x2048xbf16, #tpu.memory_space<vmem>>, vector<8x128xbf16>
    tpu.vector_store %arg5[%c0_20, %c128], %14 {strides = array<i32>} : memref<8x2048xbf16, #tpu.memory_space<vmem>>, vector<8x128xbf16>,
    %c0_21 = arith.constant 0 : index
    %c0_22 = arith.constant 0 : index
    %c0_23 = arith.constant 0 : index
    %c1_24 = arith.constant 1 : index
    %c0_25 = arith.constant 0 : index
    %16 = vector.load %arg1[%c0_21, %c0_22, %c0_23, %c1_24, %c0_25] : memref<2x4x3x3x128xbf16, #tpu.memory_space<vmem>>, vector<1x1x2x2x128xbf16>
    %17 = vector.shape_cast %16 : vector<1x1x2x2x128xbf16> to vector<2x2x128xbf16>
    %18 = vector.shape_cast %17 : vector<2x2x128xbf16> to vector<4x128xbf16>
    %c1_26 = arith.constant 1 : index
    %c0_27 = arith.constant 0 : index
    %c0_28 = arith.constant 0 : index
    %c1_29 = arith.constant 1 : index
    %c0_30 = arith.constant 0 : index
    %19 = vector.load %arg1[%c1_26, %c0_27, %c0_28, %c1_29, %c0_30] : memref<2x4x3x3x128xbf16, #tpu.memory_space<vmem>>, vector<1x1x2x2x128xbf16>
    %20 = vector.shape_cast %19 : vector<1x1x2x2x128xbf16> to vector<2x2x128xbf16>
    %21 = vector.shape_cast %20 : vector<2x2x128xbf16> to vector<4x128xbf16>
    %22 = tpu.concatenate %18, %21 in 0 : vector<4x128xbf16>, vector<4x128xbf16> -> vector<8x128xbf16>
    %c0_31 = arith.constant 0 : index
    %c256 = arith.constant 256 : index
    %23 = vector.load %arg5[%c0_31, %c256] : memref<8x2048xbf16, #tpu.memory_space<vmem>>, vector<8x128xbf16>
    tpu.vector_store %arg5[%c0_31, %c256], %22 {strides = array<i32>} : memref<8x2048xbf16, #tpu.memory_space<vmem>>, vector<8x128xbf16>,
    %c0_32 = arith.constant 0 : index
    %c1_33 = arith.constant 1 : index
    %c0_34 = arith.constant 0 : index
    %c1_35 = arith.constant 1 : index
    %c0_36 = arith.constant 0 : index
    %24 = vector.load %arg1[%c0_32, %c1_33, %c0_34, %c1_35, %c0_36] : memref<2x4x3x3x128xbf16, #tpu.memory_space<vmem>>, vector<1x1x2x2x128xbf16>
    %25 = vector.shape_cast %24 : vector<1x1x2x2x128xbf16> to vector<2x2x128xbf16>
    %26 = vector.shape_cast %25 : vector<2x2x128xbf16> to vector<4x128xbf16>
    %c1_37 = arith.constant 1 : index
    %c1_38 = arith.constant 1 : index
    %c0_39 = arith.constant 0 : index
    %c1_40 = arith.constant 1 : index
    %c0_41 = arith.constant 0 : index
    %27 = vector.load %arg1[%c1_37, %c1_38, %c0_39, %c1_40, %c0_41] : memref<2x4x3x3x128xbf16, #tpu.memory_space<vmem>>, vector<1x1x2x2x128xbf16>
    %28 = vector.shape_cast %27 : vector<1x1x2x2x128xbf16> to vector<2x2x128xbf16>
    %29 = vector.shape_cast %28 : vector<2x2x128xbf16> to vector<4x128xbf16>
    %30 = tpu.concatenate %26, %29 in 0 : vector<4x128xbf16>, vector<4x128xbf16> -> vector<8x128xbf16>
    %c0_42 = arith.constant 0 : index
    %c384 = arith.constant 384 : index
    %31 = vector.load %arg5[%c0_42, %c384] : memref<8x2048xbf16, #tpu.memory_space<vmem>>, vector<8x128xbf16>
    tpu.vector_store %arg5[%c0_42, %c384], %30 {strides = array<i32>} : memref<8x2048xbf16, #tpu.memory_space<vmem>>, vector<8x128xbf16>,
    %c0_43 = arith.constant 0 : index
    %c2 = arith.constant 2 : index
    %c0_44 = arith.constant 0 : index
    %c0_45 = arith.constant 0 : index
    %c0_46 = arith.constant 0 : index
    %32 = vector.load %arg1[%c0_43, %c2, %c0_44, %c0_45, %c0_46] : memref<2x4x3x3x128xbf16, #tpu.memory_space<vmem>>, vector<1x1x2x2x128xbf16>
    %33 = vector.shape_cast %32 : vector<1x1x2x2x128xbf16> to vector<2x2x128xbf16>
    %34 = vector.shape_cast %33 : vector<2x2x128xbf16> to vector<4x128xbf16>
    %c1_47 = arith.constant 1 : index
    %c2_48 = arith.constant 2 : index
    %c0_49 = arith.constant 0 : index
    %c0_50 = arith.constant 0 : index
    %c0_51 = arith.constant 0 : index
    %35 = vector.load %arg1[%c1_47, %c2_48, %c0_49, %c0_50, %c0_51] : memref<2x4x3x3x128xbf16, #tpu.memory_space<vmem>>, vector<1x1x2x2x128xbf16>
    %36 = vector.shape_cast %35 : vector<1x1x2x2x128xbf16> to vector<2x2x128xbf16>
    %37 = vector.shape_cast %36 : vector<2x2x128xbf16> to vector<4x128xbf16>
    %38 = tpu.concatenate %34, %37 in 0 : vector<4x128xbf16>, vector<4x128xbf16> -> vector<8x128xbf16>
    %c0_52 = arith.constant 0 : index
    %c512 = arith.constant 512 : index
    %39 = vector.load %arg5[%c0_52, %c512] : memref<8x2048xbf16, #tpu.memory_space<vmem>>, vector<8x128xbf16>
    tpu.vector_store %arg5[%c0_52, %c512], %38 {strides = array<i32>} : memref<8x2048xbf16, #tpu.memory_space<vmem>>, vector<8x128xbf16>,
    %c0_53 = arith.constant 0 : index
    %c3 = arith.constant 3 : index
    %c0_54 = arith.constant 0 : index
    %c0_55 = arith.constant 0 : index
    %c0_56 = arith.constant 0 : index
    %40 = vector.load %arg1[%c0_53, %c3, %c0_54, %c0_55, %c0_56] : memref<2x4x3x3x128xbf16, #tpu.memory_space<vmem>>, vector<1x1x2x2x128xbf16>
    %41 = vector.shape_cast %40 : vector<1x1x2x2x128xbf16> to vector<2x2x128xbf16>
    %42 = vector.shape_cast %41 : vector<2x2x128xbf16> to vector<4x128xbf16>
    %c1_57 = arith.constant 1 : index
    %c3_58 = arith.constant 3 : index
    %c0_59 = arith.constant 0 : index
    %c0_60 = arith.constant 0 : index
    %c0_61 = arith.constant 0 : index
    %43 = vector.load %arg1[%c1_57, %c3_58, %c0_59, %c0_60, %c0_61] : memref<2x4x3x3x128xbf16, #tpu.memory_space<vmem>>, vector<1x1x2x2x128xbf16>
    %44 = vector.shape_cast %43 : vector<1x1x2x2x128xbf16> to vector<2x2x128xbf16>
    %45 = vector.shape_cast %44 : vector<2x2x128xbf16> to vector<4x128xbf16>
    %46 = tpu.concatenate %42, %45 in 0 : vector<4x128xbf16>, vector<4x128xbf16> -> vector<8x128xbf16>
    %c0_62 = arith.constant 0 : index
    %c640 = arith.constant 640 : index
    %47 = vector.load %arg5[%c0_62, %c640] : memref<8x2048xbf16, #tpu.memory_space<vmem>>, vector<8x128xbf16>
    tpu.vector_store %arg5[%c0_62, %c640], %46 {strides = array<i32>} : memref<8x2048xbf16, #tpu.memory_space<vmem>>, vector<8x128xbf16>,
    %c0_63 = arith.constant 0 : index
    %c2_64 = arith.constant 2 : index
    %c0_65 = arith.constant 0 : index
    %c1_66 = arith.constant 1 : index
    %c0_67 = arith.constant 0 : index
    %48 = vector.load %arg1[%c0_63, %c2_64, %c0_65, %c1_66, %c0_67] : memref<2x4x3x3x128xbf16, #tpu.memory_space<vmem>>, vector<1x1x2x2x128xbf16>
    %49 = vector.shape_cast %48 : vector<1x1x2x2x128xbf16> to vector<2x2x128xbf16>
    %50 = vector.shape_cast %49 : vector<2x2x128xbf16> to vector<4x128xbf16>
    %c1_68 = arith.constant 1 : index
    %c2_69 = arith.constant 2 : index
    %c0_70 = arith.constant 0 : index
    %c1_71 = arith.constant 1 : index
    %c0_72 = arith.constant 0 : index
    %51 = vector.load %arg1[%c1_68, %c2_69, %c0_70, %c1_71, %c0_72] : memref<2x4x3x3x128xbf16, #tpu.memory_space<vmem>>, vector<1x1x2x2x128xbf16>
    %52 = vector.shape_cast %51 : vector<1x1x2x2x128xbf16> to vector<2x2x128xbf16>
    %53 = vector.shape_cast %52 : vector<2x2x128xbf16> to vector<4x128xbf16>
    %54 = tpu.concatenate %50, %53 in 0 : vector<4x128xbf16>, vector<4x128xbf16> -> vector<8x128xbf16>
    %c0_73 = arith.constant 0 : index
    %c768 = arith.constant 768 : index
    %55 = vector.load %arg5[%c0_73, %c768] : memref<8x2048xbf16, #tpu.memory_space<vmem>>, vector<8x128xbf16>
    tpu.vector_store %arg5[%c0_73, %c768], %54 {strides = array<i32>} : memref<8x2048xbf16, #tpu.memory_space<vmem>>, vector<8x128xbf16>,
    %c0_74 = arith.constant 0 : index
    %c3_75 = arith.constant 3 : index
    %c0_76 = arith.constant 0 : index
    %c1_77 = arith.constant 1 : index
    %c0_78 = arith.constant 0 : index
    %56 = vector.load %arg1[%c0_74, %c3_75, %c0_76, %c1_77, %c0_78] : memref<2x4x3x3x128xbf16, #tpu.memory_space<vmem>>, vector<1x1x2x2x128xbf16>
    %57 = vector.shape_cast %56 : vector<1x1x2x2x128xbf16> to vector<2x2x128xbf16>
    %58 = vector.shape_cast %57 : vector<2x2x128xbf16> to vector<4x128xbf16>
    %c1_79 = arith.constant 1 : index
    %c3_80 = arith.constant 3 : index
    %c0_81 = arith.constant 0 : index
    %c1_82 = arith.constant 1 : index
    %c0_83 = arith.constant 0 : index
    %59 = vector.load %arg1[%c1_79, %c3_80, %c0_81, %c1_82, %c0_83] : memref<2x4x3x3x128xbf16, #tpu.memory_space<vmem>>, vector<1x1x2x2x128xbf16>
    %60 = vector.shape_cast %59 : vector<1x1x2x2x128xbf16> to vector<2x2x128xbf16>
    %61 = vector.shape_cast %60 : vector<2x2x128xbf16> to vector<4x128xbf16>
    %62 = tpu.concatenate %58, %61 in 0 : vector<4x128xbf16>, vector<4x128xbf16> -> vector<8x128xbf16>
    %c0_84 = arith.constant 0 : index
    %c896 = arith.constant 896 : index
    %63 = vector.load %arg5[%c0_84, %c896] : memref<8x2048xbf16, #tpu.memory_space<vmem>>, vector<8x128xbf16>
    tpu.vector_store %arg5[%c0_84, %c896], %62 {strides = array<i32>} : memref<8x2048xbf16, #tpu.memory_space<vmem>>, vector<8x128xbf16>,
    %c0_85 = arith.constant 0 : index
    %c0_86 = arith.constant 0 : index
    %c1_87 = arith.constant 1 : index
    %c0_88 = arith.constant 0 : index
    %c0_89 = arith.constant 0 : index
    %64 = vector.load %arg1[%c0_85, %c0_86, %c1_87, %c0_88, %c0_89] : memref<2x4x3x3x128xbf16, #tpu.memory_space<vmem>>, vector<1x1x2x2x128xbf16>
    %65 = vector.shape_cast %64 : vector<1x1x2x2x128xbf16> to vector<2x2x128xbf16>
    %66 = vector.shape_cast %65 : vector<2x2x128xbf16> to vector<4x128xbf16>
    %c1_90 = arith.constant 1 : index
    %c0_91 = arith.constant 0 : index
    %c1_92 = arith.constant 1 : index
    %c0_93 = arith.constant 0 : index
    %c0_94 = arith.constant 0 : index
    %67 = vector.load %arg1[%c1_90, %c0_91, %c1_92, %c0_93, %c0_94] : memref<2x4x3x3x128xbf16, #tpu.memory_space<vmem>>, vector<1x1x2x2x128xbf16>
    %68 = vector.shape_cast %67 : vector<1x1x2x2x128xbf16> to vector<2x2x128xbf16>
    %69 = vector.shape_cast %68 : vector<2x2x128xbf16> to vector<4x128xbf16>
    %70 = tpu.concatenate %66, %69 in 0 : vector<4x128xbf16>, vector<4x128xbf16> -> vector<8x128xbf16>
    %c0_95 = arith.constant 0 : index
    %c1024 = arith.constant 1024 : index
    %71 = vector.load %arg5[%c0_95, %c1024] : memref<8x2048xbf16, #tpu.memory_space<vmem>>, vector<8x128xbf16>
    tpu.vector_store %arg5[%c0_95, %c1024], %70 {strides = array<i32>} : memref<8x2048xbf16, #tpu.memory_space<vmem>>, vector<8x128xbf16>,
    %c0_96 = arith.constant 0 : index
    %c1_97 = arith.constant 1 : index
    %c1_98 = arith.constant 1 : index
    %c0_99 = arith.constant 0 : index
    %c0_100 = arith.constant 0 : index
    %72 = vector.load %arg1[%c0_96, %c1_97, %c1_98, %c0_99, %c0_100] : memref<2x4x3x3x128xbf16, #tpu.memory_space<vmem>>, vector<1x1x2x2x128xbf16>
    %73 = vector.shape_cast %72 : vector<1x1x2x2x128xbf16> to vector<2x2x128xbf16>
    %74 = vector.shape_cast %73 : vector<2x2x128xbf16> to vector<4x128xbf16>
    %c1_101 = arith.constant 1 : index
    %c1_102 = arith.constant 1 : index
    %c1_103 = arith.constant 1 : index
    %c0_104 = arith.constant 0 : index
    %c0_105 = arith.constant 0 : index
    %75 = vector.load %arg1[%c1_101, %c1_102, %c1_103, %c0_104, %c0_105] : memref<2x4x3x3x128xbf16, #tpu.memory_space<vmem>>, vector<1x1x2x2x128xbf16>
    %76 = vector.shape_cast %75 : vector<1x1x2x2x128xbf16> to vector<2x2x128xbf16>
    %77 = vector.shape_cast %76 : vector<2x2x128xbf16> to vector<4x128xbf16>
    %78 = tpu.concatenate %74, %77 in 0 : vector<4x128xbf16>, vector<4x128xbf16> -> vector<8x128xbf16>
    %c0_106 = arith.constant 0 : index
    %c1152 = arith.constant 1152 : index
    %79 = vector.load %arg5[%c0_106, %c1152] : memref<8x2048xbf16, #tpu.memory_space<vmem>>, vector<8x128xbf16>
    tpu.vector_store %arg5[%c0_106, %c1152], %78 {strides = array<i32>} : memref<8x2048xbf16, #tpu.memory_space<vmem>>, vector<8x128xbf16>,
    %c0_107 = arith.constant 0 : index
    %c0_108 = arith.constant 0 : index
    %c1_109 = arith.constant 1 : index
    %c1_110 = arith.constant 1 : index
    %c0_111 = arith.constant 0 : index
    %80 = vector.load %arg1[%c0_107, %c0_108, %c1_109, %c1_110, %c0_111] : memref<2x4x3x3x128xbf16, #tpu.memory_space<vmem>>, vector<1x1x2x2x128xbf16>
    %81 = vector.shape_cast %80 : vector<1x1x2x2x128xbf16> to vector<2x2x128xbf16>
    %82 = vector.shape_cast %81 : vector<2x2x128xbf16> to vector<4x128xbf16>
    %c1_112 = arith.constant 1 : index
    %c0_113 = arith.constant 0 : index
    %c1_114 = arith.constant 1 : index
    %c1_115 = arith.constant 1 : index
    %c0_116 = arith.constant 0 : index
    %83 = vector.load %arg1[%c1_112, %c0_113, %c1_114, %c1_115, %c0_116] : memref<2x4x3x3x128xbf16, #tpu.memory_space<vmem>>, vector<1x1x2x2x128xbf16>
    %84 = vector.shape_cast %83 : vector<1x1x2x2x128xbf16> to vector<2x2x128xbf16>
    %85 = vector.shape_cast %84 : vector<2x2x128xbf16> to vector<4x128xbf16>
    %86 = tpu.concatenate %82, %85 in 0 : vector<4x128xbf16>, vector<4x128xbf16> -> vector<8x128xbf16>
    %c0_117 = arith.constant 0 : index
    %c1280 = arith.constant 1280 : index
    %87 = vector.load %arg5[%c0_117, %c1280] : memref<8x2048xbf16, #tpu.memory_space<vmem>>, vector<8x128xbf16>
    tpu.vector_store %arg5[%c0_117, %c1280], %86 {strides = array<i32>} : memref<8x2048xbf16, #tpu.memory_space<vmem>>, vector<8x128xbf16>,
    %c0_118 = arith.constant 0 : index
    %c1_119 = arith.constant 1 : index
    %c1_120 = arith.constant 1 : index
    %c1_121 = arith.constant 1 : index
    %c0_122 = arith.constant 0 : index
    %88 = vector.load %arg1[%c0_118, %c1_119, %c1_120, %c1_121, %c0_122] : memref<2x4x3x3x128xbf16, #tpu.memory_space<vmem>>, vector<1x1x2x2x128xbf16>
    %89 = vector.shape_cast %88 : vector<1x1x2x2x128xbf16> to vector<2x2x128xbf16>
    %90 = vector.shape_cast %89 : vector<2x2x128xbf16> to vector<4x128xbf16>
    %c1_123 = arith.constant 1 : index
    %c1_124 = arith.constant 1 : index
    %c1_125 = arith.constant 1 : index
    %c1_126 = arith.constant 1 : index
    %c0_127 = arith.constant 0 : index
    %91 = vector.load %arg1[%c1_123, %c1_124, %c1_125, %c1_126, %c0_127] : memref<2x4x3x3x128xbf16, #tpu.memory_space<vmem>>, vector<1x1x2x2x128xbf16>
    %92 = vector.shape_cast %91 : vector<1x1x2x2x128xbf16> to vector<2x2x128xbf16>
    %93 = vector.shape_cast %92 : vector<2x2x128xbf16> to vector<4x128xbf16>
    %94 = tpu.concatenate %90, %93 in 0 : vector<4x128xbf16>, vector<4x128xbf16> -> vector<8x128xbf16>
    %c0_128 = arith.constant 0 : index
    %c1408 = arith.constant 1408 : index
    %95 = vector.load %arg5[%c0_128, %c1408] : memref<8x2048xbf16, #tpu.memory_space<vmem>>, vector<8x128xbf16>
    tpu.vector_store %arg5[%c0_128, %c1408], %94 {strides = array<i32>} : memref<8x2048xbf16, #tpu.memory_space<vmem>>, vector<8x128xbf16>,
    %c0_129 = arith.constant 0 : index
    %c2_130 = arith.constant 2 : index
    %c1_131 = arith.constant 1 : index
    %c0_132 = arith.constant 0 : index
    %c0_133 = arith.constant 0 : index
    %96 = vector.load %arg1[%c0_129, %c2_130, %c1_131, %c0_132, %c0_133] : memref<2x4x3x3x128xbf16, #tpu.memory_space<vmem>>, vector<1x1x2x2x128xbf16>
    %97 = vector.shape_cast %96 : vector<1x1x2x2x128xbf16> to vector<2x2x128xbf16>
    %98 = vector.shape_cast %97 : vector<2x2x128xbf16> to vector<4x128xbf16>
    %c1_134 = arith.constant 1 : index
    %c2_135 = arith.constant 2 : index
    %c1_136 = arith.constant 1 : index
    %c0_137 = arith.constant 0 : index
    %c0_138 = arith.constant 0 : index
    %99 = vector.load %arg1[%c1_134, %c2_135, %c1_136, %c0_137, %c0_138] : memref<2x4x3x3x128xbf16, #tpu.memory_space<vmem>>, vector<1x1x2x2x128xbf16>
    %100 = vector.shape_cast %99 : vector<1x1x2x2x128xbf16> to vector<2x2x128xbf16>
    %101 = vector.shape_cast %100 : vector<2x2x128xbf16> to vector<4x128xbf16>
    %102 = tpu.concatenate %98, %101 in 0 : vector<4x128xbf16>, vector<4x128xbf16> -> vector<8x128xbf16>
    %c0_139 = arith.constant 0 : index
    %c1536 = arith.constant 1536 : index
    %103 = vector.load %arg5[%c0_139, %c1536] : memref<8x2048xbf16, #tpu.memory_space<vmem>>, vector<8x128xbf16>
    tpu.vector_store %arg5[%c0_139, %c1536], %102 {strides = array<i32>} : memref<8x2048xbf16, #tpu.memory_space<vmem>>, vector<8x128xbf16>,
    %c0_140 = arith.constant 0 : index
    %c3_141 = arith.constant 3 : index
    %c1_142 = arith.constant 1 : index
    %c0_143 = arith.constant 0 : index
    %c0_144 = arith.constant 0 : index
    %104 = vector.load %arg1[%c0_140, %c3_141, %c1_142, %c0_143, %c0_144] : memref<2x4x3x3x128xbf16, #tpu.memory_space<vmem>>, vector<1x1x2x2x128xbf16>
    %105 = vector.shape_cast %104 : vector<1x1x2x2x128xbf16> to vector<2x2x128xbf16>
    %106 = vector.shape_cast %105 : vector<2x2x128xbf16> to vector<4x128xbf16>
    %c1_145 = arith.constant 1 : index
    %c3_146 = arith.constant 3 : index
    %c1_147 = arith.constant 1 : index
    %c0_148 = arith.constant 0 : index
    %c0_149 = arith.constant 0 : index
    %107 = vector.load %arg1[%c1_145, %c3_146, %c1_147, %c0_148, %c0_149] : memref<2x4x3x3x128xbf16, #tpu.memory_space<vmem>>, vector<1x1x2x2x128xbf16>
    %108 = vector.shape_cast %107 : vector<1x1x2x2x128xbf16> to vector<2x2x128xbf16>
    %109 = vector.shape_cast %108 : vector<2x2x128xbf16> to vector<4x128xbf16>
    %110 = tpu.concatenate %106, %109 in 0 : vector<4x128xbf16>, vector<4x128xbf16> -> vector<8x128xbf16>
    %c0_150 = arith.constant 0 : index
    %c1664 = arith.constant 1664 : index
    %111 = vector.load %arg5[%c0_150, %c1664] : memref<8x2048xbf16, #tpu.memory_space<vmem>>, vector<8x128xbf16>
    tpu.vector_store %arg5[%c0_150, %c1664], %110 {strides = array<i32>} : memref<8x2048xbf16, #tpu.memory_space<vmem>>, vector<8x128xbf16>,
    %c0_151 = arith.constant 0 : index
    %c2_152 = arith.constant 2 : index
    %c1_153 = arith.constant 1 : index
    %c1_154 = arith.constant 1 : index
    %c0_155 = arith.constant 0 : index
    %112 = vector.load %arg1[%c0_151, %c2_152, %c1_153, %c1_154, %c0_155] : memref<2x4x3x3x128xbf16, #tpu.memory_space<vmem>>, vector<1x1x2x2x128xbf16>
    %113 = vector.shape_cast %112 : vector<1x1x2x2x128xbf16> to vector<2x2x128xbf16>
    %114 = vector.shape_cast %113 : vector<2x2x128xbf16> to vector<4x128xbf16>
    %c1_156 = arith.constant 1 : index
    %c2_157 = arith.constant 2 : index
    %c1_158 = arith.constant 1 : index
    %c1_159 = arith.constant 1 : index
    %c0_160 = arith.constant 0 : index
    %115 = vector.load %arg1[%c1_156, %c2_157, %c1_158, %c1_159, %c0_160] : memref<2x4x3x3x128xbf16, #tpu.memory_space<vmem>>, vector<1x1x2x2x128xbf16>
    %116 = vector.shape_cast %115 : vector<1x1x2x2x128xbf16> to vector<2x2x128xbf16>
    %117 = vector.shape_cast %116 : vector<2x2x128xbf16> to vector<4x128xbf16>
    %118 = tpu.concatenate %114, %117 in 0 : vector<4x128xbf16>, vector<4x128xbf16> -> vector<8x128xbf16>
    %c0_161 = arith.constant 0 : index
    %c1792 = arith.constant 1792 : index
    %119 = vector.load %arg5[%c0_161, %c1792] : memref<8x2048xbf16, #tpu.memory_space<vmem>>, vector<8x128xbf16>
    tpu.vector_store %arg5[%c0_161, %c1792], %118 {strides = array<i32>} : memref<8x2048xbf16, #tpu.memory_space<vmem>>, vector<8x128xbf16>,
    %c0_162 = arith.constant 0 : index
    %c3_163 = arith.constant 3 : index
    %c1_164 = arith.constant 1 : index
    %c1_165 = arith.constant 1 : index
    %c0_166 = arith.constant 0 : index
    %120 = vector.load %arg1[%c0_162, %c3_163, %c1_164, %c1_165, %c0_166] : memref<2x4x3x3x128xbf16, #tpu.memory_space<vmem>>, vector<1x1x2x2x128xbf16>
    %121 = vector.shape_cast %120 : vector<1x1x2x2x128xbf16> to vector<2x2x128xbf16>
    %122 = vector.shape_cast %121 : vector<2x2x128xbf16> to vector<4x128xbf16>
    %c1_167 = arith.constant 1 : index
    %c3_168 = arith.constant 3 : index
    %c1_169 = arith.constant 1 : index
    %c1_170 = arith.constant 1 : index
    %c0_171 = arith.constant 0 : index
    %123 = vector.load %arg1[%c1_167, %c3_168, %c1_169, %c1_170, %c0_171] : memref<2x4x3x3x128xbf16, #tpu.memory_space<vmem>>, vector<1x1x2x2x128xbf16>
    %124 = vector.shape_cast %123 : vector<1x1x2x2x128xbf16> to vector<2x2x128xbf16>
    %125 = vector.shape_cast %124 : vector<2x2x128xbf16> to vector<4x128xbf16>
    %126 = tpu.concatenate %122, %125 in 0 : vector<4x128xbf16>, vector<4x128xbf16> -> vector<8x128xbf16>
    %c0_172 = arith.constant 0 : index
    %c1920 = arith.constant 1920 : index
    %127 = vector.load %arg5[%c0_172, %c1920] : memref<8x2048xbf16, #tpu.memory_space<vmem>>, vector<8x128xbf16>
    tpu.vector_store %arg5[%c0_172, %c1920], %126 {strides = array<i32>} : memref<8x2048xbf16, #tpu.memory_space<vmem>>, vector<8x128xbf16>,
    %c0_173 = arith.constant 0 : index
    %c0_174 = arith.constant 0 : index
    %128 = vector.load %arg3[%c0_173, %c0_174] : memref<1x128xf32, #tpu.memory_space<vmem>>, vector<1x128xf32>
    %c0_175 = arith.constant 0 : index
    %c0_176 = arith.constant 0 : index
    %129 = vector.load %arg5[%c0_175, %c0_176] : memref<8x2048xbf16, #tpu.memory_space<vmem>>, vector<8x2048xbf16>
    %c0_177 = arith.constant 0 : index
    %c0_178 = arith.constant 0 : index
    %130 = vector.load %arg2[%c0_177, %c0_178] : memref<2048x128xbf16, #tpu.memory_space<vmem>>, vector<2048x128xbf16>
    %cst = arith.constant dense<0.000000e+00> : vector<8x128xf32>
    %131 = tpu.matmul %129, %130, %cst {dimension_numbers = #tpu.dot_dimension_numbers<[1], [0], [0], [1], [0, 0, 1, 1], [], []>} : vector<8x2048xbf16>, vector<2048x128xbf16>, vector<8x128xf32> -> vector<8x128xf32>
    %132 = vector.broadcast %128 : vector<1x128xf32> to vector<8x128xf32>
    %133 = arith.addf %131, %132 : vector<8x128xf32>
    %cst_179 = arith.constant 0.000000e+00 : f32
    %134 = vector.broadcast %cst_179 : f32 to vector<8x128xf32>
    %135 = arith.cmpf ogt, %133, %134 : vector<8x128xf32>
    %cst_180 = arith.constant 2.000000e-01 : f32
    %136 = vector.broadcast %cst_180 : f32 to vector<8x128xf32>
    %137 = arith.mulf %136, %133 : vector<8x128xf32>
    %138 = arith.select %135, %133, %137 : vector<8x128xi1>, vector<8x128xf32>
    %139 = arith.truncf %138 : vector<8x128xf32> to vector<8x128xbf16>
    %c0_181 = arith.constant 0 : index
    %c0_182 = arith.constant 0 : index
    %c0_183 = arith.constant 0 : index
    %140 = vector.load %arg4[%c0_181, %c0_182, %c0_183] : memref<1x8x128xbf16, #tpu.memory_space<vmem>>, vector<1x8x128xbf16>
    %141 = vector.shape_cast %140 : vector<1x8x128xbf16> to vector<8x128xbf16>
    %142 = vector.shape_cast %139 : vector<8x128xbf16> to vector<1x8x128xbf16>
    tpu.vector_store %arg4[%c0_181, %c0_182, %c0_183], %142 {strides = array<i32>} : memref<1x8x128xbf16, #tpu.memory_space<vmem>>, vector<1x8x128xbf16>,
    return
  }
  func.func @transform_0(%arg0: i32) -> (i32, i32, i32, i32, i32) {
    %c0_i32 = arith.constant 0 : i32
    %c0_i32_0 = arith.constant 0 : i32
    %c0_i32_1 = arith.constant 0 : i32
    %c0_i32_2 = arith.constant 0 : i32
    %c0_i32_3 = arith.constant 0 : i32
    return %arg0, %c0_i32, %c0_i32_0, %c0_i32_1, %c0_i32_2 : i32, i32, i32, i32, i32
  }
  func.func @transform_1(%arg0: i32) -> (i32, i32) {
    %c0_i32 = arith.constant 0 : i32
    %c0_i32_0 = arith.constant 0 : i32
    %c0_i32_1 = arith.constant 0 : i32
    return %c0_i32, %c0_i32_0 : i32, i32
  }
  func.func @transform_2(%arg0: i32) -> (i32, i32) {
    %c0_i32 = arith.constant 0 : i32
    %c0_i32_0 = arith.constant 0 : i32
    %c0_i32_1 = arith.constant 0 : i32
    return %c0_i32, %c0_i32_0 : i32, i32
  }
  func.func @transform_3(%arg0: i32) -> (i32, i32, i32) {
    %c0_i32 = arith.constant 0 : i32
    %c0_i32_0 = arith.constant 0 : i32
    %c0_i32_1 = arith.constant 0 : i32
    return %arg0, %c0_i32, %c0_i32_0 : i32, i32, i32
  }
}

module attributes {stable_mosaic.version = 11 : i64} {
  func.func @_conv_tapfold_kernel(%arg0: i32, %arg1: memref<2x4x2x2x128xbf16, #tpu.memory_space<vmem>>, %arg2: memref<1x2048xbf16, #tpu.memory_space<vmem>>, %arg3: memref<1x1xf32, #tpu.memory_space<vmem>>, %arg4: memref<1x2x1xf32, #tpu.memory_space<vmem>>, %arg5: memref<2x2048xbf16, #tpu.memory_space<vmem>>) attributes {dimension_semantics = [#tpu.dimension_semantics<parallel>], iteration_bounds = array<i64: 1>, scalar_prefetch = 0 : i64, scratch_operands = 1 : i64, tpu.core_type = #tpu.core_type<tc>, window_params = [{transform_indices = @transform_0, window_bounds = array<i64: 2, 4, 2, 2, 128>}, {pipeline_mode = #tpu.pipeline_mode<synchronous>, transform_indices = @transform_1, window_bounds = array<i64: 1, 2048>}, {pipeline_mode = #tpu.pipeline_mode<synchronous>, transform_indices = @transform_2, window_bounds = array<i64: 1, 1>}, {transform_indices = @transform_3, window_bounds = array<i64: 1, 2, 1>}]} {
    %c0 = arith.constant 0 : index
    %c0_0 = arith.constant 0 : index
    %c0_1 = arith.constant 0 : index
    %c0_2 = arith.constant 0 : index
    %c0_3 = arith.constant 0 : index
    %0 = vector.load %arg1[%c0, %c0_0, %c0_1, %c0_2, %c0_3] : memref<2x4x2x2x128xbf16, #tpu.memory_space<vmem>>, vector<1x1x1x1x128xbf16>
    %1 = vector.shape_cast %0 : vector<1x1x1x1x128xbf16> to vector<1x1x128xbf16>
    %2 = vector.shape_cast %1 : vector<1x1x128xbf16> to vector<1x128xbf16>
    %c1 = arith.constant 1 : index
    %c0_4 = arith.constant 0 : index
    %c0_5 = arith.constant 0 : index
    %c0_6 = arith.constant 0 : index
    %c0_7 = arith.constant 0 : index
    %3 = vector.load %arg1[%c1, %c0_4, %c0_5, %c0_6, %c0_7] : memref<2x4x2x2x128xbf16, #tpu.memory_space<vmem>>, vector<1x1x1x1x128xbf16>
    %4 = vector.shape_cast %3 : vector<1x1x1x1x128xbf16> to vector<1x1x128xbf16>
    %5 = vector.shape_cast %4 : vector<1x1x128xbf16> to vector<1x128xbf16>
    %6 = tpu.concatenate %2, %5 in 0 : vector<1x128xbf16>, vector<1x128xbf16> -> vector<2x128xbf16>
    %c0_8 = arith.constant 0 : index
    %c0_9 = arith.constant 0 : index
    %7 = vector.load %arg5[%c0_8, %c0_9] : memref<2x2048xbf16, #tpu.memory_space<vmem>>, vector<2x128xbf16>
    tpu.vector_store %arg5[%c0_8, %c0_9], %6 {strides = array<i32>} : memref<2x2048xbf16, #tpu.memory_space<vmem>>, vector<2x128xbf16>,
    %c0_10 = arith.constant 0 : index
    %c1_11 = arith.constant 1 : index
    %c0_12 = arith.constant 0 : index
    %c0_13 = arith.constant 0 : index
    %c0_14 = arith.constant 0 : index
    %8 = vector.load %arg1[%c0_10, %c1_11, %c0_12, %c0_13, %c0_14] : memref<2x4x2x2x128xbf16, #tpu.memory_space<vmem>>, vector<1x1x1x1x128xbf16>
    %9 = vector.shape_cast %8 : vector<1x1x1x1x128xbf16> to vector<1x1x128xbf16>
    %10 = vector.shape_cast %9 : vector<1x1x128xbf16> to vector<1x128xbf16>
    %c1_15 = arith.constant 1 : index
    %c1_16 = arith.constant 1 : index
    %c0_17 = arith.constant 0 : index
    %c0_18 = arith.constant 0 : index
    %c0_19 = arith.constant 0 : index
    %11 = vector.load %arg1[%c1_15, %c1_16, %c0_17, %c0_18, %c0_19] : memref<2x4x2x2x128xbf16, #tpu.memory_space<vmem>>, vector<1x1x1x1x128xbf16>
    %12 = vector.shape_cast %11 : vector<1x1x1x1x128xbf16> to vector<1x1x128xbf16>
    %13 = vector.shape_cast %12 : vector<1x1x128xbf16> to vector<1x128xbf16>
    %14 = tpu.concatenate %10, %13 in 0 : vector<1x128xbf16>, vector<1x128xbf16> -> vector<2x128xbf16>
    %c0_20 = arith.constant 0 : index
    %c128 = arith.constant 128 : index
    %15 = vector.load %arg5[%c0_20, %c128] : memref<2x2048xbf16, #tpu.memory_space<vmem>>, vector<2x128xbf16>
    tpu.vector_store %arg5[%c0_20, %c128], %14 {strides = array<i32>} : memref<2x2048xbf16, #tpu.memory_space<vmem>>, vector<2x128xbf16>,
    %c0_21 = arith.constant 0 : index
    %c0_22 = arith.constant 0 : index
    %c0_23 = arith.constant 0 : index
    %c1_24 = arith.constant 1 : index
    %c0_25 = arith.constant 0 : index
    %16 = vector.load %arg1[%c0_21, %c0_22, %c0_23, %c1_24, %c0_25] : memref<2x4x2x2x128xbf16, #tpu.memory_space<vmem>>, vector<1x1x1x1x128xbf16>
    %17 = vector.shape_cast %16 : vector<1x1x1x1x128xbf16> to vector<1x1x128xbf16>
    %18 = vector.shape_cast %17 : vector<1x1x128xbf16> to vector<1x128xbf16>
    %c1_26 = arith.constant 1 : index
    %c0_27 = arith.constant 0 : index
    %c0_28 = arith.constant 0 : index
    %c1_29 = arith.constant 1 : index
    %c0_30 = arith.constant 0 : index
    %19 = vector.load %arg1[%c1_26, %c0_27, %c0_28, %c1_29, %c0_30] : memref<2x4x2x2x128xbf16, #tpu.memory_space<vmem>>, vector<1x1x1x1x128xbf16>
    %20 = vector.shape_cast %19 : vector<1x1x1x1x128xbf16> to vector<1x1x128xbf16>
    %21 = vector.shape_cast %20 : vector<1x1x128xbf16> to vector<1x128xbf16>
    %22 = tpu.concatenate %18, %21 in 0 : vector<1x128xbf16>, vector<1x128xbf16> -> vector<2x128xbf16>
    %c0_31 = arith.constant 0 : index
    %c256 = arith.constant 256 : index
    %23 = vector.load %arg5[%c0_31, %c256] : memref<2x2048xbf16, #tpu.memory_space<vmem>>, vector<2x128xbf16>
    tpu.vector_store %arg5[%c0_31, %c256], %22 {strides = array<i32>} : memref<2x2048xbf16, #tpu.memory_space<vmem>>, vector<2x128xbf16>,
    %c0_32 = arith.constant 0 : index
    %c1_33 = arith.constant 1 : index
    %c0_34 = arith.constant 0 : index
    %c1_35 = arith.constant 1 : index
    %c0_36 = arith.constant 0 : index
    %24 = vector.load %arg1[%c0_32, %c1_33, %c0_34, %c1_35, %c0_36] : memref<2x4x2x2x128xbf16, #tpu.memory_space<vmem>>, vector<1x1x1x1x128xbf16>
    %25 = vector.shape_cast %24 : vector<1x1x1x1x128xbf16> to vector<1x1x128xbf16>
    %26 = vector.shape_cast %25 : vector<1x1x128xbf16> to vector<1x128xbf16>
    %c1_37 = arith.constant 1 : index
    %c1_38 = arith.constant 1 : index
    %c0_39 = arith.constant 0 : index
    %c1_40 = arith.constant 1 : index
    %c0_41 = arith.constant 0 : index
    %27 = vector.load %arg1[%c1_37, %c1_38, %c0_39, %c1_40, %c0_41] : memref<2x4x2x2x128xbf16, #tpu.memory_space<vmem>>, vector<1x1x1x1x128xbf16>
    %28 = vector.shape_cast %27 : vector<1x1x1x1x128xbf16> to vector<1x1x128xbf16>
    %29 = vector.shape_cast %28 : vector<1x1x128xbf16> to vector<1x128xbf16>
    %30 = tpu.concatenate %26, %29 in 0 : vector<1x128xbf16>, vector<1x128xbf16> -> vector<2x128xbf16>
    %c0_42 = arith.constant 0 : index
    %c384 = arith.constant 384 : index
    %31 = vector.load %arg5[%c0_42, %c384] : memref<2x2048xbf16, #tpu.memory_space<vmem>>, vector<2x128xbf16>
    tpu.vector_store %arg5[%c0_42, %c384], %30 {strides = array<i32>} : memref<2x2048xbf16, #tpu.memory_space<vmem>>, vector<2x128xbf16>,
    %c0_43 = arith.constant 0 : index
    %c2 = arith.constant 2 : index
    %c0_44 = arith.constant 0 : index
    %c0_45 = arith.constant 0 : index
    %c0_46 = arith.constant 0 : index
    %32 = vector.load %arg1[%c0_43, %c2, %c0_44, %c0_45, %c0_46] : memref<2x4x2x2x128xbf16, #tpu.memory_space<vmem>>, vector<1x1x1x1x128xbf16>
    %33 = vector.shape_cast %32 : vector<1x1x1x1x128xbf16> to vector<1x1x128xbf16>
    %34 = vector.shape_cast %33 : vector<1x1x128xbf16> to vector<1x128xbf16>
    %c1_47 = arith.constant 1 : index
    %c2_48 = arith.constant 2 : index
    %c0_49 = arith.constant 0 : index
    %c0_50 = arith.constant 0 : index
    %c0_51 = arith.constant 0 : index
    %35 = vector.load %arg1[%c1_47, %c2_48, %c0_49, %c0_50, %c0_51] : memref<2x4x2x2x128xbf16, #tpu.memory_space<vmem>>, vector<1x1x1x1x128xbf16>
    %36 = vector.shape_cast %35 : vector<1x1x1x1x128xbf16> to vector<1x1x128xbf16>
    %37 = vector.shape_cast %36 : vector<1x1x128xbf16> to vector<1x128xbf16>
    %38 = tpu.concatenate %34, %37 in 0 : vector<1x128xbf16>, vector<1x128xbf16> -> vector<2x128xbf16>
    %c0_52 = arith.constant 0 : index
    %c512 = arith.constant 512 : index
    %39 = vector.load %arg5[%c0_52, %c512] : memref<2x2048xbf16, #tpu.memory_space<vmem>>, vector<2x128xbf16>
    tpu.vector_store %arg5[%c0_52, %c512], %38 {strides = array<i32>} : memref<2x2048xbf16, #tpu.memory_space<vmem>>, vector<2x128xbf16>,
    %c0_53 = arith.constant 0 : index
    %c3 = arith.constant 3 : index
    %c0_54 = arith.constant 0 : index
    %c0_55 = arith.constant 0 : index
    %c0_56 = arith.constant 0 : index
    %40 = vector.load %arg1[%c0_53, %c3, %c0_54, %c0_55, %c0_56] : memref<2x4x2x2x128xbf16, #tpu.memory_space<vmem>>, vector<1x1x1x1x128xbf16>
    %41 = vector.shape_cast %40 : vector<1x1x1x1x128xbf16> to vector<1x1x128xbf16>
    %42 = vector.shape_cast %41 : vector<1x1x128xbf16> to vector<1x128xbf16>
    %c1_57 = arith.constant 1 : index
    %c3_58 = arith.constant 3 : index
    %c0_59 = arith.constant 0 : index
    %c0_60 = arith.constant 0 : index
    %c0_61 = arith.constant 0 : index
    %43 = vector.load %arg1[%c1_57, %c3_58, %c0_59, %c0_60, %c0_61] : memref<2x4x2x2x128xbf16, #tpu.memory_space<vmem>>, vector<1x1x1x1x128xbf16>
    %44 = vector.shape_cast %43 : vector<1x1x1x1x128xbf16> to vector<1x1x128xbf16>
    %45 = vector.shape_cast %44 : vector<1x1x128xbf16> to vector<1x128xbf16>
    %46 = tpu.concatenate %42, %45 in 0 : vector<1x128xbf16>, vector<1x128xbf16> -> vector<2x128xbf16>
    %c0_62 = arith.constant 0 : index
    %c640 = arith.constant 640 : index
    %47 = vector.load %arg5[%c0_62, %c640] : memref<2x2048xbf16, #tpu.memory_space<vmem>>, vector<2x128xbf16>
    tpu.vector_store %arg5[%c0_62, %c640], %46 {strides = array<i32>} : memref<2x2048xbf16, #tpu.memory_space<vmem>>, vector<2x128xbf16>,
    %c0_63 = arith.constant 0 : index
    %c2_64 = arith.constant 2 : index
    %c0_65 = arith.constant 0 : index
    %c1_66 = arith.constant 1 : index
    %c0_67 = arith.constant 0 : index
    %48 = vector.load %arg1[%c0_63, %c2_64, %c0_65, %c1_66, %c0_67] : memref<2x4x2x2x128xbf16, #tpu.memory_space<vmem>>, vector<1x1x1x1x128xbf16>
    %49 = vector.shape_cast %48 : vector<1x1x1x1x128xbf16> to vector<1x1x128xbf16>
    %50 = vector.shape_cast %49 : vector<1x1x128xbf16> to vector<1x128xbf16>
    %c1_68 = arith.constant 1 : index
    %c2_69 = arith.constant 2 : index
    %c0_70 = arith.constant 0 : index
    %c1_71 = arith.constant 1 : index
    %c0_72 = arith.constant 0 : index
    %51 = vector.load %arg1[%c1_68, %c2_69, %c0_70, %c1_71, %c0_72] : memref<2x4x2x2x128xbf16, #tpu.memory_space<vmem>>, vector<1x1x1x1x128xbf16>
    %52 = vector.shape_cast %51 : vector<1x1x1x1x128xbf16> to vector<1x1x128xbf16>
    %53 = vector.shape_cast %52 : vector<1x1x128xbf16> to vector<1x128xbf16>
    %54 = tpu.concatenate %50, %53 in 0 : vector<1x128xbf16>, vector<1x128xbf16> -> vector<2x128xbf16>
    %c0_73 = arith.constant 0 : index
    %c768 = arith.constant 768 : index
    %55 = vector.load %arg5[%c0_73, %c768] : memref<2x2048xbf16, #tpu.memory_space<vmem>>, vector<2x128xbf16>
    tpu.vector_store %arg5[%c0_73, %c768], %54 {strides = array<i32>} : memref<2x2048xbf16, #tpu.memory_space<vmem>>, vector<2x128xbf16>,
    %c0_74 = arith.constant 0 : index
    %c3_75 = arith.constant 3 : index
    %c0_76 = arith.constant 0 : index
    %c1_77 = arith.constant 1 : index
    %c0_78 = arith.constant 0 : index
    %56 = vector.load %arg1[%c0_74, %c3_75, %c0_76, %c1_77, %c0_78] : memref<2x4x2x2x128xbf16, #tpu.memory_space<vmem>>, vector<1x1x1x1x128xbf16>
    %57 = vector.shape_cast %56 : vector<1x1x1x1x128xbf16> to vector<1x1x128xbf16>
    %58 = vector.shape_cast %57 : vector<1x1x128xbf16> to vector<1x128xbf16>
    %c1_79 = arith.constant 1 : index
    %c3_80 = arith.constant 3 : index
    %c0_81 = arith.constant 0 : index
    %c1_82 = arith.constant 1 : index
    %c0_83 = arith.constant 0 : index
    %59 = vector.load %arg1[%c1_79, %c3_80, %c0_81, %c1_82, %c0_83] : memref<2x4x2x2x128xbf16, #tpu.memory_space<vmem>>, vector<1x1x1x1x128xbf16>
    %60 = vector.shape_cast %59 : vector<1x1x1x1x128xbf16> to vector<1x1x128xbf16>
    %61 = vector.shape_cast %60 : vector<1x1x128xbf16> to vector<1x128xbf16>
    %62 = tpu.concatenate %58, %61 in 0 : vector<1x128xbf16>, vector<1x128xbf16> -> vector<2x128xbf16>
    %c0_84 = arith.constant 0 : index
    %c896 = arith.constant 896 : index
    %63 = vector.load %arg5[%c0_84, %c896] : memref<2x2048xbf16, #tpu.memory_space<vmem>>, vector<2x128xbf16>
    tpu.vector_store %arg5[%c0_84, %c896], %62 {strides = array<i32>} : memref<2x2048xbf16, #tpu.memory_space<vmem>>, vector<2x128xbf16>,
    %c0_85 = arith.constant 0 : index
    %c0_86 = arith.constant 0 : index
    %c1_87 = arith.constant 1 : index
    %c0_88 = arith.constant 0 : index
    %c0_89 = arith.constant 0 : index
    %64 = vector.load %arg1[%c0_85, %c0_86, %c1_87, %c0_88, %c0_89] : memref<2x4x2x2x128xbf16, #tpu.memory_space<vmem>>, vector<1x1x1x1x128xbf16>
    %65 = vector.shape_cast %64 : vector<1x1x1x1x128xbf16> to vector<1x1x128xbf16>
    %66 = vector.shape_cast %65 : vector<1x1x128xbf16> to vector<1x128xbf16>
    %c1_90 = arith.constant 1 : index
    %c0_91 = arith.constant 0 : index
    %c1_92 = arith.constant 1 : index
    %c0_93 = arith.constant 0 : index
    %c0_94 = arith.constant 0 : index
    %67 = vector.load %arg1[%c1_90, %c0_91, %c1_92, %c0_93, %c0_94] : memref<2x4x2x2x128xbf16, #tpu.memory_space<vmem>>, vector<1x1x1x1x128xbf16>
    %68 = vector.shape_cast %67 : vector<1x1x1x1x128xbf16> to vector<1x1x128xbf16>
    %69 = vector.shape_cast %68 : vector<1x1x128xbf16> to vector<1x128xbf16>
    %70 = tpu.concatenate %66, %69 in 0 : vector<1x128xbf16>, vector<1x128xbf16> -> vector<2x128xbf16>
    %c0_95 = arith.constant 0 : index
    %c1024 = arith.constant 1024 : index
    %71 = vector.load %arg5[%c0_95, %c1024] : memref<2x2048xbf16, #tpu.memory_space<vmem>>, vector<2x128xbf16>
    tpu.vector_store %arg5[%c0_95, %c1024], %70 {strides = array<i32>} : memref<2x2048xbf16, #tpu.memory_space<vmem>>, vector<2x128xbf16>,
    %c0_96 = arith.constant 0 : index
    %c1_97 = arith.constant 1 : index
    %c1_98 = arith.constant 1 : index
    %c0_99 = arith.constant 0 : index
    %c0_100 = arith.constant 0 : index
    %72 = vector.load %arg1[%c0_96, %c1_97, %c1_98, %c0_99, %c0_100] : memref<2x4x2x2x128xbf16, #tpu.memory_space<vmem>>, vector<1x1x1x1x128xbf16>
    %73 = vector.shape_cast %72 : vector<1x1x1x1x128xbf16> to vector<1x1x128xbf16>
    %74 = vector.shape_cast %73 : vector<1x1x128xbf16> to vector<1x128xbf16>
    %c1_101 = arith.constant 1 : index
    %c1_102 = arith.constant 1 : index
    %c1_103 = arith.constant 1 : index
    %c0_104 = arith.constant 0 : index
    %c0_105 = arith.constant 0 : index
    %75 = vector.load %arg1[%c1_101, %c1_102, %c1_103, %c0_104, %c0_105] : memref<2x4x2x2x128xbf16, #tpu.memory_space<vmem>>, vector<1x1x1x1x128xbf16>
    %76 = vector.shape_cast %75 : vector<1x1x1x1x128xbf16> to vector<1x1x128xbf16>
    %77 = vector.shape_cast %76 : vector<1x1x128xbf16> to vector<1x128xbf16>
    %78 = tpu.concatenate %74, %77 in 0 : vector<1x128xbf16>, vector<1x128xbf16> -> vector<2x128xbf16>
    %c0_106 = arith.constant 0 : index
    %c1152 = arith.constant 1152 : index
    %79 = vector.load %arg5[%c0_106, %c1152] : memref<2x2048xbf16, #tpu.memory_space<vmem>>, vector<2x128xbf16>
    tpu.vector_store %arg5[%c0_106, %c1152], %78 {strides = array<i32>} : memref<2x2048xbf16, #tpu.memory_space<vmem>>, vector<2x128xbf16>,
    %c0_107 = arith.constant 0 : index
    %c0_108 = arith.constant 0 : index
    %c1_109 = arith.constant 1 : index
    %c1_110 = arith.constant 1 : index
    %c0_111 = arith.constant 0 : index
    %80 = vector.load %arg1[%c0_107, %c0_108, %c1_109, %c1_110, %c0_111] : memref<2x4x2x2x128xbf16, #tpu.memory_space<vmem>>, vector<1x1x1x1x128xbf16>
    %81 = vector.shape_cast %80 : vector<1x1x1x1x128xbf16> to vector<1x1x128xbf16>
    %82 = vector.shape_cast %81 : vector<1x1x128xbf16> to vector<1x128xbf16>
    %c1_112 = arith.constant 1 : index
    %c0_113 = arith.constant 0 : index
    %c1_114 = arith.constant 1 : index
    %c1_115 = arith.constant 1 : index
    %c0_116 = arith.constant 0 : index
    %83 = vector.load %arg1[%c1_112, %c0_113, %c1_114, %c1_115, %c0_116] : memref<2x4x2x2x128xbf16, #tpu.memory_space<vmem>>, vector<1x1x1x1x128xbf16>
    %84 = vector.shape_cast %83 : vector<1x1x1x1x128xbf16> to vector<1x1x128xbf16>
    %85 = vector.shape_cast %84 : vector<1x1x128xbf16> to vector<1x128xbf16>
    %86 = tpu.concatenate %82, %85 in 0 : vector<1x128xbf16>, vector<1x128xbf16> -> vector<2x128xbf16>
    %c0_117 = arith.constant 0 : index
    %c1280 = arith.constant 1280 : index
    %87 = vector.load %arg5[%c0_117, %c1280] : memref<2x2048xbf16, #tpu.memory_space<vmem>>, vector<2x128xbf16>
    tpu.vector_store %arg5[%c0_117, %c1280], %86 {strides = array<i32>} : memref<2x2048xbf16, #tpu.memory_space<vmem>>, vector<2x128xbf16>,
    %c0_118 = arith.constant 0 : index
    %c1_119 = arith.constant 1 : index
    %c1_120 = arith.constant 1 : index
    %c1_121 = arith.constant 1 : index
    %c0_122 = arith.constant 0 : index
    %88 = vector.load %arg1[%c0_118, %c1_119, %c1_120, %c1_121, %c0_122] : memref<2x4x2x2x128xbf16, #tpu.memory_space<vmem>>, vector<1x1x1x1x128xbf16>
    %89 = vector.shape_cast %88 : vector<1x1x1x1x128xbf16> to vector<1x1x128xbf16>
    %90 = vector.shape_cast %89 : vector<1x1x128xbf16> to vector<1x128xbf16>
    %c1_123 = arith.constant 1 : index
    %c1_124 = arith.constant 1 : index
    %c1_125 = arith.constant 1 : index
    %c1_126 = arith.constant 1 : index
    %c0_127 = arith.constant 0 : index
    %91 = vector.load %arg1[%c1_123, %c1_124, %c1_125, %c1_126, %c0_127] : memref<2x4x2x2x128xbf16, #tpu.memory_space<vmem>>, vector<1x1x1x1x128xbf16>
    %92 = vector.shape_cast %91 : vector<1x1x1x1x128xbf16> to vector<1x1x128xbf16>
    %93 = vector.shape_cast %92 : vector<1x1x128xbf16> to vector<1x128xbf16>
    %94 = tpu.concatenate %90, %93 in 0 : vector<1x128xbf16>, vector<1x128xbf16> -> vector<2x128xbf16>
    %c0_128 = arith.constant 0 : index
    %c1408 = arith.constant 1408 : index
    %95 = vector.load %arg5[%c0_128, %c1408] : memref<2x2048xbf16, #tpu.memory_space<vmem>>, vector<2x128xbf16>
    tpu.vector_store %arg5[%c0_128, %c1408], %94 {strides = array<i32>} : memref<2x2048xbf16, #tpu.memory_space<vmem>>, vector<2x128xbf16>,
    %c0_129 = arith.constant 0 : index
    %c2_130 = arith.constant 2 : index
    %c1_131 = arith.constant 1 : index
    %c0_132 = arith.constant 0 : index
    %c0_133 = arith.constant 0 : index
    %96 = vector.load %arg1[%c0_129, %c2_130, %c1_131, %c0_132, %c0_133] : memref<2x4x2x2x128xbf16, #tpu.memory_space<vmem>>, vector<1x1x1x1x128xbf16>
    %97 = vector.shape_cast %96 : vector<1x1x1x1x128xbf16> to vector<1x1x128xbf16>
    %98 = vector.shape_cast %97 : vector<1x1x128xbf16> to vector<1x128xbf16>
    %c1_134 = arith.constant 1 : index
    %c2_135 = arith.constant 2 : index
    %c1_136 = arith.constant 1 : index
    %c0_137 = arith.constant 0 : index
    %c0_138 = arith.constant 0 : index
    %99 = vector.load %arg1[%c1_134, %c2_135, %c1_136, %c0_137, %c0_138] : memref<2x4x2x2x128xbf16, #tpu.memory_space<vmem>>, vector<1x1x1x1x128xbf16>
    %100 = vector.shape_cast %99 : vector<1x1x1x1x128xbf16> to vector<1x1x128xbf16>
    %101 = vector.shape_cast %100 : vector<1x1x128xbf16> to vector<1x128xbf16>
    %102 = tpu.concatenate %98, %101 in 0 : vector<1x128xbf16>, vector<1x128xbf16> -> vector<2x128xbf16>
    %c0_139 = arith.constant 0 : index
    %c1536 = arith.constant 1536 : index
    %103 = vector.load %arg5[%c0_139, %c1536] : memref<2x2048xbf16, #tpu.memory_space<vmem>>, vector<2x128xbf16>
    tpu.vector_store %arg5[%c0_139, %c1536], %102 {strides = array<i32>} : memref<2x2048xbf16, #tpu.memory_space<vmem>>, vector<2x128xbf16>,
    %c0_140 = arith.constant 0 : index
    %c3_141 = arith.constant 3 : index
    %c1_142 = arith.constant 1 : index
    %c0_143 = arith.constant 0 : index
    %c0_144 = arith.constant 0 : index
    %104 = vector.load %arg1[%c0_140, %c3_141, %c1_142, %c0_143, %c0_144] : memref<2x4x2x2x128xbf16, #tpu.memory_space<vmem>>, vector<1x1x1x1x128xbf16>
    %105 = vector.shape_cast %104 : vector<1x1x1x1x128xbf16> to vector<1x1x128xbf16>
    %106 = vector.shape_cast %105 : vector<1x1x128xbf16> to vector<1x128xbf16>
    %c1_145 = arith.constant 1 : index
    %c3_146 = arith.constant 3 : index
    %c1_147 = arith.constant 1 : index
    %c0_148 = arith.constant 0 : index
    %c0_149 = arith.constant 0 : index
    %107 = vector.load %arg1[%c1_145, %c3_146, %c1_147, %c0_148, %c0_149] : memref<2x4x2x2x128xbf16, #tpu.memory_space<vmem>>, vector<1x1x1x1x128xbf16>
    %108 = vector.shape_cast %107 : vector<1x1x1x1x128xbf16> to vector<1x1x128xbf16>
    %109 = vector.shape_cast %108 : vector<1x1x128xbf16> to vector<1x128xbf16>
    %110 = tpu.concatenate %106, %109 in 0 : vector<1x128xbf16>, vector<1x128xbf16> -> vector<2x128xbf16>
    %c0_150 = arith.constant 0 : index
    %c1664 = arith.constant 1664 : index
    %111 = vector.load %arg5[%c0_150, %c1664] : memref<2x2048xbf16, #tpu.memory_space<vmem>>, vector<2x128xbf16>
    tpu.vector_store %arg5[%c0_150, %c1664], %110 {strides = array<i32>} : memref<2x2048xbf16, #tpu.memory_space<vmem>>, vector<2x128xbf16>,
    %c0_151 = arith.constant 0 : index
    %c2_152 = arith.constant 2 : index
    %c1_153 = arith.constant 1 : index
    %c1_154 = arith.constant 1 : index
    %c0_155 = arith.constant 0 : index
    %112 = vector.load %arg1[%c0_151, %c2_152, %c1_153, %c1_154, %c0_155] : memref<2x4x2x2x128xbf16, #tpu.memory_space<vmem>>, vector<1x1x1x1x128xbf16>
    %113 = vector.shape_cast %112 : vector<1x1x1x1x128xbf16> to vector<1x1x128xbf16>
    %114 = vector.shape_cast %113 : vector<1x1x128xbf16> to vector<1x128xbf16>
    %c1_156 = arith.constant 1 : index
    %c2_157 = arith.constant 2 : index
    %c1_158 = arith.constant 1 : index
    %c1_159 = arith.constant 1 : index
    %c0_160 = arith.constant 0 : index
    %115 = vector.load %arg1[%c1_156, %c2_157, %c1_158, %c1_159, %c0_160] : memref<2x4x2x2x128xbf16, #tpu.memory_space<vmem>>, vector<1x1x1x1x128xbf16>
    %116 = vector.shape_cast %115 : vector<1x1x1x1x128xbf16> to vector<1x1x128xbf16>
    %117 = vector.shape_cast %116 : vector<1x1x128xbf16> to vector<1x128xbf16>
    %118 = tpu.concatenate %114, %117 in 0 : vector<1x128xbf16>, vector<1x128xbf16> -> vector<2x128xbf16>
    %c0_161 = arith.constant 0 : index
    %c1792 = arith.constant 1792 : index
    %119 = vector.load %arg5[%c0_161, %c1792] : memref<2x2048xbf16, #tpu.memory_space<vmem>>, vector<2x128xbf16>
    tpu.vector_store %arg5[%c0_161, %c1792], %118 {strides = array<i32>} : memref<2x2048xbf16, #tpu.memory_space<vmem>>, vector<2x128xbf16>,
    %c0_162 = arith.constant 0 : index
    %c3_163 = arith.constant 3 : index
    %c1_164 = arith.constant 1 : index
    %c1_165 = arith.constant 1 : index
    %c0_166 = arith.constant 0 : index
    %120 = vector.load %arg1[%c0_162, %c3_163, %c1_164, %c1_165, %c0_166] : memref<2x4x2x2x128xbf16, #tpu.memory_space<vmem>>, vector<1x1x1x1x128xbf16>
    %121 = vector.shape_cast %120 : vector<1x1x1x1x128xbf16> to vector<1x1x128xbf16>
    %122 = vector.shape_cast %121 : vector<1x1x128xbf16> to vector<1x128xbf16>
    %c1_167 = arith.constant 1 : index
    %c3_168 = arith.constant 3 : index
    %c1_169 = arith.constant 1 : index
    %c1_170 = arith.constant 1 : index
    %c0_171 = arith.constant 0 : index
    %123 = vector.load %arg1[%c1_167, %c3_168, %c1_169, %c1_170, %c0_171] : memref<2x4x2x2x128xbf16, #tpu.memory_space<vmem>>, vector<1x1x1x1x128xbf16>
    %124 = vector.shape_cast %123 : vector<1x1x1x1x128xbf16> to vector<1x1x128xbf16>
    %125 = vector.shape_cast %124 : vector<1x1x128xbf16> to vector<1x128xbf16>
    %126 = tpu.concatenate %122, %125 in 0 : vector<1x128xbf16>, vector<1x128xbf16> -> vector<2x128xbf16>
    %c0_172 = arith.constant 0 : index
    %c1920 = arith.constant 1920 : index
    %127 = vector.load %arg5[%c0_172, %c1920] : memref<2x2048xbf16, #tpu.memory_space<vmem>>, vector<2x128xbf16>
    tpu.vector_store %arg5[%c0_172, %c1920], %126 {strides = array<i32>} : memref<2x2048xbf16, #tpu.memory_space<vmem>>, vector<2x128xbf16>,
    %c0_173 = arith.constant 0 : index
    %c0_174 = arith.constant 0 : index
    %128 = vector.load %arg3[%c0_173, %c0_174] : memref<1x1xf32, #tpu.memory_space<vmem>>, vector<1x1xf32>
    %c0_175 = arith.constant 0 : index
    %c0_176 = arith.constant 0 : index
    %129 = vector.load %arg2[%c0_175, %c0_176] : memref<1x2048xbf16, #tpu.memory_space<vmem>>, vector<1x2048xbf16>
    %130 = arith.extf %129 : vector<1x2048xbf16> to vector<1x2048xf32>
    %c0_177 = arith.constant 0 : index
    %c0_178 = arith.constant 0 : index
    %131 = vector.load %arg5[%c0_177, %c0_178] : memref<2x2048xbf16, #tpu.memory_space<vmem>>, vector<2x2048xbf16>
    %132 = arith.extf %131 : vector<2x2048xbf16> to vector<2x2048xf32>
    %133 = vector.broadcast %130 : vector<1x2048xf32> to vector<2x2048xf32>
    %134 = arith.mulf %132, %133 : vector<2x2048xf32>
    %cst = arith.constant dense<0.000000e+00> : vector<2xf32>
    %135 = vector.multi_reduction <add>, %134, %cst [1] : vector<2x2048xf32> to vector<2xf32>
    %136 = vector.shape_cast %135 : vector<2xf32> to vector<2x1xf32>
    %137 = vector.broadcast %128 : vector<1x1xf32> to vector<2x1xf32>
    %138 = arith.addf %136, %137 : vector<2x1xf32>
    %c0_179 = arith.constant 0 : index
    %c0_180 = arith.constant 0 : index
    %c0_181 = arith.constant 0 : index
    %139 = vector.load %arg4[%c0_179, %c0_180, %c0_181] : memref<1x2x1xf32, #tpu.memory_space<vmem>>, vector<1x2x1xf32>
    %140 = vector.shape_cast %139 : vector<1x2x1xf32> to vector<2x1xf32>
    %141 = vector.shape_cast %138 : vector<2x1xf32> to vector<1x2x1xf32>
    tpu.vector_store %arg4[%c0_179, %c0_180, %c0_181], %141 {strides = array<i32>} : memref<1x2x1xf32, #tpu.memory_space<vmem>>, vector<1x2x1xf32>,
    return
  }
  func.func @transform_0(%arg0: i32) -> (i32, i32, i32, i32, i32) {
    %c0_i32 = arith.constant 0 : i32
    %c0_i32_0 = arith.constant 0 : i32
    %c0_i32_1 = arith.constant 0 : i32
    %c0_i32_2 = arith.constant 0 : i32
    %c0_i32_3 = arith.constant 0 : i32
    return %arg0, %c0_i32, %c0_i32_0, %c0_i32_1, %c0_i32_2 : i32, i32, i32, i32, i32
  }
  func.func @transform_1(%arg0: i32) -> (i32, i32) {
    %c0_i32 = arith.constant 0 : i32
    %c0_i32_0 = arith.constant 0 : i32
    %c0_i32_1 = arith.constant 0 : i32
    return %c0_i32, %c0_i32_0 : i32, i32
  }
  func.func @transform_2(%arg0: i32) -> (i32, i32) {
    %c0_i32 = arith.constant 0 : i32
    %c0_i32_0 = arith.constant 0 : i32
    %c0_i32_1 = arith.constant 0 : i32
    return %c0_i32, %c0_i32_0 : i32, i32
  }
  func.func @transform_3(%arg0: i32) -> (i32, i32, i32) {
    %c0_i32 = arith.constant 0 : i32
    %c0_i32_0 = arith.constant 0 : i32
    %c0_i32_1 = arith.constant 0 : i32
    return %arg0, %c0_i32, %c0_i32_0 : i32, i32, i32
  }
}

</mosaic_0001>

<bundles_post_ra>
// kernel: tf_discriminator_forward.5
= control target key start
LH: loop header
LB: loop body
LE: loop exit
PB: predicated region body
PF: predicated region fallthrough
CT: control target
= control target key end

     0   :  { %s960_s12 = smov 0   ;;  %s1085_s0 = inlined_call_operand.vmem [shape: bf16[2,256,128], index: 0, kind: input, shape index: {}]   ;;  %s1086_s1 = inlined_call_operand.vmem [shape: bf16[128,128], index: 1, kind: input, shape index: {}]   ;;  %s1087_s2 = inlined_call_operand.vmem [shape: f32[1,128], index: 2, kind: input, shape index: {}]   ;;  %s1088_s3 = inlined_call_operand.vmem [shape: bf16[2,256,128], index: 3, kind: output, shape index: {}]  }
   0x1 LB: > { %s671_s13 = sadd.s32 4294967295, %s938_s12   ;;  %p675_p0 = scmp.ge.s32.totalorder %s938_s12, 1  ;;  %s938_s12 = sphi %s960_s12, %s13_s12  }
   0x2   : > { %p137_p1 = scmp.lt.s32.totalorder %s938_s12, 3 }
   0x4   : > { %p138_p2 = pnand %p675_p0, %p137_p1 }
   0x5   : > { %p161_p3 = scmp.lt.s32.totalorder (!%p138_p2), %s671_s13, 1 }
   0x6   : > { %141 = sbr.rel (%p138_p2) target bundleno = 241 (0xf1), region = 32 }
   0xb   : > { %v803_v0 = vld [vmem:[%s1086_s1 + $0x38] sm:$0xff]  ;;  %v802_v1 = vld [vmem:[%s1086_s1 + $0x30] sm:$0xff]  ;;  %v801_v2 = vld [vmem:[%s1086_s1 + $0x28] sm:$0xff]  ;;  %s1090_s13 = smov (!%p161_p3, %s671_s13), 1 }
   0xc   : > { %367 = vmatpush.bf16.msra.mxu0 %v803_v0  ;;  %899 = vmatpush.bf16.msra.mxu1 %v803_v0  ;;  %v800_v3 = vld [vmem:[%s1086_s1 + $0x20] sm:$0xff]  ;;  %v799_v4 = vld [vmem:[%s1086_s1 + $0x18] sm:$0xff]  ;;  %v798_v5 = vld [vmem:[%s1086_s1 + $0x10] sm:$0xff]  ;;  %s778_s28 = sshll.u32 %s1090_s13, 7 }
   0xd   : > { %900 = vmatpush.bf16.msra.mxu2 %v803_v0  ;;  %901 = vmatpush.bf16.msra.mxu3 %v803_v0  ;;  %v797_v6 = vld [vmem:[%s1086_s1 + $0x8] sm:$0xff]  ;;  %v796_v7 = vld [vmem:[%s1086_s1] sm:$0xff]  ;;  %s1004_s6 = scalar_lea.vmem %s1085_s0, %s778_s28  ;;  %s1038_s11 = scalar_lea.vmem %s1088_s3, %s778_s28 }
   0xe   : > { %v780_v8 = vld [vmem:[%s1004_s6] sm:$0xff]  ;;  %v781_v12 = vld [vmem:[%s1004_s6 + $0x8] sm:$0xff]  ;;  %v782_v16 = vld [vmem:[%s1004_s6 + $0x10] sm:$0xff] }
   0xf   : > { %v784_v9 = vld [vmem:[%s1004_s6 + $0x20] sm:$0xff]  ;;  %v785_v13 = vld [vmem:[%s1004_s6 + $0x28] sm:$0xff]  ;;  %v786_v17 = vld [vmem:[%s1004_s6 + $0x30] sm:$0xff] }
  0x10   : > { %368 = vmatpush.bf16.msra.mxu0 %v802_v1  ;;  %902 = vmatpush.bf16.msra.mxu1 %v802_v1  ;;  %v788_v10 = vld [vmem:[%s1004_s6 + $0x40] sm:$0xff]  ;;  %v789_v14 = vld [vmem:[%s1004_s6 + $0x48] sm:$0xff]  ;;  %v790_v18 = vld [vmem:[%s1004_s6 + $0x50] sm:$0xff] }
  0x11   : > { %903 = vmatpush.bf16.msra.mxu2 %v802_v1  ;;  %904 = vmatpush.bf16.msra.mxu3 %v802_v1  ;;  %v792_v11 = vld [vmem:[%s1004_s6 + $0x60] sm:$0xff]  ;;  %v793_v15 = vld [vmem:[%s1004_s6 + $0x68] sm:$0xff]  ;;  %v794_v19 = vld [vmem:[%s1004_s6 + $0x70] sm:$0xff] }
  0x12   : > { %v783_v20 = vld [vmem:[%s1004_s6 + $0x18] sm:$0xff]  ;;  %v1025_v26 = vld [vmem:[%s1087_s2] ss:$0 sm:$0xff] }
  0x13   : > { %v787_v21 = vld [vmem:[%s1004_s6 + $0x38] sm:$0xff] }
  0x14   : > { %369 = vmatpush.bf16.msra.mxu0 %v801_v2  ;;  %905 = vmatpush.bf16.msra.mxu1 %v801_v2  ;;  %v791_v22 = vld [vmem:[%s1004_s6 + $0x58] sm:$0xff] }
  0x15   : > { %906 = vmatpush.bf16.msra.mxu2 %v801_v2  ;;  %907 = vmatpush.bf16.msra.mxu3 %v801_v2  ;;  %v795_v23 = vld [vmem:[%s1004_s6 + $0x78] sm:$0xff] }
  0x18   : > { %370 = vmatpush.bf16.msra.mxu0 %v800_v3  ;;  %908 = vmatpush.bf16.msra.mxu1 %v800_v3 }
  0x19   : > { %909 = vmatpush.bf16.msra.mxu2 %v800_v3  ;;  %910 = vmatpush.bf16.msra.mxu3 %v800_v3 }
  0x1c   : > { %371 = vmatpush.bf16.msra.mxu0 %v799_v4  ;;  %911 = vmatpush.bf16.msra.mxu1 %v799_v4 }
  0x1d   : > { %912 = vmatpush.bf16.msra.mxu2 %v799_v4  ;;  %913 = vmatpush.bf16.msra.mxu3 %v799_v4 }
  0x20   : > { %372 = vmatpush.bf16.msra.mxu0 %v798_v5  ;;  %914 = vmatpush.bf16.msra.mxu1 %v798_v5 }
  0x21   : > { %915 = vmatpush.bf16.msra.mxu2 %v798_v5  ;;  %916 = vmatpush.bf16.msra.mxu3 %v798_v5 }
  0x24   : > { %373 = vmatpush.bf16.msra.mxu0 %v797_v6  ;;  %917 = vmatpush.bf16.msra.mxu1 %v797_v6 }
  0x25   : > { %918 = vmatpush.bf16.msra.mxu2 %v797_v6  ;;  %919 = vmatpush.bf16.msra.mxu3 %v797_v6 }
  0x28   : > { %374 = vmatpush.bf16.msra.mxu0 %v796_v7  ;;  %920 = vmatpush.bf16.msra.mxu1 %v796_v7 }
  0x29   : > { %921 = vmatpush.bf16.msra.mxu2 %v796_v7  ;;  %922 = vmatpush.bf16.msra.mxu3 %v796_v7 }
  0x2b   : > { %375 = vmatmul.bf16.vlgmr.msra.gmra.mxu0 %v780_v8  ;;  %395 = vmatmul.bf16.vlgmr.msra.gmra.mxu1 %v784_v9 }
  0x2c   : > { %415 = vmatmul.bf16.vlgmr.msra.gmra.mxu2 %v788_v10  ;;  %435 = vmatmul.bf16.vlgmr.msra.gmra.mxu3 %v792_v11 }
  0x3b   : > { %380 = vmatmul.bf16.gmra.mxu0 %v781_v12  ;;  %400 = vmatmul.bf16.gmra.mxu1 %v785_v13 }
  0x3c   : > { %420 = vmatmul.bf16.gmra.mxu2 %v789_v14  ;;  %440 = vmatmul.bf16.gmra.mxu3 %v793_v15 }
  0x4b   : > { %385 = vmatmul.bf16.gmra.mxu0 %v782_v16  ;;  %405 = vmatmul.bf16.gmra.mxu1 %v786_v17 }
  0x4c   : > { %425 = vmatmul.bf16.gmra.mxu2 %v790_v18  ;;  %445 = vmatmul.bf16.gmra.mxu3 %v794_v19 }
  0x5b   : > { %390 = vmatmul.bf16.gmra.mxu0 %v783_v20  ;;  %410 = vmatmul.bf16.gmra.mxu1 %v787_v21 }
  0x5c   : > { %430 = vmatmul.bf16.gmra.mxu2 %v791_v22  ;;  %450 = vmatmul.bf16.gmra.mxu3 %v795_v23 }
  0xa8   : > { %v376_v24 = vpop.f32.mrf.mxu0  ;;  %v396_v25 = vpop.f32.mrf.mxu1 }
  0xa9   : > { %v377_v27 = vadd.f32 %v1025_v26, %v376_v24  ;;  %v397_v28 = vadd.f32 %v1025_v26, %v396_v25 }
  0xab   : > { %v488_v33 = vmul.f32 0.2, %v377_v27  ;;  %v496_v34 = vmul.f32 0.2, %v397_v28  ;;  %vm456_vm0 = vcmp.gt.f32.partialorder %v377_v27, 0.0  ;;  %vm464_vm1 = vcmp.gt.f32.partialorder %v397_v28, 0.0 }
  0xad   : > { %v520_v41 = vsel %vm456_vm0, %v377_v27, %v488_v33  ;;  %v528_v42 = vsel %vm464_vm1, %v397_v28, %v496_v34 }
  0xaf   : > { %v416_v29 = vpop.f32.mrf.mxu2  ;;  %v436_v30 = vpop.f32.mrf.mxu3 }
  0xb0   : > { %v378_v31 = vpop.f32.mrf.mxu0  ;;  %v398_v32 = vpop.f32.mrf.mxu1  ;;  %v417_v39 = vadd.f32 %v1025_v26, %v416_v29  ;;  %v437_v40 = vadd.f32 %v1025_v26, %v436_v30 }
  0xb1   : > { %v379_v35 = vadd.f32 %v1025_v26, %v378_v31  ;;  %v399_v36 = vadd.f32 %v1025_v26, %v398_v32 }
  0xb2   : > { %v504_v49 = vmul.f32 0.2, %v417_v39  ;;  %v512_v50 = vmul.f32 0.2, %v437_v40  ;;  %vm472_vm4 = vcmp.gt.f32.partialorder %v417_v39, 0.0  ;;  %vm480_vm5 = vcmp.gt.f32.partialorder %v437_v40, 0.0 }
  0xb3   : > { %vm457_vm2 = vcmp.gt.f32.partialorder %v379_v35, 0.0  ;;  %v489_v37 = vmul.f32 0.2, %v379_v35  ;;  %vm465_vm3 = vcmp.gt.f32.partialorder %v399_v36, 0.0  ;;  %v497_v38 = vmul.f32 0.2, %v399_v36 }
  0xb4   : > { %v536_v57 = vsel %vm472_vm4, %v417_v39, %v504_v49  ;;  %v544_v58 = vsel %vm480_vm5, %v437_v40, %v512_v50 }
  0xb5   : > { %v521_v43 = vsel %vm457_vm2, %v379_v35, %v489_v37  ;;  %v529_v44 = vsel %vm465_vm3, %v399_v36, %v497_v38 }
  0xb6   : > { %v807_v45 = vpack.c.bf16 %v521_v43, %v520_v41  ;;  %v827_v46 = vpack.c.bf16 %v529_v44, %v528_v42 }
  0xb7   : > { %v418_v47 = vpop.f32.mrf.mxu2  ;;  %v438_v48 = vpop.f32.mrf.mxu3 }
  0xb8   : > { %808 = vst [vmem:[%s1038_s11] sm:$0xff] %v807_v45   ;;  %v419_v51 = vadd.f32 %v1025_v26, %v418_v47  ;;  %v439_v52 = vadd.f32 %v1025_v26, %v438_v48  ;;  %v381_v53 = vpop.f32.mrf.mxu0  ;;  %v401_v54 = vpop.f32.mrf.mxu1 }
  0xb9   : > { %887 = vst [vmem:[%s1038_s11 + $0x20] sm:$0xff] %v827_v46   ;;  %v382_v63 = vadd.f32 %v1025_v26, %v381_v53  ;;  %v402_v0 = vadd.f32 %v1025_v26, %v401_v54 }
  0xba   : > { %vm473_vm6 = vcmp.gt.f32.partialorder %v419_v51, 0.0  ;;  %v505_v55 = vmul.f32 0.2, %v419_v51  ;;  %vm481_vm7 = vcmp.gt.f32.partialorder %v439_v52, 0.0  ;;  %v513_v56 = vmul.f32 0.2, %v439_v52 }
  0xbb   : > { %v490_v5 = vmul.f32 0.2, %v382_v63  ;;  %v498_v6 = vmul.f32 0.2, %v402_v0  ;;  %vm458_vm8 = vcmp.gt.f32.partialorder %v382_v63, 0.0  ;;  %vm466_vm9 = vcmp.gt.f32.partialorder %v402_v0, 0.0 }
  0xbc   : > { %v537_v59 = vsel %vm473_vm6, %v419_v51, %v505_v55  ;;  %v545_v60 = vsel %vm481_vm7, %v439_v52, %v513_v56 }
  0xbd   : > { %v847_v61 = vpack.c.bf16 %v537_v59, %v536_v57  ;;  %v867_v62 = vpack.c.bf16 %v545_v60, %v544_v58  ;;  %v522_v13 = vsel %vm458_vm8, %v382_v63, %v490_v5  ;;  %v530_v14 = vsel %vm466_vm9, %v402_v0, %v498_v6 }
  0xbf   : > { %891 = vst [vmem:[%s1038_s11 + $0x40] sm:$0xff] %v847_v61   ;;  %v421_v1 = vpop.f32.mrf.mxu2  ;;  %v441_v2 = vpop.f32.mrf.mxu3 }
  0xc0   : > { %895 = vst [vmem:[%s1038_s11 + $0x60] sm:$0xff] %v867_v62   ;;  %v383_v3 = vpop.f32.mrf.mxu0  ;;  %v403_v4 = vpop.f32.mrf.mxu1  ;;  %v422_v11 = vadd.f32 %v1025_v26, %v421_v1  ;;  %v442_v12 = vadd.f32 %v1025_v26, %v441_v2 }
  0xc1   : > { %v384_v7 = vadd.f32 %v1025_v26, %v383_v3  ;;  %v404_v8 = vadd.f32 %v1025_v26, %v403_v4 }
  0xc2   : > { %v506_v21 = vmul.f32 0.2, %v422_v11  ;;  %v514_v22 = vmul.f32 0.2, %v442_v12  ;;  %vm474_vm12 = vcmp.gt.f32.partialorder %v422_v11, 0.0  ;;  %vm482_vm13 = vcmp.gt.f32.partialorder %v442_v12, 0.0 }
  0xc3   : > { %vm459_vm10 = vcmp.gt.f32.partialorder %v384_v7, 0.0  ;;  %v491_v9 = vmul.f32 0.2, %v384_v7  ;;  %vm467_vm11 = vcmp.gt.f32.partialorder %v404_v8, 0.0  ;;  %v499_v10 = vmul.f32 0.2, %v404_v8 }
  0xc4   : > { %v538_v30 = vsel %vm474_vm12, %v422_v11, %v506_v21  ;;  %v546_v31 = vsel %vm482_vm13, %v442_v12, %v514_v22 }
  0xc5   : > { %v523_v15 = vsel %vm459_vm10, %v384_v7, %v491_v9  ;;  %v531_v16 = vsel %vm467_vm11, %v404_v8, %v499_v10 }
  0xc6   : > { %v812_v17 = vpack.c.bf16 %v523_v15, %v522_v13  ;;  %v832_v18 = vpack.c.bf16 %v531_v16, %v530_v14 }
  0xc7   : > { %v423_v19 = vpop.f32.mrf.mxu2  ;;  %v443_v20 = vpop.f32.mrf.mxu3 }
  0xc8   : > { %884 = vst [vmem:[%s1038_s11 + $0x8] sm:$0xff] %v812_v17   ;;  %v424_v23 = vadd.f32 %v1025_v26, %v423_v19  ;;  %v444_v24 = vadd.f32 %v1025_v26, %v443_v20  ;;  %v386_v25 = vpop.f32.mrf.mxu0  ;;  %v406_v27 = vpop.f32.mrf.mxu1 }
  0xc9   : > { %888 = vst [vmem:[%s1038_s11 + $0x28] sm:$0xff] %v832_v18   ;;  %v387_v36 = vadd.f32 %v1025_v26, %v386_v25  ;;  %v407_v37 = vadd.f32 %v1025_v26, %v406_v27 }
  0xca   : > { %vm475_vm14 = vcmp.gt.f32.partialorder %v424_v23, 0.0  ;;  %v507_v28 = vmul.f32 0.2, %v424_v23  ;;  %vm483_vm15 = vcmp.gt.f32.partialorder %v444_v24, 0.0  ;;  %v515_v29 = vmul.f32 0.2, %v444_v24 }
  0xcb   : > { %v492_v42 = vmul.f32 0.2, %v387_v36  ;;  %v500_v43 = vmul.f32 0.2, %v407_v37  ;;  %vm460_vm0 = vcmp.gt.f32.partialorder %v387_v36, 0.0  ;;  %vm468_vm1 = vcmp.gt.f32.partialorder %v407_v37, 0.0 }
  0xcc   : > { %v539_v32 = vsel %vm475_vm14, %v424_v23, %v507_v28  ;;  %v547_v33 = vsel %vm483_vm15, %v444_v24, %v515_v29 }
  0xcd   : > { %v852_v34 = vpack.c.bf16 %v539_v32, %v538_v30  ;;  %v872_v35 = vpack.c.bf16 %v547_v33, %v546_v31  ;;  %v524_v50 = vsel %vm460_vm0, %v387_v36, %v492_v42  ;;  %v532_v51 = vsel %vm468_vm1, %v407_v37, %v500_v43 }
  0xcf   : > { %892 = vst [vmem:[%s1038_s11 + $0x48] sm:$0xff] %v852_v34   ;;  %v426_v38 = vpop.f32.mrf.mxu2  ;;  %v446_v39 = vpop.f32.mrf.mxu3 }
  0xd0   : > { %896 = vst [vmem:[%s1038_s11 + $0x68] sm:$0xff] %v872_v35   ;;  %v388_v40 = vpop.f32.mrf.mxu0  ;;  %v408_v41 = vpop.f32.mrf.mxu1  ;;  %v427_v48 = vadd.f32 %v1025_v26, %v426_v38  ;;  %v447_v49 = vadd.f32 %v1025_v26, %v446_v39 }
  0xd1   : > { %v389_v44 = vadd.f32 %v1025_v26, %v388_v40  ;;  %v409_v45 = vadd.f32 %v1025_v26, %v408_v41 }
  0xd2   : > { %v508_v58 = vmul.f32 0.2, %v427_v48  ;;  %v516_v59 = vmul.f32 0.2, %v447_v49  ;;  %vm476_vm4 = vcmp.gt.f32.partialorder %v427_v48, 0.0  ;;  %vm484_vm5 = vcmp.gt.f32.partialorder %v447_v49, 0.0 }
  0xd3   : > { %vm461_vm2 = vcmp.gt.f32.partialorder %v389_v44, 0.0  ;;  %v493_v46 = vmul.f32 0.2, %v389_v44  ;;  %vm469_vm3 = vcmp.gt.f32.partialorder %v409_v45, 0.0  ;;  %v501_v47 = vmul.f32 0.2, %v409_v45 }
  0xd4   : > { %v540_v2 = vsel %vm476_vm4, %v427_v48, %v508_v58  ;;  %v548_v3 = vsel %vm484_vm5, %v447_v49, %v516_v59 }
  0xd5   : > { %v525_v52 = vsel %vm461_vm2, %v389_v44, %v493_v46  ;;  %v533_v53 = vsel %vm469_vm3, %v409_v45, %v501_v47 }
  0xd6   : > { %v817_v54 = vpack.c.bf16 %v525_v52, %v524_v50  ;;  %v837_v55 = vpack.c.bf16 %v533_v53, %v532_v51 }
  0xd7   : > { %v428_v56 = vpop.f32.mrf.mxu2  ;;  %v448_v57 = vpop.f32.mrf.mxu3 }
  0xd8   : > { %885 = vst [vmem:[%s1038_s11 + $0x10] sm:$0xff] %v817_v54   ;;  %v429_v60 = vadd.f32 %v1025_v26, %v428_v56  ;;  %v449_v61 = vadd.f32 %v1025_v26, %v448_v57  ;;  %v391_v62 = vpop.f32.mrf.mxu0  ;;  %v411_v63 = vpop.f32.mrf.mxu1 }
  0xd9   : > { %889 = vst [vmem:[%s1038_s11 + $0x30] sm:$0xff] %v837_v55   ;;  %v392_v8 = vadd.f32 %v1025_v26, %v391_v62  ;;  %v412_v9 = vadd.f32 %v1025_v26, %v411_v63 }
  0xda   : > { %vm477_vm6 = vcmp.gt.f32.partialorder %v429_v60, 0.0  ;;  %v509_v0 = vmul.f32 0.2, %v429_v60  ;;  %vm485_vm7 = vcmp.gt.f32.partialorder %v449_v61, 0.0  ;;  %v517_v1 = vmul.f32 0.2, %v449_v61 }
  0xdb   : > { %v494_v14 = vmul.f32 0.2, %v392_v8  ;;  %v502_v15 = vmul.f32 0.2, %v412_v9  ;;  %vm462_vm8 = vcmp.gt.f32.partialorder %v392_v8, 0.0  ;;  %vm470_vm9 = vcmp.gt.f32.partialorder %v412_v9, 0.0 }
  0xdc   : > { %v541_v4 = vsel %vm477_vm6, %v429_v60, %v509_v0  ;;  %v549_v5 = vsel %vm485_vm7, %v449_v61, %v517_v1 }
  0xdd   : > { %v857_v6 = vpack.c.bf16 %v541_v4, %v540_v2  ;;  %v877_v7 = vpack.c.bf16 %v549_v5, %v548_v3  ;;  %v526_v22 = vsel %vm462_vm8, %v392_v8, %v494_v14  ;;  %v534_v23 = vsel %vm470_vm9, %v412_v9, %v502_v15 }
  0xdf   : > { %893 = vst [vmem:[%s1038_s11 + $0x50] sm:$0xff] %v857_v6   ;;  %v431_v10 = vpop.f32.mrf.mxu2  ;;  %v451_v11 = vpop.f32.mrf.mxu3 }
  0xe0   : > { %897 = vst [vmem:[%s1038_s11 + $0x70] sm:$0xff] %v877_v7   ;;  %v393_v12 = vpop.f32.mrf.mxu0  ;;  %v413_v13 = vpop.f32.mrf.mxu1  ;;  %v432_v20 = vadd.f32 %v1025_v26, %v431_v10  ;;  %v452_v21 = vadd.f32 %v1025_v26, %v451_v11 }
  0xe1   : > { %v394_v16 = vadd.f32 %v1025_v26, %v393_v12  ;;  %v414_v17 = vadd.f32 %v1025_v26, %v413_v13 }
  0xe2   : > { %v510_v31 = vmul.f32 0.2, %v432_v20  ;;  %v518_v32 = vmul.f32 0.2, %v452_v21  ;;  %vm478_vm12 = vcmp.gt.f32.partialorder %v432_v20, 0.0  ;;  %vm486_vm13 = vcmp.gt.f32.partialorder %v452_v21, 0.0 }
  0xe3   : > { %vm463_vm10 = vcmp.gt.f32.partialorder %v394_v16, 0.0  ;;  %v495_v18 = vmul.f32 0.2, %v394_v16  ;;  %vm471_vm11 = vcmp.gt.f32.partialorder %v414_v17, 0.0  ;;  %v503_v19 = vmul.f32 0.2, %v414_v17 }
  0xe4   : > { %v542_v37 = vsel %vm478_vm12, %v432_v20, %v510_v31  ;;  %v550_v38 = vsel %vm486_vm13, %v452_v21, %v518_v32 }
  0xe5   : > { %v527_v24 = vsel %vm463_vm10, %v394_v16, %v495_v18  ;;  %v535_v25 = vsel %vm471_vm11, %v414_v17, %v503_v19 }
  0xe6   : > { %v822_v27 = vpack.c.bf16 %v527_v24, %v526_v22  ;;  %v842_v28 = vpack.c.bf16 %v535_v25, %v534_v23 }
  0xe7   : > { %v433_v29 = vpop.f32.mrf.mxu2  ;;  %v453_v30 = vpop.f32.mrf.mxu3 }
  0xe8   : > { %886 = vst [vmem:[%s1038_s11 + $0x18] sm:$0xff] %v822_v27   ;;  %v434_v33 = vadd.f32 %v1025_v26, %v433_v29  ;;  %v454_v34 = vadd.f32 %v1025_v26, %v453_v30 }
  0xe9   : > { %890 = vst [vmem:[%s1038_s11 + $0x38] sm:$0xff] %v842_v28  }
  0xea   : > { %vm479_vm14 = vcmp.gt.f32.partialorder %v434_v33, 0.0  ;;  %v511_v35 = vmul.f32 0.2, %v434_v33  ;;  %vm487_vm15 = vcmp.gt.f32.partialorder %v454_v34, 0.0  ;;  %v519_v36 = vmul.f32 0.2, %v454_v34 }
  0xec   : > { %v543_v39 = vsel %vm479_vm14, %v434_v33, %v511_v35  ;;  %v551_v40 = vsel %vm487_vm15, %v454_v34, %v519_v36 }
  0xed   : > { %v862_v41 = vpack.c.bf16 %v543_v39, %v542_v37  ;;  %v882_v42 = vpack.c.bf16 %v551_v40, %v550_v38 }
  0xef   : > { %894 = vst [vmem:[%s1038_s11 + $0x58] sm:$0xff] %v862_v41  }
  0xf0   : > { %898 = vst [vmem:[%s1038_s11 + $0x78] sm:$0xff] %v882_v42  }
  0xf1 PF: > { %s13_s12 = sadd.s32 1, %s938_s12  }
  0xf2   : > { %p10_p4 = scmp.ge.s32.totalorder %s13_s12, 4  }
  0xf4   :  { %12 = sbr.rel (!%p10_p4) target bundleno = 1 (0x1), region = 62 }

// kernel: tf_discriminator_forward.6
= control target key start
LH: loop header
LB: loop body
LE: loop exit
PB: predicated region body
PF: predicated region fallthrough
CT: control target
= control target key end

     0   :  { %s4632_s12 = smov 0   ;;  %s5474_s0 = inlined_call_operand.vmem [shape: bf16[2,4,9,9,128], index: 0, kind: input, shape index: {}]   ;;  %s5475_s1 = inlined_call_operand.vmem [shape: bf16[2048,128], index: 1, kind: input, shape index: {}]   ;;  %s5476_s2 = inlined_call_operand.vmem [shape: f32[1,128], index: 2, kind: input, shape index: {}]   ;;  %s5477_s3 = inlined_call_operand.vmem [shape: bf16[2,64,128], index: 3, kind: output, shape index: {}]  }
   0x1 LB: > { %s3432_s13 = sadd.s32 4294967295, %s4610_s12   ;;  %p3436_p0 = scmp.ge.s32.totalorder %s4610_s12, 1  ;;  %s4610_s12 = sphi %s4632_s12, %s13_s12  }
   0x2   : > { %p137_p1 = scmp.lt.s32.totalorder %s4610_s12, 3 }
   0x4   : > { %p138_p2 = pnand %p3436_p0, %p137_p1 }
   0x5   : > { %p161_p3 = scmp.lt.s32.totalorder (!%p138_p2), %s3432_s13, 1 }
   0x6   : > { %141 = sbr.rel (%p138_p2) target bundleno = 436 (0x1b4), region = 32 }
   0xb   : > { %v4450_v0 = vld [vmem:[%s5475_s1 + $0x38] sm:$0xff]  ;;  %v4449_v4 = vld [vmem:[%s5475_s1 + $0x30] sm:$0xff]  ;;  %s5481_s13 = smov (!%p161_p3, %s3432_s13), 1  ;;  %v4448_v8 = vld [vmem:[%s5475_s1 + $0x28] sm:$0xff]  ;;  %vm220_vm0 = vsmask.f32 3328 }
   0xc   : > { %v4458_v1 = vld [vmem:[%s5475_s1 + $0x78] sm:$0xff]  ;;  %2873 = vmatpush.bf16.msra.mxu0 %v4450_v0  ;;  %v4457_v5 = vld [vmem:[%s5475_s1 + $0x70] sm:$0xff]  ;;  %s4594_s30 = smul.u32 288, %s5481_s13  ;;  %v4456_v9 = vld [vmem:[%s5475_s1 + $0x68] sm:$0xff]  ;;  %vm221_vm1 = vsmask.f32 7440 }
   0xd   : > { %v4466_v2 = vld [vmem:[%s5475_s1 + $0xb8] sm:$0xff]  ;;  %2902 = vmatpush.bf16.msra.mxu1 %v4458_v1  ;;  %v4465_v6 = vld [vmem:[%s5475_s1 + $0xb0] sm:$0xff]  ;;  %v4464_v10 = vld [vmem:[%s5475_s1 + $0xa8] sm:$0xff] }
   0xe   : > { %v4474_v3 = vld [vmem:[%s5475_s1 + $0xf8] sm:$0xff]  ;;  %2931 = vmatpush.bf16.msra.mxu2 %v4466_v2  ;;  %v4473_v7 = vld [vmem:[%s5475_s1 + $0xf0] sm:$0xff]  ;;  %v4472_v11 = vld [vmem:[%s5475_s1 + $0xe8] sm:$0xff]  ;;  %s4688_s20 = scalar_lea.vmem %s5474_s0, %s4594_s30 }
   0xf   : > { %2960 = vmatpush.bf16.msra.mxu3 %v4474_v3  ;;  %v4447_v12 = vld [vmem:[%s5475_s1 + $0x20] sm:$0xff]  ;;  %v172_v17 = vld [vmem:[%s4688_s20 + $0x8] sm:$0xf]  ;;  %v4446_v19 = vld [vmem:[%s5475_s1 + $0x18] sm:$0xff] }
  0x10   : > { %2874 = vmatpush.bf16.msra.mxu0 %v4449_v4  ;;  %v4455_v13 = vld [vmem:[%s5475_s1 + $0x60] sm:$0xff]  ;;  %v3440_v18 = vld [vmem:[%s4688_s20 + $0x48] sm:$0xf]  ;;  %v4454_v20 = vld [vmem:[%s5475_s1 + $0x58] sm:$0xff]  ;;  %180 = vst [vmem:[#allocation2 + $0x40] sm:$0xf] %v172_v17 }
  0x11   : > { %2903 = vmatpush.bf16.msra.mxu1 %v4457_v5  ;;  %v4463_v14 = vld [vmem:[%s5475_s1 + $0xa0] sm:$0xff]  ;;  %v3441_v21 = vld [vmem:[%s4688_s20 + $0x50] sm:$0xf]  ;;  %v4462_v23 = vld [vmem:[%s5475_s1 + $0x98] sm:$0xff]  ;;  %196 = vst [vmem:[#allocation2 + $0x4] sm:$0xf] %v3440_v18 }
  0x12   : > { %2932 = vmatpush.bf16.msra.mxu2 %v4465_v6  ;;  %v4471_v15 = vld [vmem:[%s5475_s1 + $0xe0] sm:$0xff]  ;;  %v4470_v24 = vld [vmem:[%s5475_s1 + $0xd8] sm:$0xff]  ;;  %v206_v26 = vld [vmem:[%s4688_s20 + $0x8] sm:$0xf]  ;;  %197 = vst [vmem:[#allocation2 + $0x44] sm:$0xf] %v3441_v21 }
  0x13   : > { %2961 = vmatpush.bf16.msra.mxu3 %v4473_v7  ;;  %v171_v16 = vld [vmem:[%s4688_s20] sm:$0xf]  ;;  %v205_v25 = vld [vmem:[%s4688_s20 + $0x4] sm:$0x1]  ;;  %v207_v27 = vld [vmem:[%s4688_s20 + $0xc] sm:$0x1] }
  0x14   : > { %2875 = vmatpush.bf16.msra.mxu0 %v4448_v8  ;;  %179 = vst [vmem:[#allocation2] sm:$0xf] %v171_v16  ;;  %v204_v22 = vld [vmem:[%s4688_s20] sm:$0xf]  ;;  %v233_v30 = vshll.u32 %v205_v25, 16  ;;  %v238_v31 = vshrl.u32 %v206_v26, 16  ;;  %vm4734_vm2 = vmor %vm220_vm0, %vm221_vm1 }
  0x15   : > { %2904 = vmatpush.bf16.msra.mxu1 %v4456_v9  ;;  %v224_v28 = vshrl.u32 %v204_v22, 16  ;;  %v227_v29 = vshll.u32 %v204_v22, 16  ;;  %v241_v32 = vshll.u32 %v206_v26, 16  ;;  %v247_v33 = vshll.u32 %v207_v27, 16  ;;  %v3448_v34 = vld [vmem:[%s4688_s20 + $0x48] sm:$0xf] }
  0x16   : > { %2933 = vmatpush.bf16.msra.mxu2 %v4464_v10  ;;  %v3449_v37 = vld [vmem:[%s4688_s20 + $0x4c] sm:$0x1]  ;;  %v3450_v38 = vld [vmem:[%s4688_s20 + $0x50] sm:$0xf]  ;;  %v235_v39 = vrot.slane %v233_v30, 5  ;;  %v240_v40 = vrot.slane %v238_v31, 4 }
  0x17   : > { %2962 = vmatpush.bf16.msra.mxu3 %v4472_v11  ;;  %v226_v35 = vrot.slane %v224_v28, 4  ;;  %v229_v36 = vrot.slane %v227_v29, 5  ;;  %v243_v41 = vrot.slane %v241_v32, 5  ;;  %v249_v42 = vrot.slane %v247_v33, 5  ;;  %v3451_v43 = vld [vmem:[%s4688_s20 + $0x54] sm:$0x1] }
  0x18   : > { %2876 = vmatpush.bf16.msra.mxu0 %v4447_v12  ;;  %v4445_v44 = vld [vmem:[%s5475_s1 + $0x10] sm:$0xff]  ;;  %v368_v47 = vshrl.u32 %v3448_v34, 16  ;;  %v371_v48 = vshll.u32 %v3448_v34, 16  ;;  %v377_v49 = vshll.u32 %v3449_v37, 16  ;;  %v382_v54 = vshrl.u32 %v3450_v38, 16  ;;  %v4444_v63 = vld [vmem:[%s5475_s1 + $0x8] sm:$0xff] }
  0x19   : > { %2905 = vmatpush.bf16.msra.mxu1 %v4455_v13  ;;  %v4453_v45 = vld [vmem:[%s5475_s1 + $0x50] sm:$0xff]  ;;  %v230_v46 = vor.u32 %v229_v36, %v226_v35  ;;  %v244_v53 = vor.u32 %v243_v41, %v240_v40  ;;  %v385_v55 = vshll.u32 %v3450_v38, 16  ;;  %v391_v56 = vshll.u32 %v3451_v43, 16  ;;  %v4452_v0 = vld [vmem:[%s5475_s1 + $0x48] sm:$0xff]  ;;  %v4754_v7 = vld [vmem:[#allocation2 + $0x3c] sm:$0xf0] }
  0x1a   : > { %2934 = vmatpush.bf16.msra.mxu2 %v4463_v14  ;;  %v4461_v50 = vld [vmem:[%s5475_s1 + $0x90] sm:$0xff]  ;;  %v370_v58 = vrot.slane %v368_v47, 4  ;;  %v373_v59 = vrot.slane %v371_v48, 5  ;;  %v384_v61 = vrot.slane %v382_v54, 4  ;;  %v4460_v1 = vld [vmem:[%s5475_s1 + $0x88] sm:$0xff]  ;;  %v379_v4 = vrot.slane %v377_v49, 5 }
  0x1b   : > { %2963 = vmatpush.bf16.msra.mxu3 %v4471_v15  ;;  %v4469_v51 = vld [vmem:[%s5475_s1 + $0xd0] sm:$0xff]  ;;  %v231_v57 = vrot.slane %v230_v46, 4  ;;  %v245_v60 = vrot.slane %v244_v53, 4  ;;  %v387_v62 = vrot.slane %v385_v55, 5  ;;  %v4468_v5 = vld [vmem:[%s5475_s1 + $0xc8] sm:$0xff]  ;;  %v393_v12 = vrot.slane %v391_v56, 5 }
  0x1c   : > { %2877 = vmatpush.bf16.msra.mxu0 %v4446_v19  ;;  %v374_v3 = vor.u32 %v373_v59, %v370_v58  ;;  %v4752_v6 = vld [vmem:[#allocation2] sm:$0xf]  ;;  %v4756_v8 = vld [vmem:[#allocation2 + $0x4] sm:$0xf]  ;;  %v173_v13 = vld [vmem:[%s4688_s20 + $0x10] sm:$0xf] }
  0x1d   : > { %2906 = vmatpush.bf16.msra.mxu1 %v4454_v20  ;;  %v236_v2 = vsel %vm4734_vm2, %v231_v57, %v235_v39  ;;  %v4758_v9 = vld [vmem:[#allocation2 + $0x40] sm:$0xf0]  ;;  %v250_v10 = vsel %vm4734_vm2, %v245_v60, %v249_v42  ;;  %v388_v11 = vor.u32 %v387_v62, %v384_v61  ;;  %v174_v17 = vld [vmem:[%s4688_s20 + $0x18] sm:$0xf]  ;;  %181 = vst [vmem:[#allocation2 + $0x80] sm:$0xf] %v173_v13 }
  0x1e   : > { %2935 = vmatpush.bf16.msra.mxu2 %v4462_v23  ;;  %343 = vst [vmem:[#allocation2 + $0x8] sm:$0xf] %v236_v2  ;;  %v4443_v14 = vld [vmem:[%s5475_s1] sm:$0xff]  ;;  %v375_v16 = vrot.slane %v374_v3, 4  ;;  %v3442_v21 = vld [vmem:[%s4688_s20 + $0x58] sm:$0xf]  ;;  %v3611_v30 = vor.u32 %v4754_v7, %v4752_v6  ;;  %v3615_v31 = vor.u32 %v4756_v8, %v4758_v9 }
  0x1f   : > { %2964 = vmatpush.bf16.msra.mxu3 %v4470_v24  ;;  %v4451_v15 = vld [vmem:[%s5475_s1 + $0x40] sm:$0xff]  ;;  %344 = vst [vmem:[#allocation2 + $0x48] sm:$0xf] %v250_v10  ;;  %v389_v20 = vrot.slane %v388_v11, 4  ;;  %v4498_v23 = vld [vmem:[%s5475_s1 + $0x1b8] sm:$0xff]  ;;  %v4481_v49 = vld [vmem:[%s5475_s1 + $0x130] sm:$0xff] }
  0x20   : > { %2878 = vmatpush.bf16.msra.mxu0 %v4445_v44  ;;  %v4459_v18 = vld [vmem:[%s5475_s1 + $0x80] sm:$0xff]  ;;  %v380_v22 = vsel %vm4734_vm2, %v375_v16, %v379_v4  ;;  %v4482_v24 = vld [vmem:[%s5475_s1 + $0x138] sm:$0xff]  ;;  %182 = vst [vmem:[#allocation2 + $0xc0] sm:$0xf] %v174_v17  ;;  %v208_v26 = vld [vmem:[%s4688_s20 + $0x10] sm:$0xf] }
  0x21   : > { %2907 = vmatpush.bf16.msra.mxu1 %v4453_v45  ;;  %v4467_v19 = vld [vmem:[%s5475_s1 + $0xc0] sm:$0xff]  ;;  %v394_v27 = vsel %vm4734_vm2, %v389_v20, %v393_v12  ;;  %487 = vst [vmem:[#allocation2 + $0xc] sm:$0xf] %v380_v22  ;;  %v209_v28 = vld [vmem:[%s4688_s20 + $0x14] sm:$0x1]  ;;  %v4506_v32 = vld [vmem:[%s5475_s1 + $0x1f8] sm:$0xff] }
  0x22   : > { %2936 = vmatpush.bf16.msra.mxu2 %v4461_v50  ;;  %v3443_v25 = vld [vmem:[%s4688_s20 + $0x60] sm:$0xf]  ;;  %v210_v29 = vld [vmem:[%s4688_s20 + $0x18] sm:$0xf]  ;;  %488 = vst [vmem:[#allocation2 + $0x4c] sm:$0xf] %v394_v27 }
  0x23   : > { %2965 = vmatpush.bf16.msra.mxu3 %v4469_v51  ;;  %v211_v33 = vld [vmem:[%s4688_s20 + $0x1c] sm:$0x1]  ;;  %v252_v34 = vshrl.u32 %v208_v26, 16  ;;  %v255_v35 = vshll.u32 %v208_v26, 16  ;;  %198 = vst [vmem:[#allocation2 + $0x84] sm:$0xf] %v3442_v21 }
  0x24   : > { %2879 = vmatpush.bf16.msra.mxu0 %v4444_v63  ;;  %v261_v36 = vshll.u32 %v209_v28, 16  ;;  %v266_v37 = vshrl.u32 %v210_v29, 16  ;;  %v269_v38 = vshll.u32 %v210_v29, 16  ;;  %v275_v39 = vshll.u32 %v211_v33, 16  ;;  %199 = vst [vmem:[#allocation2 + $0xc4] sm:$0xf] %v3443_v25 }
  0x25   : > { %2908 = vmatpush.bf16.msra.mxu1 %v4452_v0  ;;  %v3618_v40 = vld [vmem:[#allocation2 + $0x8] sm:$0xf]  ;;  %v254_v41 = vrot.slane %v252_v34, 4  ;;  %v257_v42 = vrot.slane %v255_v35, 5  ;;  %v4490_v44 = vld [vmem:[%s5475_s1 + $0x178] sm:$0xff]  ;;  %v4497_v45 = vld [vmem:[%s5475_s1 + $0x1b0] sm:$0xff] }
  0x26   : > { %2937 = vmatpush.bf16.msra.mxu2 %v4460_v1  ;;  %v4388_v43 = vld [vmem:[#allocation2 + $0x44] sm:$0xf0]  ;;  %v268_v46 = vrot.slane %v266_v37, 4  ;;  %v271_v47 = vrot.slane %v269_v38, 5  ;;  %v263_v51 = vrot.slane %v261_v36, 5  ;;  %v4505_v55 = vld [vmem:[%s5475_s1 + $0x1f0] sm:$0xff] }
  0x27   : > { %2966 = vmatpush.bf16.msra.mxu3 %v4468_v5  ;;  %v3619_v48 = vor.u32 %v4388_v43, %v3618_v40  ;;  %v258_v50 = vor.u32 %v257_v42, %v254_v41  ;;  %v3452_v53 = vld [vmem:[%s4688_s20 + $0x58] sm:$0xf]  ;;  %v3453_v54 = vld [vmem:[%s4688_s20 + $0x5c] sm:$0x1]  ;;  %v277_v57 = vrot.slane %v275_v39, 5  ;;  %v4489_v61 = vld [vmem:[%s5475_s1 + $0x170] sm:$0xff] }
  0x28   : > { %2880 = vmatpush.bf16.msra.mxu0 %v4443_v14  ;;  %v272_v56 = vor.u32 %v271_v47, %v268_v46  ;;  %v3454_v58 = vld [vmem:[%s4688_s20 + $0x60] sm:$0xf]  ;;  %v3455_v59 = vld [vmem:[%s4688_s20 + $0x64] sm:$0x1]  ;;  %v4380_v60 = vld [vmem:[#allocation2 + $0xc] sm:$0xf] }
  0x29   : > { %2909 = vmatpush.bf16.msra.mxu1 %v4451_v15  ;;  %v259_v62 = vrot.slane %v258_v50, 4  ;;  %v396_v63 = vshrl.u32 %v3452_v53, 16  ;;  %v399_v0 = vshll.u32 %v3452_v53, 16  ;;  %v3620_v1 = vld [vmem:[#allocation2 + $0x48] sm:$0xf0]  ;;  %v405_v3 = vshll.u32 %v3453_v54, 16 }
  0x2a   : > { %2938 = vmatpush.bf16.msra.mxu2 %v4459_v18  ;;  %v273_v2 = vrot.slane %v272_v56, 4  ;;  %v410_v4 = vshrl.u32 %v3454_v58, 16  ;;  %v413_v5 = vshll.u32 %v3454_v58, 16  ;;  %v3623_v6 = vor.u32 %v4380_v60, %v3620_v1  ;;  %v4496_v10 = vld [vmem:[%s5475_s1 + $0x1a8] sm:$0xff]  ;;  %v4495_v20 = vld [vmem:[%s5475_s1 + $0x1a0] sm:$0xff] }
  0x2b   : > { %2967 = vmatpush.bf16.msra.mxu3 %v4467_v19  ;;  %2881 = vmatmul.bf16.vlgmr.msra.gmra.mxu0 %v3611_v30  ;;  %v264_v7 = vsel %vm4734_vm2, %v259_v62, %v263_v51  ;;  %v398_v8 = vrot.slane %v396_v63, 4  ;;  %v401_v9 = vrot.slane %v399_v0, 5  ;;  %v4480_v11 = vld [vmem:[%s5475_s1 + $0x128] sm:$0xff]  ;;  %v407_v17 = vrot.slane %v405_v3, 5  ;;  %v4479_v21 = vld [vmem:[%s5475_s1 + $0x120] sm:$0xff] }
  0x2c   : > { %2989 = vmatpush.bf16.msrb.mxu0 %v4482_v24  ;;  %2910 = vmatmul.bf16.vlgmr.msra.gmra.mxu1 %v3615_v31  ;;  %v278_v12 = vsel %vm4734_vm2, %v273_v2, %v277_v57  ;;  %345 = vst [vmem:[#allocation2 + $0x88] sm:$0xf] %v264_v7  ;;  %v412_v13 = vrot.slane %v410_v4, 4  ;;  %v4504_v14 = vld [vmem:[%s5475_s1 + $0x1e8] sm:$0xff]  ;;  %v415_v18 = vrot.slane %v413_v5, 5  ;;  %v419_v19 = vshll.u32 %v3455_v59, 16 }
  0x2d   : > { %2939 = vmatmul.bf16.vlgmr.msra.gmra.mxu2 %v3619_v48  ;;  %3018 = vmatpush.bf16.msrb.mxu1 %v4490_v44  ;;  %v4488_v15 = vld [vmem:[%s5475_s1 + $0x168] sm:$0xff]  ;;  %346 = vst [vmem:[#allocation2 + $0xc8] sm:$0xf] %v278_v12  ;;  %v402_v16 = vor.u32 %v401_v9, %v398_v8  ;;  %v175_v22 = vld [vmem:[%s4688_s20 + $0x20] sm:$0xf]  ;;  %v4494_v57 = vld [vmem:[%s5475_s1 + $0x198] sm:$0xff] }
  0x2e   : > { %3047 = vmatpush.bf16.msrb.mxu2 %v4498_v23  ;;  %2968 = vmatmul.bf16.vlgmr.msra.gmra.mxu3 %v3623_v6  ;;  %v176_v23 = vld [vmem:[%s4688_s20 + $0x28] sm:$0xf]  ;;  %v3674_v24 = vld [vmem:[#allocation2 + $0x80] sm:$0xf]  ;;  %v4395_v26 = vld [vmem:[#allocation2 + $0x84] sm:$0xf]  ;;  %v416_v29 = vor.u32 %v415_v18, %v412_v13 }
  0x2f   : > { %3076 = vmatpush.bf16.msrb.mxu3 %v4506_v32  ;;  %v4403_v25 = vld [vmem:[#allocation2 + $0xbc] sm:$0xf0]  ;;  %v3676_v27 = vld [vmem:[#allocation2 + $0xc0] sm:$0xf0]  ;;  %v403_v28 = vrot.slane %v402_v16, 4  ;;  %v421_v30 = vrot.slane %v419_v19, 5 }
  0x30   : > { %2990 = vmatpush.bf16.msrb.mxu0 %v4481_v49  ;;  %183 = vst [vmem:[#allocation2 + $0x100] sm:$0xf] %v175_v22  ;;  %v3444_v31 = vld [vmem:[%s4688_s20 + $0x68] sm:$0xf]  ;;  %v4503_v32 = vld [vmem:[%s5475_s1 + $0x1e0] sm:$0xff]  ;;  %v417_v37 = vrot.slane %v416_v29, 4  ;;  %v3675_v46 = vor.u32 %v4403_v25, %v3674_v24  ;;  %v3679_v47 = vor.u32 %v4395_v26, %v3676_v27 }
  0x31   : > { %3019 = vmatpush.bf16.msrb.mxu1 %v4489_v61  ;;  %v4487_v33 = vld [vmem:[%s5475_s1 + $0x160] sm:$0xff]  ;;  %184 = vst [vmem:[#allocation2 + $0x140] sm:$0xf] %v176_v23  ;;  %v3445_v34 = vld [vmem:[%s4688_s20 + $0x70] sm:$0xf]  ;;  %v408_v36 = vsel %vm4734_vm2, %v403_v28, %v407_v17  ;;  %v4478_v9 = vld [vmem:[%s5475_s1 + $0x118] sm:$0xff] }
  0x32   : > { %3048 = vmatpush.bf16.msrb.mxu2 %v4497_v45  ;;  %v212_v35 = vld [vmem:[%s4688_s20 + $0x20] sm:$0xf]  ;;  %200 = vst [vmem:[#allocation2 + $0x104] sm:$0xf] %v3444_v31  ;;  %v213_v38 = vld [vmem:[%s4688_s20 + $0x24] sm:$0x1]  ;;  %v422_v43 = vsel %vm4734_vm2, %v417_v37, %v421_v30 }
  0x33   : > { %3077 = vmatpush.bf16.msrb.mxu3 %v4505_v55  ;;  %v280_v39 = vshrl.u32 %v212_v35, 16  ;;  %489 = vst [vmem:[#allocation2 + $0x8c] sm:$0xf] %v408_v36  ;;  %v214_v40 = vld [vmem:[%s4688_s20 + $0x28] sm:$0xf]  ;;  %v283_v45 = vshll.u32 %v212_v35, 16 }
  0x34   : > { %2991 = vmatpush.bf16.msrb.mxu0 %v4480_v11  ;;  %v215_v41 = vld [vmem:[%s4688_s20 + $0x2c] sm:$0x1]  ;;  %v3682_v42 = vld [vmem:[#allocation2 + $0x88] sm:$0xf]  ;;  %201 = vst [vmem:[#allocation2 + $0x144] sm:$0xf] %v3445_v34 }
  0x35   : > { %3020 = vmatpush.bf16.msrb.mxu1 %v4488_v15  ;;  %v282_v44 = vrot.slane %v280_v39, 4  ;;  %v4404_v48 = vld [vmem:[#allocation2 + $0xc4] sm:$0xf0]  ;;  %490 = vst [vmem:[#allocation2 + $0xcc] sm:$0xf] %v422_v43  ;;  %v289_v49 = vshll.u32 %v213_v38, 16 }
  0x36   : > { %3049 = vmatpush.bf16.msrb.mxu2 %v4496_v10  ;;  %v294_v50 = vshrl.u32 %v214_v40, 16  ;;  %v3683_v51 = vor.u32 %v4404_v48, %v3682_v42  ;;  %v285_v53 = vrot.slane %v283_v45, 5  ;;  %v297_v54 = vshll.u32 %v214_v40, 16  ;;  %v3456_v56 = vld [vmem:[%s4688_s20 + $0x68] sm:$0xf]  ;;  %v4502_v18 = vld [vmem:[%s5475_s1 + $0x1d8] sm:$0xff] }
  0x37   : > { %3078 = vmatpush.bf16.msrb.mxu3 %v4504_v14  ;;  %v303_v55 = vshll.u32 %v215_v41, 16  ;;  %v3457_v59 = vld [vmem:[%s4688_s20 + $0x6c] sm:$0x1]  ;;  %v291_v61 = vrot.slane %v289_v49, 5  ;;  %v3458_v63 = vld [vmem:[%s4688_s20 + $0x70] sm:$0xf] }
  0x38   : > { %2992 = vmatpush.bf16.msrb.mxu0 %v4479_v21  ;;  %v296_v58 = vrot.slane %v294_v50, 4  ;;  %v286_v60 = vor.u32 %v285_v53, %v282_v44  ;;  %v299_v62 = vrot.slane %v297_v54, 5  ;;  %v3459_v1 = vld [vmem:[%s4688_s20 + $0x74] sm:$0x1]  ;;  %v424_v2 = vshrl.u32 %v3456_v56, 16  ;;  %v4486_v19 = vld [vmem:[%s5475_s1 + $0x158] sm:$0xff] }
  0x39   : > { %3021 = vmatpush.bf16.msrb.mxu1 %v4487_v33  ;;  %v305_v0 = vrot.slane %v303_v55, 5  ;;  %v427_v3 = vshll.u32 %v3456_v56, 16  ;;  %v433_v7 = vshll.u32 %v3457_v59, 16  ;;  %v438_v8 = vshrl.u32 %v3458_v63, 16  ;;  %v4493_v24 = vld [vmem:[%s5475_s1 + $0x190] sm:$0xff]  ;;  %v4492_v38 = vld [vmem:[%s5475_s1 + $0x188] sm:$0xff] }
  0x3a   : > { %3050 = vmatpush.bf16.msrb.mxu2 %v4495_v20  ;;  %v4396_v4 = vld [vmem:[#allocation2 + $0x8c] sm:$0xf]  ;;  %v287_v5 = vrot.slane %v286_v60, 4  ;;  %v300_v6 = vor.u32 %v299_v62, %v296_v58  ;;  %v426_v10 = vrot.slane %v424_v2, 4  ;;  %v441_v12 = vshll.u32 %v3458_v63, 16  ;;  %v4477_v25 = vld [vmem:[%s5475_s1 + $0x110] sm:$0xff] }
  0x3b   : > { %3079 = vmatpush.bf16.msrb.mxu3 %v4503_v32  ;;  %2886 = vmatmul.bf16.gmra.mxu0 %v3675_v46  ;;  %v429_v11 = vrot.slane %v427_v3, 5  ;;  %v447_v13 = vshll.u32 %v3459_v1, 16  ;;  %v435_v17 = vrot.slane %v433_v7, 5  ;;  %v440_v22 = vrot.slane %v438_v8, 4  ;;  %v4501_v28 = vld [vmem:[%s5475_s1 + $0x1d0] sm:$0xff]  ;;  %v4476_v44 = vld [vmem:[%s5475_s1 + $0x108] sm:$0xff] }
  0x3c   : > { %2915 = vmatmul.bf16.gmra.mxu1 %v3679_v47  ;;  %v3684_v14 = vld [vmem:[#allocation2 + $0xc8] sm:$0xf0]  ;;  %v292_v15 = vsel %vm4734_vm2, %v287_v5, %v291_v61  ;;  %v301_v16 = vrot.slane %v300_v6, 4  ;;  %2993 = vmatpush.bf16.msrb.mxu0 %v4478_v9  ;;  %v443_v23 = vrot.slane %v441_v12, 5  ;;  %v4485_v29 = vld [vmem:[%s5475_s1 + $0x150] sm:$0xff] }
  0x3d   : > { %2944 = vmatmul.bf16.gmra.mxu2 %v3683_v51  ;;  %v3687_v20 = vor.u32 %v4396_v4, %v3684_v14  ;;  %347 = vst [vmem:[#allocation2 + $0x108] sm:$0xf] %v292_v15  ;;  %v430_v21 = vor.u32 %v429_v11, %v426_v10  ;;  %v449_v27 = vrot.slane %v447_v13, 5  ;;  %3022 = vmatpush.bf16.msrb.mxu1 %v4486_v19  ;;  %v177_v30 = vld [vmem:[%s4688_s20 + $0x30] sm:$0xf]  ;;  %v4500_v12 = vld [vmem:[%s5475_s1 + $0x1c8] sm:$0xff] }
  0x3e   : > { %3051 = vmatpush.bf16.msrb.mxu2 %v4494_v57  ;;  %v306_v26 = vsel %vm4734_vm2, %v301_v16, %v305_v0  ;;  %v3738_v31 = vld [vmem:[#allocation2 + $0x100] sm:$0xf]  ;;  %v4411_v33 = vld [vmem:[#allocation2 + $0x104] sm:$0xf]  ;;  %v444_v36 = vor.u32 %v443_v23, %v440_v22  ;;  %v178_v37 = vld [vmem:[%s4688_s20 + $0x38] sm:$0xf] }
  0x3f   : > { %3080 = vmatpush.bf16.msrb.mxu3 %v4502_v18  ;;  %v4419_v32 = vld [vmem:[#allocation2 + $0x13c] sm:$0xf0]  ;;  %v3740_v34 = vld [vmem:[#allocation2 + $0x140] sm:$0xf0]  ;;  %348 = vst [vmem:[#allocation2 + $0x148] sm:$0xf] %v306_v26 }
  0x40   : > { %2973 = vmatmul.bf16.gmra.mxu3 %v3687_v20  ;;  %v431_v35 = vrot.slane %v430_v21, 4  ;;  %2994 = vmatpush.bf16.msrb.mxu0 %v4477_v25  ;;  %185 = vst [vmem:[#allocation2 + $0x180] sm:$0xf] %v177_v30  ;;  %v3446_v39 = vld [vmem:[%s4688_s20 + $0x78] sm:$0xf]  ;;  %v445_v42 = vrot.slane %v444_v36, 4  ;;  %v3739_v51 = vor.u32 %v4419_v32, %v3738_v31  ;;  %v3743_v53 = vor.u32 %v4411_v33, %v3740_v34 }
  0x41   : > { %v3447_v40 = vld [vmem:[%s4688_s20 + $0x80] sm:$0xf]  ;;  %186 = vst [vmem:[#allocation2 + $0x1c0] sm:$0xf] %v178_v37  ;;  %v216_v43 = vld [vmem:[%s4688_s20 + $0x30] sm:$0xf]  ;;  %3023 = vmatpush.bf16.msrb.mxu1 %v4485_v29 }
  0x42   : > { %3052 = vmatpush.bf16.msrb.mxu2 %v4493_v24  ;;  %v436_v41 = vsel %vm4734_vm2, %v431_v35, %v435_v17  ;;  %v217_v45 = vld [vmem:[%s4688_s20 + $0x34] sm:$0x1]  ;;  %v218_v46 = vld [vmem:[%s4688_s20 + $0x38] sm:$0xf]  ;;  %v450_v47 = vsel %vm4734_vm2, %v445_v42, %v449_v27  ;;  %202 = vst [vmem:[#allocation2 + $0x184] sm:$0xf] %v3446_v39 }
  0x43   : > { %491 = vst [vmem:[#allocation2 + $0x10c] sm:$0xf] %v436_v41  ;;  %3081 = vmatpush.bf16.msrb.mxu3 %v4501_v28  ;;  %v219_v48 = vld [vmem:[%s4688_s20 + $0x3c] sm:$0x1]  ;;  %v308_v49 = vshrl.u32 %v216_v43, 16  ;;  %v311_v50 = vshll.u32 %v216_v43, 16 }
  0x44   : > { %v3746_v54 = vld [vmem:[#allocation2 + $0x108] sm:$0xf]  ;;  %492 = vst [vmem:[#allocation2 + $0x14c] sm:$0xf] %v450_v47  ;;  %v317_v55 = vshll.u32 %v217_v45, 16  ;;  %v322_v56 = vshrl.u32 %v218_v46, 16  ;;  %2995 = vmatpush.bf16.msrb.mxu0 %v4476_v44 }
  0x45   : > { %203 = vst [vmem:[#allocation2 + $0x1c4] sm:$0xf] %v3447_v40  ;;  %v310_v57 = vrot.slane %v308_v49, 4  ;;  %v313_v58 = vrot.slane %v311_v50, 5  ;;  %v325_v59 = vshll.u32 %v218_v46, 16  ;;  %v331_v60 = vshll.u32 %v219_v48, 16 }
  0x46   : > { %3053 = vmatpush.bf16.msrb.mxu2 %v4492_v38  ;;  %v4420_v61 = vld [vmem:[#allocation2 + $0x144] sm:$0xf0]  ;;  %v324_v62 = vrot.slane %v322_v56, 4  ;;  %v3460_v63 = vld [vmem:[%s4688_s20 + $0x78] sm:$0xf]  ;;  %v319_v2 = vrot.slane %v317_v55, 5 }
  0x47   : > { %v3747_v0 = vor.u32 %v4420_v61, %v3746_v54  ;;  %v314_v1 = vor.u32 %v313_v58, %v310_v57  ;;  %v327_v3 = vrot.slane %v325_v59, 5  ;;  %v3461_v4 = vld [vmem:[%s4688_s20 + $0x7c] sm:$0x1]  ;;  %v333_v5 = vrot.slane %v331_v60, 5  ;;  %v3462_v6 = vld [vmem:[%s4688_s20 + $0x80] sm:$0xf]  ;;  %3082 = vmatpush.bf16.msrb.mxu3 %v4500_v12 }
  0x48   : > { %v3463_v7 = vld [vmem:[%s4688_s20 + $0x84] sm:$0x1]  ;;  %v452_v11 = vshrl.u32 %v3460_v63, 16  ;;  %v4484_v13 = vld [vmem:[%s5475_s1 + $0x148] sm:$0xff]  ;;  %v455_v14 = vshll.u32 %v3460_v63, 16  ;;  %v461_v15 = vshll.u32 %v3461_v4, 16 }
  0x49   : > { %v315_v9 = vrot.slane %v314_v1, 4  ;;  %v328_v10 = vor.u32 %v327_v3, %v324_v62  ;;  %v466_v16 = vshrl.u32 %v3462_v6, 16  ;;  %v469_v17 = vshll.u32 %v3462_v6, 16  ;;  %3024 = vmatpush.bf16.msrb.mxu1 %v4484_v13  ;;  %v4491_v23 = vld [vmem:[%s5475_s1 + $0x180] sm:$0xff]  ;;  %v3464_v35 = vld [vmem:[%s4688_s20 + $0x90] sm:$0xf] }
  0x4a   : > { %v4412_v8 = vld [vmem:[#allocation2 + $0x10c] sm:$0xf]  ;;  %v454_v21 = vrot.slane %v452_v11, 4  ;;  %v475_v22 = vshll.u32 %v3463_v7, 16  ;;  %v457_v25 = vrot.slane %v455_v14, 5  ;;  %3054 = vmatpush.bf16.msrb.mxu2 %v4491_v23  ;;  %v4475_v29 = vld [vmem:[%s5475_s1 + $0x100] sm:$0xff] }
  0x4b   : > { %2891 = vmatmul.bf16.gmra.mxu0 %v3739_v51  ;;  %v3748_v18 = vld [vmem:[#allocation2 + $0x148] sm:$0xf0]  ;;  %v320_v19 = vsel %vm4734_vm2, %v315_v9, %v319_v2  ;;  %v329_v20 = vrot.slane %v328_v10, 4  ;;  %v468_v27 = vrot.slane %v466_v16, 4  ;;  %v471_v28 = vrot.slane %v469_v17, 5  ;;  %v4499_v30 = vld [vmem:[%s5475_s1 + $0x1c0] sm:$0xff] }
  0x4c   : > { %2920 = vmatmul.bf16.gmra.mxu1 %v3743_v53  ;;  %v3751_v24 = vor.u32 %v4412_v8, %v3748_v18  ;;  %349 = vst [vmem:[#allocation2 + $0x188] sm:$0xf] %v320_v19  ;;  %v4483_v31 = vld [vmem:[%s5475_s1 + $0x140] sm:$0xff]  ;;  %v458_v32 = vor.u32 %v457_v25, %v454_v21  ;;  %v463_v33 = vrot.slane %v461_v15, 5  ;;  %v477_v34 = vrot.slane %v475_v22, 5  ;;  %2996 = vmatpush.bf16.msrb.mxu0 %v4475_v29  ;;  %v4530_v45 = vld [vmem:[%s5475_s1 + $0x2b8] sm:$0xff] }
  0x4d   : > { %2949 = vmatmul.bf16.gmra.mxu2 %v3747_v0  ;;  %v334_v26 = vsel %vm4734_vm2, %v329_v20, %v333_v5  ;;  %v472_v36 = vor.u32 %v471_v28, %v468_v27  ;;  %v3465_v37 = vld [vmem:[%s4688_s20 + $0x98] sm:$0xf]  ;;  %504 = vst [vmem:[#allocation2 + $0x10] sm:$0xf] %v3464_v35  ;;  %v3802_v39 = vld [vmem:[#allocation2 + $0x180] sm:$0xf]  ;;  %3083 = vmatpush.bf16.msrb.mxu3 %v4499_v30 }
  0x4e   : > { %350 = vst [vmem:[#allocation2 + $0x1c8] sm:$0xf] %v334_v26  ;;  %v3472_v38 = vld [vmem:[%s4688_s20 + $0xd8] sm:$0xf]  ;;  %v4435_v40 = vld [vmem:[#allocation2 + $0x1bc] sm:$0xf0]  ;;  %3025 = vmatpush.bf16.msrb.mxu1 %v4483_v31  ;;  %3163 = vmatpush.bf16.msra.mxu2 %v4530_v45 }
  0x4f   : > { %v4427_v41 = vld [vmem:[#allocation2 + $0x184] sm:$0xf]  ;;  %v459_v43 = vrot.slane %v458_v32, 4  ;;  %505 = vst [vmem:[#allocation2 + $0x50] sm:$0xf] %v3465_v37  ;;  %v473_v46 = vrot.slane %v472_v36, 4  ;;  %v3803_v60 = vor.u32 %v4435_v40, %v3802_v39 }
  0x50   : > { %2978 = vmatmul.bf16.gmra.mxu3 %v3751_v24  ;;  %v3804_v42 = vld [vmem:[#allocation2 + $0x1c0] sm:$0xf0]  ;;  %v3473_v44 = vld [vmem:[%s4688_s20 + $0xe0] sm:$0xf]  ;;  %521 = vst [vmem:[#allocation2 + $0x14] sm:$0xf] %v3472_v38 }
  0x51   : > { %v3480_v47 = vld [vmem:[%s4688_s20 + $0x90] sm:$0xf]  ;;  %v4514_v48 = vld [vmem:[%s5475_s1 + $0x238] sm:$0xff]  ;;  %v464_v49 = vsel %vm4734_vm2, %v459_v43, %v463_v33  ;;  %522 = vst [vmem:[#allocation2 + $0x54] sm:$0xf] %v3473_v44  ;;  %v478_v54 = vsel %vm4734_vm2, %v473_v46, %v477_v34  ;;  %v3807_v61 = vor.u32 %v4427_v41, %v3804_v42  ;;  %v4528_v45 = vld [vmem:[%s5475_s1 + $0x2a8] sm:$0xff] }
  0x52   : > { %v3481_v50 = vld [vmem:[%s4688_s20 + $0x94] sm:$0x1]  ;;  %v3482_v51 = vld [vmem:[%s4688_s20 + $0x98] sm:$0xf]  ;;  %493 = vst [vmem:[#allocation2 + $0x18c] sm:$0xf] %v464_v49  ;;  %3105 = vmatpush.bf16.msra.mxu0 %v4514_v48 }
  0x53   : > { %v3810_v53 = vld [vmem:[#allocation2 + $0x188] sm:$0xf]  ;;  %v3483_v55 = vld [vmem:[%s4688_s20 + $0x9c] sm:$0x1]  ;;  %494 = vst [vmem:[#allocation2 + $0x1cc] sm:$0xf] %v478_v54 }
  0x54   : > { %v546_v56 = vshrl.u32 %v3480_v47, 16  ;;  %v549_v57 = vshll.u32 %v3480_v47, 16  ;;  %v555_v58 = vshll.u32 %v3481_v50, 16  ;;  %v560_v59 = vshrl.u32 %v3482_v51, 16  ;;  %v3496_v1 = vld [vmem:[%s4688_s20 + $0xd8] sm:$0xf] }
  0x55   : > { %v4436_v62 = vld [vmem:[#allocation2 + $0x1c4] sm:$0xf0]  ;;  %v563_v63 = vshll.u32 %v3482_v51, 16  ;;  %v569_v0 = vshll.u32 %v3483_v55, 16  ;;  %v4538_v5 = vld [vmem:[%s5475_s1 + $0x2f8] sm:$0xff]  ;;  %v690_v8 = vshrl.u32 %v3496_v1, 16 }
  0x56   : > { %v3811_v2 = vor.u32 %v4436_v62, %v3810_v53  ;;  %v548_v3 = vrot.slane %v546_v56, 4  ;;  %v551_v4 = vrot.slane %v549_v57, 5  ;;  %v562_v6 = vrot.slane %v560_v59, 4  ;;  %v3497_v11 = vld [vmem:[%s4688_s20 + $0xdc] sm:$0x1]  ;;  %3192 = vmatpush.bf16.msra.mxu3 %v4538_v5  ;;  %v4529_v32 = vld [vmem:[%s5475_s1 + $0x2b0] sm:$0xff] }
  0x57   : > { %v565_v7 = vrot.slane %v563_v63, 5  ;;  %v557_v10 = vrot.slane %v555_v58, 5  ;;  %v3498_v12 = vld [vmem:[%s4688_s20 + $0xe0] sm:$0xf]  ;;  %v571_v14 = vrot.slane %v569_v0, 5  ;;  %v692_v16 = vrot.slane %v690_v8, 4  ;;  %3164 = vmatpush.bf16.msra.mxu2 %v4529_v32 }
  0x58   : > { %v552_v9 = vor.u32 %v551_v4, %v548_v3  ;;  %v3499_v15 = vld [vmem:[%s4688_s20 + $0xe4] sm:$0x1]  ;;  %v693_v17 = vshll.u32 %v3496_v1, 16  ;;  %v699_v20 = vshll.u32 %v3497_v11, 16  ;;  %v704_v21 = vshrl.u32 %v3498_v12, 16  ;;  %v4522_v22 = vld [vmem:[%s5475_s1 + $0x278] sm:$0xff] }
  0x59   : > { %v566_v13 = vor.u32 %v565_v7, %v562_v6  ;;  %v4428_v18 = vld [vmem:[#allocation2 + $0x18c] sm:$0xf]  ;;  %v707_v26 = vshll.u32 %v3498_v12, 16  ;;  %v713_v27 = vshll.u32 %v3499_v15, 16  ;;  %3134 = vmatpush.bf16.msra.mxu1 %v4522_v22  ;;  %v4513_v33 = vld [vmem:[%s5475_s1 + $0x230] sm:$0xff] }
  0x5a   : > { %v553_v19 = vrot.slane %v552_v9, 4  ;;  %v3812_v23 = vld [vmem:[#allocation2 + $0x1c8] sm:$0xf0]  ;;  %v695_v25 = vrot.slane %v693_v17, 5  ;;  %v701_v30 = vrot.slane %v699_v20, 5  ;;  %v706_v31 = vrot.slane %v704_v21, 4  ;;  %3106 = vmatpush.bf16.msra.mxu0 %v4513_v33 }
  0x5b   : > { %2896 = vmatmul.bf16.gmra.mxu0 %v3803_v60  ;;  %v567_v24 = vrot.slane %v566_v13, 4  ;;  %v3815_v28 = vor.u32 %v4428_v18, %v3812_v23  ;;  %v4537_v34 = vld [vmem:[%s5475_s1 + $0x2f0] sm:$0xff]  ;;  %v709_v37 = vrot.slane %v707_v26, 5  ;;  %v715_v38 = vrot.slane %v713_v27, 5  ;;  %v3466_v40 = vld [vmem:[%s4688_s20 + $0xa0] sm:$0xf]  ;;  %3165 = vmatpush.bf16.msra.mxu2 %v4528_v45 }
  0x5c   : > { %2925 = vmatmul.bf16.gmra.mxu1 %v3807_v61  ;;  %v558_v29 = vsel %vm4734_vm2, %v553_v19, %v557_v10  ;;  %v696_v36 = vor.u32 %v695_v25, %v692_v16  ;;  %v4521_v39 = vld [vmem:[%s5475_s1 + $0x270] sm:$0xff]  ;;  %v3467_v41 = vld [vmem:[%s4688_s20 + $0xa8] sm:$0xf]  ;;  %506 = vst [vmem:[#allocation2 + $0x90] sm:$0xf] %v3466_v40  ;;  %3193 = vmatpush.bf16.msra.mxu3 %v4537_v34  ;;  %v4511_v40 = vld [vmem:[%s5475_s1 + $0x220] sm:$0xff] }
  0x5d   : > { %2954 = vmatmul.bf16.gmra.mxu2 %v3811_v2  ;;  %v572_v35 = vsel %vm4734_vm2, %v567_v24, %v571_v14  ;;  %665 = vst [vmem:[#allocation2 + $0x18] sm:$0xf] %v558_v29  ;;  %v710_v43 = vor.u32 %v709_v37, %v706_v31  ;;  %v3474_v44 = vld [vmem:[%s4688_s20 + $0xe8] sm:$0xf]  ;;  %v3626_v46 = vld [vmem:[#allocation2 + $0x10] sm:$0xf]  ;;  %3135 = vmatpush.bf16.msra.mxu1 %v4521_v39 }
  0x5e   : > { %666 = vst [vmem:[#allocation2 + $0x58] sm:$0xf] %v572_v35  ;;  %v697_v42 = vrot.slane %v696_v36, 4  ;;  %v4389_v47 = vld [vmem:[#allocation2 + $0x4c] sm:$0xf0]  ;;  %v4512_v63 = vld [vmem:[%s5475_s1 + $0x228] sm:$0xff] }
  0x5f   : > { %v4381_v48 = vld [vmem:[#allocation2 + $0x14] sm:$0xf]  ;;  %507 = vst [vmem:[#allocation2 + $0xd0] sm:$0xf] %v3467_v41  ;;  %v3475_v50 = vld [vmem:[%s4688_s20 + $0xf0] sm:$0xf]  ;;  %v3627_v3 = vor.u32 %v4389_v47, %v3626_v46  ;;  %3107 = vmatpush.bf16.msra.mxu0 %v4512_v63 }
  0x60   : > { %2983 = vmatmul.bf16.gmra.mxu3 %v3815_v28  ;;  %v3628_v49 = vld [vmem:[#allocation2 + $0x50] sm:$0xf0]  ;;  %v3484_v51 = vld [vmem:[%s4688_s20 + $0xa0] sm:$0xf]  ;;  %v702_v53 = vsel %vm4734_vm2, %v697_v42, %v701_v30  ;;  %v711_v54 = vrot.slane %v710_v43, 4  ;;  %v4536_v8 = vld [vmem:[%s5475_s1 + $0x2e8] sm:$0xff] }
  0x61   : > { %523 = vst [vmem:[#allocation2 + $0x94] sm:$0xf] %v3474_v44  ;;  %v3485_v55 = vld [vmem:[%s4688_s20 + $0xa4] sm:$0x1]  ;;  %v574_v56 = vshrl.u32 %v3484_v51, 16  ;;  %v577_v61 = vshll.u32 %v3484_v51, 16  ;;  %v3631_v4 = vor.u32 %v4381_v48, %v3628_v49  ;;  %3194 = vmatpush.bf16.msra.mxu3 %v4536_v8 }
  0x62   : > { %809 = vst [vmem:[#allocation2 + $0x1c] sm:$0xf] %v702_v53  ;;  %v3486_v57 = vld [vmem:[%s4688_s20 + $0xa8] sm:$0xf]  ;;  %v3487_v58 = vld [vmem:[%s4688_s20 + $0xac] sm:$0x1]  ;;  %v716_v59 = vsel %vm4734_vm2, %v711_v54, %v715_v38 }
  0x63   : > { %524 = vst [vmem:[#allocation2 + $0xd4] sm:$0xf] %v3475_v50  ;;  %v576_v60 = vrot.slane %v574_v56, 4  ;;  %v583_v62 = vshll.u32 %v3485_v55, 16  ;;  %v588_v1 = vshrl.u32 %v3486_v57, 16  ;;  %v591_v2 = vshll.u32 %v3486_v57, 16  ;;  %3108 = vmatpush.bf16.msra.mxu0 %v4511_v40 }
  0x64   : > { %v3634_v0 = vld [vmem:[#allocation2 + $0x18] sm:$0xf]  ;;  %810 = vst [vmem:[#allocation2 + $0x5c] sm:$0xf] %v716_v59  ;;  %v579_v6 = vrot.slane %v577_v61, 5  ;;  %v597_v7 = vshll.u32 %v3487_v58, 16 }
  0x65   : > { %v4390_v5 = vld [vmem:[#allocation2 + $0x54] sm:$0xf0]  ;;  %v590_v10 = vrot.slane %v588_v1, 4  ;;  %v593_v11 = vrot.slane %v591_v2, 5  ;;  %v3500_v12 = vld [vmem:[%s4688_s20 + $0xe8] sm:$0xf] }
  0x66   : > { %v3635_v9 = vor.u32 %v4390_v5, %v3634_v0  ;;  %v580_v13 = vor.u32 %v579_v6, %v576_v60  ;;  %v585_v14 = vrot.slane %v583_v62, 5  ;;  %v3501_v15 = vld [vmem:[%s4688_s20 + $0xec] sm:$0x1]  ;;  %v718_v16 = vshrl.u32 %v3500_v12, 16  ;;  %v3502_v19 = vld [vmem:[%s4688_s20 + $0xf0] sm:$0xf] }
  0x67   : > { %v594_v17 = vor.u32 %v593_v11, %v590_v10  ;;  %v599_v18 = vrot.slane %v597_v7, 5  ;;  %v3503_v20 = vld [vmem:[%s4688_s20 + $0xf4] sm:$0x1]  ;;  %v721_v24 = vshll.u32 %v3500_v12, 16  ;;  %v727_v25 = vshll.u32 %v3501_v15, 16  ;;  %v4520_v34 = vld [vmem:[%s5475_s1 + $0x268] sm:$0xff] }
  0x68   : > { %v581_v22 = vrot.slane %v580_v13, 4  ;;  %v720_v23 = vrot.slane %v718_v16, 4  ;;  %v732_v27 = vshrl.u32 %v3502_v19, 16  ;;  %v735_v28 = vshll.u32 %v3502_v19, 16  ;;  %v4527_v35 = vld [vmem:[%s5475_s1 + $0x2a0] sm:$0xff]  ;;  %3136 = vmatpush.bf16.msra.mxu1 %v4520_v34  ;;  %v4526_v51 = vld [vmem:[%s5475_s1 + $0x298] sm:$0xff] }
  0x69   : > { %v4382_v21 = vld [vmem:[#allocation2 + $0x1c] sm:$0xf]  ;;  %v595_v26 = vrot.slane %v594_v17, 4  ;;  %v741_v29 = vshll.u32 %v3503_v20, 16  ;;  %v723_v32 = vrot.slane %v721_v24, 5  ;;  %v729_v33 = vrot.slane %v727_v25, 5  ;;  %3166 = vmatpush.bf16.msra.mxu2 %v4527_v35 }
  0x6a   : > { %v586_v31 = vsel %vm4734_vm2, %v581_v22, %v585_v14  ;;  %v734_v38 = vrot.slane %v732_v27, 4  ;;  %v737_v39 = vrot.slane %v735_v28, 5  ;;  %v4535_v41 = vld [vmem:[%s5475_s1 + $0x2e0] sm:$0xff]  ;;  %v3468_v45 = vld [vmem:[%s4688_s20 + $0xb0] sm:$0xf]  ;;  %v4510_v59 = vld [vmem:[%s5475_s1 + $0x218] sm:$0xff] }
  0x6b   : > { %2997 = vmatmul.bf16.vlgmr.msrb.gmra.mxu0 %v3627_v3  ;;  %v3636_v30 = vld [vmem:[#allocation2 + $0x58] sm:$0xf0]  ;;  %v600_v37 = vsel %vm4734_vm2, %v595_v26, %v599_v18  ;;  %667 = vst [vmem:[#allocation2 + $0x98] sm:$0xf] %v586_v31  ;;  %v724_v42 = vor.u32 %v723_v32, %v720_v23  ;;  %v743_v43 = vrot.slane %v741_v29, 5  ;;  %v4519_v44 = vld [vmem:[%s5475_s1 + $0x260] sm:$0xff]  ;;  %3195 = vmatpush.bf16.msra.mxu3 %v4535_v41 }
  0x6c   : > { %3026 = vmatmul.bf16.vlgmr.msrb.gmra.mxu1 %v3631_v4  ;;  %v3639_v36 = vor.u32 %v4382_v21, %v3636_v30  ;;  %668 = vst [vmem:[#allocation2 + $0xd8] sm:$0xf] %v600_v37  ;;  %v738_v46 = vor.u32 %v737_v39, %v734_v38  ;;  %v3469_v47 = vld [vmem:[%s4688_s20 + $0xb8] sm:$0xf]  ;;  %v3477_v50 = vld [vmem:[%s4688_s20 + $0x100] sm:$0xf]  ;;  %3109 = vmatpush.bf16.msra.mxu0 %v4510_v59 }
  0x6d   : > { %3055 = vmatmul.bf16.vlgmr.msrb.gmra.mxu2 %v3635_v9  ;;  %508 = vst [vmem:[#allocation2 + $0x110] sm:$0xf] %v3468_v45  ;;  %v3476_v48 = vld [vmem:[%s4688_s20 + $0xf8] sm:$0xf]  ;;  %v725_v49 = vrot.slane %v724_v42, 4  ;;  %3137 = vmatpush.bf16.msra.mxu1 %v4519_v44  ;;  %v4525_v38 = vld [vmem:[%s5475_s1 + $0x290] sm:$0xff] }
  0x6e   : > { %509 = vst [vmem:[#allocation2 + $0x150] sm:$0xf] %v3469_v47  ;;  %v3690_v53 = vld [vmem:[#allocation2 + $0x90] sm:$0xf]  ;;  %v4397_v55 = vld [vmem:[#allocation2 + $0x94] sm:$0xf]  ;;  %3167 = vmatpush.bf16.msra.mxu2 %v4526_v51 }
  0x6f   : > { %v4405_v54 = vld [vmem:[#allocation2 + $0xcc] sm:$0xf0]  ;;  %v3692_v56 = vld [vmem:[#allocation2 + $0xd0] sm:$0xf0]  ;;  %v739_v57 = vrot.slane %v738_v46, 4  ;;  %v730_v60 = vsel %vm4734_vm2, %v725_v49, %v729_v33  ;;  %v4534_v27 = vld [vmem:[%s5475_s1 + $0x2d8] sm:$0xff] }
  0x70   : > { %3084 = vmatmul.bf16.vlgmr.msrb.gmra.mxu3 %v3639_v36  ;;  %525 = vst [vmem:[#allocation2 + $0x114] sm:$0xf] %v3476_v48  ;;  %v3488_v58 = vld [vmem:[%s4688_s20 + $0xb0] sm:$0xf]  ;;  %v3489_v61 = vld [vmem:[%s4688_s20 + $0xb4] sm:$0x1]  ;;  %v3691_v11 = vor.u32 %v4405_v54, %v3690_v53  ;;  %v3695_v12 = vor.u32 %v4397_v55, %v3692_v56 }
  0x71   : > { %526 = vst [vmem:[#allocation2 + $0x154] sm:$0xf] %v3477_v50  ;;  %v3490_v62 = vld [vmem:[%s4688_s20 + $0xb8] sm:$0xf]  ;;  %v744_v63 = vsel %vm4734_vm2, %v739_v57, %v743_v43  ;;  %v3491_v0 = vld [vmem:[%s4688_s20 + $0xbc] sm:$0x1]  ;;  %3196 = vmatpush.bf16.msra.mxu3 %v4534_v27 }
  0x72   : > { %811 = vst [vmem:[#allocation2 + $0x9c] sm:$0xf] %v730_v60  ;;  %v602_v1 = vshrl.u32 %v3488_v58, 16  ;;  %v605_v2 = vshll.u32 %v3488_v58, 16  ;;  %v3698_v3 = vld [vmem:[#allocation2 + $0x98] sm:$0xf]  ;;  %3168 = vmatpush.bf16.msra.mxu2 %v4525_v38 }
  0x73   : > { %812 = vst [vmem:[#allocation2 + $0xdc] sm:$0xf] %v744_v63  ;;  %v611_v4 = vshll.u32 %v3489_v61, 16  ;;  %v616_v5 = vshrl.u32 %v3490_v62, 16  ;;  %v4406_v6 = vld [vmem:[#allocation2 + $0xd4] sm:$0xf0] }
  0x74   : > { %v604_v7 = vrot.slane %v602_v1, 4  ;;  %v607_v8 = vrot.slane %v605_v2, 5  ;;  %v619_v9 = vshll.u32 %v3490_v62, 16  ;;  %v625_v10 = vshll.u32 %v3491_v0, 16  ;;  %v3504_v14 = vld [vmem:[%s4688_s20 + $0xf8] sm:$0xf] }
  0x75   : > { %v618_v13 = vrot.slane %v616_v5, 4  ;;  %v3699_v15 = vor.u32 %v4406_v6, %v3698_v3  ;;  %v613_v17 = vrot.slane %v611_v4, 5  ;;  %v3505_v19 = vld [vmem:[%s4688_s20 + $0xfc] sm:$0x1]  ;;  %v3506_v21 = vld [vmem:[%s4688_s20 + $0x100] sm:$0xf] }
  0x76   : > { %v608_v16 = vor.u32 %v607_v8, %v604_v7  ;;  %v621_v18 = vrot.slane %v619_v9, 5  ;;  %v627_v20 = vrot.slane %v625_v10, 5  ;;  %v3507_v24 = vld [vmem:[%s4688_s20 + $0x104] sm:$0x1]  ;;  %v746_v25 = vshrl.u32 %v3504_v14, 16  ;;  %v4518_v32 = vld [vmem:[%s5475_s1 + $0x258] sm:$0xff] }
  0x77   : > { %v749_v26 = vshll.u32 %v3504_v14, 16  ;;  %v755_v29 = vshll.u32 %v3505_v19, 16  ;;  %v760_v30 = vshrl.u32 %v3506_v21, 16  ;;  %v763_v31 = vshll.u32 %v3506_v21, 16  ;;  %3138 = vmatpush.bf16.msra.mxu1 %v4518_v32  ;;  %v4509_v42 = vld [vmem:[%s5475_s1 + $0x210] sm:$0xff]  ;;  %v4524_v61 = vld [vmem:[%s5475_s1 + $0x288] sm:$0xff] }
  0x78   : > { %v609_v22 = vrot.slane %v608_v16, 4  ;;  %v622_v23 = vor.u32 %v621_v18, %v618_v13  ;;  %v748_v36 = vrot.slane %v746_v25, 4  ;;  %v769_v46 = vshll.u32 %v3507_v24, 16  ;;  %v4533_v47 = vld [vmem:[%s5475_s1 + $0x2d0] sm:$0xff]  ;;  %v3470_v49 = vld [vmem:[%s4688_s20 + $0xc0] sm:$0xf]  ;;  %3110 = vmatpush.bf16.msra.mxu0 %v4509_v42  ;;  %3169 = vmatpush.bf16.msra.mxu2 %v4524_v61 }
  0x79   : > { %v4398_v28 = vld [vmem:[#allocation2 + $0x9c] sm:$0xf]  ;;  %v751_v37 = vrot.slane %v749_v26, 5  ;;  %v762_v40 = vrot.slane %v760_v30, 4  ;;  %v765_v41 = vrot.slane %v763_v31, 5  ;;  %v757_v45 = vrot.slane %v755_v29, 5  ;;  %3197 = vmatpush.bf16.msra.mxu3 %v4533_v47 }
  0x7a   : > { %v3700_v33 = vld [vmem:[#allocation2 + $0xd8] sm:$0xf0]  ;;  %v614_v34 = vsel %vm4734_vm2, %v609_v22, %v613_v17  ;;  %v623_v35 = vrot.slane %v622_v23, 4  ;;  %v4517_v48 = vld [vmem:[%s5475_s1 + $0x250] sm:$0xff]  ;;  %v3471_v51 = vld [vmem:[%s4688_s20 + $0xc8] sm:$0xf] }
  0x7b   : > { %3002 = vmatmul.bf16.gmra.mxu0 %v3691_v11  ;;  %v3703_v39 = vor.u32 %v4398_v28, %v3700_v33  ;;  %669 = vst [vmem:[#allocation2 + $0x118] sm:$0xf] %v614_v34  ;;  %v752_v44 = vor.u32 %v751_v37, %v748_v36  ;;  %v766_v50 = vor.u32 %v765_v41, %v762_v40  ;;  %v3478_v53 = vld [vmem:[%s4688_s20 + $0x108] sm:$0xf]  ;;  %v771_v55 = vrot.slane %v769_v46, 5 }
  0x7c   : > { %3031 = vmatmul.bf16.gmra.mxu1 %v3695_v12  ;;  %v628_v43 = vsel %vm4734_vm2, %v623_v35, %v627_v20  ;;  %510 = vst [vmem:[#allocation2 + $0x190] sm:$0xf] %v3470_v49  ;;  %v3479_v56 = vld [vmem:[%s4688_s20 + $0x110] sm:$0xf]  ;;  %v3492_v60 = vld [vmem:[%s4688_s20 + $0xc0] sm:$0xf] }
  0x7d   : > { %3060 = vmatmul.bf16.gmra.mxu2 %v3699_v15  ;;  %670 = vst [vmem:[#allocation2 + $0x158] sm:$0xf] %v628_v43  ;;  %v753_v54 = vrot.slane %v752_v44, 4  ;;  %v3754_v57 = vld [vmem:[#allocation2 + $0x110] sm:$0xf]  ;;  %v767_v59 = vrot.slane %v766_v50, 4  ;;  %3139 = vmatpush.bf16.msra.mxu1 %v4517_v48 }
  0x7e   : > { %v4421_v58 = vld [vmem:[#allocation2 + $0x14c] sm:$0xf0]  ;;  %511 = vst [vmem:[#allocation2 + $0x1d0] sm:$0xf] %v3471_v51  ;;  %v4413_v62 = vld [vmem:[#allocation2 + $0x114] sm:$0xf] }
  0x7f   : > { %v3756_v63 = vld [vmem:[#allocation2 + $0x150] sm:$0xf0]  ;;  %v758_v0 = vsel %vm4734_vm2, %v753_v54, %v757_v45  ;;  %527 = vst [vmem:[#allocation2 + $0x194] sm:$0xf] %v3478_v53  ;;  %v3493_v1 = vld [vmem:[%s4688_s20 + $0xc4] sm:$0x1]  ;;  %v772_v3 = vsel %vm4734_vm2, %v767_v59, %v771_v55  ;;  %v3755_v14 = vor.u32 %v4421_v58, %v3754_v57 }
  0x80   : > { %3089 = vmatmul.bf16.gmra.mxu3 %v3703_v39  ;;  %v3494_v2 = vld [vmem:[%s4688_s20 + $0xc8] sm:$0xf]  ;;  %813 = vst [vmem:[#allocation2 + $0x11c] sm:$0xf] %v758_v0  ;;  %v3495_v4 = vld [vmem:[%s4688_s20 + $0xcc] sm:$0x1]  ;;  %v3759_v18 = vor.u32 %v4413_v62, %v3756_v63 }
  0x81   : > { %v630_v5 = vshrl.u32 %v3492_v60, 16  ;;  %v633_v6 = vshll.u32 %v3492_v60, 16  ;;  %814 = vst [vmem:[#allocation2 + $0x15c] sm:$0xf] %v772_v3  ;;  %v639_v8 = vshll.u32 %v3493_v1, 16  ;;  %v644_v9 = vshrl.u32 %v3494_v2, 16 }
  0x82   : > { %v3762_v7 = vld [vmem:[#allocation2 + $0x118] sm:$0xf]  ;;  %528 = vst [vmem:[#allocation2 + $0x1d4] sm:$0xf] %v3479_v56  ;;  %v647_v12 = vshll.u32 %v3494_v2, 16  ;;  %v653_v13 = vshll.u32 %v3495_v4, 16 }
  0x83   : > { %v632_v10 = vrot.slane %v630_v5, 4  ;;  %v635_v11 = vrot.slane %v633_v6, 5  ;;  %v646_v16 = vrot.slane %v644_v9, 4  ;;  %v3508_v17 = vld [vmem:[%s4688_s20 + $0x108] sm:$0xf]  ;;  %v641_v20 = vrot.slane %v639_v8, 5 }
  0x84   : > { %v4422_v15 = vld [vmem:[#allocation2 + $0x154] sm:$0xf0]  ;;  %v649_v21 = vrot.slane %v647_v12, 5  ;;  %v3509_v22 = vld [vmem:[%s4688_s20 + $0x10c] sm:$0x1]  ;;  %v655_v28 = vrot.slane %v653_v13, 5 }
  0x85   : > { %v636_v19 = vor.u32 %v635_v11, %v632_v10  ;;  %v3763_v23 = vor.u32 %v4422_v15, %v3762_v7  ;;  %v3510_v24 = vld [vmem:[%s4688_s20 + $0x110] sm:$0xf]  ;;  %v3511_v25 = vld [vmem:[%s4688_s20 + $0x114] sm:$0x1]  ;;  %v774_v29 = vshrl.u32 %v3508_v17, 16  ;;  %v4508_v30 = vld [vmem:[%s5475_s1 + $0x208] sm:$0xff] }
  0x86   : > { %v650_v27 = vor.u32 %v649_v21, %v646_v16  ;;  %v4532_v31 = vld [vmem:[%s5475_s1 + $0x2c8] sm:$0xff]  ;;  %v777_v33 = vshll.u32 %v3508_v17, 16  ;;  %v783_v34 = vshll.u32 %v3509_v22, 16  ;;  %v788_v35 = vshrl.u32 %v3510_v24, 16  ;;  %3111 = vmatpush.bf16.msra.mxu0 %v4508_v30  ;;  %v4523_v49 = vld [vmem:[%s5475_s1 + $0x280] sm:$0xff]  ;;  %v4562_v3 = vld [vmem:[%s5475_s1 + $0x3b8] sm:$0xff] }
  0x87   : > { %v637_v26 = vrot.slane %v636_v19, 4  ;;  %v4414_v32 = vld [vmem:[#allocation2 + $0x11c] sm:$0xf]  ;;  %v791_v36 = vshll.u32 %v3510_v24, 16  ;;  %v776_v40 = vrot.slane %v774_v29, 4  ;;  %v797_v41 = vshll.u32 %v3511_v25, 16  ;;  %3198 = vmatpush.bf16.msra.mxu3 %v4532_v31  ;;  %3170 = vmatpush.bf16.msra.mxu2 %v4523_v49 }
  0x88   : > { %v3764_v37 = vld [vmem:[#allocation2 + $0x158] sm:$0xf0]  ;;  %v651_v39 = vrot.slane %v650_v27, 4  ;;  %v4516_v42 = vld [vmem:[%s5475_s1 + $0x248] sm:$0xff]  ;;  %v779_v44 = vrot.slane %v777_v33, 5  ;;  %v785_v46 = vrot.slane %v783_v34, 5 }
  0x89   : > { %v642_v38 = vsel %vm4734_vm2, %v637_v26, %v641_v20  ;;  %v3767_v43 = vor.u32 %v4414_v32, %v3764_v37  ;;  %v790_v47 = vrot.slane %v788_v35, 4  ;;  %v793_v48 = vrot.slane %v791_v36, 5  ;;  %3140 = vmatpush.bf16.msra.mxu1 %v4516_v42  ;;  %v4507_v50 = vld [vmem:[%s5475_s1 + $0x200] sm:$0xff]  ;;  %v3512_v57 = vld [vmem:[%s4688_s20 + $0x8] sm:$0xf]  ;;  %v4546_v22 = vld [vmem:[%s5475_s1 + $0x338] sm:$0xff] }
  0x8a   : > { %671 = vst [vmem:[#allocation2 + $0x198] sm:$0xf] %v642_v38  ;;  %v656_v45 = vsel %vm4734_vm2, %v651_v39, %v655_v28  ;;  %v780_v51 = vor.u32 %v779_v44, %v776_v40  ;;  %v4531_v53 = vld [vmem:[%s5475_s1 + $0x2c0] sm:$0xff]  ;;  %v799_v56 = vrot.slane %v797_v41, 5  ;;  %v3513_v58 = vld [vmem:[%s4688_s20 + $0x10] sm:$0xf]  ;;  %3112 = vmatpush.bf16.msra.mxu0 %v4507_v50 }
  0x8b   : > { %3007 = vmatmul.bf16.gmra.mxu0 %v3755_v14  ;;  %672 = vst [vmem:[#allocation2 + $0x1d8] sm:$0xf] %v656_v45  ;;  %v4515_v54 = vld [vmem:[%s5475_s1 + $0x240] sm:$0xff]  ;;  %v794_v55 = vor.u32 %v793_v48, %v790_v47  ;;  %v3818_v59 = vld [vmem:[#allocation2 + $0x190] sm:$0xf]  ;;  %3199 = vmatpush.bf16.msra.mxu3 %v4531_v53  ;;  %v4570_v48 = vld [vmem:[%s5475_s1 + $0x3f8] sm:$0xff] }
  0x8c   : > { %3036 = vmatmul.bf16.gmra.mxu1 %v3759_v18  ;;  %v4437_v60 = vld [vmem:[#allocation2 + $0x1cc] sm:$0xf0]  ;;  %v781_v61 = vrot.slane %v780_v51, 4  ;;  %826 = vst [vmem:[#allocation2 + $0x20] sm:$0xf] %v3512_v57  ;;  %3279 = vmatpush.bf16.msrb.mxu2 %v4562_v3  ;;  %v4554_v49 = vld [vmem:[%s5475_s1 + $0x378] sm:$0xff] }
  0x8d   : > { %3065 = vmatmul.bf16.gmra.mxu2 %v3763_v23  ;;  %v3520_v62 = vld [vmem:[%s4688_s20 + $0x50] sm:$0xf]  ;;  %v4429_v63 = vld [vmem:[#allocation2 + $0x194] sm:$0xf]  ;;  %v795_v1 = vrot.slane %v794_v55, 4  ;;  %3141 = vmatpush.bf16.msra.mxu1 %v4515_v54  ;;  %v3819_v13 = vor.u32 %v4437_v60, %v3818_v59 }
  0x8e   : > { %v3820_v0 = vld [vmem:[#allocation2 + $0x1d0] sm:$0xf0]  ;;  %827 = vst [vmem:[#allocation2 + $0x60] sm:$0xf] %v3513_v58  ;;  %v3521_v2 = vld [vmem:[%s4688_s20 + $0x58] sm:$0xf]  ;;  %v786_v4 = vsel %vm4734_vm2, %v781_v61, %v785_v46  ;;  %3221 = vmatpush.bf16.msrb.mxu0 %v4546_v22 }
  0x8f   : > { %843 = vst [vmem:[#allocation2 + $0x24] sm:$0xf] %v3520_v62  ;;  %v3528_v5 = vld [vmem:[%s4688_s20 + $0x8] sm:$0xf]  ;;  %v3529_v6 = vld [vmem:[%s4688_s20 + $0xc] sm:$0x1]  ;;  %v800_v8 = vsel %vm4734_vm2, %v795_v1, %v799_v56  ;;  %v3823_v17 = vor.u32 %v4429_v63, %v3820_v0  ;;  %3308 = vmatpush.bf16.msrb.mxu3 %v4570_v48 }
  0x90   : > { %3094 = vmatmul.bf16.gmra.mxu3 %v3767_v43  ;;  %815 = vst [vmem:[#allocation2 + $0x19c] sm:$0xf] %v786_v4  ;;  %v3530_v9 = vld [vmem:[%s4688_s20 + $0x10] sm:$0xf]  ;;  %v3531_v10 = vld [vmem:[%s4688_s20 + $0x14] sm:$0x1] }
  0x91   : > { %v3826_v7 = vld [vmem:[#allocation2 + $0x198] sm:$0xf]  ;;  %816 = vst [vmem:[#allocation2 + $0x1dc] sm:$0xf] %v800_v8  ;;  %v868_v11 = vshrl.u32 %v3528_v5, 16  ;;  %v871_v12 = vshll.u32 %v3528_v5, 16  ;;  %3250 = vmatpush.bf16.msrb.mxu1 %v4554_v49 }
  0x92   : > { %v4438_v14 = vld [vmem:[#allocation2 + $0x1d4] sm:$0xf0]  ;;  %844 = vst [vmem:[#allocation2 + $0x64] sm:$0xf] %v3521_v2  ;;  %v877_v15 = vshll.u32 %v3529_v6, 16  ;;  %v882_v16 = vshrl.u32 %v3530_v9, 16 }
  0x93   : > { %v870_v18 = vrot.slane %v868_v11, 4  ;;  %v873_v19 = vrot.slane %v871_v12, 5  ;;  %v885_v20 = vshll.u32 %v3530_v9, 16  ;;  %v3544_v21 = vld [vmem:[%s4688_s20 + $0x50] sm:$0xf]  ;;  %v3827_v23 = vor.u32 %v4438_v14, %v3826_v7  ;;  %v4560_v8 = vld [vmem:[%s5475_s1 + $0x3a8] sm:$0xff] }
  0x94   : > { %v884_v24 = vrot.slane %v882_v16, 4  ;;  %v891_v25 = vshll.u32 %v3531_v10, 16  ;;  %v1012_v26 = vshrl.u32 %v3544_v21, 16  ;;  %v879_v28 = vrot.slane %v877_v15, 5  ;;  %v3545_v30 = vld [vmem:[%s4688_s20 + $0x54] sm:$0x1] }
  0x95   : > { %v874_v27 = vor.u32 %v873_v19, %v870_v18  ;;  %v887_v29 = vrot.slane %v885_v20, 5  ;;  %v1015_v31 = vshll.u32 %v3544_v21, 16  ;;  %v3546_v33 = vld [vmem:[%s4688_s20 + $0x58] sm:$0xf]  ;;  %v3547_v38 = vld [vmem:[%s4688_s20 + $0x5c] sm:$0x1] }
  0x96   : > { %v893_v32 = vrot.slane %v891_v25, 5  ;;  %v1014_v34 = vrot.slane %v1012_v26, 4  ;;  %v1021_v41 = vshll.u32 %v3545_v30, 16  ;;  %v1026_v42 = vshrl.u32 %v3546_v33, 16  ;;  %v4561_v55 = vld [vmem:[%s5475_s1 + $0x3b0] sm:$0xff] }
  0x97   : > { %v4430_v35 = vld [vmem:[#allocation2 + $0x19c] sm:$0xf]  ;;  %v875_v36 = vrot.slane %v874_v27, 4  ;;  %v888_v37 = vor.u32 %v887_v29, %v884_v24  ;;  %v1017_v39 = vrot.slane %v1015_v31, 5  ;;  %v1029_v43 = vshll.u32 %v3546_v33, 16  ;;  %v4545_v59 = vld [vmem:[%s5475_s1 + $0x330] sm:$0xff]  ;;  %3280 = vmatpush.bf16.msrb.mxu2 %v4561_v55 }
  0x98   : > { %v3828_v40 = vld [vmem:[#allocation2 + $0x1d8] sm:$0xf0]  ;;  %v1035_v44 = vshll.u32 %v3547_v38, 16  ;;  %v1023_v51 = vrot.slane %v1021_v41, 5  ;;  %v1028_v53 = vrot.slane %v1026_v42, 4  ;;  %v4569_v60 = vld [vmem:[%s5475_s1 + $0x3f0] sm:$0xff]  ;;  %3222 = vmatpush.bf16.msrb.mxu0 %v4545_v59 }
  0x99   : > { %v880_v45 = vsel %vm4734_vm2, %v875_v36, %v879_v28  ;;  %v889_v46 = vrot.slane %v888_v37, 4  ;;  %v1018_v47 = vor.u32 %v1017_v39, %v1014_v34  ;;  %v3831_v50 = vor.u32 %v4430_v35, %v3828_v40  ;;  %v4553_v61 = vld [vmem:[%s5475_s1 + $0x370] sm:$0xff]  ;;  %v3514_v63 = vld [vmem:[%s4688_s20 + $0x18] sm:$0xf]  ;;  %v3515_v0 = vld [vmem:[%s4688_s20 + $0x20] sm:$0xf]  ;;  %3309 = vmatpush.bf16.msrb.mxu3 %v4569_v60 }
  0x9a   : > { %987 = vst [vmem:[#allocation2 + $0x28] sm:$0xf] %v880_v45  ;;  %v1031_v54 = vrot.slane %v1029_v43, 5  ;;  %v1037_v58 = vrot.slane %v1035_v44, 5  ;;  %v3522_v2 = vld [vmem:[%s4688_s20 + $0x60] sm:$0xf]  ;;  %3251 = vmatpush.bf16.msrb.mxu1 %v4553_v61 }
  0x9b   : > { %3012 = vmatmul.bf16.gmra.mxu0 %v3819_v13  ;;  %v894_v56 = vsel %vm4734_vm2, %v889_v46, %v893_v32  ;;  %v1019_v57 = vrot.slane %v1018_v47, 4  ;;  %828 = vst [vmem:[#allocation2 + $0xa0] sm:$0xf] %v3514_v63  ;;  %v3523_v3 = vld [vmem:[%s4688_s20 + $0x68] sm:$0xf]  ;;  %3281 = vmatpush.bf16.msrb.mxu2 %v4560_v8  ;;  %v4543_v60 = vld [vmem:[%s5475_s1 + $0x320] sm:$0xff] }
  0x9c   : > { %3041 = vmatmul.bf16.gmra.mxu1 %v3823_v17  ;;  %988 = vst [vmem:[#allocation2 + $0x68] sm:$0xf] %v894_v56  ;;  %v1032_v62 = vor.u32 %v1031_v54, %v1028_v53  ;;  %v3642_v4 = vld [vmem:[#allocation2 + $0x20] sm:$0xf]  ;;  %v3532_v7 = vld [vmem:[%s4688_s20 + $0x18] sm:$0xf] }
  0x9d   : > { %3070 = vmatmul.bf16.gmra.mxu2 %v3827_v23  ;;  %v1024_v1 = vsel %vm4734_vm2, %v1019_v57, %v1023_v51  ;;  %v4391_v5 = vld [vmem:[#allocation2 + $0x5c] sm:$0xf0]  ;;  %v4383_v9 = vld [vmem:[#allocation2 + $0x24] sm:$0xf]  ;;  %829 = vst [vmem:[#allocation2 + $0xe0] sm:$0xf] %v3515_v0 }
  0x9e   : > { %v1033_v6 = vrot.slane %v1032_v62, 4  ;;  %1131 = vst [vmem:[#allocation2 + $0x2c] sm:$0xf] %v1024_v1  ;;  %v3644_v10 = vld [vmem:[#allocation2 + $0x60] sm:$0xf0]  ;;  %v896_v16 = vshrl.u32 %v3532_v7, 16  ;;  %v3643_v25 = vor.u32 %v4391_v5, %v3642_v4 }
  0x9f   : > { %v3533_v11 = vld [vmem:[%s4688_s20 + $0x1c] sm:$0x1]  ;;  %v3534_v12 = vld [vmem:[%s4688_s20 + $0x20] sm:$0xf]  ;;  %845 = vst [vmem:[#allocation2 + $0xa4] sm:$0xf] %v3522_v2  ;;  %v3647_v29 = vor.u32 %v4383_v9, %v3644_v10 }
  0xa0   : > { %3099 = vmatmul.bf16.gmra.mxu3 %v3831_v50  ;;  %v5169_v13 = vld [vmem:[%s5476_s2] ss:$0 sm:$0xff]  ;;  %v1038_v14 = vsel %vm4734_vm2, %v1033_v6, %v1037_v58  ;;  %v3535_v15 = vld [vmem:[%s4688_s20 + $0x24] sm:$0x1]  ;;  %v899_v17 = vshll.u32 %v3532_v7, 16  ;;  %v905_v19 = vshll.u32 %v3533_v11, 16 }
  0xa1   : > { %v3650_v18 = vld [vmem:[#allocation2 + $0x28] sm:$0xf]  ;;  %1132 = vst [vmem:[#allocation2 + $0x6c] sm:$0xf] %v1038_v14  ;;  %v910_v20 = vshrl.u32 %v3534_v12, 16  ;;  %v898_v21 = vrot.slane %v896_v16, 4 }
  0xa2   : > { %846 = vst [vmem:[#allocation2 + $0xe4] sm:$0xf] %v3523_v3  ;;  %v901_v22 = vrot.slane %v899_v17, 5  ;;  %v913_v23 = vshll.u32 %v3534_v12, 16  ;;  %v919_v24 = vshll.u32 %v3535_v15, 16  ;;  %v907_v31 = vrot.slane %v905_v19, 5 }
  0xa3   : > { %v4392_v26 = vld [vmem:[#allocation2 + $0x64] sm:$0xf0]  ;;  %v912_v27 = vrot.slane %v910_v20, 4  ;;  %v3548_v28 = vld [vmem:[%s4688_s20 + $0x60] sm:$0xf] }
  0xa4   : > { %v902_v30 = vor.u32 %v901_v22, %v898_v21  ;;  %v915_v32 = vrot.slane %v913_v23, 5  ;;  %v3549_v33 = vld [vmem:[%s4688_s20 + $0x64] sm:$0x1]  ;;  %v3651_v36 = vor.u32 %v4392_v26, %v3650_v18  ;;  %v921_v37 = vrot.slane %v919_v24, 5  ;;  %v3550_v38 = vld [vmem:[%s4688_s20 + $0x68] sm:$0xf] }
  0xa5   : > { %v4384_v40 = vld [vmem:[#allocation2 + $0x2c] sm:$0xf]  ;;  %v1040_v43 = vshrl.u32 %v3548_v28, 16  ;;  %v1043_v47 = vshll.u32 %v3548_v28, 16  ;;  %v1049_v48 = vshll.u32 %v3549_v33, 16  ;;  %v1054_v49 = vshrl.u32 %v3550_v38, 16 }
  0xa6   : > { %v903_v41 = vrot.slane %v902_v30, 4  ;;  %v916_v42 = vor.u32 %v915_v32, %v912_v27  ;;  %v4544_v44 = vld [vmem:[%s5475_s1 + $0x328] sm:$0xff]  ;;  %v4559_v57 = vld [vmem:[%s5475_s1 + $0x3a0] sm:$0xff]  ;;  %v1057_v0 = vshll.u32 %v3550_v38, 16  ;;  %v3517_v6 = vld [vmem:[%s4688_s20 + $0x30] sm:$0xf] }
  0xa7   : > { %v4568_v45 = vld [vmem:[%s5475_s1 + $0x3e8] sm:$0xff]  ;;  %v1042_v56 = vrot.slane %v1040_v43, 4  ;;  %v1045_v59 = vrot.slane %v1043_v47, 5  ;;  %3223 = vmatpush.bf16.msrb.mxu0 %v4544_v44  ;;  %v1051_v62 = vrot.slane %v1049_v48, 5  ;;  %v1056_v63 = vrot.slane %v1054_v49, 4  ;;  %v4551_v1 = vld [vmem:[%s5475_s1 + $0x360] sm:$0xff]  ;;  %3282 = vmatpush.bf16.msrb.mxu2 %v4559_v57 }
  0xa8   : > { %v2882_v34 = vpop.f32.mrf.mxu0  ;;  %v3551_v46 = vld [vmem:[%s4688_s20 + $0x6c] sm:$0x1]  ;;  %v908_v54 = vsel %vm4734_vm2, %v903_v41, %v907_v31  ;;  %v917_v55 = vrot.slane %v916_v42, 4  ;;  %3310 = vmatpush.bf16.msrb.mxu3 %v4568_v45  ;;  %v3516_v2 = vld [vmem:[%s4688_s20 + $0x28] sm:$0xf]  ;;  %v4567_v5 = vld [vmem:[%s5475_s1 + $0x3e0] sm:$0xff] }
  0xa9   : > { %v2911_v35 = vpop.f32.mrf.mxu1  ;;  %v2883_v39 = vadd.f32 %v5169_v13, %v2882_v34  ;;  %v4552_v50 = vld [vmem:[%s5475_s1 + $0x368] sm:$0xff]  ;;  %989 = vst [vmem:[#allocation2 + $0xa8] sm:$0xf] %v908_v54  ;;  %v1046_v3 = vor.u32 %v1045_v59, %v1042_v56  ;;  %v1063_v4 = vshll.u32 %v3551_v46, 16  ;;  %v1059_v8 = vrot.slane %v1057_v0, 5  ;;  %v4558_v38 = vld [vmem:[%s5475_s1 + $0x398] sm:$0xff] }
  0xaa   : > { %v3652_v53 = vld [vmem:[#allocation2 + $0x68] sm:$0xf0]  ;;  %v922_v61 = vsel %vm4734_vm2, %v917_v55, %v921_v37  ;;  %3252 = vmatpush.bf16.msrb.mxu1 %v4552_v50  ;;  %830 = vst [vmem:[#allocation2 + $0x120] sm:$0xf] %v3516_v2  ;;  %v3524_v9 = vld [vmem:[%s4688_s20 + $0x70] sm:$0xf] }
  0xab   : > { %v2912_v51 = vadd.f32 %v2911_v35, %v2883_v39  ;;  %3113 = vmatmul.bf16.vlgmr.msra.gmra.mxu0 %v3643_v25  ;;  %v3655_v58 = vor.u32 %v4384_v40, %v3652_v53  ;;  %990 = vst [vmem:[#allocation2 + $0xe8] sm:$0xf] %v922_v61  ;;  %v1047_v14 = vrot.slane %v1046_v3, 4  ;;  %v1065_v15 = vrot.slane %v1063_v4, 5  ;;  %v3525_v16 = vld [vmem:[%s4688_s20 + $0x78] sm:$0xf]  ;;  %3283 = vmatpush.bf16.msrb.mxu2 %v4558_v38 }
  0xac   : > { %3142 = vmatmul.bf16.vlgmr.msra.gmra.mxu1 %v3647_v29  ;;  %3224 = vmatpush.bf16.msrb.mxu0 %v4543_v60  ;;  %831 = vst [vmem:[#allocation2 + $0x160] sm:$0xf] %v3517_v6  ;;  %v5209_v18 = vld [vmem:[#allocation2 + $0xa0] sm:$0xf]  ;;  %v4399_v20 = vld [vmem:[#allocation2 + $0xa4] sm:$0xf]  ;;  %v1060_v22 = vor.u32 %v1059_v8, %v1056_v63 }
  0xad   : > { %3171 = vmatmul.bf16.vlgmr.msra.gmra.mxu2 %v3651_v36  ;;  %v4407_v19 = vld [vmem:[#allocation2 + $0xdc] sm:$0xf0]  ;;  %v3708_v21 = vld [vmem:[#allocation2 + $0xe0] sm:$0xf0]  ;;  %847 = vst [vmem:[#allocation2 + $0x124] sm:$0xf] %v3524_v9  ;;  %v1052_v25 = vsel %vm4734_vm2, %v1047_v14, %v1051_v62  ;;  %3311 = vmatpush.bf16.msrb.mxu3 %v4567_v5 }
  0xae   : > { %3253 = vmatpush.bf16.msrb.mxu1 %v4551_v1  ;;  %v3536_v23 = vld [vmem:[%s4688_s20 + $0x28] sm:$0xf]  ;;  %v3537_v24 = vld [vmem:[%s4688_s20 + $0x2c] sm:$0x1]  ;;  %848 = vst [vmem:[#allocation2 + $0x164] sm:$0xf] %v3525_v16  ;;  %v3707_v45 = vor.u32 %v4407_v19, %v5209_v18  ;;  %v3711_v46 = vor.u32 %v4399_v20, %v3708_v21 }
  0xaf   : > { %v3538_v26 = vld [vmem:[%s4688_s20 + $0x30] sm:$0xf]  ;;  %v3539_v27 = vld [vmem:[%s4688_s20 + $0x34] sm:$0x1]  ;;  %v1061_v31 = vrot.slane %v1060_v22, 4  ;;  %v924_v32 = vshrl.u32 %v3536_v23, 16 }
  0xb0   : > { %v2940_v7 = vpop.f32.mrf.mxu2  ;;  %v2884_v11 = vpop.f32.mrf.mxu0  ;;  %3200 = vmatmul.bf16.vlgmr.msra.gmra.mxu3 %v3655_v58  ;;  %v3714_v30 = vld [vmem:[#allocation2 + $0xa8] sm:$0xf]  ;;  %1133 = vst [vmem:[#allocation2 + $0xac] sm:$0xf] %v1052_v25  ;;  %v927_v34 = vshll.u32 %v3536_v23, 16  ;;  %v933_v35 = vshll.u32 %v3537_v24, 16 }
  0xb1   : > { %v2941_v10 = vadd.f32 %v2940_v7, %v2912_v51  ;;  %v2913_v12 = vpop.f32.mrf.mxu1  ;;  %v2885_v17 = vadd.f32 %v5169_v13, %v2884_v11  ;;  %v2969_v28 = vpop.f32.mrf.mxu3  ;;  %v938_v36 = vshrl.u32 %v3538_v26, 16  ;;  %v3552_v37 = vld [vmem:[%s4688_s20 + $0x70] sm:$0xf]  ;;  %v1066_v40 = vsel %vm4734_vm2, %v1061_v31, %v1065_v15  ;;  %v4542_v44 = vld [vmem:[%s5475_s1 + $0x318] sm:$0xff]  ;;  %v3553_v60 = vld [vmem:[%s4688_s20 + $0x74] sm:$0x1] }
  0xb2   : > { %v4408_v39 = vld [vmem:[#allocation2 + $0xe4] sm:$0xf0]  ;;  %v926_v41 = vrot.slane %v924_v32, 4  ;;  %v941_v42 = vshll.u32 %v3538_v26, 16  ;;  %v947_v43 = vshll.u32 %v3539_v27, 16  ;;  %v929_v47 = vrot.slane %v927_v34, 5  ;;  %3225 = vmatpush.bf16.msrb.mxu0 %v4542_v44 }
  0xb3   : > { %v2914_v29 = vadd.f32 %v2913_v12, %v2885_v17  ;;  %v5217_v33 = vadd.f32 %v2969_v28, %v2941_v10  ;;  %1134 = vst [vmem:[#allocation2 + $0xec] sm:$0xf] %v1066_v40  ;;  %v3715_v49 = vor.u32 %v4408_v39, %v3714_v30  ;;  %v940_v50 = vrot.slane %v938_v36, 4  ;;  %v3554_v61 = vld [vmem:[%s4688_s20 + $0x78] sm:$0xf]  ;;  %v4557_v15 = vld [vmem:[%s5475_s1 + $0x390] sm:$0xff] }
  0xb4   : > { %v943_v51 = vrot.slane %v941_v42, 5  ;;  %v1068_v53 = vshrl.u32 %v3552_v37, 16  ;;  %v930_v57 = vor.u32 %v929_v47, %v926_v41  ;;  %v935_v58 = vrot.slane %v933_v35, 5  ;;  %v3555_v0 = vld [vmem:[%s4688_s20 + $0x7c] sm:$0x1]  ;;  %v4541_v16 = vld [vmem:[%s5475_s1 + $0x310] sm:$0xff]  ;;  %3284 = vmatpush.bf16.msrb.mxu2 %v4557_v15 }
  0xb5   : > { %v949_v59 = vrot.slane %v947_v43, 5  ;;  %v1071_v2 = vshll.u32 %v3552_v37, 16  ;;  %v1077_v5 = vshll.u32 %v3553_v60, 16  ;;  %v1082_v6 = vshrl.u32 %v3554_v61, 16  ;;  %v4566_v7 = vld [vmem:[%s5475_s1 + $0x3d8] sm:$0xff]  ;;  %v4565_v21 = vld [vmem:[%s5475_s1 + $0x3d0] sm:$0xff] }
  0xb6   : > { %v944_v63 = vor.u32 %v943_v51, %v940_v50  ;;  %v1070_v1 = vrot.slane %v1068_v53, 4  ;;  %v931_v4 = vrot.slane %v930_v57, 4  ;;  %v1085_v12 = vshll.u32 %v3554_v61, 16  ;;  %v4550_v14 = vld [vmem:[%s5475_s1 + $0x358] sm:$0xff]  ;;  %3312 = vmatpush.bf16.msrb.mxu3 %v4566_v7  ;;  %3226 = vmatpush.bf16.msrb.mxu0 %v4541_v16  ;;  %v3519_v30 = vld [vmem:[%s4688_s20 + $0x40] sm:$0xf] }
  0xb7   : > { %v4400_v3 = vld [vmem:[#allocation2 + $0xac] sm:$0xf]  ;;  %v1073_v11 = vrot.slane %v1071_v2, 5  ;;  %v1079_v19 = vrot.slane %v1077_v5, 5  ;;  %v1084_v20 = vrot.slane %v1082_v6, 4  ;;  %v1091_v27 = vshll.u32 %v3555_v0, 16  ;;  %3254 = vmatpush.bf16.msrb.mxu1 %v4550_v14 }
  0xb8   : > { %v2942_v48 = vpop.f32.mrf.mxu2  ;;  %v2887_v55 = vpop.f32.mrf.mxu0  ;;  %v945_v10 = vrot.slane %v944_v63, 4  ;;  %v936_v18 = vsel %vm4734_vm2, %v931_v4, %v935_v58  ;;  %v3518_v22 = vld [vmem:[%s4688_s20 + $0x38] sm:$0xf]  ;;  %v1087_v26 = vrot.slane %v1085_v12, 5  ;;  %v3526_v36 = vld [vmem:[%s4688_s20 + $0x80] sm:$0xf] }
  0xb9   : > { %v2943_v54 = vadd.f32 %v2942_v48, %v2914_v29  ;;  %v2916_v56 = vpop.f32.mrf.mxu1  ;;  %v2888_v62 = vadd.f32 %v5169_v13, %v2887_v55  ;;  %v2971_v8 = vpop.f32.mrf.mxu3  ;;  %991 = vst [vmem:[#allocation2 + $0x128] sm:$0xf] %v936_v18  ;;  %v1074_v25 = vor.u32 %v1073_v11, %v1070_v1  ;;  %v4549_v29 = vld [vmem:[%s5475_s1 + $0x350] sm:$0xff]  ;;  %v1093_v35 = vrot.slane %v1091_v27, 5  ;;  %v3527_v40 = vld [vmem:[%s4688_s20 + $0x88] sm:$0xf] }
  0xba   : > { %v3716_v23 = vld [vmem:[#allocation2 + $0xe8] sm:$0xf0]  ;;  %v950_v24 = vsel %vm4734_vm2, %v945_v10, %v949_v59  ;;  %v1088_v34 = vor.u32 %v1087_v26, %v1084_v20  ;;  %832 = vst [vmem:[#allocation2 + $0x1a0] sm:$0xf] %v3518_v22  ;;  %3313 = vmatpush.bf16.msrb.mxu3 %v4565_v21  ;;  %v3540_v41 = vld [vmem:[%s4688_s20 + $0x38] sm:$0xf] }
  0xbb   : > { %v2917_v9 = vadd.f32 %v2916_v56, %v2888_v62  ;;  %3118 = vmatmul.bf16.gmra.mxu0 %v3707_v45  ;;  %v5245_v17 = vadd.f32 %v2971_v8, %v2943_v54  ;;  %v3719_v28 = vor.u32 %v4400_v3, %v3716_v23  ;;  %992 = vst [vmem:[#allocation2 + $0x168] sm:$0xf] %v950_v24  ;;  %v1075_v32 = vrot.slane %v1074_v25, 4  ;;  %v3770_v43 = vld [vmem:[#allocation2 + $0x120] sm:$0xf]  ;;  %v4556_v4 = vld [vmem:[%s5475_s1 + $0x388] sm:$0xff] }
  0xbc   : > { %3147 = vmatmul.bf16.gmra.mxu1 %v3711_v46  ;;  %833 = vst [vmem:[#allocation2 + $0x1e0] sm:$0xf] %v3519_v30  ;;  %v4423_v44 = vld [vmem:[#allocation2 + $0x15c] sm:$0xf0]  ;;  %v4415_v45 = vld [vmem:[#allocation2 + $0x124] sm:$0xf]  ;;  %3285 = vmatpush.bf16.msrb.mxu2 %v4556_v4 }
  0xbd   : > { %3176 = vmatmul.bf16.gmra.mxu2 %v3715_v49  ;;  %v3772_v46 = vld [vmem:[#allocation2 + $0x160] sm:$0xf0]  ;;  %v1080_v47 = vsel %vm4734_vm2, %v1075_v32, %v1079_v19  ;;  %v1089_v48 = vrot.slane %v1088_v34, 4  ;;  %3255 = vmatpush.bf16.msrb.mxu1 %v4549_v29  ;;  %849 = vst [vmem:[#allocation2 + $0x1a4] sm:$0xf] %v3526_v36  ;;  %v952_v50 = vshrl.u32 %v3540_v41, 16  ;;  %v3771_v5 = vor.u32 %v4423_v44, %v3770_v43 }
  0xbe   : > { %v3541_v49 = vld [vmem:[%s4688_s20 + $0x3c] sm:$0x1]  ;;  %1135 = vst [vmem:[#allocation2 + $0x12c] sm:$0xf] %v1080_v47  ;;  %v3542_v51 = vld [vmem:[%s4688_s20 + $0x40] sm:$0xf]  ;;  %v3775_v6 = vor.u32 %v4415_v45, %v3772_v46 }
  0xbf   : > { %v3543_v53 = vld [vmem:[%s4688_s20 + $0x44] sm:$0x1]  ;;  %v1094_v55 = vsel %vm4734_vm2, %v1089_v48, %v1093_v35  ;;  %850 = vst [vmem:[#allocation2 + $0x1e4] sm:$0xf] %v3527_v40  ;;  %v954_v56 = vrot.slane %v952_v50, 4  ;;  %v955_v57 = vshll.u32 %v3540_v41, 16 }
  0xc0   : > { %v2945_v31 = vpop.f32.mrf.mxu2  ;;  %v2889_v38 = vpop.f32.mrf.mxu0  ;;  %3205 = vmatmul.bf16.gmra.mxu3 %v3719_v28  ;;  %v3556_v58 = vld [vmem:[%s4688_s20 + $0x80] sm:$0xf]  ;;  %v3778_v60 = vld [vmem:[#allocation2 + $0x128] sm:$0xf]  ;;  %1136 = vst [vmem:[#allocation2 + $0x16c] sm:$0xf] %v1094_v55 }
  0xc1   : > { %v2946_v37 = vadd.f32 %v2945_v31, %v2917_v9  ;;  %v2918_v39 = vpop.f32.mrf.mxu1  ;;  %v2890_v42 = vadd.f32 %v5169_v13, %v2889_v38  ;;  %v961_v61 = vshll.u32 %v3541_v49, 16  ;;  %v966_v62 = vshrl.u32 %v3542_v51, 16  ;;  %v3557_v8 = vld [vmem:[%s4688_s20 + $0x84] sm:$0x1]  ;;  %v3558_v15 = vld [vmem:[%s4688_s20 + $0x88] sm:$0xf] }
  0xc2   : > { %v4424_v0 = vld [vmem:[#allocation2 + $0x164] sm:$0xf0]  ;;  %v957_v1 = vrot.slane %v955_v57, 5  ;;  %v969_v2 = vshll.u32 %v3542_v51, 16  ;;  %v975_v3 = vshll.u32 %v3543_v53, 16  ;;  %v1096_v21 = vshrl.u32 %v3556_v58, 16 }
  0xc3   : > { %v2919_v54 = vadd.f32 %v2918_v39, %v2890_v42  ;;  %v2974_v59 = vpop.f32.mrf.mxu3  ;;  %v968_v7 = vrot.slane %v966_v62, 4  ;;  %v3779_v10 = vor.u32 %v4424_v0, %v3778_v60  ;;  %v963_v12 = vrot.slane %v961_v61, 5  ;;  %v4540_v28 = vld [vmem:[%s5475_s1 + $0x308] sm:$0xff]  ;;  %v4555_v41 = vld [vmem:[%s5475_s1 + $0x380] sm:$0xff]  ;;  %v3576_v4 = vld [vmem:[%s4688_s20 + $0x98] sm:$0xf] }
  0xc4   : > { %v5271_v63 = vadd.f32 %v2974_v59, %v2946_v37  ;;  %v958_v11 = vor.u32 %v957_v1, %v954_v56  ;;  %v971_v14 = vrot.slane %v969_v2, 5  ;;  %v977_v20 = vrot.slane %v975_v3, 5  ;;  %v4564_v29 = vld [vmem:[%s5475_s1 + $0x3c8] sm:$0xff]  ;;  %3227 = vmatpush.bf16.msrb.mxu0 %v4540_v28  ;;  %v4539_v47 = vld [vmem:[%s5475_s1 + $0x300] sm:$0xff]  ;;  %3286 = vmatpush.bf16.msrb.mxu2 %v4555_v41 }
  0xc5   : > { %v1099_v22 = vshll.u32 %v3556_v58, 16  ;;  %v4416_v24 = vld [vmem:[#allocation2 + $0x12c] sm:$0xf]  ;;  %v1105_v27 = vshll.u32 %v3557_v8, 16  ;;  %v1098_v31 = vrot.slane %v1096_v21, 4  ;;  %v1110_v34 = vshrl.u32 %v3558_v15, 16  ;;  %3314 = vmatpush.bf16.msrb.mxu3 %v4564_v29 }
  0xc6   : > { %v959_v25 = vrot.slane %v958_v11, 4  ;;  %v972_v26 = vor.u32 %v971_v14, %v968_v7  ;;  %v3559_v30 = vld [vmem:[%s4688_s20 + $0x8c] sm:$0x1]  ;;  %v1113_v35 = vshll.u32 %v3558_v15, 16  ;;  %v4547_v53 = vld [vmem:[%s5475_s1 + $0x340] sm:$0xff]  ;;  %v1193_v21 = vshll.u32 %v3576_v4, 16 }
  0xc7   : > { %v1101_v32 = vrot.slane %v1099_v22, 5  ;;  %v3780_v37 = vld [vmem:[#allocation2 + $0x168] sm:$0xf0]  ;;  %v1107_v45 = vrot.slane %v1105_v27, 5  ;;  %v1112_v46 = vrot.slane %v1110_v34, 4  ;;  %v1119_v51 = vshll.u32 %v3559_v30, 16 }
  0xc8   : > { %v2947_v9 = vpop.f32.mrf.mxu2  ;;  %v2892_v18 = vpop.f32.mrf.mxu0  ;;  %v964_v38 = vsel %vm4734_vm2, %v959_v25, %v963_v12  ;;  %v973_v39 = vrot.slane %v972_v26, 4  ;;  %v4548_v40 = vld [vmem:[%s5475_s1 + $0x348] sm:$0xff]  ;;  %v3783_v43 = vor.u32 %v4416_v24, %v3780_v37  ;;  %v1115_v50 = vrot.slane %v1113_v35, 5  ;;  %v4563_v56 = vld [vmem:[%s5475_s1 + $0x3c0] sm:$0xff]  ;;  %3228 = vmatpush.bf16.msrb.mxu0 %v4539_v47 }
  0xc9   : > { %v2948_v16 = vadd.f32 %v2947_v9, %v2919_v54  ;;  %v2921_v19 = vpop.f32.mrf.mxu1  ;;  %v2893_v23 = vadd.f32 %v5169_v13, %v2892_v18  ;;  %993 = vst [vmem:[#allocation2 + $0x1a8] sm:$0xf] %v964_v38  ;;  %v1102_v44 = vor.u32 %v1101_v32, %v1098_v31  ;;  %3256 = vmatpush.bf16.msrb.mxu1 %v4548_v40  ;;  %v3560_v54 = vld [vmem:[%s4688_s20 + $0x98] sm:$0xf]  ;;  %v3561_v57 = vld [vmem:[%s4688_s20 + $0xa0] sm:$0xf] }
  0xca   : > { %v978_v49 = vsel %vm4734_vm2, %v973_v39, %v977_v20  ;;  %v1116_v59 = vor.u32 %v1115_v50, %v1112_v46  ;;  %v1121_v60 = vrot.slane %v1119_v51, 5  ;;  %1148 = vst [vmem:[#allocation2 + $0x30] sm:$0xf] %v3560_v54  ;;  %v3568_v61 = vld [vmem:[%s4688_s20 + $0xe0] sm:$0xf]  ;;  %3315 = vmatpush.bf16.msrb.mxu3 %v4563_v56  ;;  %v1195_v29 = vrot.slane %v1193_v21, 5 }
  0xcb   : > { %v2922_v36 = vadd.f32 %v2921_v19, %v2893_v23  ;;  %3123 = vmatmul.bf16.gmra.mxu0 %v3771_v5  ;;  %v2976_v42 = vpop.f32.mrf.mxu3  ;;  %994 = vst [vmem:[#allocation2 + $0x1e8] sm:$0xf] %v978_v49  ;;  %v1103_v55 = vrot.slane %v1102_v44, 4  ;;  %v3569_v3 = vld [vmem:[%s4688_s20 + $0xe8] sm:$0xf] }
  0xcc   : > { %3152 = vmatmul.bf16.gmra.mxu1 %v3775_v6  ;;  %v5297_v48 = vadd.f32 %v2976_v42, %v2948_v16  ;;  %1149 = vst [vmem:[#allocation2 + $0x70] sm:$0xf] %v3561_v57  ;;  %v3834_v6 = vld [vmem:[#allocation2 + $0x1a0] sm:$0xf]  ;;  %v1117_v8 = vrot.slane %v1116_v59, 4 }
  0xcd   : > { %3181 = vmatmul.bf16.gmra.mxu2 %v3779_v10  ;;  %v1108_v2 = vsel %vm4734_vm2, %v1103_v55, %v1107_v45  ;;  %v4439_v7 = vld [vmem:[#allocation2 + $0x1dc] sm:$0xf0]  ;;  %3257 = vmatpush.bf16.msrb.mxu1 %v4547_v53  ;;  %v3577_v9 = vld [vmem:[%s4688_s20 + $0x9c] sm:$0x1]  ;;  %v1190_v10 = vshrl.u32 %v3576_v4, 16 }
  0xce   : > { %1137 = vst [vmem:[#allocation2 + $0x1ac] sm:$0xf] %v1108_v2  ;;  %v4431_v11 = vld [vmem:[#allocation2 + $0x1a4] sm:$0xf]  ;;  %v3578_v14 = vld [vmem:[%s4688_s20 + $0xa0] sm:$0xf]  ;;  %v1122_v19 = vsel %vm4734_vm2, %v1117_v8, %v1121_v60  ;;  %v3835_v31 = vor.u32 %v4439_v7, %v3834_v6 }
  0xcf   : > { %v3836_v12 = vld [vmem:[#allocation2 + $0x1e0] sm:$0xf0]  ;;  %1165 = vst [vmem:[#allocation2 + $0x34] sm:$0xf] %v3568_v61  ;;  %v1192_v20 = vrot.slane %v1190_v10, 4  ;;  %v1199_v23 = vshll.u32 %v3577_v9, 16 }
  0xd0   : > { %v2950_v58 = vpop.f32.mrf.mxu2  ;;  %v2894_v0 = vpop.f32.mrf.mxu0  ;;  %3210 = vmatmul.bf16.gmra.mxu3 %v3783_v43  ;;  %v3579_v15 = vld [vmem:[%s4688_s20 + $0xa4] sm:$0x1]  ;;  %v3842_v18 = vld [vmem:[#allocation2 + $0x1a8] sm:$0xf]  ;;  %1166 = vst [vmem:[#allocation2 + $0x74] sm:$0xf] %v3569_v3 }
  0xd1   : > { %v2951_v62 = vadd.f32 %v2950_v58, %v2922_v36  ;;  %v2923_v1 = vpop.f32.mrf.mxu1  ;;  %v2895_v5 = vadd.f32 %v5169_v13, %v2894_v0  ;;  %1138 = vst [vmem:[#allocation2 + $0x1ec] sm:$0xf] %v1122_v19  ;;  %v1204_v24 = vshrl.u32 %v3578_v14, 16  ;;  %v1207_v25 = vshll.u32 %v3578_v14, 16  ;;  %v3592_v30 = vld [vmem:[%s4688_s20 + $0xe0] sm:$0xf] }
  0xd2   : > { %v1213_v26 = vshll.u32 %v3579_v15, 16  ;;  %v4440_v28 = vld [vmem:[#allocation2 + $0x1e4] sm:$0xf0]  ;;  %v3839_v36 = vor.u32 %v4431_v11, %v3836_v12  ;;  %v1196_v37 = vor.u32 %v1195_v29, %v1192_v20  ;;  %v1201_v38 = vrot.slane %v1199_v23, 5  ;;  %v3593_v39 = vld [vmem:[%s4688_s20 + $0xe4] sm:$0x1] }
  0xd3   : > { %v2924_v16 = vadd.f32 %v2923_v1, %v2895_v5  ;;  %v2979_v22 = vpop.f32.mrf.mxu3  ;;  %v1206_v32 = vrot.slane %v1204_v24, 4  ;;  %v1209_v34 = vrot.slane %v1207_v25, 5  ;;  %v1334_v40 = vshrl.u32 %v3592_v30, 16  ;;  %v3594_v47 = vld [vmem:[%s4688_s20 + $0xe8] sm:$0xf] }
  0xd4   : > { %v5320_v27 = vadd.f32 %v2979_v22, %v2951_v62  ;;  %v3843_v44 = vor.u32 %v4440_v28, %v3842_v18  ;;  %v1215_v46 = vrot.slane %v1213_v26, 5  ;;  %v1197_v51 = vrot.slane %v1196_v37, 4  ;;  %v3595_v56 = vld [vmem:[%s4688_s20 + $0xec] sm:$0x1]  ;;  %v3562_v1 = vld [vmem:[%s4688_s20 + $0xa8] sm:$0xf] }
  0xd5   : > { %v1210_v45 = vor.u32 %v1209_v34, %v1206_v32  ;;  %v4432_v50 = vld [vmem:[#allocation2 + $0x1ac] sm:$0xf]  ;;  %v1336_v53 = vrot.slane %v1334_v40, 4  ;;  %v1337_v54 = vshll.u32 %v3592_v30, 16  ;;  %v1343_v57 = vshll.u32 %v3593_v39, 16 }
  0xd6   : > { %v1348_v58 = vshrl.u32 %v3594_v47, 16  ;;  %v1351_v59 = vshll.u32 %v3594_v47, 16  ;;  %v1202_v62 = vsel %vm4734_vm2, %v1197_v51, %v1201_v38  ;;  %v3563_v7 = vld [vmem:[%s4688_s20 + $0xb0] sm:$0xf]  ;;  %v1357_v11 = vshll.u32 %v3595_v56, 16 }
  0xd7   : > { %v1211_v55 = vrot.slane %v1210_v45, 4  ;;  %v1339_v0 = vrot.slane %v1337_v54, 5  ;;  %1309 = vst [vmem:[#allocation2 + $0x38] sm:$0xf] %v1202_v62  ;;  %v1345_v5 = vrot.slane %v1343_v57, 5 }
  0xd8   : > { %v2952_v35 = vpop.f32.mrf.mxu2  ;;  %v2897_v42 = vpop.f32.mrf.mxu0  ;;  %v3844_v61 = vld [vmem:[#allocation2 + $0x1e8] sm:$0xf0]  ;;  %v1350_v6 = vrot.slane %v1348_v58, 4  ;;  %v1353_v10 = vrot.slane %v1351_v59, 5  ;;  %v3570_v12 = vld [vmem:[%s4688_s20 + $0xf0] sm:$0xf] }
  0xd9   : > { %v2953_v41 = vadd.f32 %v2952_v35, %v2924_v16  ;;  %v2926_v43 = vpop.f32.mrf.mxu1  ;;  %v2898_v49 = vadd.f32 %v5169_v13, %v2897_v42  ;;  %v3847_v3 = vor.u32 %v4432_v50, %v3844_v61  ;;  %v1216_v4 = vsel %vm4734_vm2, %v1211_v55, %v1215_v46  ;;  %1150 = vst [vmem:[#allocation2 + $0xb0] sm:$0xf] %v3562_v1  ;;  %v3571_v14 = vld [vmem:[%s4688_s20 + $0xf8] sm:$0xf]  ;;  %v3580_v15 = vld [vmem:[%s4688_s20 + $0xa8] sm:$0xf] }
  0xda   : > { %1310 = vst [vmem:[#allocation2 + $0x78] sm:$0xf] %v1216_v4  ;;  %v1340_v9 = vor.u32 %v1339_v0, %v1336_v53  ;;  %v5338_v18 = vld [vmem:[#allocation2 + $0x30] sm:$0xf]  ;;  %v1354_v21 = vor.u32 %v1353_v10, %v1350_v6  ;;  %v1359_v22 = vrot.slane %v1357_v11, 5  ;;  %v1221_v38 = vshll.u32 %v3580_v15, 16 }
  0xdb   : > { %v2927_v60 = vadd.f32 %v2926_v43, %v2898_v49  ;;  %3128 = vmatmul.bf16.gmra.mxu0 %v3835_v31  ;;  %v2981_v2 = vpop.f32.mrf.mxu3  ;;  %v5340_v19 = vld [vmem:[#allocation2 + $0x6c] sm:$0xf0]  ;;  %1151 = vst [vmem:[#allocation2 + $0xf0] sm:$0xf] %v3563_v7  ;;  %v3581_v23 = vld [vmem:[%s4688_s20 + $0xac] sm:$0x1] }
  0xdc   : > { %3157 = vmatmul.bf16.gmra.mxu1 %v3839_v36  ;;  %v5333_v8 = vadd.f32 %v2981_v2, %v2953_v41  ;;  %v1341_v20 = vrot.slane %v1340_v9, 4  ;;  %v4385_v28 = vld [vmem:[#allocation2 + $0x34] sm:$0xf]  ;;  %1167 = vst [vmem:[#allocation2 + $0xb4] sm:$0xf] %v3570_v12  ;;  %v1355_v35 = vrot.slane %v1354_v21, 4  ;;  %v3659_v49 = vor.u32 %v5340_v19, %v5338_v18 }
  0xdd   : > { %3186 = vmatmul.bf16.gmra.mxu2 %v3843_v44  ;;  %v3660_v29 = vld [vmem:[#allocation2 + $0x70] sm:$0xf0]  ;;  %v3582_v30 = vld [vmem:[%s4688_s20 + $0xb0] sm:$0xf]  ;;  %1168 = vst [vmem:[#allocation2 + $0xf4] sm:$0xf] %v3571_v14 }
  0xde   : > { %v3583_v31 = vld [vmem:[%s4688_s20 + $0xb4] sm:$0x1]  ;;  %v1346_v34 = vsel %vm4734_vm2, %v1341_v20, %v1345_v5  ;;  %v1218_v36 = vshrl.u32 %v3580_v15, 16  ;;  %v3596_v37 = vld [vmem:[%s4688_s20 + $0xf0] sm:$0xf]  ;;  %v1227_v39 = vshll.u32 %v3581_v23, 16  ;;  %v1360_v44 = vsel %vm4734_vm2, %v1355_v35, %v1359_v22 }
  0xdf   : > { %1453 = vst [vmem:[#allocation2 + $0x3c] sm:$0xf] %v1346_v34  ;;  %v1232_v40 = vshrl.u32 %v3582_v30, 16  ;;  %v1235_v41 = vshll.u32 %v3582_v30, 16  ;;  %v3666_v43 = vld [vmem:[#allocation2 + $0x38] sm:$0xf]  ;;  %v3663_v54 = vor.u32 %v4385_v28, %v3660_v29 }
  0xe0   : > { %v2955_v16 = vpop.f32.mrf.mxu2  ;;  %v2899_v25 = vpop.f32.mrf.mxu0  ;;  %3215 = vmatmul.bf16.gmra.mxu3 %v3847_v3  ;;  %v1241_v45 = vshll.u32 %v3583_v31, 16  ;;  %v3597_v46 = vld [vmem:[%s4688_s20 + $0xf4] sm:$0x1]  ;;  %1454 = vst [vmem:[#allocation2 + $0x7c] sm:$0xf] %v1360_v44  ;;  %v1223_v51 = vrot.slane %v1221_v38, 5 }
  0xe1   : > { %v2956_v24 = vadd.f32 %v2955_v16, %v2927_v60  ;;  %v2928_v26 = vpop.f32.mrf.mxu1  ;;  %v2900_v32 = vadd.f32 %v5169_v13, %v2899_v25  ;;  %v1220_v13 = vrot.slane %v1218_v36, 4  ;;  %v4394_v50 = vld [vmem:[#allocation2 + $0x74] sm:$0xf0]  ;;  %v1234_v55 = vrot.slane %v1232_v40, 4  ;;  %v3599_v10 = vld [vmem:[%s4688_s20 + $0xfc] sm:$0x1] }
  0xe2   : > { %v1237_v56 = vrot.slane %v1235_v41, 5  ;;  %v3598_v57 = vld [vmem:[%s4688_s20 + $0xf8] sm:$0xf]  ;;  %v3667_v58 = vor.u32 %v4394_v50, %v3666_v43  ;;  %v1229_v60 = vrot.slane %v1227_v39, 5  ;;  %v1362_v61 = vshrl.u32 %v3596_v37, 16 }
  0xe3   : > { %v2929_v42 = vadd.f32 %v2928_v26, %v2900_v32  ;;  %v2984_v47 = vpop.f32.mrf.mxu3  ;;  %v1224_v59 = vor.u32 %v1223_v51, %v1220_v13  ;;  %v1243_v1 = vrot.slane %v1241_v45, 5  ;;  %v1365_v2 = vshll.u32 %v3596_v37, 16  ;;  %v3564_v4 = vld [vmem:[%s4688_s20 + $0xb8] sm:$0xf]  ;;  %v3565_v19 = vld [vmem:[%s4688_s20 + $0xc0] sm:$0xf] }
  0xe4   : > { %v5354_v53 = vadd.f32 %v2984_v47, %v2956_v24  ;;  %v1238_v0 = vor.u32 %v1237_v56, %v1234_v55  ;;  %v1371_v3 = vshll.u32 %v3597_v46, 16  ;;  %v1364_v11 = vrot.slane %v1362_v61, 4  ;;  %1152 = vst [vmem:[#allocation2 + $0x130] sm:$0xf] %v3564_v4  ;;  %v3572_v28 = vld [vmem:[%s4688_s20 + $0x100] sm:$0xf] }
  0xe5   : > { %v1225_v9 = vrot.slane %v1224_v59, 4  ;;  %v1376_v12 = vshrl.u32 %v3598_v57, 16  ;;  %v1367_v18 = vrot.slane %v1365_v2, 5  ;;  %v1379_v23 = vshll.u32 %v3598_v57, 16  ;;  %v3573_v32 = vld [vmem:[%s4688_s20 + $0x108] sm:$0xf] }
  0xe6   : > { %v4386_v15 = vld [vmem:[#allocation2 + $0x3c] sm:$0xf]  ;;  %v1239_v16 = vrot.slane %v1238_v0, 4  ;;  %v1373_v21 = vrot.slane %v1371_v3, 5  ;;  %v1385_v31 = vshll.u32 %v3599_v10, 16 }
  0xe7   : > { %v1230_v20 = vsel %vm4734_vm2, %v1225_v9, %v1229_v60  ;;  %v1378_v22 = vrot.slane %v1376_v12, 4  ;;  %v3668_v25 = vld [vmem:[#allocation2 + $0x78] sm:$0xf0]  ;;  %v1368_v26 = vor.u32 %v1367_v18, %v1364_v11  ;;  %v1381_v30 = vrot.slane %v1379_v23, 5  ;;  %1153 = vst [vmem:[#allocation2 + $0x170] sm:$0xf] %v3565_v19 }
  0xe8   : > { %v2957_v62 = vpop.f32.mrf.mxu2  ;;  %v2998_v6 = vpop.f32.mrf.mxu0  ;;  %1311 = vst [vmem:[#allocation2 + $0xb8] sm:$0xf] %v1230_v20  ;;  %v3671_v35 = vor.u32 %v4386_v15, %v3668_v25  ;;  %v3584_v37 = vld [vmem:[%s4688_s20 + $0xb8] sm:$0xf]  ;;  %v1387_v39 = vrot.slane %v1385_v31, 5 }
  0xe9   : > { %v2958_v5 = vadd.f32 %v2957_v62, %v2929_v42  ;;  %v3027_v7 = vpop.f32.mrf.mxu1  ;;  %v2999_v14 = vadd.f32 %v2998_v6, %v5217_v33  ;;  %v1244_v33 = vsel %vm4734_vm2, %v1239_v16, %v1243_v1  ;;  %v1369_v36 = vrot.slane %v1368_v26, 4  ;;  %1169 = vst [vmem:[#allocation2 + $0x134] sm:$0xf] %v3572_v28  ;;  %v3585_v40 = vld [vmem:[%s4688_s20 + $0xbc] sm:$0x1] }
  0xea   : > { %1312 = vst [vmem:[#allocation2 + $0xf8] sm:$0xf] %v1244_v33  ;;  %v1382_v38 = vor.u32 %v1381_v30, %v1378_v22  ;;  %v1246_v41 = vshrl.u32 %v3584_v37, 16  ;;  %v3586_v44 = vld [vmem:[%s4688_s20 + $0xc0] sm:$0xf]  ;;  %v1249_v55 = vshll.u32 %v3584_v37, 16 }
  0xeb   : > { %v3028_v24 = vadd.f32 %v3027_v7, %v2999_v14  ;;  %3229 = vmatmul.bf16.vlgmr.msrb.gmra.mxu0 %v3659_v49  ;;  %v2986_v29 = vpop.f32.mrf.mxu3  ;;  %v1374_v43 = vsel %vm4734_vm2, %v1369_v36, %v1373_v21  ;;  %1170 = vst [vmem:[#allocation2 + $0x174] sm:$0xf] %v3573_v32  ;;  %v3587_v13 = vld [vmem:[%s4688_s20 + $0xc4] sm:$0x1]  ;;  %v3722_v49 = vld [vmem:[#allocation2 + $0xb0] sm:$0xf] }
  0xec   : > { %3258 = vmatmul.bf16.vlgmr.msrb.gmra.mxu1 %v3663_v54  ;;  %v5367_v34 = vadd.f32 %v2986_v29, %v2958_v5  ;;  %v4409_v50 = vld [vmem:[#allocation2 + $0xec] sm:$0xf0]  ;;  %v1383_v51 = vrot.slane %v1382_v38, 4  ;;  %1455 = vst [vmem:[#allocation2 + $0xbc] sm:$0xf] %v1374_v43  ;;  %v1248_v54 = vrot.slane %v1246_v41, 4 }
  0xed   : > { %3287 = vmatmul.bf16.vlgmr.msrb.gmra.mxu2 %v3667_v58  ;;  %v4401_v57 = vld [vmem:[#allocation2 + $0xb4] sm:$0xf]  ;;  %v1255_v58 = vshll.u32 %v3585_v40, 16  ;;  %v1260_v59 = vshrl.u32 %v3586_v44, 16  ;;  %v1263_v60 = vshll.u32 %v3586_v44, 16  ;;  %v1251_v1 = vrot.slane %v1249_v55, 5 }
  0xee   : > { %v3724_v61 = vld [vmem:[#allocation2 + $0xf0] sm:$0xf0]  ;;  %v1388_v0 = vsel %vm4734_vm2, %v1383_v51, %v1387_v39  ;;  %v1269_v2 = vshll.u32 %v3587_v13, 16  ;;  %v3600_v5 = vld [vmem:[%s4688_s20 + $0x100] sm:$0xf]  ;;  %v3723_v14 = vor.u32 %v4409_v50, %v3722_v49 }
  0xef   : > { %v3730_v62 = vld [vmem:[#allocation2 + $0xb8] sm:$0xf]  ;;  %1456 = vst [vmem:[#allocation2 + $0xfc] sm:$0xf] %v1388_v0  ;;  %v1262_v4 = vrot.slane %v1260_v59, 4  ;;  %v1257_v9 = vrot.slane %v1255_v58, 5  ;;  %v3727_v15 = vor.u32 %v4401_v57, %v3724_v61 }
  0xf0   : > { %v3056_v42 = vpop.f32.mrf.mxu2  ;;  %v3000_v46 = vpop.f32.mrf.mxu0  ;;  %3316 = vmatmul.bf16.vlgmr.msrb.gmra.mxu3 %v3671_v35  ;;  %v1265_v10 = vrot.slane %v1263_v60, 5  ;;  %v3601_v11 = vld [vmem:[%s4688_s20 + $0x104] sm:$0x1]  ;;  %v1271_v16 = vrot.slane %v1269_v2, 5  ;;  %v3602_v18 = vld [vmem:[%s4688_s20 + $0x108] sm:$0xf] }
  0xf1   : > { %v3057_v45 = vadd.f32 %v3056_v42, %v3028_v24  ;;  %v3029_v47 = vpop.f32.mrf.mxu1  ;;  %v3001_v56 = vadd.f32 %v3000_v46, %v5245_v17  ;;  %v4410_v7 = vld [vmem:[#allocation2 + $0xf4] sm:$0xf0]  ;;  %v1252_v17 = vor.u32 %v1251_v1, %v1248_v54  ;;  %v1390_v21 = vshrl.u32 %v3600_v5, 16  ;;  %v3603_v25 = vld [vmem:[%s4688_s20 + $0x10c] sm:$0x1] }
  0xf2   : > { %v1266_v20 = vor.u32 %v1265_v10, %v1262_v4  ;;  %v1393_v22 = vshll.u32 %v3600_v5, 16  ;;  %v3731_v24 = vor.u32 %v4410_v7, %v3730_v62  ;;  %v1399_v33 = vshll.u32 %v3601_v11, 16  ;;  %v3566_v38 = vld [vmem:[%s4688_s20 + $0xc8] sm:$0xf]  ;;  %v3567_v39 = vld [vmem:[%s4688_s20 + $0xd0] sm:$0xf] }
  0xf3   : > { %v3030_v3 = vadd.f32 %v3029_v47, %v3001_v56  ;;  %v3085_v6 = vpop.f32.mrf.mxu3  ;;  %v1253_v19 = vrot.slane %v1252_v17, 4  ;;  %v1404_v26 = vshrl.u32 %v3602_v18, 16  ;;  %v1407_v28 = vshll.u32 %v3602_v18, 16  ;;  %v4402_v32 = vld [vmem:[#allocation2 + $0xbc] sm:$0xf] }
  0xf4   : > { %v5380_v12 = vadd.f32 %v3085_v6, %v3057_v45  ;;  %v1267_v36 = vrot.slane %v1266_v20, 4  ;;  %v1392_v37 = vrot.slane %v1390_v21, 4  ;;  %v1395_v41 = vrot.slane %v1393_v22, 5  ;;  %1154 = vst [vmem:[#allocation2 + $0x1b0] sm:$0xf] %v3566_v38 }
  0xf5   : > { %v1258_v35 = vsel %vm4734_vm2, %v1253_v19, %v1257_v9  ;;  %v1401_v42 = vrot.slane %v1399_v33, 5  ;;  %v1406_v43 = vrot.slane %v1404_v26, 4  ;;  %v1409_v45 = vrot.slane %v1407_v28, 5  ;;  %v3575_v50 = vld [vmem:[%s4688_s20 + $0x118] sm:$0xf] }
  0xf6   : > { %1313 = vst [vmem:[#allocation2 + $0x138] sm:$0xf] %v1258_v35  ;;  %v3732_v44 = vld [vmem:[#allocation2 + $0xf8] sm:$0xf0]  ;;  %v1272_v13 = vsel %vm4734_vm2, %v1267_v36, %v1271_v16  ;;  %v1413_v46 = vshll.u32 %v3603_v25, 16  ;;  %v1396_v49 = vor.u32 %v1395_v41, %v1392_v37 }
  0xf7   : > { %1314 = vst [vmem:[#allocation2 + $0x178] sm:$0xf] %v1272_v13  ;;  %v1410_v54 = vor.u32 %v1409_v45, %v1406_v43  ;;  %v3588_v56 = vld [vmem:[%s4688_s20 + $0xc8] sm:$0xf]  ;;  %v3735_v58 = vor.u32 %v4402_v32, %v3732_v44  ;;  %v3589_v60 = vld [vmem:[%s4688_s20 + $0xcc] sm:$0x1] }
  0xf8   : > { %v3058_v23 = vpop.f32.mrf.mxu2  ;;  %v3003_v30 = vpop.f32.mrf.mxu0  ;;  %v1415_v55 = vrot.slane %v1413_v46, 5  ;;  %1155 = vst [vmem:[#allocation2 + $0x1f0] sm:$0xf] %v3567_v39  ;;  %v1397_v59 = vrot.slane %v1396_v49, 4  ;;  %v1274_v61 = vshrl.u32 %v3588_v56, 16  ;;  %v1277_v1 = vshll.u32 %v3588_v56, 16 }
  0xf9   : > { %v3059_v29 = vadd.f32 %v3058_v23, %v3030_v3  ;;  %v3032_v31 = vpop.f32.mrf.mxu1  ;;  %v3004_v40 = vadd.f32 %v3003_v30, %v5271_v63  ;;  %v3574_v63 = vld [vmem:[%s4688_s20 + $0x110] sm:$0xf]  ;;  %v1411_v62 = vrot.slane %v1410_v54, 4  ;;  %1172 = vst [vmem:[#allocation2 + $0x1f4] sm:$0xf] %v3575_v50  ;;  %v1283_v6 = vshll.u32 %v3589_v60, 16 }
  0xfa   : > { %1171 = vst [vmem:[#allocation2 + $0x1b4] sm:$0xf] %v3574_v63  ;;  %v3590_v0 = vld [vmem:[%s4688_s20 + $0xd0] sm:$0xf]  ;;  %v1402_v3 = vsel %vm4734_vm2, %v1397_v59, %v1401_v42  ;;  %v3591_v4 = vld [vmem:[%s4688_s20 + $0xd4] sm:$0x1] }
  0xfb   : > { %v3033_v47 = vadd.f32 %v3032_v31, %v3004_v40  ;;  %3234 = vmatmul.bf16.gmra.mxu0 %v3723_v14  ;;  %v3087_v51 = vpop.f32.mrf.mxu3  ;;  %v1276_v5 = vrot.slane %v1274_v61, 4  ;;  %v1288_v7 = vshrl.u32 %v3590_v0, 16  ;;  %v1416_v11 = vsel %vm4734_vm2, %v1411_v62, %v1415_v55  ;;  %1457 = vst [vmem:[#allocation2 + $0x13c] sm:$0xf] %v1402_v3  ;;  %v3786_v19 = vld [vmem:[#allocation2 + $0x130] sm:$0xf] }
  0xfc   : > { %3263 = vmatmul.bf16.gmra.mxu1 %v3727_v15  ;;  %v5394_v57 = vadd.f32 %v3087_v51, %v3059_v29  ;;  %v1279_v14 = vrot.slane %v1277_v1, 5  ;;  %v1291_v15 = vshll.u32 %v3590_v0, 16  ;;  %1458 = vst [vmem:[#allocation2 + $0x17c] sm:$0xf] %v1416_v11  ;;  %v4425_v20 = vld [vmem:[#allocation2 + $0x16c] sm:$0xf0] }
  0xfd   : > { %3292 = vmatmul.bf16.gmra.mxu2 %v3731_v24  ;;  %v1290_v18 = vrot.slane %v1288_v7, 4  ;;  %v1285_v22 = vrot.slane %v1283_v6, 5  ;;  %v1297_v24 = vshll.u32 %v3591_v4, 16  ;;  %v3604_v25 = vld [vmem:[%s4688_s20 + $0x110] sm:$0xf]  ;;  %v3787_v45 = vor.u32 %v4425_v20, %v3786_v19 }
  0xfe   : > { %v1280_v21 = vor.u32 %v1279_v14, %v1276_v5  ;;  %v1293_v23 = vrot.slane %v1291_v15, 5  ;;  %v4417_v26 = vld [vmem:[#allocation2 + $0x134] sm:$0xf]  ;;  %v3606_v29 = vld [vmem:[%s4688_s20 + $0x118] sm:$0xf]  ;;  %v1418_v39 = vshrl.u32 %v3604_v25, 16 }
  0xff   : > { %v3605_v28 = vld [vmem:[%s4688_s20 + $0x114] sm:$0x1]  ;;  %v3794_v32 = vld [vmem:[#allocation2 + $0x138] sm:$0xf]  ;;  %v1421_v40 = vshll.u32 %v3604_v25, 16  ;;  %v1432_v44 = vshrl.u32 %v3606_v29, 16 }
 0x100   : > { %v3061_v2 = vpop.f32.mrf.mxu2  ;;  %v3005_v9 = vpop.f32.mrf.mxu0  ;;  %3321 = vmatmul.bf16.gmra.mxu3 %v3735_v58  ;;  %v3788_v31 = vld [vmem:[#allocation2 + $0x170] sm:$0xf0]  ;;  %v1281_v35 = vrot.slane %v1280_v21, 4  ;;  %v1294_v36 = vor.u32 %v1293_v23, %v1290_v18  ;;  %v4426_v38 = vld [vmem:[#allocation2 + $0x174] sm:$0xf0]  ;;  %v1427_v41 = vshll.u32 %v3605_v28, 16 }
 0x101   : > { %v3062_v17 = vadd.f32 %v3061_v2, %v3033_v47  ;;  %v3034_v10 = vpop.f32.mrf.mxu1  ;;  %v3006_v16 = vadd.f32 %v3005_v9, %v5297_v48  ;;  %v1299_v48 = vrot.slane %v1297_v24, 5  ;;  %v3791_v46 = vor.u32 %v4417_v26, %v3788_v31  ;;  %v3607_v47 = vld [vmem:[%s4688_s20 + $0x11c] sm:$0x1]  ;;  %v4441_v24 = vld [vmem:[#allocation2 + $0x1ec] sm:$0xf0]  ;;  %s4378_s20 = sshll.u32 %s5481_s13, 5 }
 0x102   : > { %v1286_v42 = vsel %vm4734_vm2, %v1281_v35, %v1285_v22  ;;  %v1295_v43 = vrot.slane %v1294_v36, 4  ;;  %v1420_v49 = vrot.slane %v1418_v39, 4  ;;  %v1423_v63 = vrot.slane %v1421_v40, 5  ;;  %v4418_v56 = vld [vmem:[#allocation2 + $0x13c] sm:$0xf]  ;;  %s5454_s10 = scalar_lea.vmem %s5477_s3, %s4378_s20 }
 0x103   : > { %v3035_v33 = vadd.f32 %v3034_v10, %v3006_v16  ;;  %v3090_v30 = vpop.f32.mrf.mxu3  ;;  %1315 = vst [vmem:[#allocation2 + $0x1b8] sm:$0xf] %v1286_v42  ;;  %v3795_v55 = vor.u32 %v4426_v38, %v3794_v32  ;;  %v1429_v59 = vrot.slane %v1427_v41, 5  ;;  %v3796_v61 = vld [vmem:[#allocation2 + $0x178] sm:$0xf0]  ;;  %v1434_v0 = vrot.slane %v1432_v44, 4 }
 0x104   : > { %v5407_v37 = vadd.f32 %v3090_v30, %v3062_v17  ;;  %v1300_v58 = vsel %vm4734_vm2, %v1295_v43, %v1299_v48  ;;  %v1424_v62 = vor.u32 %v1423_v63, %v1420_v49  ;;  %v1435_v1 = vshll.u32 %v3606_v29, 16  ;;  %v3850_v22 = vld [vmem:[#allocation2 + $0x1b0] sm:$0xf]  ;;  %v4433_v25 = vld [vmem:[#allocation2 + $0x1b4] sm:$0xf] }
 0x105   : > { %1316 = vst [vmem:[#allocation2 + $0x1f8] sm:$0xf] %v1300_v58  ;;  %v1441_v2 = vshll.u32 %v3607_v47, 16  ;;  %v3799_v7 = vor.u32 %v4418_v56, %v3796_v61  ;;  %v3851_v31 = vor.u32 %v4441_v24, %v3850_v22 }
 0x106   : > { %v1425_v4 = vrot.slane %v1424_v62, 4  ;;  %v1437_v5 = vrot.slane %v1435_v1, 5 }
 0x107   : > { %v1443_v10 = vrot.slane %v1441_v2, 5 }
 0x108   : > { %v3063_v13 = vpop.f32.mrf.mxu2  ;;  %v3008_v51 = vpop.f32.mrf.mxu0  ;;  %v1430_v9 = vsel %vm4734_vm2, %v1425_v4, %v1429_v59 }
 0x109   : > { %v3064_v50 = vadd.f32 %v3063_v13, %v3035_v33  ;;  %v3037_v54 = vpop.f32.mrf.mxu1  ;;  %v3009_v60 = vadd.f32 %v3008_v51, %v5320_v27  ;;  %v1438_v27 = vor.u32 %v1437_v5, %v1434_v0  ;;  %1459 = vst [vmem:[#allocation2 + $0x1bc] sm:$0xf] %v1430_v9  ;;  %v3852_v33 = vld [vmem:[#allocation2 + $0x1f0] sm:$0xf0] }
 0x10a   : > { %v3858_v28 = vld [vmem:[#allocation2 + $0x1b8] sm:$0xf]  ;;  %v3855_v32 = vor.u32 %v4433_v25, %v3852_v33 }
 0x10b   : > { %v3038_v3 = vadd.f32 %v3037_v54, %v3009_v60  ;;  %3239 = vmatmul.bf16.gmra.mxu0 %v3787_v45  ;;  %v3092_v6 = vpop.f32.mrf.mxu3  ;;  %v1439_v14 = vrot.slane %v1438_v27, 4 }
 0x10c   : > { %3268 = vmatmul.bf16.gmra.mxu1 %v3791_v46  ;;  %v5415_v17 = vadd.f32 %v3092_v6, %v3064_v50  ;;  %v4442_v29 = vld [vmem:[#allocation2 + $0x1f4] sm:$0xf0] }
 0x10d   : > { %3297 = vmatmul.bf16.gmra.mxu2 %v3795_v55  ;;  %v1444_v20 = vsel %vm4734_vm2, %v1439_v14, %v1443_v10 }
 0x10e   : > { %1460 = vst [vmem:[#allocation2 + $0x1fc] sm:$0xf] %v1444_v20 }
 0x110   : > { %v3066_v11 = vpop.f32.mrf.mxu2  ;;  %v3010_v16 = vpop.f32.mrf.mxu0  ;;  %3326 = vmatmul.bf16.gmra.mxu3 %v3799_v7  ;;  %v4434_v38 = vld [vmem:[#allocation2 + $0x1bc] sm:$0xf] }
 0x111   : > { %v3067_v15 = vadd.f32 %v3066_v11, %v3038_v3  ;;  %v3039_v18 = vpop.f32.mrf.mxu1  ;;  %v3011_v19 = vadd.f32 %v3010_v16, %v5333_v8  ;;  %v3859_v8 = vor.u32 %v4442_v29, %v3858_v28 }
 0x113   : > { %v3040_v21 = vadd.f32 %v3039_v18, %v3011_v19  ;;  %v3095_v23 = vpop.f32.mrf.mxu3 }
 0x114   : > { %v3096_v26 = vadd.f32 %v3095_v23, %v3067_v15 }
 0x115   : > { %v3860_v39 = vld [vmem:[#allocation2 + $0x1f8] sm:$0xf0] }
 0x116   : > { %v3863_v43 = vor.u32 %v4434_v38, %v3860_v39 }
 0x118   : > { %v3068_v30 = vpop.f32.mrf.mxu2  ;;  %v3013_v36 = vpop.f32.mrf.mxu0 }
 0x119   : > { %v3069_v35 = vadd.f32 %v3068_v30, %v3040_v21  ;;  %v3042_v48 = vpop.f32.mrf.mxu1  ;;  %v3014_v52 = vadd.f32 %v3013_v36, %v5354_v53 }
 0x11b   : > { %v3043_v40 = vadd.f32 %v3042_v48, %v3014_v52  ;;  %3244 = vmatmul.bf16.gmra.mxu0 %v3851_v31  ;;  %v3097_v41 = vpop.f32.mrf.mxu3 }
 0x11c   : > { %3273 = vmatmul.bf16.gmra.mxu1 %v3855_v32  ;;  %v5423_v42 = vadd.f32 %v3097_v41, %v3069_v35 }
 0x11d   : > { %3302 = vmatmul.bf16.gmra.mxu2 %v3859_v8 }
 0x120   : > { %v3071_v44 = vpop.f32.mrf.mxu2  ;;  %v3015_v45 = vpop.f32.mrf.mxu0  ;;  %3331 = vmatmul.bf16.gmra.mxu3 %v3863_v43 }
 0x121   : > { %v3072_v13 = vadd.f32 %v3071_v44, %v3043_v40  ;;  %v3044_v46 = vpop.f32.mrf.mxu1  ;;  %v3016_v47 = vadd.f32 %v3015_v45, %v5367_v34 }
 0x123   : > { %v3045_v49 = vadd.f32 %v3044_v46, %v3016_v47  ;;  %v3100_v63 = vpop.f32.mrf.mxu3 }
 0x124   : > { %v3101_v53 = vadd.f32 %v3100_v63, %v3072_v13 }
 0x128   : > { %v3073_v50 = vpop.f32.mrf.mxu2  ;;  %v3114_v54 = vpop.f32.mrf.mxu0 }
 0x129   : > { %v3074_v51 = vadd.f32 %v3073_v50, %v3045_v49  ;;  %v3143_v55 = vpop.f32.mrf.mxu1  ;;  %v3115_v56 = vadd.f32 %v3114_v54, %v5380_v12 }
 0x12b   : > { %v3144_v58 = vadd.f32 %v3143_v55, %v3115_v56  ;;  %v3102_v59 = vpop.f32.mrf.mxu3 }
 0x12c   : > { %v5427_v60 = vadd.f32 %v3102_v59, %v3074_v51 }
 0x130   : > { %v3172_v61 = vpop.f32.mrf.mxu2  ;;  %v3116_v0 = vpop.f32.mrf.mxu0 }
 0x131   : > { %v3173_v62 = vadd.f32 %v3172_v61, %v3144_v58  ;;  %v3145_v1 = vpop.f32.mrf.mxu1  ;;  %v3117_v40 = vadd.f32 %v3116_v0, %v5394_v57 }
 0x133   : > { %v3201_v2 = vpop.f32.mrf.mxu3  ;;  %v3146_v13 = vadd.f32 %v3145_v1, %v3117_v40 }
 0x134   : > { %v3202_v3 = vadd.f32 %v3201_v2, %v3173_v62 }
 0x138   : > { %v3174_v34 = vpop.f32.mrf.mxu2  ;;  %v3119_v4 = vpop.f32.mrf.mxu0 }
 0x139   : > { %v3148_v5 = vpop.f32.mrf.mxu1  ;;  %v3120_v6 = vadd.f32 %v3119_v4, %v5407_v37  ;;  %v3175_v46 = vadd.f32 %v3174_v34, %v3146_v13 }
 0x13b   : > { %v3149_v7 = vadd.f32 %v3148_v5, %v3120_v6  ;;  %v3203_v9 = vpop.f32.mrf.mxu3 }
 0x13c   : > { %v3204_v50 = vadd.f32 %v3203_v9, %v3175_v46 }
 0x140   : > { %v3177_v27 = vpop.f32.mrf.mxu2  ;;  %v3121_v12 = vpop.f32.mrf.mxu0 }
 0x141   : > { %v3178_v10 = vadd.f32 %v3177_v27, %v3149_v7  ;;  %v3150_v11 = vpop.f32.mrf.mxu1  ;;  %v3122_v57 = vadd.f32 %v3121_v12, %v5415_v17 }
 0x143   : > { %v3206_v14 = vpop.f32.mrf.mxu3  ;;  %v3151_v2 = vadd.f32 %v3150_v11, %v3122_v57 }
 0x144   : > { %v3207_v15 = vadd.f32 %v3206_v14, %v3178_v10 }
 0x148   : > { %v3179_v16 = vpop.f32.mrf.mxu2  ;;  %v3124_v18 = vpop.f32.mrf.mxu0 }
 0x149   : > { %v3153_v19 = vpop.f32.mrf.mxu1  ;;  %v3125_v20 = vadd.f32 %v3124_v18, %v3096_v26 }
 0x14b   : > { %v3154_v21 = vadd.f32 %v3153_v19, %v3125_v20  ;;  %v3208_v22 = vpop.f32.mrf.mxu3 }
 0x150   : > { %v3182_v23 = vpop.f32.mrf.mxu2  ;;  %v3126_v25 = vpop.f32.mrf.mxu0 }
 0x151   : > { %v3183_v24 = vadd.f32 %v3182_v23, %v3154_v21  ;;  %v5430_v33 = vpop.f32.mrf.mxu1 }
 0x153   : > { %v3211_v37 = vpop.f32.mrf.mxu3 }
 0x154   : > { %v5432_v28 = vadd.f32 %v3211_v37, %v3183_v24 }
 0x158   : > { %v5434_v29 = vpop.f32.mrf.mxu2  ;;  %v3129_v30 = vpop.f32.mrf.mxu0 }
 0x159   : > { %v3158_v31 = vpop.f32.mrf.mxu1  ;;  %v3130_v32 = vadd.f32 %v3129_v30, %v3101_v53 }
 0x15b   : > { %v3159_v35 = vadd.f32 %v3158_v31, %v3130_v32  ;;  %v5436_v36 = vpop.f32.mrf.mxu3 }
 0x160   : > { %v3187_v48 = vpop.f32.mrf.mxu2  ;;  %v5438_v8 = vpop.f32.mrf.mxu0 }
 0x161   : > { %v3188_v26 = vadd.f32 %v3187_v48, %v3159_v35  ;;  %v5440_v52 = vpop.f32.mrf.mxu1 }
 0x163   : > { %v3216_v38 = vpop.f32.mrf.mxu3 }
 0x164   : > { %v5442_v39 = vadd.f32 %v3216_v38, %v3188_v26 }
 0x168   : > { %v5445_v41 = vpop.f32.mrf.mxu2  ;;  %v3230_v43 = vpop.f32.mrf.mxu0 }
 0x169   : > { %v3259_v44 = vpop.f32.mrf.mxu1  ;;  %v3231_v47 = vadd.f32 %v3230_v43, %v3202_v3  ;;  %v3180_v3 = vadd.f32 %v3179_v16, %v3151_v2 }
 0x16b   : > { %v5447_v45 = vpop.f32.mrf.mxu3  ;;  %v3260_v51 = vadd.f32 %v3259_v44, %v3231_v47  ;;  %v3209_v17 = vadd.f32 %v3208_v22, %v3180_v3 }
 0x170   : > { %v3288_v49 = vpop.f32.mrf.mxu2  ;;  %v3232_v63 = vpop.f32.mrf.mxu0 }
 0x171   : > { %v3261_v53 = vpop.f32.mrf.mxu1  ;;  %v3233_v54 = vadd.f32 %v3232_v63, %v3204_v50  ;;  %v3289_v56 = vadd.f32 %v3288_v49, %v3260_v51 }
 0x173   : > { %v3317_v55 = vpop.f32.mrf.mxu3  ;;  %v3262_v58 = vadd.f32 %v3261_v53, %v3233_v54  ;;  %v3132_v53 = vadd.f32 %v5438_v8, %v5427_v60 }
 0x174   : > { %v3318_v0 = vadd.f32 %v3317_v55, %v3289_v56 }
 0x175   : > { %v3161_v56 = vadd.f32 %v5440_v52, %v3132_v53 }
 0x176   : > { %v3345_v4 = vmul.f32 0.2, %v3318_v0  ;;  %vm3337_vm3 = vcmp.gt.f32.partialorder %v3318_v0, 0.0 }
 0x178   : > { %v3290_v59 = vpop.f32.mrf.mxu2  ;;  %v3235_v61 = vpop.f32.mrf.mxu0  ;;  %v3353_v12 = vsel %vm3337_vm3, %v3318_v0, %v3345_v4 }
 0x179   : > { %v3264_v62 = vpop.f32.mrf.mxu1  ;;  %v3291_v1 = vadd.f32 %v3290_v59, %v3262_v58  ;;  %v3236_v7 = vadd.f32 %v3235_v61, %v3207_v15  ;;  %v3127_v15 = vadd.f32 %v3126_v25, %v5423_v42  ;;  %v3190_v58 = vadd.f32 %v5445_v41, %v3161_v56 }
 0x17b   : > { %v3319_v34 = vpop.f32.mrf.mxu3  ;;  %v3265_v16 = vadd.f32 %v3264_v62, %v3236_v7  ;;  %v3156_v31 = vadd.f32 %v5430_v33, %v3127_v15 }
 0x17c   : > { %v3320_v5 = vadd.f32 %v3319_v34, %v3291_v1  ;;  %v3219_v1 = vadd.f32 %v5447_v45, %v3190_v58 }
 0x17d   : > { %v3185_v35 = vadd.f32 %v5434_v29, %v3156_v31 }
 0x17e   : > { %vm3338_vm4 = vcmp.gt.f32.partialorder %v3320_v5, 0.0  ;;  %v3346_v6 = vmul.f32 0.2, %v3320_v5 }
 0x17f   : > { %v3214_v43 = vadd.f32 %v5436_v36, %v3185_v35 }
 0x180   : > { %v3293_v9 = vpop.f32.mrf.mxu2  ;;  %v3237_v27 = vpop.f32.mrf.mxu0  ;;  %v3354_v11 = vsel %vm3338_vm4, %v3320_v5, %v3346_v6 }
 0x181   : > { %v3266_v10 = vpop.f32.mrf.mxu1  ;;  %v4574_v14 = vpack.c.bf16 %v3354_v11, %v3353_v12  ;;  %v3238_v18 = vadd.f32 %v3237_v27, %v3209_v17  ;;  %v3294_v20 = vadd.f32 %v3293_v9, %v3265_v16 }
 0x183   : > { %4575 = vst [vmem:[%s5454_s10] sm:$0xff] %v4574_v14   ;;  %v3322_v19 = vpop.f32.mrf.mxu3  ;;  %v3267_v21 = vadd.f32 %v3266_v10, %v3238_v18 }
 0x184   : > { %v3323_v37 = vadd.f32 %v3322_v19, %v3294_v20 }
 0x186   : > { %v3347_v48 = vmul.f32 0.2, %v3323_v37  ;;  %vm3339_vm5 = vcmp.gt.f32.partialorder %v3323_v37, 0.0 }
 0x188   : > { %v3295_v23 = vpop.f32.mrf.mxu2  ;;  %v3240_v24 = vpop.f32.mrf.mxu0  ;;  %v3355_v44 = vsel %vm3339_vm5, %v3323_v37, %v3347_v48 }
 0x189   : > { %v3269_v22 = vpop.f32.mrf.mxu1  ;;  %v3296_v30 = vadd.f32 %v3295_v23, %v3267_v21  ;;  %v3241_v40 = vadd.f32 %v3240_v24, %v5432_v28 }
 0x18b   : > { %v3324_v32 = vpop.f32.mrf.mxu3  ;;  %v3270_v33 = vadd.f32 %v3269_v22, %v3241_v40 }
 0x18c   : > { %v3325_v26 = vadd.f32 %v3324_v32, %v3296_v30 }
 0x18e   : > { %vm3340_vm6 = vcmp.gt.f32.partialorder %v3325_v26, 0.0  ;;  %v3348_v38 = vmul.f32 0.2, %v3325_v26 }
 0x190   : > { %v3298_v42 = vpop.f32.mrf.mxu2  ;;  %v3242_v25 = vpop.f32.mrf.mxu0  ;;  %v3356_v13 = vsel %vm3340_vm6, %v3325_v26, %v3348_v38 }
 0x191   : > { %v4579_v46 = vpack.c.bf16 %v3356_v13, %v3355_v44  ;;  %v3271_v47 = vpop.f32.mrf.mxu1  ;;  %v3243_v49 = vadd.f32 %v3242_v25, %v3214_v43  ;;  %v3299_v63 = vadd.f32 %v3298_v42, %v3270_v33 }
 0x193   : > { %4591 = vst [vmem:[%s5454_s10 + $0x8] sm:$0xff] %v4579_v46   ;;  %v3327_v29 = vpop.f32.mrf.mxu3  ;;  %v3272_v50 = vadd.f32 %v3271_v47, %v3243_v49 }
 0x194   : > { %v3328_v28 = vadd.f32 %v3327_v29, %v3299_v63 }
 0x196   : > { %v3349_v59 = vmul.f32 0.2, %v3328_v28  ;;  %vm3341_vm7 = vcmp.gt.f32.partialorder %v3328_v28, 0.0 }
 0x198   : > { %v3300_v51 = vpop.f32.mrf.mxu2  ;;  %v3245_v54 = vpop.f32.mrf.mxu0  ;;  %v3357_v2 = vsel %vm3341_vm7, %v3328_v28, %v3349_v59 }
 0x199   : > { %v3301_v55 = vadd.f32 %v3300_v51, %v3272_v50  ;;  %v3274_v57 = vpop.f32.mrf.mxu1  ;;  %v3246_v0 = vadd.f32 %v3245_v54, %v5442_v39 }
 0x19b   : > { %v3329_v36 = vpop.f32.mrf.mxu3  ;;  %v3275_v52 = vadd.f32 %v3274_v57, %v3246_v0 }
 0x19c   : > { %v3330_v61 = vadd.f32 %v3329_v36, %v3301_v55 }
 0x19e   : > { %vm3342_vm8 = vcmp.gt.f32.partialorder %v3330_v61, 0.0  ;;  %v3350_v62 = vmul.f32 0.2, %v3330_v61 }
 0x1a0   : > { %v3303_v60 = vpop.f32.mrf.mxu2  ;;  %v3247_v8 = vpop.f32.mrf.mxu0  ;;  %v3358_v34 = vsel %vm3342_vm8, %v3330_v61, %v3350_v62 }
 0x1a1   : > { %v4584_v3 = vpack.c.bf16 %v3358_v34, %v3357_v2  ;;  %v3248_v4 = vadd.f32 %v3247_v8, %v3219_v1  ;;  %v3304_v41 = vadd.f32 %v3303_v60, %v3275_v52  ;;  %v3276_v6 = vpop.f32.mrf.mxu1 }
 0x1a3   : > { %4592 = vst [vmem:[%s5454_s10 + $0x10] sm:$0xff] %v4584_v3   ;;  %v3332_v5 = vpop.f32.mrf.mxu3  ;;  %v3277_v7 = vadd.f32 %v3276_v6, %v3248_v4 }
 0x1a4   : > { %v3333_v27 = vadd.f32 %v3332_v5, %v3304_v41 }
 0x1a6   : > { %v3351_v39 = vmul.f32 0.2, %v3333_v27  ;;  %vm3343_vm9 = vcmp.gt.f32.partialorder %v3333_v27, 0.0 }
 0x1a8   : > { %v3305_v9 = vpop.f32.mrf.mxu2  ;;  %v3359_v11 = vsel %vm3343_vm9, %v3333_v27, %v3351_v39 }
 0x1a9   : > { %v3306_v10 = vadd.f32 %v3305_v9, %v3277_v7 }
 0x1ab   : > { %v3334_v17 = vpop.f32.mrf.mxu3 }
 0x1ac   : > { %v3335_v12 = vadd.f32 %v3334_v17, %v3306_v10 }
 0x1ae   : > { %vm3344_vm10 = vcmp.gt.f32.partialorder %v3335_v12, 0.0  ;;  %v3352_v45 = vmul.f32 0.2, %v3335_v12 }
 0x1b0   : > { %v3360_v14 = vsel %vm3344_vm10, %v3335_v12, %v3352_v45 }
 0x1b1   : > { %v4589_v16 = vpack.c.bf16 %v3360_v14, %v3359_v11 }
 0x1b3   : > { %4593 = vst [vmem:[%s5454_s10 + $0x18] sm:$0xff] %v4589_v16  }
 0x1b4 PF: > { %s13_s12 = sadd.s32 1, %s4610_s12  }
 0x1b5   : > { %p10_p4 = scmp.ge.s32.totalorder %s13_s12, 4  }
 0x1b7   :  { %12 = sbr.rel (!%p10_p4) target bundleno = 1 (0x1), region = 69 }

// kernel: tf_discriminator_forward.7
= control target key start
LH: loop header
LB: loop body
LE: loop exit
PB: predicated region body
PF: predicated region fallthrough
CT: control target
= control target key end

     0   :  { %vm129_vm0 = vcmask 1041408   ;;  %vm133_vm1 = vcmask 1043458   ;;  %vm155_vm2 = vsmask.f32 1280  ;;  %vm156_vm3 = vsmask.f32 3336  ;;  %s6096_s1 = inlined_call_operand.vmem [shape: bf16[2048,128], index: 1, kind: input, shape index: {}]   ;;  %s6097_s0 = inlined_call_operand.vmem [shape: bf16[2,4,5,5,128], index: 0, kind: input, shape index: {}]   ;;  %s6098_s2 = inlined_call_operand.vmem [shape: f32[1,128], index: 2, kind: input, shape index: {}]   ;;  %s6099_s3 = inlined_call_operand.vmem [shape: bf16[1,32,128], index: 3, kind: output, shape index: {}]  }
   0x1   :  { %v4529_v0 = vld [vmem:[%s6096_s1 + $0x38] sm:$0xff]  ;;  %v4528_v3 = vld [vmem:[%s6096_s1 + $0x30] sm:$0xff]  ;;  %v4527_v6 = vld [vmem:[%s6096_s1 + $0x28] sm:$0xff]  ;;  %vm158_vm4 = vsmask.f32 5392 }
   0x2   :  { %v4537_v1 = vld [vmem:[%s6096_s1 + $0x78] sm:$0xff]  ;;  %3402 = vmatpush.bf16.msra.mxu0 %v4529_v0  ;;  %v4536_v4 = vld [vmem:[%s6096_s1 + $0x70] sm:$0xff]  ;;  %v4535_v7 = vld [vmem:[%s6096_s1 + $0x68] sm:$0xff]  ;;  %vm160_vm5 = vsmask.f32 7448 }
   0x3   :  { %v4545_v2 = vld [vmem:[%s6096_s1 + $0xb8] sm:$0xff]  ;;  %3421 = vmatpush.bf16.msra.mxu1 %v4537_v1  ;;  %v4544_v5 = vld [vmem:[%s6096_s1 + $0xb0] sm:$0xff]  ;;  %v4543_v9 = vld [vmem:[%s6096_s1 + $0xa8] sm:$0xff] }
   0x4   :  { %3440 = vmatpush.bf16.msra.mxu2 %v4545_v2  ;;  %v4553_v8 = vld [vmem:[%s6096_s1 + $0xf8] sm:$0xff]  ;;  %v4552_v10 = vld [vmem:[%s6096_s1 + $0xf0] sm:$0xff]  ;;  %v14_v11 = vld [vmem:[%s6097_s0] sm:$0x3] }
   0x5   :  { %3459 = vmatpush.bf16.msra.mxu3 %v4553_v8  ;;  %v15_v12 = vld [vmem:[%s6097_s0 + $0x4] sm:$0x3]  ;;  %v16_v13 = vld [vmem:[%s6097_s0 + $0x8] sm:$0x3]  ;;  %v17_v14 = vld [vmem:[%s6097_s0 + $0xc] sm:$0x3] }
   0x6   :  { %3403 = vmatpush.bf16.msra.mxu0 %v4528_v3  ;;  %24 = vst [vmem:[#allocation1] ss:$4 sm:$0xff] %v14_v11  ;;  %v4526_v15 = vld [vmem:[%s6096_s1 + $0x20] sm:$0xff]  ;;  %v4551_v18 = vld [vmem:[%s6096_s1 + $0xe8] sm:$0xff]  ;;  %v4525_v19 = vld [vmem:[%s6096_s1 + $0x18] sm:$0xff] }
   0x7   :  { %3422 = vmatpush.bf16.msra.mxu1 %v4536_v4  ;;  %v4534_v16 = vld [vmem:[%s6096_s1 + $0x60] sm:$0xff]  ;;  %27 = vst [vmem:[#allocation1 + $0x1] ss:$4 sm:$0xff] %v15_v12  ;;  %v4533_v20 = vld [vmem:[%s6096_s1 + $0x58] sm:$0xff]  ;;  %v119_v24 = vld [vmem:[%s6097_s0 + $0x8] sm:$0x7] }
   0x8   :  { %3441 = vmatpush.bf16.msra.mxu2 %v4544_v5  ;;  %v4542_v17 = vld [vmem:[%s6096_s1 + $0xa0] sm:$0xff]  ;;  %30 = vst [vmem:[#allocation1 + $0x2] ss:$4 sm:$0xff] %v16_v13  ;;  %v4541_v21 = vld [vmem:[%s6096_s1 + $0x98] sm:$0xff]  ;;  %v4524_v26 = vld [vmem:[%s6096_s1 + $0x10] sm:$0xff]  ;;  %v127_v29 = vrot.slane %v119_v24, 2 }
   0x9   :  { %3460 = vmatpush.bf16.msra.mxu3 %v4552_v10  ;;  %33 = vst [vmem:[#allocation1 + $0x3] ss:$4 sm:$0xff] %v17_v14  ;;  %v117_v22 = vld [vmem:[%s6097_s0] sm:$0x7]  ;;  %v118_v23 = vld [vmem:[%s6097_s0 + $0x4] sm:$0x7]  ;;  %vm4866_vm6 = vmor %vm155_vm2, %vm156_vm3 }
   0xa   :  { %3404 = vmatpush.bf16.msra.mxu0 %v4527_v6  ;;  %v125_v25 = vrot.slane %v117_v22, 2  ;;  %v3730_v27 = vld [vmem:[%s6097_s0 + $0x50] sm:$0x3]  ;;  %v126_v28 = vrot.slane %v118_v23, 2  ;;  %v3731_v31 = vld [vmem:[%s6097_s0 + $0x54] sm:$0x3]  ;;  %v145_v45 = vsel %vm129_vm0, %v119_v24, %v127_v29  ;;  %v146_v53 = vsel %vm133_vm1, %v119_v24, %v127_v29  ;;  %vm4885_vm7 = vmor %vm4866_vm6, %vm158_vm4 }
   0xb   :  { %3423 = vmatpush.bf16.msra.mxu1 %v4535_v7  ;;  %v4532_v30 = vld [vmem:[%s6096_s1 + $0x50] sm:$0xff]  ;;  %v3732_v32 = vld [vmem:[%s6097_s0 + $0x58] sm:$0x3]  ;;  %v120_v36 = vld [vmem:[%s6097_s0 + $0xc] sm:$0x7]  ;;  %v188_v63 = vshrl.u32 %v145_v45, 16 }
   0xc   :  { %3442 = vmatpush.bf16.msra.mxu2 %v4543_v9  ;;  %v134_v33 = vsel %vm133_vm1, %v117_v22, %v125_v25  ;;  %v4540_v34 = vld [vmem:[%s6096_s1 + $0x90] sm:$0xff]  ;;  %v132_v37 = vsel %vm129_vm0, %v117_v22, %v125_v25  ;;  %v140_v38 = vsel %vm133_vm1, %v118_v23, %v126_v28  ;;  %v3733_v41 = vld [vmem:[%s6097_s0 + $0x5c] sm:$0x3]  ;;  %v139_v43 = vsel %vm129_vm0, %v118_v23, %v126_v28  ;;  %v4523_v46 = vld [vmem:[%s6096_s1 + $0x8] sm:$0xff] }
   0xd   :  { %3461 = vmatpush.bf16.msra.mxu3 %v4551_v18  ;;  %v136_v42 = vrot.slane %v134_v33, 2  ;;  %v142_v44 = vrot.slane %v140_v38, 2  ;;  %v4531_v47 = vld [vmem:[%s6096_s1 + $0x48] sm:$0xff]  ;;  %v128_v50 = vrot.slane %v120_v36, 2  ;;  %v162_v51 = vshrl.u32 %v132_v37, 16  ;;  %v4522_v55 = vld [vmem:[%s6096_s1] sm:$0xff]  ;;  %vm4905_vm8 = vmor %vm4885_vm7, %vm160_vm5 }
   0xe   :  { %3405 = vmatpush.bf16.msra.mxu0 %v4526_v15  ;;  %v4539_v52 = vld [vmem:[%s6096_s1 + $0x88] sm:$0xff]  ;;  %v165_v54 = vshll.u32 %v132_v37, 16  ;;  %v4530_v56 = vld [vmem:[%s6096_s1 + $0x40] sm:$0xff]  ;;  %v175_v59 = vshrl.u32 %v139_v43, 16  ;;  %v178_v60 = vshll.u32 %v139_v43, 16  ;;  %v191_v0 = vshll.u32 %v145_v45, 16 }
   0xf   :  { %3424 = vmatpush.bf16.msra.mxu1 %v4534_v16  ;;  %v152_v57 = vsel %vm133_vm1, %v120_v36, %v128_v50  ;;  %v4803_v58 = vshll.u32 %v136_v42, 16  ;;  %v4550_v61 = vld [vmem:[%s6096_s1 + $0xe0] sm:$0xff]  ;;  %v4808_v62 = vshll.u32 %v142_v44, 16  ;;  %v4561_v1 = vld [vmem:[%s6096_s1 + $0x138] sm:$0xff]  ;;  %v3734_v2 = vld [vmem:[%s6097_s0 + $0x14] sm:$0x3]  ;;  %v151_v13 = vsel %vm129_vm0, %v120_v36, %v128_v50 }
  0x10   :  { %3443 = vmatpush.bf16.msra.mxu2 %v4542_v17  ;;  %v34_v35 = vld.sshfl [vmem:[#allocation1] sm:$0xff pattern:$0x73625140]  ;;  %v148_v3 = vrot.slane %v146_v53, 2  ;;  %v164_v4 = vrot.slane %v162_v51, 6  ;;  %v167_v5 = vrot.slane %v165_v54, 7 }
  0x11   :  { %v49_v39 = vunpack.c.l.b16 %v34_v35  ;;  %v50_v40 = vunpack.c.h.b16 %v34_v35  ;;  %37 = vst [vmem:[#allocation1] ss:$4 sm:$0xff] %v3730_v27  ;;  %v3742_v6 = vld [vmem:[%s6097_s0 + $0x50] sm:$0x7]  ;;  %v3735_v7 = vld [vmem:[%s6097_s0 + $0x18] sm:$0x3]  ;;  %3462 = vmatpush.bf16.msra.mxu3 %v4550_v61 }
  0x12   :  { %3406 = vmatpush.bf16.msra.mxu0 %v4525_v19  ;;  %40 = vst [vmem:[#allocation1 + $0x1] ss:$4 sm:$0xff] %v3731_v31  ;;  %v4569_v8 = vld [vmem:[%s6096_s1 + $0x178] sm:$0xff]  ;;  %v154_v9 = vrot.slane %v152_v57, 2  ;;  %v3743_v10 = vld [vmem:[%s6097_s0 + $0x54] sm:$0x7] }
  0x13   :  { %3425 = vmatpush.bf16.msra.mxu1 %v4533_v20  ;;  %v53_v48 = vpack.c.b16 %v49_v39, %v49_v39  ;;  %v54_v49 = vpack.c.b16 %v50_v40, %v50_v40  ;;  %43 = vst [vmem:[#allocation1 + $0x2] ss:$4 sm:$0xff] %v3732_v32  ;;  %v3736_v11 = vld [vmem:[%s6097_s0 + $0x1c] sm:$0x3]  ;;  %v4538_v12 = vld [vmem:[%s6096_s1 + $0x80] sm:$0xff]  ;;  %v173_v14 = vrot.slane %v4803_v58, 7 }
  0x14   :  { %3444 = vmatpush.bf16.msra.mxu2 %v4541_v21  ;;  %46 = vst [vmem:[#allocation1 + $0x3] ss:$4 sm:$0xff] %v3733_v41  ;;  %v177_v15 = vrot.slane %v175_v59, 6  ;;  %v180_v16 = vrot.slane %v178_v60, 7  ;;  %v3744_v17 = vld [vmem:[%s6097_s0 + $0x58] sm:$0x7] }
  0x15   :  { %61 = vst [vmem:[#allocation2] sm:$0xf] %v53_v48  ;;  %v3737_v18 = vld [vmem:[%s6097_s0 + $0x20] sm:$0x3]  ;;  %v4568_v19 = vld [vmem:[%s6096_s1 + $0x170] sm:$0xff]  ;;  %v186_v20 = vrot.slane %v4808_v62, 7 }
  0x16   :  { %3407 = vmatpush.bf16.msra.mxu0 %v4524_v26  ;;  %62 = vst [vmem:[#allocation2 + $0x40] sm:$0xf] %v54_v49  ;;  %v4846_v21 = vrot.slane %v188_v63, 6  ;;  %v4848_v22 = vrot.slane %v191_v0, 7  ;;  %v222_v23 = vrot.slane %v3742_v6, 2  ;;  %v4560_v25 = vld [vmem:[%s6096_s1 + $0x130] sm:$0xff]  ;;  %v168_v26 = vor.u32 %v167_v5, %v164_v4 }
  0x17   :  { %3426 = vmatpush.bf16.msra.mxu1 %v4532_v30  ;;  %v4855_v27 = vshll.u32 %v148_v3, 16  ;;  %v3745_v28 = vld [vmem:[%s6097_s0 + $0x5c] sm:$0x7]  ;;  %v201_v30 = vshrl.u32 %v151_v13, 16  ;;  %v204_v31 = vshll.u32 %v151_v13, 16  ;;  %v181_v33 = vor.u32 %v180_v16, %v177_v15 }
  0x18   :  { %3445 = vmatpush.bf16.msra.mxu2 %v4540_v34  ;;  %v223_v34 = vrot.slane %v3743_v10, 2  ;;  %v224_v35 = vrot.slane %v3744_v17, 2  ;;  %v4860_v37 = vshll.u32 %v154_v9, 16  ;;  %v228_v38 = vsel %vm129_vm0, %v3742_v6, %v222_v23  ;;  %v3738_v53 = vld [vmem:[%s6097_s0 + $0x64] sm:$0x3] }
  0x19   :  { %v229_v39 = vsel %vm133_vm1, %v3742_v6, %v222_v23  ;;  %v169_v41 = vrot.slane %v168_v26, 2  ;;  %v225_v42 = vrot.slane %v3745_v28, 2  ;;  %v194_v45 = vor.u32 %v4848_v22, %v4846_v21  ;;  %v3739_v60 = vld [vmem:[%s6097_s0 + $0x68] sm:$0x3] }
  0x1a   :  { %3408 = vmatpush.bf16.msra.mxu0 %v4523_v46  ;;  %v234_v43 = vsel %vm129_vm0, %v3743_v10, %v223_v34  ;;  %v235_v44 = vsel %vm133_vm1, %v3743_v10, %v223_v34  ;;  %v231_v46 = vrot.slane %v229_v39, 2  ;;  %v241_v48 = vsel %vm133_vm1, %v3744_v17, %v224_v35  ;;  %v4934_v39 = vld [vmem:[%s6097_s0 + $0x20] sm:$0x7] }
  0x1b   :  { %3427 = vmatpush.bf16.msra.mxu1 %v4531_v47  ;;  %v4850_v24 = vld.sshfl [vmem:[#allocation1] sm:$0xff pattern:$0x73625140]  ;;  %v240_v47 = vsel %vm129_vm0, %v3744_v17, %v224_v35  ;;  %v4876_v49 = vrot.slane %v181_v33, 2  ;;  %v199_v50 = vrot.slane %v4855_v27, 7  ;;  %v203_v51 = vrot.slane %v201_v30, 6 }
  0x1c   :  { %3446 = vmatpush.bf16.msra.mxu2 %v4539_v52  ;;  %v3852_v29 = vld [vmem:[#allocation2] sm:$0xf]  ;;  %76 = vst [vmem:[#allocation1] ss:$4 sm:$0xff] %v3734_v2  ;;  %v250_v52 = vshrl.u32 %v228_v38, 16  ;;  %v253_v57 = vshll.u32 %v228_v38, 16  ;;  %v246_v63 = vsel %vm129_vm0, %v3745_v28, %v225_v42  ;;  %v247_v3 = vsel %vm133_vm1, %v3745_v28, %v225_v42 }
  0x1d   :  { %v4498_v32 = vld [vmem:[#allocation2 + $0x3c] sm:$0xf0]  ;;  %79 = vst [vmem:[#allocation1 + $0x1] ss:$4 sm:$0xff] %v3735_v7  ;;  %v263_v59 = vshrl.u32 %v234_v43, 16  ;;  %v243_v61 = vrot.slane %v241_v48, 2  ;;  %v4920_v26 = vsel %vm4905_vm8, %v169_v41, %v173_v14  ;;  %v52_v48 = vunpack.c.h.b16 %v4850_v24 }
  0x1e   :  { %3409 = vmatpush.bf16.msra.mxu0 %v4522_v55  ;;  %v3853_v36 = vor.u32 %v4498_v32, %v3852_v29  ;;  %82 = vst [vmem:[#allocation1 + $0x2] ss:$4 sm:$0xff] %v3736_v11  ;;  %v206_v55 = vrot.slane %v204_v31, 7  ;;  %v266_v0 = vshll.u32 %v234_v43, 16  ;;  %v3740_v2 = vld [vmem:[%s6097_s0 + $0x6c] sm:$0x3] }
  0x1f   :  { %3428 = vmatpush.bf16.msra.mxu1 %v4530_v56  ;;  %85 = vst [vmem:[#allocation1 + $0x3] ss:$4 sm:$0xff] %v3737_v18  ;;  %v237_v56 = vrot.slane %v235_v44, 2  ;;  %v252_v4 = vrot.slane %v250_v52, 6  ;;  %v4897_v5 = vshll.u32 %v231_v46, 16  ;;  %v279_v6 = vshll.u32 %v240_v47, 16 }
  0x20   :  { %3447 = vmatpush.bf16.msra.mxu2 %v4538_v12  ;;  %v3741_v7 = vld [vmem:[%s6097_s0 + $0x70] sm:$0x3]  ;;  %v255_v9 = vrot.slane %v253_v57, 7  ;;  %v265_v10 = vrot.slane %v263_v59, 6  ;;  %v268_v11 = vrot.slane %v266_v0, 7  ;;  %v207_v15 = vor.u32 %v206_v55, %v203_v51  ;;  %v4549_v44 = vld [vmem:[%s6096_s1 + $0xd8] sm:$0xff] }
  0x21   :  { %3410 = vmatmul.bf16.vlgmr.msra.gmra.mxu0 %v3853_v36  ;;  %v281_v16 = vrot.slane %v279_v6, 7  ;;  %v289_v17 = vshrl.u32 %v246_v63, 16  ;;  %v292_v18 = vshll.u32 %v246_v63, 16  ;;  %v4909_v22 = vshll.u32 %v237_v56, 16  ;;  %v3747_v35 = vld [vmem:[%s6097_s0 + $0x18] sm:$0x7]  ;;  %3463 = vmatpush.bf16.msra.mxu3 %v4549_v44 }
  0x22   :  { %3478 = vmatpush.bf16.msrb.mxu0 %v4561_v1  ;;  %v276_v1 = vshrl.u32 %v240_v47, 16  ;;  %v4911_v23 = vshll.u32 %v243_v61, 16  ;;  %v249_v28 = vrot.slane %v247_v3, 2  ;;  %v195_v33 = vrot.slane %v194_v45, 2  ;;  %v4929_v14 = vld [vmem:[%s6097_s0 + $0x1c] sm:$0x7] }
  0x23   :  { %3497 = vmatpush.bf16.msrb.mxu1 %v4569_v8  ;;  %v291_v29 = vrot.slane %v289_v17, 6  ;;  %v294_v30 = vrot.slane %v292_v18, 7  ;;  %v256_v34 = vor.u32 %v255_v9, %v252_v4  ;;  %v212_v36 = vrot.slane %v4860_v37, 7  ;;  %v4559_v45 = vld [vmem:[%s6096_s1 + $0x128] sm:$0xff]  ;;  %v4577_v46 = vld [vmem:[%s6096_s1 + $0x1b8] sm:$0xff]  ;;  %v4558_v59 = vld [vmem:[%s6096_s1 + $0x120] sm:$0xff] }
  0x24   :  { %v278_v12 = vrot.slane %v276_v1, 6  ;;  %v269_v58 = vor.u32 %v268_v11, %v265_v10  ;;  %v208_v41 = vrot.slane %v207_v15, 2  ;;  %v261_v42 = vrot.slane %v4897_v5, 7  ;;  %3516 = vmatpush.bf16.msrb.mxu2 %v4577_v46  ;;  %v4576_v1 = vld [vmem:[%s6096_s1 + $0x1b0] sm:$0xff]  ;;  %v4547_v10 = vld [vmem:[%s6096_s1 + $0xc8] sm:$0xff] }
  0x25   :  { %v274_v43 = vrot.slane %v4909_v22, 7  ;;  %v287_v37 = vrot.slane %v4911_v23, 7  ;;  %v51_v47 = vunpack.c.l.b16 %v4850_v24  ;;  %v295_v51 = vor.u32 %v294_v30, %v291_v29  ;;  %v4548_v24 = vld [vmem:[%s6096_s1 + $0xd0] sm:$0xff]  ;;  %v4575_v27 = vld [vmem:[%s6096_s1 + $0x1a8] sm:$0xff]  ;;  %v3750_v5 = vld [vmem:[%s6097_s0 + $0x64] sm:$0x7] }
  0x26   :  { %3479 = vmatpush.bf16.msrb.mxu0 %v4560_v25  ;;  %v86_v13 = vld.sshfl [vmem:[#allocation1] sm:$0xff pattern:$0x73625140]  ;;  %v3746_v25 = vld [vmem:[%s6097_s0 + $0x14] sm:$0x7]  ;;  %v282_v38 = vor.u32 %v281_v16, %v278_v12  ;;  %v4950_v52 = vshll.u32 %v249_v28, 16  ;;  %v56_v61 = vpack.c.b16 %v52_v48, %v52_v48  ;;  %v187_v9 = vsel %vm4905_vm8, %v4876_v49, %v186_v20  ;;  %3464 = vmatpush.bf16.msra.mxu3 %v4548_v24 }
  0x27   :  { %3498 = vmatpush.bf16.msrb.mxu1 %v4568_v19  ;;  %v101_v19 = vunpack.c.l.b16 %v86_v13  ;;  %v102_v21 = vunpack.c.h.b16 %v86_v13  ;;  %89 = vst [vmem:[#allocation1] ss:$4 sm:$0xff] %v3738_v53  ;;  %v352_v40 = vrot.slane %v3746_v25, 2  ;;  %v4567_v53 = vld [vmem:[%s6096_s1 + $0x168] sm:$0xff]  ;;  %v4955_v54 = vrot.slane %v256_v34, 2  ;;  %v4557_v49 = vld [vmem:[%s6096_s1 + $0x118] sm:$0xff] }
  0x28   :  { %92 = vst [vmem:[#allocation1 + $0x1] ss:$4 sm:$0xff] %v3739_v60  ;;  %v353_v55 = vrot.slane %v3747_v35, 2  ;;  %v55_v60 = vpack.c.b16 %v51_v47, %v51_v47  ;;  %v4967_v63 = vrot.slane %v269_v58, 2  ;;  %v4969_v0 = vrot.slane %v282_v38, 2  ;;  %3517 = vmatpush.bf16.msrb.mxu2 %v4576_v1  ;;  %v4565_v34 = vld [vmem:[%s6096_s1 + $0x158] sm:$0xff] }
  0x29   :  { %v105_v31 = vpack.c.b16 %v101_v19, %v101_v19  ;;  %v106_v32 = vpack.c.b16 %v102_v21, %v102_v21  ;;  %95 = vst [vmem:[#allocation1 + $0x2] ss:$4 sm:$0xff] %v3740_v2  ;;  %v358_v56 = vsel %vm129_vm0, %v3746_v25, %v352_v40  ;;  %v4959_v57 = vsel %vm133_vm1, %v3746_v25, %v352_v40  ;;  %v4566_v2 = vld [vmem:[%s6096_s1 + $0x160] sm:$0xff]  ;;  %v4556_v44 = vld [vmem:[%s6096_s1 + $0x110] sm:$0xff] }
  0x2a   :  { %98 = vst [vmem:[#allocation1 + $0x3] ss:$4 sm:$0xff] %v3741_v7  ;;  %3480 = vmatpush.bf16.msrb.mxu0 %v4559_v45  ;;  %v354_v3 = vrot.slane %v4929_v14, 2  ;;  %v355_v4 = vrot.slane %v4934_v39, 2  ;;  %v365_v6 = vsel %vm133_vm1, %v3747_v35, %v353_v55  ;;  %v380_v7 = vshrl.u32 %v358_v56, 16  ;;  %v4574_v58 = vld [vmem:[%s6096_s1 + $0x1a0] sm:$0xff]  ;;  %3465 = vmatpush.bf16.msra.mxu3 %v4547_v10 }
  0x2b   :  { %113 = vst [vmem:[#allocation2 + $0x4] sm:$0xf] %v105_v31  ;;  %3499 = vmatpush.bf16.msrb.mxu1 %v4567_v53  ;;  %v4988_v11 = vrot.slane %v295_v51, 2  ;;  %v300_v12 = vrot.slane %v4950_v52, 7  ;;  %v361_v13 = vrot.slane %v4959_v57, 2  ;;  %v200_v62 = vsel %vm4905_vm8, %v195_v33, %v199_v50  ;;  %v4564_v57 = vld [vmem:[%s6096_s1 + $0x150] sm:$0xff] }
  0x2c   :  { %114 = vst [vmem:[#allocation2 + $0x44] sm:$0xf] %v106_v32  ;;  %v213_v20 = vsel %vm4905_vm8, %v208_v41, %v212_v36  ;;  %v371_v16 = vsel %vm133_vm1, %v4929_v14, %v354_v3  ;;  %v364_v19 = vsel %vm129_vm0, %v3747_v35, %v353_v55  ;;  %v367_v21 = vrot.slane %v365_v6, 2  ;;  %v4546_v35 = vld [vmem:[%s6096_s1 + $0xc0] sm:$0xff]  ;;  %3518 = vmatpush.bf16.msrb.mxu2 %v4575_v27 }
  0x2d   :  { %63 = vst [vmem:[#allocation2 + $0x80] sm:$0xf] %v55_v60  ;;  %v370_v28 = vsel %vm129_vm0, %v4929_v14, %v354_v3  ;;  %v382_v29 = vrot.slane %v380_v7, 6  ;;  %v383_v30 = vshll.u32 %v358_v56, 16  ;;  %v373_v36 = vrot.slane %v371_v16, 2 }
  0x2e   :  { %64 = vst [vmem:[#allocation2 + $0xc0] sm:$0xf] %v56_v61  ;;  %3481 = vmatpush.bf16.msrb.mxu0 %v4558_v59  ;;  %v377_v38 = vsel %vm133_vm1, %v4934_v39, %v355_v4  ;;  %v393_v40 = vshrl.u32 %v364_v19, 16  ;;  %v396_v41 = vshll.u32 %v364_v19, 16  ;;  %v389_v45 = vshll.u32 %v361_v13, 16  ;;  %3466 = vmatpush.bf16.msra.mxu3 %v4546_v35 }
  0x2f   :  { %3500 = vmatpush.bf16.msrb.mxu1 %v4566_v2  ;;  %v385_v14 = vrot.slane %v383_v30, 7  ;;  %v5026_v46 = vshll.u32 %v367_v21, 16  ;;  %v406_v47 = vshrl.u32 %v370_v28, 16  ;;  %v409_v48 = vshll.u32 %v370_v28, 16 }
  0x30   :  { %v395_v53 = vrot.slane %v393_v40, 6  ;;  %v398_v55 = vrot.slane %v396_v41, 7  ;;  %v262_v24 = vsel %vm4905_vm8, %v4955_v54, %v261_v42  ;;  %v5036_v61 = vshll.u32 %v373_v36, 16  ;;  %3519 = vmatpush.bf16.msrb.mxu2 %v4574_v58  ;;  %v4573_v40 = vld [vmem:[%s6096_s1 + $0x198] sm:$0xff] }
  0x31   :  { %v99_v15 = vld.sshfl [vmem:[#allocation1] sm:$0xff pattern:$0x73625140]  ;;  %v408_v59 = vrot.slane %v406_v47, 6  ;;  %v411_v60 = vrot.slane %v409_v48, 7  ;;  %v275_v2 = vsel %vm4905_vm8, %v4967_v63, %v274_v43  ;;  %v379_v3 = vrot.slane %v377_v38, 2 }
  0x32   :  { %v4490_v17 = vld [vmem:[#allocation2 + $0x4] sm:$0xf]  ;;  %303 = vst [vmem:[#allocation1] ss:$4 sm:$0xff] %v4920_v26  ;;  %v103_v50 = vunpack.c.l.b16 %v99_v15  ;;  %v104_v18 = vunpack.c.h.b16 %v99_v15  ;;  %v376_v26 = vsel %vm129_vm0, %v4934_v39, %v355_v4  ;;  %3482 = vmatpush.bf16.msrb.mxu0 %v4557_v49  ;;  %v386_v39 = vor.u32 %v385_v14, %v382_v29  ;;  %v3751_v63 = vld [vmem:[%s6097_s0 + $0x68] sm:$0x7] }
  0x33   :  { %v3854_v25 = vld [vmem:[#allocation2 + $0x40] sm:$0xf0]  ;;  %306 = vst [vmem:[#allocation1 + $0x1] ss:$4 sm:$0xff] %v187_v9  ;;  %3501 = vmatpush.bf16.msrb.mxu1 %v4565_v34  ;;  %v419_v4 = vshrl.u32 %v376_v26, 16  ;;  %v288_v42 = vsel %vm4905_vm8, %v4969_v0, %v287_v37  ;;  %v301_v22 = vsel %vm4905_vm8, %v4988_v11, %v300_v12  ;;  %v399_v43 = vor.u32 %v398_v55, %v395_v53  ;;  %v4585_v41 = vld [vmem:[%s6096_s1 + $0x1f8] sm:$0xff] }
  0x34   :  { %v3857_v31 = vor.u32 %v4490_v17, %v3854_v25  ;;  %309 = vst [vmem:[#allocation1 + $0x2] ss:$4 sm:$0xff] %v200_v62  ;;  %v107_v32 = vpack.c.b16 %v103_v50, %v103_v50  ;;  %v108_v33 = vpack.c.b16 %v104_v18, %v104_v18  ;;  %v3916_v51 = vld [vmem:[#allocation2 + $0x80] sm:$0xf]  ;;  %v422_v54 = vshll.u32 %v376_v26, 16  ;;  %3520 = vmatpush.bf16.msrb.mxu2 %v4573_v40  ;;  %v4572_v53 = vld [vmem:[%s6096_s1 + $0x190] sm:$0xff] }
  0x35   :  { %312 = vst [vmem:[#allocation1 + $0x3] ss:$4 sm:$0xff] %v213_v20  ;;  %v4514_v56 = vld [vmem:[#allocation2 + $0xbc] sm:$0xf0]  ;;  %v387_v6 = vrot.slane %v386_v39, 2  ;;  %v391_v23 = vrot.slane %v389_v45, 7  ;;  %v412_v0 = vor.u32 %v411_v60, %v408_v59  ;;  %3535 = vmatpush.bf16.msrb.mxu3 %v4585_v41 }
  0x36   :  { %3429 = vmatmul.bf16.vlgmr.msra.gmra.mxu1 %v3857_v31  ;;  %115 = vst [vmem:[#allocation2 + $0x84] sm:$0xf] %v107_v32  ;;  %v3917_v1 = vor.u32 %v4514_v56, %v3916_v51  ;;  %v404_v7 = vrot.slane %v5026_v46, 7  ;;  %v421_v9 = vrot.slane %v419_v4, 6  ;;  %v3752_v37 = vld [vmem:[%s6097_s0 + $0x6c] sm:$0x7]  ;;  %3483 = vmatpush.bf16.msrb.mxu0 %v4556_v44 }
  0x37   :  { %116 = vst [vmem:[#allocation2 + $0xc4] sm:$0xf] %v108_v33  ;;  %3502 = vmatpush.bf16.msrb.mxu1 %v4564_v57  ;;  %v417_v10 = vrot.slane %v5036_v61, 7  ;;  %v424_v11 = vrot.slane %v422_v54, 7  ;;  %v440_v12 = vrot.slane %v3750_v5, 2  ;;  %v428_v62 = vshll.u32 %v379_v3, 16 }
  0x38   :  { %3415 = vmatmul.bf16.gmra.mxu0 %v3917_v1  ;;  %v3753_v20 = vld [vmem:[%s6097_s0 + $0x70] sm:$0x7]  ;;  %v441_v49 = vrot.slane %v3751_v63, 2  ;;  %v400_v16 = vrot.slane %v399_v43, 2  ;;  %v442_v27 = vrot.slane %v3752_v37, 2  ;;  %v392_v28 = vsel %vm4905_vm8, %v387_v6, %v391_v23  ;;  %v4555_v14 = vld [vmem:[%s6096_s1 + $0x108] sm:$0xff]  ;;  %3521 = vmatpush.bf16.msrb.mxu2 %v4572_v53 }
  0x39   :  { %v425_v17 = vor.u32 %v424_v11, %v421_v9  ;;  %v447_v50 = vsel %vm133_vm1, %v3750_v5, %v440_v12  ;;  %v413_v26 = vrot.slane %v412_v0, 2  ;;  %v443_v29 = vrot.slane %v3753_v20, 2  ;;  %v4563_v45 = vld [vmem:[%s6096_s1 + $0x148] sm:$0xff]  ;;  %v4554_v39 = vld [vmem:[%s6096_s1 + $0x100] sm:$0xff]  ;;  %v4584_v59 = vld [vmem:[%s6096_s1 + $0x1f0] sm:$0xff] }
  0x3a   :  { %v446_v30 = vsel %vm129_vm0, %v3750_v5, %v440_v12  ;;  %v453_v31 = vsel %vm133_vm1, %v3751_v63, %v441_v49  ;;  %v430_v32 = vrot.slane %v428_v62, 7  ;;  %v449_v33 = vrot.slane %v447_v50, 2  ;;  %3484 = vmatpush.bf16.msrb.mxu0 %v4555_v14  ;;  %v4562_v60 = vld [vmem:[%s6096_s1 + $0x140] sm:$0xff]  ;;  %3536 = vmatpush.bf16.msrb.mxu3 %v4584_v59  ;;  %v3770_v59 = vld [vmem:[%s6097_s0 + $0x28] sm:$0x7] }
  0x3b   :  { %v452_v34 = vsel %vm129_vm0, %v3751_v63, %v441_v49  ;;  %v459_v35 = vsel %vm133_vm1, %v3752_v37, %v442_v27  ;;  %v405_v58 = vsel %vm4905_vm8, %v400_v16, %v404_v7  ;;  %v426_v38 = vrot.slane %v425_v17, 2  ;;  %3503 = vmatpush.bf16.msrb.mxu1 %v4563_v45 }
  0x3c   :  { %v313_v52 = vld.sshfl [vmem:[#allocation1] sm:$0xff pattern:$0x73625140]  ;;  %v458_v44 = vsel %vm129_vm0, %v3752_v37, %v442_v27  ;;  %v455_v46 = vrot.slane %v453_v31, 2  ;;  %v465_v47 = vsel %vm133_vm1, %v3753_v20, %v443_v29  ;;  %v468_v48 = vshrl.u32 %v446_v30, 16 }
  0x3d   :  { %v328_v13 = vunpack.c.l.b16 %v313_v52  ;;  %v329_v15 = vunpack.c.h.b16 %v313_v52  ;;  %316 = vst [vmem:[#allocation1] ss:$4 sm:$0xff] %v262_v24  ;;  %v4506_v21 = vld [vmem:[#allocation2 + $0x84] sm:$0xf]  ;;  %v471_v51 = vshll.u32 %v446_v30, 16  ;;  %v461_v55 = vrot.slane %v459_v35, 2 }
  0x3e   :  { %319 = vst [vmem:[#allocation1 + $0x1] ss:$4 sm:$0xff] %v275_v2  ;;  %v3918_v25 = vld [vmem:[#allocation2 + $0xc0] sm:$0xf0]  ;;  %v464_v56 = vsel %vm129_vm0, %v3753_v20, %v443_v29  ;;  %v481_v57 = vshrl.u32 %v452_v34, 16  ;;  %v484_v24 = vshll.u32 %v452_v34, 16  ;;  %v418_v4 = vsel %vm4905_vm8, %v413_v26, %v417_v10  ;;  %3485 = vmatpush.bf16.msrb.mxu0 %v4554_v39 }
  0x3f   :  { %v332_v18 = vpack.c.b16 %v328_v13, %v328_v13  ;;  %v333_v19 = vpack.c.b16 %v329_v15, %v329_v15  ;;  %322 = vst [vmem:[#allocation1 + $0x2] ss:$4 sm:$0xff] %v288_v42  ;;  %v3921_v36 = vor.u32 %v4506_v21, %v3918_v25  ;;  %v470_v61 = vrot.slane %v468_v48, 6  ;;  %3504 = vmatpush.bf16.msrb.mxu1 %v4562_v60  ;;  %v4593_v48 = vld [vmem:[%s6096_s1 + $0x238] sm:$0xff]  ;;  %v3755_v39 = vld [vmem:[%s6097_s0 + $0x2c] sm:$0x3] }
  0x40   :  { %325 = vst [vmem:[#allocation1 + $0x3] ss:$4 sm:$0xff] %v301_v22  ;;  %v473_v1 = vrot.slane %v471_v51, 7  ;;  %v494_v2 = vshrl.u32 %v458_v44, 16  ;;  %v497_v3 = vshll.u32 %v458_v44, 16  ;;  %v467_v5 = vrot.slane %v465_v47, 2 }
  0x41   :  { %340 = vst [vmem:[#allocation2 + $0x8] sm:$0xf] %v332_v18  ;;  %v483_v42 = vrot.slane %v481_v57, 6  ;;  %v486_v22 = vrot.slane %v484_v24, 7  ;;  %v431_v54 = vsel %vm4905_vm8, %v426_v38, %v430_v32  ;;  %v477_v63 = vshll.u32 %v449_v33, 16  ;;  %v4583_v47 = vld [vmem:[%s6096_s1 + $0x1e8] sm:$0xff] }
  0x42   :  { %341 = vst [vmem:[#allocation2 + $0x48] sm:$0xf] %v333_v19  ;;  %v496_v6 = vrot.slane %v494_v2, 6  ;;  %v499_v23 = vrot.slane %v497_v3, 7  ;;  %v474_v52 = vor.u32 %v473_v1, %v470_v61  ;;  %v507_v0 = vshrl.u32 %v464_v56, 16  ;;  %3537 = vmatpush.bf16.msrb.mxu3 %v4583_v47  ;;  %3554 = vmatpush.bf16.msra.mxu0 %v4593_v48  ;;  %v4600_v48 = vld [vmem:[%s6096_s1 + $0x270] sm:$0xff] }
  0x43   :  { %v487_v10 = vor.u32 %v486_v22, %v483_v42  ;;  %v490_v12 = vshll.u32 %v455_v46, 16  ;;  %v503_v13 = vshll.u32 %v461_v55, 16  ;;  %v510_v17 = vshll.u32 %v464_v56, 16  ;;  %v4571_v46 = vld [vmem:[%s6096_s1 + $0x188] sm:$0xff]  ;;  %v3756_v55 = vld [vmem:[%s6097_s0 + $0x30] sm:$0x3] }
  0x44   :  { %v500_v49 = vor.u32 %v499_v23, %v496_v6  ;;  %v509_v16 = vrot.slane %v507_v0, 6  ;;  %v475_v27 = vrot.slane %v474_v52, 2  ;;  %v479_v50 = vrot.slane %v477_v63, 7  ;;  %3522 = vmatpush.bf16.msrb.mxu2 %v4571_v46  ;;  %v3754_v51 = vld [vmem:[%s6097_s0 + $0x28] sm:$0x3] }
  0x45   :  { %v516_v18 = vshll.u32 %v467_v5, 16  ;;  %v488_v19 = vrot.slane %v487_v10, 2  ;;  %v492_v21 = vrot.slane %v490_v12, 7  ;;  %v512_v25 = vrot.slane %v510_v17, 7  ;;  %v3757_v57 = vld [vmem:[%s6097_s0 + $0x34] sm:$0x3] }
  0x46   :  { %3434 = vmatmul.bf16.gmra.mxu1 %v3921_v36  ;;  %v505_v26 = vrot.slane %v503_v13, 7  ;;  %v480_v31 = vsel %vm4905_vm8, %v475_v27, %v479_v50  ;;  %v3771_v61 = vld [vmem:[%s6097_s0 + $0x2c] sm:$0x7]  ;;  %v674_v1 = vrot.slane %v3770_v59, 2  ;;  %v3772_v3 = vld [vmem:[%s6097_s0 + $0x30] sm:$0x7] }
  0x47   :  { %v326_v43 = vld.sshfl [vmem:[#allocation1] sm:$0xff pattern:$0x73625140]  ;;  %v513_v29 = vor.u32 %v512_v25, %v509_v16  ;;  %v518_v30 = vrot.slane %v516_v18, 7  ;;  %v493_v32 = vsel %vm4905_vm8, %v488_v19, %v492_v21  ;;  %v675_v2 = vrot.slane %v3771_v61, 2 }
  0x48   :  { %v3860_v7 = vld [vmem:[#allocation2 + $0x8] sm:$0xf]  ;;  %v330_v9 = vunpack.c.l.b16 %v326_v43  ;;  %v331_v37 = vunpack.c.h.b16 %v326_v43  ;;  %521 = vst [vmem:[#allocation1] ss:$4 sm:$0xff] %v392_v28  ;;  %v501_v28 = vrot.slane %v500_v49, 2  ;;  %v681_v5 = vsel %vm133_vm1, %v3770_v59, %v674_v1 }
  0x49   :  { %v4499_v11 = vld [vmem:[#allocation2 + $0x44] sm:$0xf0]  ;;  %524 = vst [vmem:[#allocation1 + $0x1] ss:$4 sm:$0xff] %v405_v58  ;;  %v514_v33 = vrot.slane %v513_v29, 2  ;;  %v687_v42 = vsel %vm133_vm1, %v3771_v61, %v675_v2  ;;  %v686_v43 = vsel %vm129_vm0, %v3771_v61, %v675_v2  ;;  %v676_v6 = vrot.slane %v3772_v3, 2 }
  0x4a   :  { %v3861_v15 = vor.u32 %v4499_v11, %v3860_v7  ;;  %v334_v62 = vpack.c.b16 %v330_v9, %v330_v9  ;;  %v335_v20 = vpack.c.b16 %v331_v37, %v331_v37  ;;  %527 = vst [vmem:[#allocation1 + $0x2] ss:$4 sm:$0xff] %v418_v4  ;;  %v506_v35 = vsel %vm4905_vm8, %v501_v28, %v505_v26  ;;  %v3773_v22 = vld [vmem:[%s6097_s0 + $0x34] sm:$0x7]  ;;  %v3759_v63 = vld [vmem:[%s6097_s0 + $0x7c] sm:$0x3] }
  0x4b   :  { %530 = vst [vmem:[#allocation1 + $0x3] ss:$4 sm:$0xff] %v431_v54  ;;  %v519_v38 = vsel %vm4905_vm8, %v514_v33, %v518_v30  ;;  %v680_v4 = vsel %vm129_vm0, %v3770_v59, %v674_v1  ;;  %v3758_v54 = vld [vmem:[%s6097_s0 + $0x78] sm:$0x3]  ;;  %v3760_v7 = vld [vmem:[%s6097_s0 + $0x80] sm:$0x3]  ;;  %v693_v10 = vsel %vm133_vm1, %v3772_v3, %v676_v6  ;;  %v692_v17 = vsel %vm129_vm0, %v3772_v3, %v676_v6 }
  0x4c   :  { %3448 = vmatmul.bf16.vlgmr.msra.gmra.mxu2 %v3861_v15  ;;  %342 = vst [vmem:[#allocation2 + $0x88] sm:$0xf] %v334_v62  ;;  %v702_v23 = vshrl.u32 %v680_v4, 16  ;;  %v683_v9 = vrot.slane %v681_v5, 2  ;;  %v689_v37 = vrot.slane %v687_v42, 2  ;;  %v705_v52 = vshll.u32 %v680_v4, 16 }
  0x4d   :  { %343 = vst [vmem:[#allocation2 + $0xc8] sm:$0xf] %v335_v20  ;;  %v677_v11 = vrot.slane %v3773_v22, 2  ;;  %v715_v13 = vshrl.u32 %v686_v43, 16  ;;  %v3761_v20 = vld [vmem:[%s6097_s0 + $0x84] sm:$0x3] }
  0x4e   :  { %v704_v12 = vrot.slane %v702_v23, 6  ;;  %v707_v49 = vrot.slane %v705_v52, 7  ;;  %v718_v16 = vshll.u32 %v686_v43, 16  ;;  %v5168_v18 = vshll.u32 %v683_v9, 16  ;;  %v3774_v26 = vld [vmem:[%s6097_s0 + $0x78] sm:$0x7] }
  0x4f   :  { %v5170_v19 = vshll.u32 %v689_v37, 16  ;;  %v695_v21 = vrot.slane %v693_v10, 2  ;;  %v698_v25 = vsel %vm129_vm0, %v3773_v22, %v677_v11  ;;  %v699_v28 = vsel %vm133_vm1, %v3773_v22, %v677_v11  ;;  %v4601_v33 = vld [vmem:[%s6096_s1 + $0x278] sm:$0xff]  ;;  %v3763_v47 = vld [vmem:[%s6097_s0 + $0x40] sm:$0x3] }
  0x50   :  { %v708_v29 = vor.u32 %v707_v49, %v704_v12  ;;  %v717_v30 = vrot.slane %v715_v13, 6  ;;  %v3775_v46 = vld [vmem:[%s6097_s0 + $0x7c] sm:$0x7]  ;;  %3573 = vmatpush.bf16.msra.mxu1 %v4601_v33  ;;  %v762_v61 = vrot.slane %v3774_v26, 2  ;;  %v3765_v1 = vld [vmem:[%s6097_s0 + $0x48] sm:$0x3] }
  0x51   :  { %v3777_v4 = vld [vmem:[%s6097_s0 + $0x84] sm:$0x7]  ;;  %v763_v5 = vrot.slane %v3775_v46, 2 }
  0x52   :  { %v531_v34 = vld.sshfl [vmem:[#allocation1] sm:$0xff pattern:$0x73625140]  ;;  %v768_v6 = vsel %vm129_vm0, %v3774_v26, %v762_v61  ;;  %v765_v9 = vrot.slane %v3777_v4, 2  ;;  %v769_v37 = vsel %vm133_vm1, %v3774_v26, %v762_v61 }
  0x53   :  { %v546_v36 = vunpack.c.l.b16 %v531_v34  ;;  %v547_v58 = vunpack.c.h.b16 %v531_v34  ;;  %534 = vst [vmem:[#allocation1] ss:$4 sm:$0xff] %v480_v31  ;;  %v3924_v14 = vld [vmem:[#allocation2 + $0x88] sm:$0xf]  ;;  %v720_v31 = vrot.slane %v718_v16, 7  ;;  %v4570_v34 = vld [vmem:[%s6096_s1 + $0x180] sm:$0xff]  ;;  %v774_v11 = vsel %vm129_vm0, %v3775_v46, %v763_v5 }
  0x54   :  { %537 = vst [vmem:[#allocation1 + $0x1] ss:$4 sm:$0xff] %v493_v32  ;;  %v4515_v40 = vld [vmem:[#allocation2 + $0xc4] sm:$0xf0]  ;;  %v728_v32 = vshrl.u32 %v692_v17, 16  ;;  %3523 = vmatpush.bf16.msrb.mxu2 %v4570_v34  ;;  %3574 = vmatpush.bf16.msra.mxu1 %v4600_v48  ;;  %v775_v10 = vsel %vm133_vm1, %v3775_v46, %v763_v5  ;;  %v771_v16 = vrot.slane %v769_v37, 2 }
  0x55   :  { %v550_v41 = vpack.c.b16 %v546_v36, %v546_v36  ;;  %v551_v44 = vpack.c.b16 %v547_v58, %v547_v58  ;;  %540 = vst [vmem:[#allocation1 + $0x2] ss:$4 sm:$0xff] %v506_v35  ;;  %v3925_v45 = vor.u32 %v4515_v40, %v3924_v14  ;;  %v4582_v35 = vld [vmem:[%s6096_s1 + $0x1e0] sm:$0xff]  ;;  %v3762_v14 = vld [vmem:[%s6097_s0 + $0x3c] sm:$0x3]  ;;  %v4592_v40 = vld [vmem:[%s6096_s1 + $0x230] sm:$0xff]  ;;  %v721_v2 = vor.u32 %v720_v31, %v717_v30 }
  0x56   :  { %543 = vst [vmem:[#allocation1 + $0x3] ss:$4 sm:$0xff] %v519_v38  ;;  %v731_v38 = vshll.u32 %v692_v17, 16  ;;  %3538 = vmatpush.bf16.msrb.mxu3 %v4582_v35  ;;  %3555 = vmatpush.bf16.msra.mxu0 %v4592_v40  ;;  %v730_v59 = vrot.slane %v728_v32, 6  ;;  %v3766_v34 = vld [vmem:[%s6097_s0 + $0x8c] sm:$0x3] }
  0x57   :  { %558 = vst [vmem:[#allocation2 + $0xc] sm:$0xf] %v550_v41  ;;  %v701_v41 = vrot.slane %v699_v28, 2  ;;  %v806_v28 = vshll.u32 %v774_v11, 16  ;;  %v3767_v35 = vld [vmem:[%s6097_s0 + $0x90] sm:$0x3] }
  0x58   :  { %559 = vst [vmem:[#allocation2 + $0x4c] sm:$0xf] %v551_v44  ;;  %v713_v44 = vrot.slane %v5168_v18, 7  ;;  %v733_v3 = vrot.slane %v731_v38, 7  ;;  %v787_v38 = vsel %vm133_vm1, %v3777_v4, %v765_v9  ;;  %v3778_v48 = vld [vmem:[%s6097_s0 + $0x3c] sm:$0x7] }
  0x59   :  { %v3769_v5 = vld [vmem:[%s6097_s0 + $0x98] sm:$0x3] }
  0x5a   :  { %v734_v12 = vor.u32 %v733_v3, %v730_v59  ;;  %v789_v59 = vrot.slane %v787_v38, 2 }
  0x5c   :  { %3453 = vmatmul.bf16.gmra.mxu2 %v3925_v45  ;;  %v726_v45 = vrot.slane %v5170_v19, 7 }
  0x5d   :  { %v5130_v53 = vld.sshfl [vmem:[#allocation1] sm:$0xff pattern:$0x73625140] }
  0x5e   :  { %v4491_v56 = vld [vmem:[#allocation2 + $0xc] sm:$0xf]  ;;  %573 = vst [vmem:[#allocation1] ss:$4 sm:$0xff] %v3754_v51  ;;  %v548_v36 = vunpack.c.l.b16 %v5130_v53  ;;  %v549_v58 = vunpack.c.h.b16 %v5130_v53  ;;  %v741_v53 = vshrl.u32 %v698_v25, 16 }
  0x5f   :  { %v3862_v24 = vld [vmem:[#allocation2 + $0x48] sm:$0xf0]  ;;  %576 = vst [vmem:[#allocation1 + $0x1] ss:$4 sm:$0xff] %v3755_v39 }
  0x60   :  { %v3865_v60 = vor.u32 %v4491_v56, %v3862_v24  ;;  %579 = vst [vmem:[#allocation1 + $0x2] ss:$4 sm:$0xff] %v3756_v55  ;;  %v552_v51 = vpack.c.b16 %v548_v36, %v548_v36  ;;  %v553_v39 = vpack.c.b16 %v549_v58, %v549_v58  ;;  %v744_v55 = vshll.u32 %v698_v25, 16  ;;  %v3776_v56 = vld [vmem:[%s6097_s0 + $0x80] sm:$0x7] }
  0x61   :  { %582 = vst [vmem:[#allocation1 + $0x3] ss:$4 sm:$0xff] %v3757_v57  ;;  %v3764_v57 = vld [vmem:[%s6097_s0 + $0x44] sm:$0x3]  ;;  %v5211_v24 = vrot.slane %v708_v29, 2  ;;  %v764_v22 = vrot.slane %v3776_v56, 2 }
  0x62   :  { %3467 = vmatmul.bf16.vlgmr.msra.gmra.mxu3 %v3865_v60  ;;  %v5213_v60 = vshll.u32 %v695_v21, 16  ;;  %560 = vst [vmem:[#allocation2 + $0x8c] sm:$0xf] %v552_v51  ;;  %v786_v21 = vsel %vm129_vm0, %v3777_v4, %v765_v9  ;;  %v803_v25 = vshrl.u32 %v774_v11, 16  ;;  %v5241_v36 = vrot.slane %v734_v12, 2 }
  0x63   :  { %561 = vst [vmem:[#allocation2 + $0xcc] sm:$0xf] %v553_v39  ;;  %v780_v13 = vsel %vm129_vm0, %v3776_v56, %v764_v22  ;;  %v781_v17 = vsel %vm133_vm1, %v3776_v56, %v764_v22  ;;  %v829_v46 = vshrl.u32 %v786_v21, 16  ;;  %v3779_v56 = vld [vmem:[%s6097_s0 + $0x40] sm:$0x7] }
  0x64   :  { %v816_v31 = vshrl.u32 %v780_v13, 16  ;;  %v819_v32 = vshll.u32 %v780_v13, 16  ;;  %v783_v58 = vrot.slane %v781_v17, 2  ;;  %v805_v39 = vrot.slane %v803_v25, 6 }
  0x66   :  { %v5263_v22 = vshll.u32 %v783_v58, 16  ;;  %v4598_v58 = vld [vmem:[%s6096_s1 + $0x260] sm:$0xff] }
  0x68   :  { %v583_v0 = vld.sshfl [vmem:[#allocation1] sm:$0xff pattern:$0x73625140] }
  0x69   :  { %v598_v15 = vunpack.c.l.b16 %v583_v0  ;;  %v599_v62 = vunpack.c.h.b16 %v583_v0  ;;  %586 = vst [vmem:[#allocation1] ss:$4 sm:$0xff] %v3758_v54  ;;  %v743_v54 = vrot.slane %v741_v53, 6  ;;  %v5227_v0 = vrot.slane %v721_v2, 2 }
  0x6a   :  { %589 = vst [vmem:[#allocation1 + $0x1] ss:$4 sm:$0xff] %v3759_v63  ;;  %v746_v63 = vrot.slane %v744_v55, 7  ;;  %v3926_v26 = vld [vmem:[#allocation2 + $0xc8] sm:$0xf0]  ;;  %v808_v53 = vrot.slane %v806_v28, 7 }
  0x6b   :  { %v602_v27 = vpack.c.b16 %v598_v15, %v598_v15  ;;  %v603_v50 = vpack.c.b16 %v599_v62, %v599_v62  ;;  %592 = vst [vmem:[#allocation1 + $0x2] ss:$4 sm:$0xff] %v3760_v7  ;;  %v5224_v7 = vshll.u32 %v701_v41, 16  ;;  %v790_v15 = vshrl.u32 %v768_v6, 16 }
  0x6c   :  { %595 = vst [vmem:[#allocation1 + $0x3] ss:$4 sm:$0xff] %v3761_v20  ;;  %v793_v62 = vshll.u32 %v768_v6, 16  ;;  %v739_v20 = vrot.slane %v5213_v60, 7  ;;  %v747_v49 = vor.u32 %v746_v63, %v743_v54  ;;  %v5248_v41 = vshll.u32 %v771_v16, 16 }
  0x6d   :  { %610 = vst [vmem:[#allocation2 + $0x10] sm:$0xf] %v602_v27  ;;  %v4507_v27 = vld [vmem:[#allocation2 + $0x8c] sm:$0xf]  ;;  %v792_v29 = vrot.slane %v790_v15, 6  ;;  %v752_v40 = vrot.slane %v5224_v7, 7  ;;  %v727_v12 = vsel %vm4905_vm8, %v5227_v0, %v726_v45 }
  0x6e   :  { %611 = vst [vmem:[#allocation2 + $0x50] sm:$0xf] %v603_v50  ;;  %v777_v50 = vrot.slane %v775_v10, 2  ;;  %v795_v30 = vrot.slane %v793_v62, 7  ;;  %v3929_v33 = vor.u32 %v4507_v27, %v3926_v26  ;;  %v5253_v51 = vrot.slane %v747_v49, 2  ;;  %v4581_v45 = vld [vmem:[%s6096_s1 + $0x1d8] sm:$0xff] }
  0x6f   :  { %v821_v2 = vrot.slane %v819_v32, 7  ;;  %v801_v54 = vrot.slane %v5248_v41, 7  ;;  %v831_v63 = vrot.slane %v829_v46, 6  ;;  %v714_v10 = vsel %vm4905_vm8, %v5211_v24, %v713_v44  ;;  %v3780_v15 = vld [vmem:[%s6097_s0 + $0x44] sm:$0x7]  ;;  %v4591_v0 = vld [vmem:[%s6096_s1 + $0x228] sm:$0xff]  ;;  %3539 = vmatpush.bf16.msrb.mxu3 %v4581_v45 }
  0x70   :  { %v5255_v55 = vshll.u32 %v777_v50, 16  ;;  %v796_v61 = vor.u32 %v795_v30, %v792_v29  ;;  %v3781_v62 = vld [vmem:[%s6097_s0 + $0x48] sm:$0x7]  ;;  %v827_v44 = vrot.slane %v5263_v22, 7  ;;  %v5286_v24 = vshll.u32 %v789_v59, 16  ;;  %v4609_v49 = vld [vmem:[%s6096_s1 + $0x2b8] sm:$0xff]  ;;  %3556 = vmatpush.bf16.msra.mxu0 %v4591_v0 }
  0x71   :  { %v894_v28 = vrot.slane %v3780_v15, 2  ;;  %v4590_v30 = vld [vmem:[%s6096_s1 + $0x220] sm:$0xff]  ;;  %3592 = vmatpush.bf16.msra.mxu2 %v4609_v49  ;;  %v895_v46 = vrot.slane %v3781_v62, 2  ;;  %v753_v60 = vsel %vm4905_vm8, %v5253_v51, %v752_v40  ;;  %v5368_v45 = vld [vmem:[%s6097_s0 + $0x90] sm:$0x7] }
  0x72   :  { %3472 = vmatmul.bf16.gmra.mxu3 %v3929_v33  ;;  %v814_v11 = vrot.slane %v5255_v55, 7  ;;  %v5283_v18 = vrot.slane %v796_v61, 2  ;;  %v4578_v0 = vld [vmem:[%s6096_s1 + $0x1c0] sm:$0xff]  ;;  %v3784_v41 = vld [vmem:[%s6097_s0 + $0x94] sm:$0x7] }
  0x73   :  { %v5221_v42 = vld.sshfl [vmem:[#allocation1] sm:$0xff pattern:$0x73625140]  ;;  %v910_v61 = vsel %vm129_vm0, %v3780_v15, %v894_v28 }
  0x74   :  { %v3868_v43 = vld [vmem:[#allocation2 + $0x10] sm:$0xf]  ;;  %625 = vst [vmem:[#allocation1] ss:$4 sm:$0xff] %v3762_v14  ;;  %v3768_v14 = vld [vmem:[%s6097_s0 + $0x94] sm:$0x3]  ;;  %v600_v16 = vunpack.c.l.b16 %v5221_v42  ;;  %v601_v17 = vunpack.c.h.b16 %v5221_v42  ;;  %3557 = vmatpush.bf16.msra.mxu0 %v4590_v30 }
  0x75   :  { %v4500_v23 = vld [vmem:[#allocation2 + $0x4c] sm:$0xf0]  ;;  %628 = vst [vmem:[#allocation1 + $0x1] ss:$4 sm:$0xff] %v3763_v47  ;;  %v832_v47 = vshll.u32 %v786_v21, 16  ;;  %v4599_v21 = vld [vmem:[%s6096_s1 + $0x268] sm:$0xff] }
  0x76   :  { %v3869_v52 = vor.u32 %v4500_v23, %v3868_v43  ;;  %631 = vst [vmem:[#allocation1 + $0x2] ss:$4 sm:$0xff] %v3764_v57  ;;  %v892_v43 = vrot.slane %v3778_v48, 2  ;;  %v893_v23 = vrot.slane %v3779_v56, 2  ;;  %v4580_v42 = vld [vmem:[%s6096_s1 + $0x1d0] sm:$0xff]  ;;  %v605_v32 = vpack.c.b16 %v601_v17, %v601_v17  ;;  %3575 = vmatpush.bf16.msra.mxu1 %v4599_v21 }
  0x77   :  { %634 = vst [vmem:[#allocation1 + $0x3] ss:$4 sm:$0xff] %v3765_v1  ;;  %v818_v1 = vrot.slane %v816_v31, 6  ;;  %v834_v6 = vrot.slane %v832_v47, 7  ;;  %v604_v31 = vpack.c.b16 %v600_v16, %v600_v16  ;;  %3540 = vmatpush.bf16.msrb.mxu3 %v4580_v42  ;;  %v4588_v42 = vld [vmem:[%s6096_s1 + $0x210] sm:$0xff] }
  0x78   :  { %3486 = vmatmul.bf16.vlgmr.msrb.gmra.mxu0 %v3869_v52  ;;  %v809_v52 = vor.u32 %v808_v53, %v805_v39  ;;  %v898_v19 = vsel %vm129_vm0, %v3778_v48, %v892_v43  ;;  %v904_v50 = vsel %vm129_vm0, %v3779_v56, %v893_v23  ;;  %v5307_v26 = vsel %vm133_vm1, %v3778_v48, %v892_v43  ;;  %v4579_v39 = vld [vmem:[%s6096_s1 + $0x1c8] sm:$0xff]  ;;  %v4596_v30 = vld [vmem:[%s6096_s1 + $0x250] sm:$0xff] }
  0x79   :  { %v822_v13 = vor.u32 %v821_v2, %v818_v1  ;;  %v835_v27 = vor.u32 %v834_v6, %v831_v63  ;;  %v5310_v29 = vsel %vm133_vm1, %v3779_v56, %v893_v23  ;;  %v920_v33 = vshrl.u32 %v898_v19, 16  ;;  %612 = vst [vmem:[#allocation2 + $0x90] sm:$0xf] %v604_v31 }
  0x7a   :  { %v5304_v25 = vrot.slane %v809_v52, 2  ;;  %v933_v47 = vshrl.u32 %v904_v50, 16  ;;  %v740_v48 = vsel %vm4905_vm8, %v5241_v36, %v739_v20  ;;  %v901_v56 = vrot.slane %v5307_v26, 2  ;;  %613 = vst [vmem:[#allocation2 + $0xd0] sm:$0xf] %v605_v32  ;;  %v4589_v20 = vld [vmem:[%s6096_s1 + $0x218] sm:$0xff]  ;;  %3576 = vmatpush.bf16.msra.mxu1 %v4598_v58 }
  0x7b   :  { %v5324_v38 = vrot.slane %v822_v13, 2  ;;  %v5335_v53 = vrot.slane %v835_v27, 2  ;;  %v4607_v36 = vld [vmem:[%s6096_s1 + $0x2a8] sm:$0xff]  ;;  %v911_v1 = vsel %vm133_vm1, %v3780_v15, %v894_v28  ;;  %v5353_v2 = vsel %vm133_vm1, %v3781_v62, %v895_v46  ;;  %v4597_v52 = vld [vmem:[%s6096_s1 + $0x258] sm:$0xff]  ;;  %3541 = vmatpush.bf16.msrb.mxu3 %v4579_v39  ;;  %3558 = vmatpush.bf16.msra.mxu0 %v4589_v20 }
  0x7c   :  { %v916_v43 = vsel %vm129_vm0, %v3781_v62, %v895_v46  ;;  %v935_v63 = vrot.slane %v933_v47, 6  ;;  %v936_v6 = vshll.u32 %v904_v50, 16  ;;  %v5362_v13 = vld [vmem:[%s6097_s0 + $0x8c] sm:$0x7]  ;;  %v946_v62 = vshrl.u32 %v910_v61, 16  ;;  %v4606_v50 = vld [vmem:[%s6096_s1 + $0x2a0] sm:$0xff] }
  0x7d   :  { %v929_v49 = vshll.u32 %v901_v56, 16  ;;  %v959_v16 = vshrl.u32 %v916_v43, 16  ;;  %v962_v17 = vshll.u32 %v916_v43, 16  ;;  %v980_v58 = vrot.slane %v5362_v13, 2 }
  0x7e   :  { %v635_v57 = vld.sshfl [vmem:[#allocation1] sm:$0xff pattern:$0x73625140]  ;;  %v938_v15 = vrot.slane %v936_v6, 7  ;;  %3577 = vmatpush.bf16.msra.mxu1 %v4597_v52  ;;  %v948_v31 = vrot.slane %v946_v62, 6  ;;  %v981_v39 = vrot.slane %v5368_v45, 2 }
  0x7f   :  { %v650_v3 = vunpack.c.l.b16 %v635_v57  ;;  %v651_v4 = vunpack.c.h.b16 %v635_v57  ;;  %638 = vst [vmem:[#allocation1] ss:$4 sm:$0xff] %v3766_v34  ;;  %v923_v34 = vshll.u32 %v898_v19, 16  ;;  %v907_v57 = vrot.slane %v5310_v29, 2  ;;  %3542 = vmatpush.bf16.msrb.mxu3 %v4578_v0  ;;  %3559 = vmatpush.bf16.msra.mxu0 %v4588_v42  ;;  %v4616_v42 = vld [vmem:[%s6096_s1 + $0x2f0] sm:$0xff] }
  0x80   :  { %641 = vst [vmem:[#allocation1 + $0x1] ss:$4 sm:$0xff] %v3767_v35  ;;  %v4608_v35 = vld [vmem:[%s6096_s1 + $0x2b0] sm:$0xff]  ;;  %v949_v19 = vshll.u32 %v910_v61, 16  ;;  %v3932_v27 = vld [vmem:[#allocation2 + $0x90] sm:$0xf]  ;;  %v939_v28 = vor.u32 %v938_v15, %v935_v63  ;;  %v986_v22 = vsel %vm129_vm0, %v5362_v13, %v980_v58  ;;  %v993_v43 = vsel %vm133_vm1, %v5368_v45, %v981_v39 }
  0x81   :  { %v654_v9 = vpack.c.b16 %v650_v3, %v650_v3  ;;  %v655_v37 = vpack.c.b16 %v651_v4, %v651_v4  ;;  %644 = vst [vmem:[#allocation1 + $0x2] ss:$4 sm:$0xff] %v3768_v14  ;;  %v840_v14 = vrot.slane %v5286_v24, 7  ;;  %v922_v3 = vrot.slane %v920_v33, 6  ;;  %3593 = vmatpush.bf16.msra.mxu2 %v4608_v35  ;;  %v4516_v29 = vld [vmem:[#allocation2 + $0xcc] sm:$0xf0] }
  0x82   :  { %647 = vst [vmem:[#allocation1 + $0x3] ss:$4 sm:$0xff] %v3769_v5  ;;  %v925_v4 = vrot.slane %v923_v34, 7  ;;  %v942_v26 = vshll.u32 %v907_v57, 16  ;;  %v951_v32 = vrot.slane %v949_v19, 7  ;;  %v3933_v33 = vor.u32 %v4516_v29, %v3932_v27  ;;  %3578 = vmatpush.bf16.msra.mxu1 %v4596_v30  ;;  %v4617_v15 = vld [vmem:[%s6096_s1 + $0x2f8] sm:$0xff] }
  0x83   :  { %662 = vst [vmem:[#allocation2 + $0x14] sm:$0xf] %v654_v9  ;;  %v802_v34 = vsel %vm4905_vm8, %v5283_v18, %v801_v54  ;;  %v815_v35 = vsel %vm4905_vm8, %v5304_v25, %v814_v11  ;;  %v961_v47 = vrot.slane %v959_v16, 6  ;;  %v931_v54 = vrot.slane %v929_v49, 7  ;;  %v3785_v11 = vld [vmem:[%s6097_s0 + $0x98] sm:$0x7]  ;;  %3611 = vmatpush.bf16.msra.mxu3 %v4617_v15 }
  0x84   :  { %663 = vst [vmem:[#allocation2 + $0x54] sm:$0xf] %v655_v37  ;;  %v926_v21 = vor.u32 %v925_v4, %v922_v3  ;;  %v940_v18 = vrot.slane %v939_v28, 2  ;;  %v944_v56 = vrot.slane %v942_v26, 7  ;;  %v828_v57 = vsel %vm4905_vm8, %v5324_v38, %v827_v44  ;;  %v4586_v27 = vld [vmem:[%s6096_s1 + $0x200] sm:$0xff] }
  0x85   :  { %3594 = vmatpush.bf16.msra.mxu2 %v4607_v36  ;;  %v983_v38 = vrot.slane %v3785_v11, 2  ;;  %v992_v24 = vsel %vm129_vm0, %v5368_v45, %v981_v39  ;;  %v1008_v63 = vshrl.u32 %v986_v22, 16  ;;  %v4595_v45 = vld [vmem:[%s6096_s1 + $0x248] sm:$0xff]  ;;  %v995_v49 = vrot.slane %v993_v43, 2  ;;  %v4594_v30 = vld [vmem:[%s6096_s1 + $0x240] sm:$0xff] }
  0x86   :  { %v927_v55 = vrot.slane %v926_v21, 2  ;;  %v945_v3 = vsel %vm4905_vm8, %v940_v18, %v944_v56  ;;  %v1024_v28 = vshll.u32 %v992_v24, 16  ;;  %3579 = vmatpush.bf16.msra.mxu1 %v4595_v45  ;;  %v3786_v45 = vld [vmem:[%s6097_s0 + $0x4] sm:$0x3] }
  0x87   :  { %v1004_v19 = vsel %vm129_vm0, %v3785_v11, %v983_v38  ;;  %v1005_v16 = vsel %vm133_vm1, %v3785_v11, %v983_v38  ;;  %3612 = vmatpush.bf16.msra.mxu3 %v4616_v42 }
  0x88   :  { %3491 = vmatmul.bf16.gmra.mxu0 %v3933_v33  ;;  %v1047_v33 = vshrl.u32 %v1004_v19, 16  ;;  %v1007_v39 = vrot.slane %v1005_v16, 2  ;;  %v3788_v16 = vld [vmem:[%s6097_s0 + $0xc] sm:$0x3] }
  0x89   :  { %v648_v59 = vld.sshfl [vmem:[#allocation1] sm:$0xff pattern:$0x73625140]  ;;  %3595 = vmatpush.bf16.msra.mxu2 %v4606_v50  ;;  %v4604_v50 = vld [vmem:[%s6096_s1 + $0x290] sm:$0xff] }
  0x8a   :  { %v4492_v7 = vld [vmem:[#allocation2 + $0x14] sm:$0xf]  ;;  %843 = vst [vmem:[#allocation1] ss:$4 sm:$0xff] %v714_v10  ;;  %v652_v40 = vunpack.c.l.b16 %v648_v59  ;;  %v653_v51 = vunpack.c.h.b16 %v648_v59  ;;  %v913_v10 = vrot.slane %v911_v1, 2  ;;  %v841_v59 = vsel %vm4905_vm8, %v5335_v53, %v840_v14  ;;  %3580 = vmatpush.bf16.msra.mxu1 %v4594_v30 }
  0x8b   :  { %v3870_v5 = vld [vmem:[#allocation2 + $0x50] sm:$0xf0]  ;;  %846 = vst [vmem:[#allocation1 + $0x1] ss:$4 sm:$0xff] %v727_v12  ;;  %v919_v12 = vrot.slane %v5353_v2, 2  ;;  %v982_v1 = vrot.slane %v3784_v41, 2 }
  0x8c   :  { %v3873_v23 = vor.u32 %v4492_v7, %v3870_v5  ;;  %849 = vst [vmem:[#allocation1 + $0x2] ss:$4 sm:$0xff] %v740_v48  ;;  %v656_v9 = vpack.c.b16 %v652_v40, %v652_v40  ;;  %v657_v37 = vpack.c.b16 %v653_v51, %v653_v51  ;;  %v5393_v46 = vshll.u32 %v913_v10, 16  ;;  %v3804_v30 = vld [vmem:[%s6097_s0 + $0xc] sm:$0x7] }
  0x8d   :  { %852 = vst [vmem:[#allocation1 + $0x3] ss:$4 sm:$0xff] %v753_v60  ;;  %v964_v48 = vrot.slane %v962_v17, 7  ;;  %v952_v60 = vor.u32 %v951_v32, %v948_v31  ;;  %v5412_v20 = vshll.u32 %v919_v12, 16  ;;  %v932_v51 = vsel %vm4905_vm8, %v927_v55, %v931_v54  ;;  %v4587_v12 = vld [vmem:[%s6096_s1 + $0x208] sm:$0xff] }
  0x8e   :  { %3505 = vmatmul.bf16.vlgmr.msrb.gmra.mxu1 %v3873_v23  ;;  %664 = vst [vmem:[#allocation2 + $0x94] sm:$0xf] %v656_v9  ;;  %v957_v2 = vrot.slane %v5393_v46, 7  ;;  %v987_v5 = vsel %vm133_vm1, %v5362_v13, %v980_v58  ;;  %v998_v23 = vsel %vm129_vm0, %v3784_v41, %v982_v1  ;;  %v1011_v9 = vshll.u32 %v986_v22, 16  ;;  %v4605_v13 = vld [vmem:[%s6096_s1 + $0x298] sm:$0xff]  ;;  %3560 = vmatpush.bf16.msra.mxu0 %v4587_v12 }
  0x8f   :  { %665 = vst [vmem:[#allocation2 + $0xd4] sm:$0xf] %v657_v37  ;;  %v965_v44 = vor.u32 %v964_v48, %v961_v47  ;;  %v970_v4 = vrot.slane %v5412_v20, 7  ;;  %v953_v6 = vrot.slane %v952_v60, 2  ;;  %v1021_v37 = vshrl.u32 %v992_v24, 16  ;;  %3596 = vmatpush.bf16.msra.mxu2 %v4605_v13 }
  0x90   :  { %v999_v62 = vsel %vm133_vm1, %v3784_v41, %v982_v1  ;;  %v989_v0 = vrot.slane %v987_v5, 2  ;;  %v1010_v17 = vrot.slane %v1008_v63, 6  ;;  %v1013_v21 = vrot.slane %v1011_v9, 7 }
  0x91   :  { %v966_v10 = vrot.slane %v965_v44, 2  ;;  %v1034_v26 = vshrl.u32 %v998_v23, 16  ;;  %v1037_v29 = vshll.u32 %v998_v23, 16  ;;  %v1001_v31 = vrot.slane %v999_v62, 2  ;;  %v4603_v62 = vld [vmem:[%s6096_s1 + $0x288] sm:$0xff] }
  0x92   :  { %v1023_v32 = vrot.slane %v1021_v37, 6  ;;  %v1026_v58 = vrot.slane %v1024_v28, 7  ;;  %v1017_v55 = vshll.u32 %v989_v0, 16  ;;  %v1049_v54 = vrot.slane %v1047_v33, 6  ;;  %3561 = vmatpush.bf16.msra.mxu0 %v4586_v27  ;;  %v3787_v0 = vld [vmem:[%s6097_s0 + $0x8] sm:$0x3] }
  0x93   :  { %v1036_v46 = vrot.slane %v1034_v26, 6  ;;  %v1039_v47 = vrot.slane %v1037_v29, 7  ;;  %v971_v41 = vsel %vm4905_vm8, %v966_v10, %v970_v4  ;;  %3597 = vmatpush.bf16.msra.mxu2 %v4604_v50  ;;  %v1043_v20 = vshll.u32 %v1001_v31, 16  ;;  %v3789_v27 = vld [vmem:[%s6097_s0 + $0x10] sm:$0x3] }
  0x94   :  { %v853_v25 = vld.sshfl [vmem:[#allocation1] sm:$0xff pattern:$0x73625140]  ;;  %v1027_v60 = vor.u32 %v1026_v58, %v1023_v32  ;;  %v1056_v38 = vshll.u32 %v1007_v39, 16  ;;  %v3803_v26 = vld [vmem:[%s6097_s0 + $0x8] sm:$0x7] }
  0x95   :  { %v868_v36 = vunpack.c.l.b16 %v853_v25  ;;  %v869_v61 = vunpack.c.h.b16 %v853_v25  ;;  %856 = vst [vmem:[#allocation1] ss:$4 sm:$0xff] %v802_v34  ;;  %v4508_v53 = vld [vmem:[#allocation2 + $0x94] sm:$0xf]  ;;  %v1050_v34 = vshll.u32 %v1004_v19, 16  ;;  %v1014_v25 = vor.u32 %v1013_v21, %v1010_v17  ;;  %v4615_v19 = vld [vmem:[%s6096_s1 + $0x2e8] sm:$0xff] }
  0x96   :  { %859 = vst [vmem:[#allocation1 + $0x1] ss:$4 sm:$0xff] %v815_v35  ;;  %v3934_v40 = vld [vmem:[#allocation2 + $0xd0] sm:$0xf0]  ;;  %v958_v35 = vsel %vm4905_vm8, %v953_v6, %v957_v2  ;;  %v1040_v2 = vor.u32 %v1039_v47, %v1036_v46  ;;  %v1058_v4 = vrot.slane %v1056_v38, 7  ;;  %3613 = vmatpush.bf16.msra.mxu3 %v4615_v19  ;;  %v1215_v42 = vrot.slane %v3803_v26, 2 }
  0x97   :  { %v872_v7 = vpack.c.b16 %v868_v36, %v868_v36  ;;  %v873_v14 = vpack.c.b16 %v869_v61, %v869_v61  ;;  %862 = vst [vmem:[#allocation1 + $0x2] ss:$4 sm:$0xff] %v828_v57  ;;  %v3937_v52 = vor.u32 %v4508_v53, %v3934_v40  ;;  %v1030_v57 = vshll.u32 %v995_v49, 16  ;;  %3598 = vmatpush.bf16.msra.mxu2 %v4603_v62  ;;  %v3802_v21 = vld [vmem:[%s6097_s0 + $0x4] sm:$0x7] }
  0x98   :  { %865 = vst [vmem:[#allocation1 + $0x3] ss:$4 sm:$0xff] %v841_v59  ;;  %v1052_v36 = vrot.slane %v1050_v34, 7  ;;  %v1015_v24 = vrot.slane %v1014_v25, 2  ;;  %v1041_v40 = vrot.slane %v1040_v2, 2  ;;  %v1214_v29 = vrot.slane %v3802_v21, 2 }
  0x99   :  { %880 = vst [vmem:[#allocation2 + $0x18] sm:$0xf] %v872_v7  ;;  %v1019_v7 = vrot.slane %v1017_v55, 7  ;;  %v1032_v53 = vrot.slane %v1030_v57, 7  ;;  %v3790_v32 = vld [vmem:[%s6097_s0 + $0x54] sm:$0x3]  ;;  %v1227_v34 = vsel %vm133_vm1, %v3803_v26, %v1215_v42  ;;  %v1226_v47 = vsel %vm129_vm0, %v3803_v26, %v1215_v42 }
  0x9a   :  { %881 = vst [vmem:[#allocation2 + $0x58] sm:$0xf] %v873_v14  ;;  %v1053_v44 = vor.u32 %v1052_v36, %v1049_v54  ;;  %v1028_v14 = vrot.slane %v1027_v60, 2  ;;  %v1221_v31 = vsel %vm133_vm1, %v3802_v21, %v1214_v29  ;;  %v1220_v33 = vsel %vm129_vm0, %v3802_v21, %v1214_v29  ;;  %v3805_v58 = vld [vmem:[%s6097_s0 + $0x10] sm:$0x7] }
  0x9b   :  { %v1020_v5 = vsel %vm4905_vm8, %v1015_v24, %v1019_v7  ;;  %v1216_v46 = vrot.slane %v3804_v30, 2  ;;  %v1229_v55 = vrot.slane %v1227_v34, 2  ;;  %v3793_v57 = vld [vmem:[%s6097_s0 + $0x60] sm:$0x3]  ;;  %v1255_v60 = vshrl.u32 %v1226_v47, 16 }
  0x9c   :  { %v1033_v43 = vsel %vm4905_vm8, %v1028_v14, %v1032_v53  ;;  %v1258_v36 = vshll.u32 %v1226_v47, 16  ;;  %v3808_v19 = vld [vmem:[%s6097_s0 + $0x5c] sm:$0x7] }
  0x9d   :  { %v1233_v54 = vsel %vm133_vm1, %v3804_v30, %v1216_v46  ;;  %v5521_v7 = vshll.u32 %v1229_v55, 16  ;;  %v1257_v53 = vrot.slane %v1255_v60, 6  ;;  %v1304_v42 = vrot.slane %v3808_v19, 2 }
  0x9e   :  { %3510 = vmatmul.bf16.gmra.mxu1 %v3937_v52 }
  0x9f   :  { %v866_v48 = vld.sshfl [vmem:[#allocation1] sm:$0xff pattern:$0x73625140]  ;;  %v1266_v62 = vrot.slane %v5521_v7, 7 }
  0xa0   :  { %v3876_v18 = vld [vmem:[#allocation2 + $0x18] sm:$0xf]  ;;  %v870_v56 = vunpack.c.l.b16 %v866_v48  ;;  %v871_v11 = vunpack.c.h.b16 %v866_v48  ;;  %1061 = vst [vmem:[#allocation1] ss:$4 sm:$0xff] %v932_v51  ;;  %v1045_v51 = vrot.slane %v1043_v20, 7  ;;  %v1232_v20 = vsel %vm129_vm0, %v3804_v30, %v1216_v46 }
  0xa1   :  { %v4501_v59 = vld [vmem:[#allocation2 + $0x54] sm:$0xf0]  ;;  %1064 = vst [vmem:[#allocation1 + $0x1] ss:$4 sm:$0xff] %v945_v3  ;;  %v1054_v3 = vrot.slane %v1053_v44, 2 }
  0xa2   :  { %v3877_v61 = vor.u32 %v4501_v59, %v3876_v18  ;;  %v874_v1 = vpack.c.b16 %v870_v56, %v870_v56  ;;  %v875_v22 = vpack.c.b16 %v871_v11, %v871_v11  ;;  %1067 = vst [vmem:[#allocation1 + $0x2] ss:$4 sm:$0xff] %v958_v35  ;;  %v1046_v6 = vsel %vm4905_vm8, %v1041_v40, %v1045_v51  ;;  %v3791_v35 = vld [vmem:[%s6097_s0 + $0x58] sm:$0x3]  ;;  %v3792_v48 = vld [vmem:[%s6097_s0 + $0x5c] sm:$0x3] }
  0xa3   :  { %1070 = vst [vmem:[#allocation1 + $0x3] ss:$4 sm:$0xff] %v971_v41  ;;  %v1059_v37 = vsel %vm4905_vm8, %v1054_v3, %v1058_v4  ;;  %v1223_v41 = vrot.slane %v1221_v31, 2  ;;  %v1242_v18 = vshrl.u32 %v1220_v33, 16  ;;  %v1245_v56 = vshll.u32 %v1220_v33, 16  ;;  %v4602_v3 = vld [vmem:[%s6096_s1 + $0x280] sm:$0xff] }
  0xa4   :  { %3524 = vmatmul.bf16.vlgmr.msrb.gmra.mxu2 %v3877_v61  ;;  %882 = vst [vmem:[#allocation2 + $0x98] sm:$0xf] %v874_v1  ;;  %v1217_v59 = vrot.slane %v3805_v58, 2  ;;  %v1268_v40 = vshrl.u32 %v1232_v20, 16  ;;  %v3806_v51 = vld [vmem:[%s6097_s0 + $0x54] sm:$0x7] }
  0xa5   :  { %883 = vst [vmem:[#allocation2 + $0xd8] sm:$0xf] %v875_v22  ;;  %v1235_v22 = vrot.slane %v1233_v54, 2  ;;  %v5518_v2 = vshll.u32 %v1223_v41, 16  ;;  %v1244_v38 = vrot.slane %v1242_v18, 6  ;;  %v1247_v24 = vrot.slane %v1245_v56, 7  ;;  %3599 = vmatpush.bf16.msra.mxu2 %v4602_v3 }
  0xa6   :  { %v1239_v44 = vsel %vm133_vm1, %v3805_v58, %v1217_v59  ;;  %v5524_v14 = vsel %vm129_vm0, %v3805_v58, %v1217_v59  ;;  %v4614_v4 = vld [vmem:[%s6096_s1 + $0x2e0] sm:$0xff]  ;;  %v3799_v3 = vld [vmem:[%s6097_s0 + $0x6c] sm:$0x3] }
  0xa7   :  { %3614 = vmatpush.bf16.msra.mxu3 %v4614_v4 }
  0xaa   :  { %v1071_v63 = vld.sshfl [vmem:[#allocation1] sm:$0xff pattern:$0x73625140] }
  0xab   :  { %v1086_v23 = vunpack.c.l.b16 %v1071_v63  ;;  %v1087_v9 = vunpack.c.h.b16 %v1071_v63  ;;  %1074 = vst [vmem:[#allocation1] ss:$4 sm:$0xff] %v1020_v5  ;;  %v3940_v52 = vld [vmem:[#allocation2 + $0x98] sm:$0xf]  ;;  %v1260_v63 = vrot.slane %v1258_v36, 7 }
  0xac   :  { %1077 = vst [vmem:[#allocation1 + $0x1] ss:$4 sm:$0xff] %v1033_v43  ;;  %v4517_v10 = vld [vmem:[#allocation2 + $0xd4] sm:$0xf0] }
  0xad   :  { %v1090_v12 = vpack.c.b16 %v1086_v23, %v1086_v23  ;;  %v1091_v13 = vpack.c.b16 %v1087_v9, %v1087_v9  ;;  %1080 = vst [vmem:[#allocation1 + $0x2] ss:$4 sm:$0xff] %v1046_v6  ;;  %v3941_v15 = vor.u32 %v4517_v10, %v3940_v52  ;;  %v1271_v6 = vshll.u32 %v1232_v20, 16  ;;  %v3794_v23 = vld [vmem:[%s6097_s0 + $0x18] sm:$0x3] }
  0xae   :  { %1083 = vst [vmem:[#allocation1 + $0x3] ss:$4 sm:$0xff] %v1059_v37  ;;  %v1241_v9 = vrot.slane %v1239_v44, 2  ;;  %v1253_v37 = vrot.slane %v5518_v2, 7  ;;  %v3807_v52 = vld [vmem:[%s6097_s0 + $0x58] sm:$0x7] }
  0xaf   :  { %1098 = vst [vmem:[#allocation2 + $0x1c] sm:$0xf] %v1090_v12  ;;  %v3795_v10 = vld [vmem:[%s6097_s0 + $0x1c] sm:$0x3]  ;;  %v1273_v21 = vrot.slane %v1271_v6, 7  ;;  %v1303_v26 = vrot.slane %v3807_v52, 2 }
  0xb0   :  { %1099 = vst [vmem:[#allocation2 + $0x5c] sm:$0xf] %v1091_v13 }
  0xb1   :  { %v1315_v47 = vsel %vm133_vm1, %v3807_v52, %v1303_v26  ;;  %v1314_v55 = vsel %vm129_vm0, %v3807_v52, %v1303_v26 }
  0xb4   :  { %3529 = vmatmul.bf16.gmra.mxu2 %v3941_v15  ;;  %v1248_v15 = vor.u32 %v1247_v24, %v1244_v38  ;;  %v3798_v38 = vld [vmem:[%s6097_s0 + $0x68] sm:$0x3] }
  0xb5   :  { %v5480_v49 = vld.sshfl [vmem:[#allocation1] sm:$0xff pattern:$0x73625140] }
  0xb6   :  { %v4493_v17 = vld [vmem:[#allocation2 + $0x1c] sm:$0xf]  ;;  %1113 = vst [vmem:[#allocation1] ss:$4 sm:$0xff] %v3786_v45  ;;  %v1088_v5 = vunpack.c.l.b16 %v5480_v49  ;;  %v1089_v43 = vunpack.c.h.b16 %v5480_v49  ;;  %v3796_v45 = vld [vmem:[%s6097_s0 + $0x20] sm:$0x3] }
  0xb7   :  { %v3878_v50 = vld [vmem:[#allocation2 + $0x58] sm:$0xf0]  ;;  %1116 = vst [vmem:[#allocation1 + $0x1] ss:$4 sm:$0xff] %v3787_v0  ;;  %v1270_v0 = vrot.slane %v1268_v40, 6  ;;  %v5554_v49 = vshll.u32 %v1235_v22, 16 }
  0xb8   :  { %v3881_v28 = vor.u32 %v4493_v17, %v3878_v50  ;;  %1119 = vst [vmem:[#allocation1 + $0x2] ss:$4 sm:$0xff] %v3788_v16  ;;  %v1092_v12 = vpack.c.b16 %v1088_v5, %v1088_v5  ;;  %v1093_v13 = vpack.c.b16 %v1089_v43, %v1089_v43  ;;  %v1281_v16 = vshrl.u32 %v5524_v14, 16 }
  0xb9   :  { %1122 = vst [vmem:[#allocation1 + $0x3] ss:$4 sm:$0xff] %v3789_v27  ;;  %v1302_v17 = vrot.slane %v3806_v51, 2  ;;  %v3797_v27 = vld [vmem:[%s6097_s0 + $0x24] sm:$0x3]  ;;  %v1261_v50 = vor.u32 %v1260_v63, %v1257_v53  ;;  %v5565_v31 = vrot.slane %v1248_v15, 2  ;;  %v1274_v54 = vor.u32 %v1273_v21, %v1270_v0 }
  0xba   :  { %3543 = vmatmul.bf16.vlgmr.msrb.gmra.mxu3 %v3881_v28  ;;  %1100 = vst [vmem:[#allocation2 + $0x9c] sm:$0xf] %v1092_v12  ;;  %v3809_v28 = vld [vmem:[%s6097_s0 + $0x60] sm:$0x7]  ;;  %v5577_v18 = vrot.slane %v1281_v16, 6  ;;  %v1346_v22 = vshll.u32 %v1314_v55, 16 }
  0xbb   :  { %1101 = vst [vmem:[#allocation2 + $0xdc] sm:$0xf] %v1093_v13  ;;  %v1309_v33 = vsel %vm133_vm1, %v3806_v51, %v1302_v17  ;;  %v1305_v58 = vrot.slane %v3809_v28, 2  ;;  %v1308_v46 = vsel %vm129_vm0, %v3806_v51, %v1302_v17  ;;  %v5573_v41 = vrot.slane %v1261_v50, 2  ;;  %v3800_v63 = vld [vmem:[%s6097_s0 + $0x70] sm:$0x3] }
  0xbc   :  { %v1311_v56 = vrot.slane %v1309_v33, 2  ;;  %v1330_v60 = vshrl.u32 %v1308_v46, 16  ;;  %v5590_v4 = vrot.slane %v1274_v54, 2  ;;  %v1348_v15 = vrot.slane %v1346_v22, 7  ;;  %v4624_v22 = vld [vmem:[%s6096_s1 + $0x330] sm:$0xff] }
  0xbd   :  { %v1327_v59 = vsel %vm133_vm1, %v3809_v28, %v1305_v58  ;;  %v1326_v36 = vsel %vm129_vm0, %v3809_v28, %v1305_v58 }
  0xbe   :  { %v1329_v43 = vrot.slane %v1327_v59, 2  ;;  %v1332_v6 = vrot.slane %v1330_v60, 6  ;;  %v1372_v52 = vshll.u32 %v1326_v36, 16 }
  0xc0   :  { %v1123_v39 = vld.sshfl [vmem:[#allocation1] sm:$0xff pattern:$0x73625140]  ;;  %v1374_v33 = vrot.slane %v1372_v52, 7  ;;  %v5629_v59 = vshll.u32 %v1329_v43, 16  ;;  %v4611_v43 = vld [vmem:[%s6096_s1 + $0x2c8] sm:$0xff] }
  0xc1   :  { %v1138_v11 = vunpack.c.l.b16 %v1123_v39  ;;  %v1139_v25 = vunpack.c.h.b16 %v1123_v39  ;;  %1126 = vst [vmem:[#allocation1] ss:$4 sm:$0xff] %v3790_v32  ;;  %v1284_v32 = vshll.u32 %v5524_v14, 16  ;;  %v1279_v39 = vrot.slane %v5554_v49, 7  ;;  %v4509_v20 = vld [vmem:[#allocation2 + $0x9c] sm:$0xf] }
  0xc2   :  { %1129 = vst [vmem:[#allocation1 + $0x1] ss:$4 sm:$0xff] %v3791_v35  ;;  %v5569_v35 = vshll.u32 %v1241_v9, 16  ;;  %v3942_v44 = vld [vmem:[#allocation2 + $0xd8] sm:$0xf0]  ;;  %v1369_v9 = vshrl.u32 %v1326_v36, 16 }
  0xc3   :  { %v1142_v61 = vpack.c.b16 %v1138_v11, %v1138_v11  ;;  %v1143_v1 = vpack.c.b16 %v1139_v25, %v1139_v25  ;;  %1132 = vst [vmem:[#allocation1 + $0x2] ss:$4 sm:$0xff] %v3792_v48  ;;  %v1320_v11 = vsel %vm129_vm0, %v3808_v19, %v1304_v42  ;;  %v1317_v25 = vrot.slane %v1315_v47, 2 }
  0xc4   :  { %1135 = vst [vmem:[#allocation1 + $0x3] ss:$4 sm:$0xff] %v3793_v57  ;;  %v1321_v57 = vsel %vm133_vm1, %v3808_v19, %v1304_v42  ;;  %v1286_v24 = vrot.slane %v1284_v32, 7  ;;  %v1292_v14 = vrot.slane %v5569_v35, 7  ;;  %v1356_v53 = vshrl.u32 %v1320_v11, 16 }
  0xc5   :  { %1150 = vst [vmem:[#allocation2 + $0x20] sm:$0xf] %v1142_v61  ;;  %v1333_v61 = vshll.u32 %v1308_v46, 16  ;;  %v1359_v40 = vshll.u32 %v1320_v11, 16  ;;  %v3945_v51 = vor.u32 %v4509_v20, %v3942_v44  ;;  %v1323_v5 = vrot.slane %v1321_v57, 2  ;;  %v4625_v57 = vld [vmem:[%s6096_s1 + $0x338] sm:$0xff] }
  0xc6   :  { %1151 = vst [vmem:[#allocation2 + $0x60] sm:$0xf] %v1143_v1  ;;  %v1343_v1 = vshrl.u32 %v1314_v55, 16  ;;  %v5600_v19 = vshll.u32 %v1317_v25, 16  ;;  %v1287_v26 = vor.u32 %v1286_v24, %v5577_v18  ;;  %v3811_v42 = vld [vmem:[%s6097_s0 + $0x1c] sm:$0x7]  ;;  %v1254_v11 = vsel %vm4905_vm8, %v5565_v31, %v1253_v37  ;;  %3630 = vmatpush.bf16.msrb.mxu0 %v4625_v57 }
  0xc7   :  { %v1335_v12 = vrot.slane %v1333_v61, 7  ;;  %v1361_v50 = vrot.slane %v1359_v40, 7  ;;  %v5616_v32 = vshll.u32 %v1323_v5, 16  ;;  %v4613_v25 = vld [vmem:[%s6096_s1 + $0x2d8] sm:$0xff]  ;;  %v5636_v37 = vld [vmem:[%s6097_s0 + $0x24] sm:$0x7]  ;;  %v1267_v61 = vsel %vm4905_vm8, %v5573_v41, %v1266_v62 }
  0xc8   :  { %v1345_v13 = vrot.slane %v1343_v1, 6  ;;  %v1288_v20 = vrot.slane %v1287_v26, 2  ;;  %3615 = vmatpush.bf16.msra.mxu3 %v4613_v25  ;;  %v4612_v1 = vld [vmem:[%s6096_s1 + $0x2d0] sm:$0xff]  ;;  %v1354_v44 = vrot.slane %v5600_v19, 7  ;;  %v1380_v40 = vrot.slane %v5629_v59, 7 }
  0xc9   :  { %v3814_v35 = vld [vmem:[%s6097_s0 + $0x68] sm:$0x7] }
  0xca   :  { %3548 = vmatmul.bf16.gmra.mxu3 %v3945_v51  ;;  %v1349_v54 = vor.u32 %v1348_v15, %v1345_v13  ;;  %v1293_v13 = vsel %vm4905_vm8, %v1288_v20, %v1292_v14  ;;  %3631 = vmatpush.bf16.msrb.mxu0 %v4624_v22  ;;  %v4623_v15 = vld [vmem:[%s6096_s1 + $0x328] sm:$0xff]  ;;  %v4610_v14 = vld [vmem:[%s6096_s1 + $0x2c0] sm:$0xff]  ;;  %v1520_v20 = vrot.slane %v3814_v35, 2  ;;  %v3816_v22 = vld [vmem:[%s6097_s0 + $0x70] sm:$0x7] }
  0xcb   :  { %v5563_v29 = vld.sshfl [vmem:[#allocation1] sm:$0xff pattern:$0x73625140] }
  0xcc   :  { %v3884_v30 = vld [vmem:[#allocation2 + $0x20] sm:$0xf]  ;;  %1165 = vst [vmem:[#allocation1] ss:$4 sm:$0xff] %v3794_v23  ;;  %v5595_v23 = vshll.u32 %v1311_v56, 16  ;;  %v1140_v16 = vunpack.c.l.b16 %v5563_v29  ;;  %v1141_v17 = vunpack.c.h.b16 %v5563_v29  ;;  %v1371_v29 = vrot.slane %v1369_v9, 6  ;;  %3616 = vmatpush.bf16.msra.mxu3 %v4612_v1 }
  0xcd   :  { %v4502_v34 = vld [vmem:[#allocation2 + $0x5c] sm:$0xf0]  ;;  %1168 = vst [vmem:[#allocation1 + $0x1] ss:$4 sm:$0xff] %v3795_v10  ;;  %v3801_v10 = vld [vmem:[%s6097_s0 + $0x74] sm:$0x3] }
  0xce   :  { %v3885_v48 = vor.u32 %v4502_v34, %v3884_v30  ;;  %1171 = vst [vmem:[#allocation1 + $0x2] ss:$4 sm:$0xff] %v3796_v45  ;;  %v3810_v45 = vld [vmem:[%s6097_s0 + $0x18] sm:$0x7]  ;;  %v5614_v30 = vld [vmem:[%s6097_s0 + $0x20] sm:$0x7]  ;;  %v1144_v47 = vpack.c.b16 %v1140_v16, %v1140_v16  ;;  %v1145_v55 = vpack.c.b16 %v1141_v17, %v1141_v17  ;;  %v1375_v36 = vor.u32 %v1374_v33, %v1371_v29 }
  0xcf   :  { %1174 = vst [vmem:[#allocation1 + $0x3] ss:$4 sm:$0xff] %v3797_v27  ;;  %v1358_v27 = vrot.slane %v1356_v53, 6  ;;  %v1432_v34 = vrot.slane %v3810_v45, 2  ;;  %v1433_v56 = vrot.slane %v3811_v42, 2  ;;  %v1434_v60 = vrot.slane %v5614_v30, 2  ;;  %3632 = vmatpush.bf16.msrb.mxu0 %v4623_v15 }
  0xd0   :  { %3562 = vmatmul.bf16.vlgmr.msra.gmra.mxu0 %v3885_v48  ;;  %v1336_v48 = vor.u32 %v1335_v12, %v1332_v6  ;;  %v1341_v2 = vrot.slane %v5595_v23, 7  ;;  %1152 = vst [vmem:[#allocation2 + $0xa0] sm:$0xf] %v1144_v47  ;;  %v5653_v62 = vrot.slane %v1349_v54, 2  ;;  %v1435_v6 = vrot.slane %v5636_v37, 2  ;;  %3617 = vmatpush.bf16.msra.mxu3 %v4611_v43 }
  0xd1   :  { %v1362_v18 = vor.u32 %v1361_v50, %v1358_v27  ;;  %v1438_v31 = vsel %vm129_vm0, %v3810_v45, %v1432_v34  ;;  %v1439_v7 = vsel %vm133_vm1, %v3810_v45, %v1432_v34  ;;  %1153 = vst [vmem:[#allocation2 + $0xe0] sm:$0xf] %v1145_v55  ;;  %v1444_v53 = vsel %vm129_vm0, %v3811_v42, %v1433_v56  ;;  %v4622_v34 = vld [vmem:[%s6096_s1 + $0x320] sm:$0xff] }
  0xd2   :  { %v1337_v24 = vrot.slane %v1336_v48, 2  ;;  %v1445_v51 = vsel %vm133_vm1, %v3811_v42, %v1433_v56  ;;  %v1460_v5 = vshrl.u32 %v1438_v31, 16  ;;  %v1441_v9 = vrot.slane %v1439_v7, 2 }
  0xd3   :  { %v5655_v41 = vrot.slane %v1362_v18, 2  ;;  %v1463_v52 = vshll.u32 %v1438_v31, 16  ;;  %v1280_v12 = vsel %vm4905_vm8, %v5590_v4, %v1279_v39  ;;  %v1473_v45 = vshrl.u32 %v1444_v53, 16  ;;  %3633 = vmatpush.bf16.msrb.mxu0 %v4622_v34 }
  0xd4   :  { %v1447_v27 = vrot.slane %v1445_v51, 2  ;;  %v1451_v4 = vsel %vm133_vm1, %v5614_v30, %v1434_v60  ;;  %v1457_v25 = vsel %vm133_vm1, %v5636_v37, %v1435_v6  ;;  %v1469_v57 = vshll.u32 %v1441_v9, 16  ;;  %3618 = vmatpush.bf16.msra.mxu3 %v4610_v14 }
  0xd5   :  { %v1475_v48 = vrot.slane %v1473_v45, 6  ;;  %v1453_v18 = vrot.slane %v1451_v4, 2 }
  0xd6   :  { %v1175_v0 = vld.sshfl [vmem:[#allocation1] sm:$0xff pattern:$0x73625140] }
  0xd7   :  { %v1190_v21 = vunpack.c.l.b16 %v1175_v0  ;;  %v1191_v28 = vunpack.c.h.b16 %v1175_v0  ;;  %1178 = vst [vmem:[#allocation1] ss:$4 sm:$0xff] %v3798_v38  ;;  %v1367_v38 = vrot.slane %v5616_v32, 7  ;;  %v1476_v0 = vshll.u32 %v1444_v53, 16  ;;  %v3948_v42 = vld [vmem:[#allocation2 + $0xa0] sm:$0xf] }
  0xd8   :  { %1181 = vst [vmem:[#allocation1 + $0x1] ss:$4 sm:$0xff] %v3799_v3  ;;  %v1450_v3 = vsel %vm129_vm0, %v5614_v30, %v1434_v60  ;;  %v4518_v47 = vld [vmem:[#allocation2 + $0xdc] sm:$0xf0]  ;;  %v1456_v30 = vsel %vm129_vm0, %v5636_v37, %v1435_v6  ;;  %v1482_v60 = vshll.u32 %v1447_v27, 16  ;;  %v1355_v37 = vsel %vm4905_vm8, %v5653_v62, %v1354_v44 }
  0xd9   :  { %v1194_v58 = vpack.c.b16 %v1190_v21, %v1190_v21  ;;  %v1195_v46 = vpack.c.b16 %v1191_v28, %v1191_v28  ;;  %1184 = vst [vmem:[#allocation1 + $0x2] ss:$4 sm:$0xff] %v3800_v63  ;;  %v5665_v63 = vrot.slane %v1375_v36, 2  ;;  %v1486_v50 = vshrl.u32 %v1450_v3, 16  ;;  %v3817_v32 = vld [vmem:[%s6097_s0 + $0x74] sm:$0x7] }
  0xda   :  { %1187 = vst [vmem:[#allocation1 + $0x3] ss:$4 sm:$0xff] %v3801_v10  ;;  %v1462_v21 = vrot.slane %v1460_v5, 6  ;;  %v1489_v28 = vshll.u32 %v1450_v3, 16  ;;  %v1478_v55 = vrot.slane %v1476_v0, 7  ;;  %v3949_v54 = vor.u32 %v4518_v47, %v3948_v42 }
  0xdb   :  { %1202 = vst [vmem:[#allocation2 + $0x24] sm:$0xf] %v1194_v58  ;;  %v1465_v58 = vrot.slane %v1463_v52, 7  ;;  %v1488_v56 = vrot.slane %v1486_v50, 6  ;;  %v1342_v36 = vsel %vm4905_vm8, %v1337_v24, %v1341_v2  ;;  %v1502_v1 = vshll.u32 %v1456_v30, 16 }
  0xdc   :  { %1203 = vst [vmem:[#allocation2 + $0x64] sm:$0xf] %v1195_v46  ;;  %v3815_v46 = vld [vmem:[%s6097_s0 + $0x6c] sm:$0x7]  ;;  %v1368_v23 = vsel %vm4905_vm8, %v5655_v41, %v1367_v38  ;;  %v1479_v2 = vor.u32 %v1478_v55, %v1475_v48  ;;  %v1381_v24 = vsel %vm4905_vm8, %v5665_v63, %v1380_v40  ;;  %v1459_v53 = vrot.slane %v1457_v25, 2  ;;  %v4632_v48 = vld [vmem:[%s6096_s1 + $0x370] sm:$0xff] }
  0xdd   :  { %v1466_v31 = vor.u32 %v1465_v58, %v1462_v21  ;;  %v1521_v7 = vrot.slane %v3815_v46, 2  ;;  %v5720_v51 = vshll.u32 %v1453_v18, 16  ;;  %v1471_v3 = vrot.slane %v1469_v57, 7 }
  0xde   :  { %v1484_v44 = vrot.slane %v1482_v60, 7  ;;  %v1522_v62 = vrot.slane %v3816_v22, 2  ;;  %v1526_v38 = vsel %vm129_vm0, %v3814_v35, %v1520_v20  ;;  %v1504_v43 = vrot.slane %v1502_v1, 7 }
  0xdf   :  { %v1467_v5 = vrot.slane %v1466_v31, 2  ;;  %v1527_v6 = vsel %vm133_vm1, %v3814_v35, %v1520_v20  ;;  %v1480_v9 = vrot.slane %v1479_v2, 2  ;;  %v1532_v52 = vsel %vm129_vm0, %v3815_v46, %v1521_v7 }
  0xe0   :  { %3567 = vmatmul.bf16.gmra.mxu0 %v3949_v54  ;;  %v1523_v15 = vrot.slane %v3817_v32, 2  ;;  %v1538_v27 = vsel %vm129_vm0, %v3816_v22, %v1522_v62  ;;  %v1539_v35 = vsel %vm133_vm1, %v3816_v22, %v1522_v62  ;;  %v1551_v14 = vshll.u32 %v1526_v38, 16 }
  0xe1   :  { %v1188_v10 = vld.sshfl [vmem:[#allocation1] sm:$0xff pattern:$0x73625140]  ;;  %v1472_v4 = vsel %vm4905_vm8, %v1467_v5, %v1471_v3  ;;  %v1485_v21 = vsel %vm4905_vm8, %v1480_v9, %v1484_v44  ;;  %v1561_v42 = vshrl.u32 %v1532_v52, 16  ;;  %v1529_v34 = vrot.slane %v1527_v6, 2 }
  0xe2   :  { %v4494_v16 = vld [vmem:[#allocation2 + $0x24] sm:$0xf]  ;;  %1383 = vst [vmem:[#allocation1] ss:$4 sm:$0xff] %v1254_v11  ;;  %v1192_v49 = vunpack.c.l.b16 %v1188_v10  ;;  %v1193_v17 = vunpack.c.h.b16 %v1188_v10  ;;  %v1491_v11 = vrot.slane %v1489_v28, 7  ;;  %v4621_v28 = vld [vmem:[%s6096_s1 + $0x318] sm:$0xff]  ;;  %v1544_v58 = vsel %vm129_vm0, %v3817_v32, %v1523_v15 }
  0xe3   :  { %v3886_v39 = vld [vmem:[#allocation2 + $0x60] sm:$0xf0]  ;;  %1386 = vst [vmem:[#allocation1 + $0x1] ss:$4 sm:$0xff] %v1267_v61  ;;  %v1499_v61 = vshrl.u32 %v1456_v30, 16  ;;  %3634 = vmatpush.bf16.msrb.mxu0 %v4621_v28  ;;  %v4620_v30 = vld [vmem:[%s6096_s1 + $0x310] sm:$0xff]  ;;  %v1545_v18 = vsel %vm133_vm1, %v3817_v32, %v1523_v15 }
  0xe4   :  { %v3889_v26 = vor.u32 %v4494_v16, %v3886_v39  ;;  %1389 = vst [vmem:[#allocation1 + $0x2] ss:$4 sm:$0xff] %v1280_v12  ;;  %v1196_v29 = vpack.c.b16 %v1192_v49, %v1192_v49  ;;  %v1197_v33 = vpack.c.b16 %v1193_v17, %v1193_v17  ;;  %v1492_v19 = vor.u32 %v1491_v11, %v1488_v56  ;;  %v4618_v9 = vld [vmem:[%s6096_s1 + $0x300] sm:$0xff] }
  0xe5   :  { %1392 = vst [vmem:[#allocation1 + $0x3] ss:$4 sm:$0xff] %v1293_v13  ;;  %v1501_v59 = vrot.slane %v1499_v61, 6  ;;  %v1497_v12 = vrot.slane %v5720_v51, 7  ;;  %v1508_v13 = vshll.u32 %v1459_v53, 16  ;;  %v1533_v17 = vsel %vm133_vm1, %v3815_v46, %v1521_v7  ;;  %v4619_v61 = vld [vmem:[%s6096_s1 + $0x308] sm:$0xff] }
  0xe6   :  { %3581 = vmatmul.bf16.vlgmr.msra.gmra.mxu1 %v3889_v26  ;;  %1204 = vst [vmem:[#allocation2 + $0xa4] sm:$0xf] %v1196_v29  ;;  %v1493_v10 = vrot.slane %v1492_v19, 2  ;;  %v1548_v39 = vshrl.u32 %v1526_v38, 16  ;;  %v4633_v26 = vld [vmem:[%s6096_s1 + $0x378] sm:$0xff]  ;;  %v1564_v29 = vshll.u32 %v1532_v52, 16 }
  0xe7   :  { %1205 = vst [vmem:[#allocation2 + $0xe4] sm:$0xf] %v1197_v33  ;;  %v1505_v50 = vor.u32 %v1504_v43, %v1501_v59  ;;  %v1574_v46 = vshrl.u32 %v1538_v27, 16  ;;  %v1510_v47 = vrot.slane %v1508_v13, 7  ;;  %3649 = vmatpush.bf16.msrb.mxu1 %v4633_v26  ;;  %v1535_v55 = vrot.slane %v1533_v17, 2  ;;  %3635 = vmatpush.bf16.msrb.mxu0 %v4620_v30  ;;  %v4630_v52 = vld [vmem:[%s6096_s1 + $0x360] sm:$0xff] }
  0xe8   :  { %v1541_v54 = vrot.slane %v1539_v35, 2  ;;  %v1550_v11 = vrot.slane %v1548_v39, 6  ;;  %v1553_v25 = vrot.slane %v1551_v14, 7  ;;  %v1577_v57 = vshll.u32 %v1538_v27, 16  ;;  %v4640_v30 = vld [vmem:[%s6096_s1 + $0x3b0] sm:$0xff] }
  0xe9   :  { %v1506_v56 = vrot.slane %v1505_v50, 2  ;;  %v1563_v60 = vrot.slane %v1561_v42, 6  ;;  %v1566_v20 = vrot.slane %v1564_v29, 7  ;;  %v1590_v31 = vshll.u32 %v1544_v58, 16 }
  0xea   :  { %v1547_v1 = vrot.slane %v1545_v18, 2  ;;  %v1557_v22 = vshll.u32 %v1529_v34, 16  ;;  %v1498_v7 = vsel %vm4905_vm8, %v1493_v10, %v1497_v12  ;;  %v1554_v62 = vor.u32 %v1553_v25, %v1550_v11  ;;  %v4629_v34 = vld [vmem:[%s6096_s1 + $0x358] sm:$0xff]  ;;  %v4627_v11 = vld [vmem:[%s6096_s1 + $0x348] sm:$0xff] }
  0xeb   :  { %3650 = vmatpush.bf16.msrb.mxu1 %v4632_v48  ;;  %v1592_v19 = vrot.slane %v1590_v31, 7  ;;  %v1511_v32 = vsel %vm4905_vm8, %v1506_v56, %v1510_v47  ;;  %v1570_v5 = vshll.u32 %v1535_v55, 16  ;;  %v1583_v59 = vshll.u32 %v1541_v54, 16  ;;  %3636 = vmatpush.bf16.msrb.mxu0 %v4619_v61  ;;  %v4628_v47 = vld [vmem:[%s6096_s1 + $0x350] sm:$0xff]  ;;  %v3818_v48 = vld [vmem:[%s6097_s0 + $0x2c] sm:$0x3] }
  0xec   :  { %v1393_v41 = vld.sshfl [vmem:[#allocation1] sm:$0xff pattern:$0x73625140]  ;;  %v1596_v12 = vshll.u32 %v1547_v1, 16  ;;  %v1555_v13 = vrot.slane %v1554_v62, 2  ;;  %v1559_v15 = vrot.slane %v1557_v22, 7 }
  0xed   :  { %v1408_v40 = vunpack.c.l.b16 %v1393_v41  ;;  %v1409_v63 = vunpack.c.h.b16 %v1393_v41  ;;  %1396 = vst [vmem:[#allocation1] ss:$4 sm:$0xff] %v1342_v36  ;;  %v4510_v16 = vld [vmem:[#allocation2 + $0xa4] sm:$0xf]  ;;  %v1587_v36 = vshrl.u32 %v1544_v58, 16  ;;  %v1567_v41 = vor.u32 %v1566_v20, %v1563_v60  ;;  %v4641_v58 = vld [vmem:[%s6096_s1 + $0x3b8] sm:$0xff] }
  0xee   :  { %1399 = vst [vmem:[#allocation1 + $0x1] ss:$4 sm:$0xff] %v1355_v37  ;;  %v3950_v49 = vld [vmem:[#allocation2 + $0xe0] sm:$0xf0]  ;;  %v1576_v37 = vrot.slane %v1574_v46, 6  ;;  %v1598_v27 = vrot.slane %v1596_v12, 7  ;;  %v1560_v50 = vsel %vm4905_vm8, %v1555_v13, %v1559_v15  ;;  %3668 = vmatpush.bf16.msrb.mxu2 %v4641_v58 }
  0xef   :  { %v1412_v45 = vpack.c.b16 %v1408_v40, %v1408_v40  ;;  %v1413_v0 = vpack.c.b16 %v1409_v63, %v1409_v63  ;;  %1402 = vst [vmem:[#allocation1 + $0x2] ss:$4 sm:$0xff] %v1368_v23  ;;  %v3953_v33 = vor.u32 %v4510_v16, %v3950_v49  ;;  %v1579_v23 = vrot.slane %v1577_v57, 7  ;;  %3637 = vmatpush.bf16.msrb.mxu0 %v4618_v9  ;;  %v3819_v55 = vld [vmem:[%s6097_s0 + $0x30] sm:$0x3]  ;;  %v4639_v25 = vld [vmem:[%s6096_s1 + $0x3a8] sm:$0xff] }
  0xf0   :  { %1405 = vst [vmem:[#allocation1 + $0x3] ss:$4 sm:$0xff] %v1381_v24  ;;  %v4631_v24 = vld [vmem:[%s6096_s1 + $0x368] sm:$0xff]  ;;  %v1589_v53 = vrot.slane %v1587_v36, 6  ;;  %v1585_v49 = vrot.slane %v1583_v59, 7 }
  0xf1   :  { %1420 = vst [vmem:[#allocation2 + $0x28] sm:$0xf] %v1412_v45  ;;  %v1580_v63 = vor.u32 %v1579_v23, %v1576_v37  ;;  %3651 = vmatpush.bf16.msrb.mxu1 %v4631_v24  ;;  %v1568_v45 = vrot.slane %v1567_v41, 2  ;;  %v3820_v54 = vld [vmem:[%s6097_s0 + $0x34] sm:$0x3]  ;;  %v4626_v23 = vld [vmem:[%s6096_s1 + $0x340] sm:$0xff] }
  0xf2   :  { %1421 = vst [vmem:[#allocation2 + $0x68] sm:$0xf] %v1413_v0  ;;  %v1593_v10 = vor.u32 %v1592_v19, %v1589_v53  ;;  %v1572_v0 = vrot.slane %v1570_v5, 7  ;;  %v3821_v18 = vld [vmem:[%s6097_s0 + $0x38] sm:$0x3]  ;;  %3669 = vmatpush.bf16.msrb.mxu2 %v4640_v30  ;;  %v3430_v30 = vpop.f32.mrf.mxu1 }
  0xf3   :  { %v1581_v16 = vrot.slane %v1580_v63, 2  ;;  %v3834_v36 = vld [vmem:[%s6097_s0 + $0x2c] sm:$0x7]  ;;  %v3835_v61 = vld [vmem:[%s6097_s0 + $0x30] sm:$0x7] }
  0xf4   :  { %v1594_v17 = vrot.slane %v1593_v10, 2  ;;  %v1573_v35 = vsel %vm4905_vm8, %v1568_v45, %v1572_v0  ;;  %v1754_v24 = vrot.slane %v3834_v36, 2  ;;  %v1755_v53 = vrot.slane %v3835_v61, 2  ;;  %v3837_v19 = vld [vmem:[%s6097_s0 + $0x38] sm:$0x7] }
  0xf5   :  { %3652 = vmatpush.bf16.msrb.mxu1 %v4630_v52  ;;  %v1586_v14 = vsel %vm4905_vm8, %v1581_v16, %v1585_v49  ;;  %v3823_v41 = vld [vmem:[%s6097_s0 + $0x80] sm:$0x3]  ;;  %v3824_v59 = vld [vmem:[%s6097_s0 + $0x84] sm:$0x3]  ;;  %v3825_v15 = vld [vmem:[%s6097_s0 + $0x88] sm:$0x3] }
  0xf6   :  { %3586 = vmatmul.bf16.gmra.mxu1 %v3953_v33  ;;  %v1599_v28 = vsel %vm4905_vm8, %v1594_v17, %v1598_v27  ;;  %3670 = vmatpush.bf16.msrb.mxu2 %v4639_v25  ;;  %v1767_v62 = vsel %vm133_vm1, %v3835_v61, %v1755_v53 }
  0xf7   :  { %v1406_v2 = vld.sshfl [vmem:[#allocation1] sm:$0xff pattern:$0x73625140]  ;;  %v1769_v52 = vrot.slane %v1767_v62, 2  ;;  %v3841_v62 = vld [vmem:[%s6097_s0 + $0x88] sm:$0x7] }
  0xf8   :  { %v3892_v51 = vld [vmem:[#allocation2 + $0x28] sm:$0xf]  ;;  %v1410_v3 = vunpack.c.l.b16 %v1406_v2  ;;  %v1411_v44 = vunpack.c.h.b16 %v1406_v2  ;;  %1601 = vst [vmem:[#allocation1] ss:$4 sm:$0xff] %v1472_v4  ;;  %v4638_v2 = vld [vmem:[%s6096_s1 + $0x3a0] sm:$0xff] }
  0xf9   :  { %v4503_v38 = vld [vmem:[#allocation2 + $0x64] sm:$0xf0]  ;;  %1604 = vst [vmem:[#allocation1 + $0x1] ss:$4 sm:$0xff] %v1485_v21  ;;  %3653 = vmatpush.bf16.msrb.mxu1 %v4629_v34  ;;  %v5849_v34 = vshll.u32 %v1769_v52, 16 }
  0xfa   :  { %v3893_v43 = vor.u32 %v4503_v38, %v3892_v51  ;;  %v1414_v6 = vpack.c.b16 %v1410_v3, %v1410_v3  ;;  %v1415_v40 = vpack.c.b16 %v1411_v44, %v1411_v44  ;;  %1607 = vst [vmem:[#allocation1 + $0x2] ss:$4 sm:$0xff] %v1498_v7  ;;  %v3836_v7 = vld [vmem:[%s6097_s0 + $0x34] sm:$0x7]  ;;  %v1760_v51 = vsel %vm129_vm0, %v3834_v36, %v1754_v24  ;;  %v3822_v38 = vld [vmem:[%s6097_s0 + $0x7c] sm:$0x3] }
  0xfb   :  { %1610 = vst [vmem:[#allocation1 + $0x3] ss:$4 sm:$0xff] %v1511_v32  ;;  %v1766_v3 = vsel %vm129_vm0, %v3835_v61, %v1755_v53  ;;  %3671 = vmatpush.bf16.msrb.mxu2 %v4638_v2  ;;  %v1756_v44 = vrot.slane %v3836_v7, 2  ;;  %v1761_v32 = vsel %vm133_vm1, %v3834_v36, %v1754_v24  ;;  %v1782_v5 = vshrl.u32 %v1760_v51, 16  ;;  %v3829_v53 = vld [vmem:[%s6097_s0 + $0x4c] sm:$0x3] }
  0xfc   :  { %3600 = vmatmul.bf16.vlgmr.msra.gmra.mxu2 %v3893_v43  ;;  %1422 = vst [vmem:[#allocation2 + $0xa8] sm:$0xf] %v1414_v6  ;;  %v1757_v43 = vrot.slane %v3837_v19, 2  ;;  %v1785_v6 = vshll.u32 %v1760_v51, 16  ;;  %v1763_v9 = vrot.slane %v1761_v32, 2  ;;  %v1798_v10 = vshll.u32 %v1766_v3, 16 }
  0xfd   :  { %1423 = vst [vmem:[#allocation2 + $0xe8] sm:$0xf] %v1415_v40  ;;  %3654 = vmatpush.bf16.msrb.mxu1 %v4628_v47  ;;  %v1795_v40 = vshrl.u32 %v1766_v3, 16  ;;  %v1772_v45 = vsel %vm129_vm0, %v3836_v7, %v1756_v44  ;;  %v1773_v0 = vsel %vm133_vm1, %v3836_v7, %v1756_v44  ;;  %v1784_v49 = vrot.slane %v1782_v5, 6  ;;  %v3411_v47 = vpop.f32.mrf.mxu0  ;;  %v3840_v7 = vld [vmem:[%s6097_s0 + $0x84] sm:$0x7] }
  0xfe   :  { %v1787_v17 = vrot.slane %v1785_v6, 7  ;;  %v4647_v51 = vld [vmem:[%s6096_s1 + $0x3e8] sm:$0xff]  ;;  %v1806_v32 = vrot.slane %v5849_v34, 7  ;;  %v1844_v52 = vrot.slane %v3840_v7, 2  ;;  %v4645_v34 = vld [vmem:[%s6096_s1 + $0x3d8] sm:$0xff] }
  0xff   :  { %v4635_v3 = vld [vmem:[%s6096_s1 + $0x388] sm:$0xff] }
 0x101   :  { %3655 = vmatpush.bf16.msrb.mxu1 %v4627_v11  ;;  %v4636_v11 = vld [vmem:[%s6096_s1 + $0x390] sm:$0xff] }
 0x102   :  { %v1611_v39 = vld.sshfl [vmem:[#allocation1] sm:$0xff pattern:$0x73625140] }
 0x103   :  { %v1626_v4 = vunpack.c.l.b16 %v1611_v39  ;;  %v1627_v21 = vunpack.c.h.b16 %v1611_v39  ;;  %1614 = vst [vmem:[#allocation1] ss:$4 sm:$0xff] %v1560_v50  ;;  %v3956_v26 = vld [vmem:[#allocation2 + $0xa8] sm:$0xf]  ;;  %v1797_v39 = vrot.slane %v1795_v40, 6 }
 0x104   :  { %1617 = vst [vmem:[#allocation1 + $0x1] ss:$4 sm:$0xff] %v1573_v35  ;;  %v4519_v42 = vld [vmem:[#allocation2 + $0xe4] sm:$0xf0] }
 0x105   :  { %v1630_v29 = vpack.c.b16 %v1626_v4, %v1626_v4  ;;  %v1631_v33 = vpack.c.b16 %v1627_v21, %v1627_v21  ;;  %1620 = vst [vmem:[#allocation1 + $0x2] ss:$4 sm:$0xff] %v1586_v14  ;;  %v3957_v46 = vor.u32 %v4519_v42, %v3956_v26  ;;  %3656 = vmatpush.bf16.msrb.mxu1 %v4626_v23  ;;  %v1800_v14 = vrot.slane %v1798_v10, 7  ;;  %v4649_v26 = vld [vmem:[%s6096_s1 + $0x3f8] sm:$0xff] }
 0x106   :  { %1623 = vst [vmem:[#allocation1 + $0x3] ss:$4 sm:$0xff] %v1599_v28  ;;  %v1775_v4 = vrot.slane %v1773_v0, 2  ;;  %v1808_v21 = vshrl.u32 %v1772_v45, 16  ;;  %v1811_v28 = vshll.u32 %v1772_v45, 16  ;;  %v4637_v42 = vld [vmem:[%s6096_s1 + $0x398] sm:$0xff]  ;;  %3687 = vmatpush.bf16.msrb.mxu3 %v4649_v26 }
 0x107   :  { %1638 = vst [vmem:[#allocation2 + $0x2c] sm:$0xf] %v1630_v29  ;;  %v1778_v29 = vsel %vm129_vm0, %v3837_v19, %v1757_v43  ;;  %3672 = vmatpush.bf16.msrb.mxu2 %v4637_v42  ;;  %v1801_v25 = vor.u32 %v1800_v14, %v1797_v39  ;;  %v4634_v39 = vld [vmem:[%s6096_s1 + $0x380] sm:$0xff]  ;;  %v1845_v14 = vrot.slane %v3841_v62, 2 }
 0x108   :  { %1639 = vst [vmem:[#allocation2 + $0x6c] sm:$0xf] %v1631_v33  ;;  %v5847_v33 = vshll.u32 %v1763_v9, 16  ;;  %v1824_v61 = vshll.u32 %v1778_v29, 16  ;;  %v5880_v2 = vshll.u32 %v1775_v4, 16 }
 0x10a   :  { %v1793_v23 = vrot.slane %v5847_v33, 7  ;;  %v1826_v9 = vrot.slane %v1824_v61, 7  ;;  %v3832_v61 = vld [vmem:[%s6097_s0 + $0x98] sm:$0x3] }
 0x10b   :  { %3673 = vmatpush.bf16.msrb.mxu2 %v4636_v11 }
 0x10c   :  { %3605 = vmatmul.bf16.gmra.mxu2 %v3957_v46  ;;  %v5854_v46 = vld [vmem:[%s6098_s2] ss:$0 sm:$0xff] }
 0x10d   :  { %v1624_v56 = vld.sshfl [vmem:[#allocation1] sm:$0xff pattern:$0x73625140]  ;;  %v3412_v36 = vadd.f32 %v5854_v46, %v3411_v47 }
 0x10e   :  { %v4495_v57 = vld [vmem:[#allocation2 + $0x2c] sm:$0xf]  ;;  %v1628_v60 = vunpack.c.l.b16 %v1624_v56  ;;  %v1629_v20 = vunpack.c.h.b16 %v1624_v56  ;;  %1653 = vst [vmem:[#allocation1] ss:$4 sm:$0xff] %v3818_v48  ;;  %v1779_v48 = vsel %vm133_vm1, %v3837_v19, %v1757_v43 }
 0x10f   :  { %v3894_v31 = vld [vmem:[#allocation2 + $0x68] sm:$0xf0]  ;;  %1656 = vst [vmem:[#allocation1 + $0x1] ss:$4 sm:$0xff] %v3819_v55  ;;  %v1788_v55 = vor.u32 %v1787_v17, %v1784_v49  ;;  %v5888_v19 = vadd.f32 %v3430_v30, %v3412_v36  ;;  %v3413_v17 = vpop.f32.mrf.mxu0  ;;  %3674 = vmatpush.bf16.msrb.mxu2 %v4635_v3 }
 0x110   :  { %v3897_v1 = vor.u32 %v4495_v57, %v3894_v31  ;;  %v1632_v22 = vpack.c.b16 %v1628_v60, %v1628_v60  ;;  %v1633_v37 = vpack.c.b16 %v1629_v20, %v1629_v20  ;;  %1659 = vst [vmem:[#allocation1 + $0x2] ss:$4 sm:$0xff] %v3820_v54  ;;  %v3838_v54 = vld [vmem:[%s6097_s0 + $0x7c] sm:$0x7]  ;;  %v4648_v56 = vld [vmem:[%s6096_s1 + $0x3f0] sm:$0xff]  ;;  %v1810_v57 = vrot.slane %v1808_v21, 6 }
 0x111   :  { %1662 = vst [vmem:[#allocation1 + $0x3] ss:$4 sm:$0xff] %v3821_v18  ;;  %v3826_v18 = vld [vmem:[%s6097_s0 + $0x40] sm:$0x3]  ;;  %v1813_v60 = vrot.slane %v1811_v28, 7  ;;  %v1821_v31 = vshrl.u32 %v1778_v29, 16  ;;  %3688 = vmatpush.bf16.msrb.mxu3 %v4648_v56  ;;  %v3432_v28 = vpop.f32.mrf.mxu1  ;;  %v1860_v29 = vsel %vm129_vm0, %v3840_v7, %v1844_v52 }
 0x112   :  { %3619 = vmatmul.bf16.vlgmr.msra.gmra.mxu3 %v3897_v1  ;;  %1640 = vst [vmem:[#allocation2 + $0xac] sm:$0xf] %v1632_v22  ;;  %v3827_v20 = vld [vmem:[%s6097_s0 + $0x44] sm:$0x3]  ;;  %v3839_v1 = vld [vmem:[%s6097_s0 + $0x80] sm:$0x7] }
 0x113   :  { %1641 = vst [vmem:[#allocation2 + $0xec] sm:$0xf] %v1633_v37  ;;  %v3828_v22 = vld [vmem:[%s6097_s0 + $0x48] sm:$0x3]  ;;  %v1781_v37 = vrot.slane %v1779_v48, 2  ;;  %v1842_v24 = vrot.slane %v3838_v54, 2  ;;  %v1814_v5 = vor.u32 %v1813_v60, %v1810_v57  ;;  %v1861_v48 = vsel %vm133_vm1, %v3840_v7, %v1844_v52  ;;  %3675 = vmatpush.bf16.msrb.mxu2 %v4634_v39 }
 0x114   :  { %v5896_v44 = vrot.slane %v1788_v55, 2  ;;  %v1843_v43 = vrot.slane %v3839_v1, 2  ;;  %v3831_v57 = vld [vmem:[%s6097_s0 + $0x94] sm:$0x3]  ;;  %v1866_v60 = vsel %vm129_vm0, %v3841_v62, %v1845_v14  ;;  %v1899_v7 = vshll.u32 %v1860_v29, 16 }
 0x115   :  { %v1849_v45 = vsel %vm133_vm1, %v3838_v54, %v1842_v24  ;;  %3689 = vmatpush.bf16.msrb.mxu3 %v4647_v51  ;;  %v1815_v26 = vrot.slane %v1814_v5, 2  ;;  %v3844_v39 = vld [vmem:[%s6097_s0 + $0x48] sm:$0x7] }
 0x116   :  { %v1851_v4 = vrot.slane %v1849_v45, 2  ;;  %v1854_v21 = vsel %vm129_vm0, %v3839_v1, %v1843_v43  ;;  %v1901_v52 = vrot.slane %v1899_v7, 7 }
 0x117   :  { %v1886_v36 = vshll.u32 %v1854_v21, 16 }
 0x118   :  { %v1663_v63 = vld.sshfl [vmem:[#allocation1] sm:$0xff pattern:$0x73625140]  ;;  %v5926_v11 = vshll.u32 %v1851_v4, 16  ;;  %v3449_v4 = vpop.f32.mrf.mxu2 }
 0x119   :  { %v1678_v12 = vunpack.c.l.b16 %v1663_v63  ;;  %v1679_v13 = vunpack.c.h.b16 %v1663_v63  ;;  %1666 = vst [vmem:[#allocation1] ss:$4 sm:$0xff] %v3822_v38  ;;  %v4511_v16 = vld [vmem:[#allocation2 + $0xac] sm:$0xf] }
 0x11a   :  { %1669 = vst [vmem:[#allocation1 + $0x1] ss:$4 sm:$0xff] %v3823_v41  ;;  %v3958_v27 = vld [vmem:[#allocation2 + $0xe8] sm:$0xf0]  ;;  %v5902_v41 = vrot.slane %v1801_v25, 2  ;;  %v1883_v25 = vshrl.u32 %v1854_v21, 16  ;;  %v3416_v21 = vpop.f32.mrf.mxu0 }
 0x11b   :  { %v1682_v50 = vpack.c.b16 %v1678_v12, %v1678_v12  ;;  %v1683_v35 = vpack.c.b16 %v1679_v13, %v1679_v13  ;;  %1672 = vst [vmem:[#allocation1 + $0x2] ss:$4 sm:$0xff] %v3824_v59  ;;  %v3961_v58 = vor.u32 %v4511_v16, %v3958_v27  ;;  %v1823_v59 = vrot.slane %v1821_v31, 6 }
 0x11c   :  { %1675 = vst [vmem:[#allocation1 + $0x3] ss:$4 sm:$0xff] %v3825_v15  ;;  %v1819_v12 = vrot.slane %v5880_v2, 7  ;;  %v5905_v13 = vshll.u32 %v1781_v37, 16  ;;  %v1848_v15 = vsel %vm129_vm0, %v3838_v54, %v1842_v24  ;;  %v1855_v27 = vsel %vm133_vm1, %v3839_v1, %v1843_v43  ;;  %v3830_v54 = vld [vmem:[%s6097_s0 + $0x90] sm:$0x3] }
 0x11d   :  { %1690 = vst [vmem:[#allocation2 + $0x30] sm:$0xf] %v1682_v50  ;;  %v4646_v50 = vld [vmem:[%s6096_s1 + $0x3e0] sm:$0xff]  ;;  %v1827_v42 = vor.u32 %v1826_v9, %v1823_v59  ;;  %v1857_v30 = vrot.slane %v1855_v27, 2  ;;  %v1873_v55 = vshll.u32 %v1848_v15, 16  ;;  %v1896_v31 = vshrl.u32 %v1860_v29, 16 }
 0x11e   :  { %1691 = vst [vmem:[#allocation2 + $0x70] sm:$0xf] %v1683_v35  ;;  %v3414_v35 = vadd.f32 %v5854_v46, %v3413_v17  ;;  %3690 = vmatpush.bf16.msrb.mxu3 %v4646_v50  ;;  %v1863_v37 = vrot.slane %v1861_v48, 2  ;;  %v3833_v24 = vld [vmem:[%s6097_s0 + $0x9c] sm:$0x3]  ;;  %v1881_v3 = vrot.slane %v5926_v11, 7  ;;  %v1807_v33 = vsel %vm4905_vm8, %v5902_v41, %v1806_v32 }
 0x11f   :  { %v1828_v1 = vrot.slane %v1827_v42, 2  ;;  %v1885_v5 = vrot.slane %v1883_v25, 6  ;;  %v1888_v59 = vrot.slane %v1886_v36, 7  ;;  %v1909_v43 = vshrl.u32 %v1866_v60, 16  ;;  %v3845_v42 = vld [vmem:[%s6097_s0 + $0x4c] sm:$0x7] }
 0x120   :  { %v5919_v47 = vadd.f32 %v3432_v28, %v3414_v35  ;;  %v1898_v9 = vrot.slane %v1896_v31, 6  ;;  %v5953_v50 = vshll.u32 %v1863_v37, 16  ;;  %v3417_v48 = vadd.f32 %v5854_v46, %v3416_v21  ;;  %v4643_v31 = vld [vmem:[%s6096_s1 + $0x3c8] sm:$0xff] }
 0x121   :  { %v1911_v45 = vrot.slane %v1909_v43, 6  ;;  %v1889_v32 = vor.u32 %v1888_v59, %v1885_v5  ;;  %v1975_v36 = vrot.slane %v3845_v42, 2 }
 0x122   :  { %3624 = vmatmul.bf16.gmra.mxu3 %v3961_v58  ;;  %v1870_v58 = vshrl.u32 %v1848_v15, 16  ;;  %v1794_v15 = vsel %vm4905_vm8, %v5896_v44, %v1793_v23  ;;  %v1820_v23 = vsel %vm4905_vm8, %v1815_v26, %v1819_v12  ;;  %v1902_v41 = vor.u32 %v1901_v52, %v1898_v9 }
 0x123   :  { %v1676_v38 = vld.sshfl [vmem:[#allocation1] sm:$0xff pattern:$0x73625140]  ;;  %3691 = vmatpush.bf16.msrb.mxu3 %v4645_v34  ;;  %v1996_v9 = vsel %vm129_vm0, %v3845_v42, %v1975_v36 }
 0x124   :  { %v3900_v6 = vld [vmem:[#allocation2 + $0x30] sm:$0xf]  ;;  %v1680_v40 = vunpack.c.l.b16 %v1676_v38  ;;  %v1681_v63 = vunpack.c.h.b16 %v1676_v38  ;;  %1705 = vst [vmem:[#allocation1] ss:$4 sm:$0xff] %v3826_v18  ;;  %v1867_v18 = vsel %vm133_vm1, %v3841_v62, %v1845_v14  ;;  %v1872_v56 = vrot.slane %v1870_v58, 6 }
 0x125   :  { %v4504_v10 = vld [vmem:[#allocation2 + $0x6c] sm:$0xf0]  ;;  %1708 = vst [vmem:[#allocation1 + $0x1] ss:$4 sm:$0xff] %v3827_v20  ;;  %v1875_v20 = vrot.slane %v1873_v55, 7  ;;  %v5940_v62 = vshll.u32 %v1857_v30, 16  ;;  %v5981_v58 = vadd.f32 %v3449_v4, %v5888_v19  ;;  %v3435_v55 = vpop.f32.mrf.mxu1 }
 0x126   :  { %v3901_v0 = vor.u32 %v4504_v10, %v3900_v6  ;;  %v1684_v16 = vpack.c.b16 %v1680_v40, %v1680_v40  ;;  %v1685_v49 = vpack.c.b16 %v1681_v63, %v1681_v63  ;;  %1711 = vst [vmem:[#allocation1 + $0x2] ss:$4 sm:$0xff] %v3828_v22  ;;  %v1832_v22 = vrot.slane %v5905_v13, 7  ;;  %v3842_v6 = vld [vmem:[%s6097_s0 + $0x40] sm:$0x7]  ;;  %v4644_v30 = vld [vmem:[%s6096_s1 + $0x3d0] sm:$0xff] }
 0x127   :  { %1714 = vst [vmem:[#allocation1 + $0x3] ss:$4 sm:$0xff] %v3829_v53  ;;  %v1869_v53 = vrot.slane %v1867_v18, 2  ;;  %v1876_v51 = vor.u32 %v1875_v20, %v1872_v56  ;;  %v3843_v10 = vld [vmem:[%s6097_s0 + $0x44] sm:$0x7]  ;;  %v1894_v2 = vrot.slane %v5940_v62, 7  ;;  %3692 = vmatpush.bf16.msrb.mxu3 %v4644_v30 }
 0x128   :  { %3638 = vmatmul.bf16.vlgmr.msrb.gmra.mxu0 %v3901_v0  ;;  %1692 = vst [vmem:[#allocation2 + $0xb0] sm:$0xf] %v1684_v16  ;;  %v1912_v0 = vshll.u32 %v1866_v60, 16  ;;  %v5966_v44 = vsel %vm4905_vm8, %v1828_v1, %v1832_v22  ;;  %v1972_v14 = vrot.slane %v3842_v6, 2  ;;  %v1973_v29 = vrot.slane %v3843_v10, 2 }
 0x129   :  { %1693 = vst [vmem:[#allocation2 + $0xf0] sm:$0xf] %v1685_v49  ;;  %v1877_v27 = vrot.slane %v1876_v51, 2  ;;  %v5975_v26 = vshll.u32 %v1869_v53, 16  ;;  %v1907_v18 = vrot.slane %v5953_v50, 7  ;;  %v1974_v56 = vrot.slane %v3844_v39, 2 }
 0x12a   :  { %v1914_v35 = vrot.slane %v1912_v0, 7  ;;  %v1978_v11 = vsel %vm129_vm0, %v3842_v6, %v1972_v14  ;;  %v1979_v25 = vsel %vm133_vm1, %v3842_v6, %v1972_v14  ;;  %v1985_v19 = vsel %vm133_vm1, %v3843_v10, %v1973_v29  ;;  %v3847_v62 = vld [vmem:[%s6097_s0 + $0x94] sm:$0x7] }
 0x12b   :  { %v1890_v60 = vrot.slane %v1889_v32, 2  ;;  %v1903_v20 = vrot.slane %v1902_v41, 2  ;;  %v1920_v1 = vrot.slane %v5975_v26, 7  ;;  %v1984_v22 = vsel %vm129_vm0, %v3843_v10, %v1973_v29  ;;  %3693 = vmatpush.bf16.msrb.mxu3 %v4643_v31  ;;  %v3849_v26 = vld [vmem:[%s6097_s0 + $0x9c] sm:$0x7] }
 0x12c   :  { %v1915_v28 = vor.u32 %v1914_v35, %v1911_v45  ;;  %v1991_v37 = vsel %vm133_vm1, %v3844_v39, %v1974_v56  ;;  %v1987_v53 = vrot.slane %v1985_v19, 2  ;;  %v1997_v51 = vsel %vm133_vm1, %v3845_v42, %v1975_v36  ;;  %v3848_v19 = vld [vmem:[%s6097_s0 + $0x98] sm:$0x7] }
 0x12d   :  { %v1993_v43 = vrot.slane %v1991_v37, 2  ;;  %v2003_v6 = vshll.u32 %v1978_v11, 16  ;;  %v2013_v10 = vshrl.u32 %v1984_v22, 16  ;;  %v1999_v35 = vrot.slane %v1997_v51, 2  ;;  %v3437_v34 = vpop.f32.mrf.mxu1 }
 0x12e   :  { %v1715_v38 = vld.sshfl [vmem:[#allocation1] sm:$0xff pattern:$0x73625140]  ;;  %v2016_v14 = vshll.u32 %v1984_v22, 16  ;;  %v2039_v21 = vshrl.u32 %v1996_v9, 16  ;;  %v1908_v30 = vsel %vm4905_vm8, %v1903_v20, %v1907_v18 }
 0x12f   :  { %v1730_v40 = vunpack.c.l.b16 %v1715_v38  ;;  %v1731_v63 = vunpack.c.h.b16 %v1715_v38  ;;  %1718 = vst [vmem:[#allocation1] ss:$4 sm:$0xff] %v3830_v54  ;;  %v3964_v13 = vld [vmem:[#allocation2 + $0xb0] sm:$0xf]  ;;  %v5989_v54 = vsel %vm4905_vm8, %v1877_v27, %v1881_v3  ;;  %v2000_v3 = vshrl.u32 %v1978_v11, 16 }
 0x130   :  { %1721 = vst [vmem:[#allocation1 + $0x1] ss:$4 sm:$0xff] %v3831_v57  ;;  %v4520_v16 = vld [vmem:[#allocation2 + $0xec] sm:$0xf0]  ;;  %v5995_v57 = vadd.f32 %v3435_v55, %v3417_v48  ;;  %v2015_v41 = vrot.slane %v2013_v10, 6  ;;  %v6025_v29 = vshll.u32 %v1993_v43, 16 }
 0x131   :  { %v1734_v49 = vpack.c.b16 %v1730_v40, %v1730_v40  ;;  %v1735_v17 = vpack.c.b16 %v1731_v63, %v1731_v63  ;;  %1724 = vst [vmem:[#allocation1 + $0x2] ss:$4 sm:$0xff] %v3832_v61  ;;  %v3965_v12 = vor.u32 %v4520_v16, %v3964_v13  ;;  %v6000_v61 = vrot.slane %v1915_v28, 2  ;;  %v3451_v16 = vpop.f32.mrf.mxu2 }
 0x132   :  { %1727 = vst [vmem:[#allocation1 + $0x3] ss:$4 sm:$0xff] %v3833_v24  ;;  %v1981_v24 = vrot.slane %v1979_v25, 2  ;;  %v1990_v63 = vsel %vm129_vm0, %v3844_v39, %v1974_v56  ;;  %v2002_v52 = vrot.slane %v2000_v3, 6  ;;  %v6013_v27 = vadd.f32 %v3451_v16, %v5919_v47 }
 0x133   :  { %1742 = vst [vmem:[#allocation2 + $0x34] sm:$0xf] %v1734_v49  ;;  %v4642_v49 = vld [vmem:[%s6096_s1 + $0x3c0] sm:$0xff]  ;;  %v2022_v47 = vshll.u32 %v1987_v53, 16  ;;  %v2029_v4 = vshll.u32 %v1990_v63, 16  ;;  %v2018_v28 = vrot.slane %v2016_v14, 7  ;;  %v1921_v50 = vsel %vm4905_vm8, %v6000_v61, %v1920_v1 }
 0x134   :  { %1743 = vst [vmem:[#allocation2 + $0x74] sm:$0xf] %v1735_v17  ;;  %v2005_v17 = vrot.slane %v2003_v6, 7  ;;  %v2009_v39 = vshll.u32 %v1981_v24, 16  ;;  %3694 = vmatpush.bf16.msrb.mxu3 %v4642_v49  ;;  %v2041_v55 = vrot.slane %v2039_v21, 6  ;;  %v2042_v56 = vshll.u32 %v1996_v9, 16 }
 0x135   :  { %v2031_v48 = vrot.slane %v2029_v4, 7  ;;  %v2024_v18 = vrot.slane %v2022_v47, 7  ;;  %v2048_v36 = vshll.u32 %v1999_v35, 16  ;;  %v2061_v24 = vrot.slane %v3847_v62, 2 }
 0x136   :  { %v2006_v32 = vor.u32 %v2005_v17, %v2002_v52  ;;  %v2011_v25 = vrot.slane %v2009_v39, 7  ;;  %v2044_v20 = vrot.slane %v2042_v56, 7  ;;  %v2063_v52 = vrot.slane %v3849_v26, 2 }
 0x137   :  { %v2073_v10 = vsel %vm133_vm1, %v3847_v62, %v2061_v24 }
 0x138   :  { %3643 = vmatmul.bf16.gmra.mxu0 %v3965_v12  ;;  %v2026_v12 = vshrl.u32 %v1990_v63, 16  ;;  %v2007_v11 = vrot.slane %v2006_v32, 2  ;;  %v2045_v3 = vor.u32 %v2044_v20, %v2041_v55  ;;  %v2075_v32 = vrot.slane %v2073_v10, 2 }
 0x139   :  { %v1728_v7 = vld.sshfl [vmem:[#allocation1] sm:$0xff pattern:$0x73625140]  ;;  %v3454_v49 = vpop.f32.mrf.mxu2 }
 0x13a   :  { %v4496_v38 = vld [vmem:[#allocation2 + $0x34] sm:$0xf]  ;;  %v1732_v5 = vunpack.c.l.b16 %v1728_v7  ;;  %v1733_v59 = vunpack.c.h.b16 %v1728_v7  ;;  %1923 = vst [vmem:[#allocation1] ss:$4 sm:$0xff] %v1794_v15  ;;  %v3418_v15 = vpop.f32.mrf.mxu0  ;;  %v2028_v42 = vrot.slane %v2026_v12, 6  ;;  %v2037_v7 = vrot.slane %v6025_v29, 7 }
 0x13b   :  { %v3902_v40 = vld [vmem:[#allocation2 + $0x70] sm:$0xf0]  ;;  %1926 = vst [vmem:[#allocation1 + $0x1] ss:$4 sm:$0xff] %v1807_v33  ;;  %v3419_v33 = vadd.f32 %v5854_v46, %v3418_v15  ;;  %v1895_v46 = vsel %vm4905_vm8, %v1890_v60, %v1894_v2  ;;  %v2019_v2 = vor.u32 %v2018_v28, %v2015_v41  ;;  %v3468_v15 = vpop.f32.mrf.mxu3  ;;  %v2085_v41 = vsel %vm133_vm1, %v3849_v26, %v2063_v52 }
 0x13c   :  { %v3905_v13 = vor.u32 %v4496_v38, %v3902_v40  ;;  %v1736_v45 = vpack.c.b16 %v1732_v5, %v1732_v5  ;;  %v1737_v0 = vpack.c.b16 %v1733_v59, %v1733_v59  ;;  %1929 = vst [vmem:[#allocation1 + $0x2] ss:$4 sm:$0xff] %v1820_v23  ;;  %v3846_v23 = vld [vmem:[%s6097_s0 + $0x90] sm:$0x7]  ;;  %v2032_v37 = vor.u32 %v2031_v48, %v2028_v42 }
 0x13d   :  { %1932 = vst [vmem:[#allocation1 + $0x3] ss:$4 sm:$0xff] %v5966_v44  ;;  %v6019_v44 = vadd.f32 %v3437_v34, %v3419_v33  ;;  %v2060_v60 = vrot.slane %v3846_v23, 2  ;;  %v2020_v22 = vrot.slane %v2019_v2, 2  ;;  %v2062_v38 = vrot.slane %v3848_v19, 2 }
 0x13e   :  { %3657 = vmatmul.bf16.vlgmr.msrb.gmra.mxu1 %v3905_v13  ;;  %1744 = vst [vmem:[#allocation2 + $0xb4] sm:$0xf] %v1736_v45  ;;  %v2012_v5 = vsel %vm4905_vm8, %v2007_v11, %v2011_v25  ;;  %v2050_v40 = vrot.slane %v2048_v36, 7  ;;  %v2033_v9 = vrot.slane %v2032_v37, 2  ;;  %v2046_v45 = vrot.slane %v2045_v3, 2 }
 0x13f   :  { %1745 = vst [vmem:[#allocation2 + $0xf4] sm:$0xf] %v1737_v0  ;;  %v2066_v59 = vsel %vm129_vm0, %v3846_v23, %v2060_v60  ;;  %v2025_v63 = vsel %vm4905_vm8, %v2020_v22, %v2024_v18  ;;  %v2072_v0 = vsel %vm129_vm0, %v3847_v62, %v2061_v24  ;;  %v2078_v33 = vsel %vm129_vm0, %v3848_v19, %v2062_v38 }
 0x140   :  { %v2088_v16 = vshrl.u32 %v2066_v59, 16  ;;  %v2079_v35 = vsel %vm133_vm1, %v3848_v19, %v2062_v38  ;;  %v2091_v39 = vshll.u32 %v2066_v59, 16  ;;  %v6061_v34 = vadd.f32 %v3468_v15, %v5981_v58 }
 0x141   :  { %v2101_v47 = vshrl.u32 %v2072_v0, 16  ;;  %v2104_v4 = vshll.u32 %v2072_v0, 16  ;;  %v2038_v21 = vsel %vm4905_vm8, %v2033_v9, %v2037_v7  ;;  %v2114_v28 = vshrl.u32 %v2078_v33, 16  ;;  %v3456_v24 = vpop.f32.mrf.mxu2 }
 0x142   :  { %v2090_v14 = vrot.slane %v2088_v16, 6  ;;  %v2093_v12 = vrot.slane %v2091_v39, 7  ;;  %v2117_v42 = vshll.u32 %v2078_v33, 16  ;;  %v2087_v29 = vrot.slane %v2085_v41, 2 }
 0x143   :  { %v2106_v58 = vrot.slane %v2104_v4, 7  ;;  %v2051_v55 = vsel %vm4905_vm8, %v2046_v45, %v2050_v40  ;;  %v2116_v62 = vrot.slane %v2114_v28, 6  ;;  %v3457_v3 = vadd.f32 %v3456_v24, %v6019_v44 }
 0x144   :  { %v1933_v31 = vld.sshfl [vmem:[#allocation1] sm:$0xff pattern:$0x73625140]  ;;  %v2119_v11 = vrot.slane %v2117_v42, 7  ;;  %v2136_v59 = vshll.u32 %v2087_v29, 16 }
 0x145   :  { %v1948_v53 = vunpack.c.l.b16 %v1933_v31  ;;  %v1949_v51 = vunpack.c.h.b16 %v1933_v31  ;;  %1936 = vst [vmem:[#allocation1] ss:$4 sm:$0xff] %v5989_v54  ;;  %v4512_v61 = vld [vmem:[#allocation2 + $0xb4] sm:$0xf]  ;;  %v2067_v54 = vsel %vm133_vm1, %v3846_v23, %v2060_v60  ;;  %v6058_v23 = vadd.f32 %v3454_v49, %v5995_v57 }
 0x146   :  { %v3966_v1 = vld [vmem:[#allocation2 + $0xf0] sm:$0xf0]  ;;  %1939 = vst [vmem:[#allocation1 + $0x1] ss:$4 sm:$0xff] %v1895_v46  ;;  %v2069_v17 = vrot.slane %v2067_v54, 2  ;;  %v2081_v46 = vrot.slane %v2079_v35, 2  ;;  %v2084_v57 = vsel %vm129_vm0, %v3849_v26, %v2063_v52  ;;  %v2094_v60 = vor.u32 %v2093_v12, %v2090_v14 }
 0x147   :  { %v1952_v43 = vpack.c.b16 %v1948_v53, %v1948_v53  ;;  %v1953_v6 = vpack.c.b16 %v1949_v51, %v1949_v51  ;;  %1942 = vst [vmem:[#allocation1 + $0x2] ss:$4 sm:$0xff] %v1908_v30  ;;  %v3969_v13 = vor.u32 %v4512_v61, %v3966_v1  ;;  %v2103_v30 = vrot.slane %v2101_v47, 6  ;;  %v3470_v53 = vpop.f32.mrf.mxu3 }
 0x148   :  { %1945 = vst [vmem:[#allocation1 + $0x3] ss:$4 sm:$0xff] %v1921_v50  ;;  %v2097_v56 = vshll.u32 %v2069_v17, 16  ;;  %v2110_v50 = vshll.u32 %v2075_v32, 16  ;;  %v2123_v36 = vshll.u32 %v2081_v46, 16  ;;  %v2127_v31 = vshrl.u32 %v2084_v57, 16 }
 0x149   :  { %1960 = vst [vmem:[#allocation2 + $0x38] sm:$0xf] %v1952_v43  ;;  %v2107_v20 = vor.u32 %v2106_v58, %v2103_v30  ;;  %v2120_v51 = vor.u32 %v2119_v11, %v2116_v62  ;;  %v6071_v26 = vadd.f32 %v3470_v53, %v6013_v27  ;;  %v2095_v61 = vrot.slane %v2094_v60, 2  ;;  %v3487_v58 = vpop.f32.mrf.mxu0 }
 0x14a   :  { %1961 = vst [vmem:[#allocation2 + $0x78] sm:$0xf] %v1953_v6  ;;  %v2099_v38 = vrot.slane %v2097_v56, 7  ;;  %v2129_v1 = vrot.slane %v2127_v31, 6  ;;  %v2112_v6 = vrot.slane %v2110_v50, 7  ;;  %v2125_v54 = vrot.slane %v2123_v36, 7 }
 0x14b   :  { %v2108_v43 = vrot.slane %v2107_v20, 2  ;;  %v2121_v40 = vrot.slane %v2120_v51, 2  ;;  %v2138_v52 = vrot.slane %v2136_v59, 7 }
 0x14c   :  { %v2100_v9 = vsel %vm4905_vm8, %v2095_v61, %v2099_v38 }
 0x14d   :  { %v2113_v27 = vsel %vm4905_vm8, %v2108_v43, %v2112_v6  ;;  %v3488_v43 = vadd.f32 %v3487_v58, %v6061_v34 }
 0x14e   :  { %3662 = vmatmul.bf16.gmra.mxu1 %v3969_v13  ;;  %v2126_v13 = vsel %vm4905_vm8, %v2121_v40, %v2125_v54 }
 0x14f   :  { %v1946_v48 = vld.sshfl [vmem:[#allocation1] sm:$0xff pattern:$0x73625140]  ;;  %v3473_v0 = vpop.f32.mrf.mxu3 }
 0x150   :  { %v3908_v25 = vld [vmem:[#allocation2 + $0x38] sm:$0xf]  ;;  %v1950_v2 = vunpack.c.l.b16 %v1946_v48  ;;  %v1951_v19 = vunpack.c.h.b16 %v1946_v48  ;;  %2141 = vst [vmem:[#allocation1] ss:$4 sm:$0xff] %v2012_v5  ;;  %v2130_v5 = vshll.u32 %v2084_v57, 16  ;;  %v6080_v15 = vadd.f32 %v3473_v0, %v6058_v23  ;;  %v3506_v48 = vpop.f32.mrf.mxu1 }
 0x151   :  { %v4505_v18 = vld [vmem:[#allocation2 + $0x74] sm:$0xf0]  ;;  %2144 = vst [vmem:[#allocation1 + $0x1] ss:$4 sm:$0xff] %v2025_v63  ;;  %v3489_v56 = vpop.f32.mrf.mxu0  ;;  %v3507_v6 = vadd.f32 %v3506_v48, %v3488_v43 }
 0x152   :  { %v3909_v22 = vor.u32 %v4505_v18, %v3908_v25  ;;  %v1954_v37 = vpack.c.b16 %v1950_v2, %v1950_v2  ;;  %v1955_v7 = vpack.c.b16 %v1951_v19, %v1951_v19  ;;  %2147 = vst [vmem:[#allocation1 + $0x2] ss:$4 sm:$0xff] %v2038_v21  ;;  %v2132_v63 = vrot.slane %v2130_v5, 7 }
 0x153   :  { %2150 = vst [vmem:[#allocation1 + $0x3] ss:$4 sm:$0xff] %v2051_v55  ;;  %v3525_v55 = vpop.f32.mrf.mxu2  ;;  %v3490_v40 = vadd.f32 %v3489_v56, %v6071_v26 }
 0x154   :  { %3676 = vmatmul.bf16.vlgmr.msrb.gmra.mxu2 %v3909_v22  ;;  %1962 = vst [vmem:[#allocation2 + $0xb8] sm:$0xf] %v1954_v37  ;;  %v2133_v44 = vor.u32 %v2132_v63, %v2129_v1 }
 0x155   :  { %1963 = vst [vmem:[#allocation2 + $0xf8] sm:$0xf] %v1955_v7 }
 0x156   :  { %v2134_v45 = vrot.slane %v2133_v44, 2  ;;  %v3526_v44 = vadd.f32 %v3525_v55, %v3507_v6 }
 0x157   :  { %v3475_v14 = vpop.f32.mrf.mxu3 }
 0x158   :  { %v2139_v17 = vsel %vm4905_vm8, %v2134_v45, %v2138_v52  ;;  %v6084_v12 = vadd.f32 %v3475_v14, %v3457_v3  ;;  %v3508_v62 = vpop.f32.mrf.mxu1 }
 0x159   :  { %v3492_v2 = vpop.f32.mrf.mxu0 }
 0x15a   :  { %v2151_v10 = vld.sshfl [vmem:[#allocation1] sm:$0xff pattern:$0x73625140] }
 0x15b   :  { %v2166_v16 = vunpack.c.l.b16 %v2151_v10  ;;  %v2167_v49 = vunpack.c.h.b16 %v2151_v10  ;;  %2154 = vst [vmem:[#allocation1] ss:$4 sm:$0xff] %v2100_v9  ;;  %v3972_v33 = vld [vmem:[#allocation2 + $0xb8] sm:$0xf]  ;;  %v3527_v11 = vpop.f32.mrf.mxu2  ;;  %v3509_v9 = vadd.f32 %v3508_v62, %v3490_v40 }
 0x15c   :  { %2157 = vst [vmem:[#allocation1 + $0x1] ss:$4 sm:$0xff] %v2113_v27  ;;  %v4521_v35 = vld [vmem:[#allocation2 + $0xf4] sm:$0xf0] }
 0x15d   :  { %v2170_v39 = vpack.c.b16 %v2166_v16, %v2166_v16  ;;  %v2171_v32 = vpack.c.b16 %v2167_v49, %v2167_v49  ;;  %2160 = vst [vmem:[#allocation1 + $0x2] ss:$4 sm:$0xff] %v2126_v13  ;;  %v3973_v41 = vor.u32 %v4521_v35, %v3972_v33  ;;  %v3528_v10 = vadd.f32 %v3527_v11, %v3509_v9 }
 0x15e   :  { %2163 = vst [vmem:[#allocation1 + $0x3] ss:$4 sm:$0xff] %v2139_v17  ;;  %v3493_v16 = vadd.f32 %v3492_v2, %v6080_v15 }
 0x15f   :  { %2178 = vst [vmem:[#allocation2 + $0x3c] sm:$0xf] %v2170_v39  ;;  %v3544_v25 = vpop.f32.mrf.mxu3 }
 0x160   :  { %2179 = vst [vmem:[#allocation2 + $0x7c] sm:$0xf] %v2171_v32  ;;  %v3511_v19 = vpop.f32.mrf.mxu1  ;;  %v3545_v13 = vadd.f32 %v3544_v25, %v3526_v44 }
 0x161   :  { %v3494_v18 = vpop.f32.mrf.mxu0  ;;  %v3512_v34 = vadd.f32 %v3511_v19, %v3493_v16 }
 0x162   :  { %v3495_v39 = vadd.f32 %v3494_v18, %v6084_v12 }
 0x163   :  { %v3530_v60 = vpop.f32.mrf.mxu2 }
 0x164   :  { %3681 = vmatmul.bf16.gmra.mxu2 %v3973_v41 }
 0x165   :  { %v2164_v47 = vld.sshfl [vmem:[#allocation1] sm:$0xff pattern:$0x73625140] }
 0x166   :  { %v4497_v23 = vld [vmem:[#allocation2 + $0x3c] sm:$0xf]  ;;  %v2168_v4 = vunpack.c.l.b16 %v2164_v47  ;;  %v2169_v21 = vunpack.c.h.b16 %v2164_v47 }
 0x167   :  { %v3910_v8 = vld [vmem:[#allocation2 + $0x78] sm:$0xf0]  ;;  %v3546_v50 = vpop.f32.mrf.mxu3 }
 0x168   :  { %v3913_v46 = vor.u32 %v4497_v23, %v3910_v8  ;;  %v2172_v28 = vpack.c.b16 %v2168_v4, %v2168_v4  ;;  %v2173_v42 = vpack.c.b16 %v2169_v21, %v2169_v21  ;;  %v3513_v20 = vpop.f32.mrf.mxu1  ;;  %v3547_v17 = vadd.f32 %v3546_v50, %v3528_v10 }
 0x169   :  { %v3563_v22 = vpop.f32.mrf.mxu0  ;;  %v3514_v47 = vadd.f32 %v3513_v20, %v3495_v39  ;;  %v3531_v23 = vadd.f32 %v3530_v60, %v3512_v34 }
 0x16a   :  { %3695 = vmatmul.bf16.vlgmr.msrb.gmra.mxu3 %v3913_v46  ;;  %2180 = vst [vmem:[#allocation2 + $0xbc] sm:$0xf] %v2172_v28  ;;  %v3564_v49 = vadd.f32 %v3563_v22, %v3545_v13 }
 0x16b   :  { %2181 = vst [vmem:[#allocation2 + $0xfc] sm:$0xf] %v2173_v42  ;;  %v3532_v36 = vpop.f32.mrf.mxu2 }
 0x16f   :  { %v3549_v31 = vpop.f32.mrf.mxu3 }
 0x170   :  { %v3582_v37 = vpop.f32.mrf.mxu1 }
 0x171   :  { %v4513_v57 = vld [vmem:[#allocation2 + $0xbc] sm:$0xf]  ;;  %v3565_v53 = vpop.f32.mrf.mxu0  ;;  %v3583_v26 = vadd.f32 %v3582_v37, %v3564_v49 }
 0x172   :  { %v3974_v29 = vld [vmem:[#allocation2 + $0xf8] sm:$0xf0]  ;;  %v3566_v32 = vadd.f32 %v3565_v53, %v3547_v17 }
 0x173   :  { %v3977_v30 = vor.u32 %v4513_v57, %v3974_v29  ;;  %v3533_v57 = vadd.f32 %v3532_v36, %v3514_v47  ;;  %v3550_v29 = vadd.f32 %v3549_v31, %v3531_v23 }
 0x177   :  { %v3551_v24 = vpop.f32.mrf.mxu3 }
 0x178   :  { %v3584_v51 = vpop.f32.mrf.mxu1  ;;  %v3552_v56 = vadd.f32 %v3551_v24, %v3533_v57 }
 0x179   :  { %v3568_v61 = vpop.f32.mrf.mxu0  ;;  %v3585_v4 = vadd.f32 %v3584_v51, %v3566_v32 }
 0x17a   :  { %3700 = vmatmul.bf16.gmra.mxu3 %v3977_v30  ;;  %v3569_v12 = vadd.f32 %v3568_v61, %v3550_v29 }
 0x17f   :  { %v3601_v7 = vpop.f32.mrf.mxu2 }
 0x180   :  { %v3587_v1 = vpop.f32.mrf.mxu1  ;;  %v3602_v41 = vadd.f32 %v3601_v7, %v3583_v26 }
 0x181   :  { %v3570_v54 = vpop.f32.mrf.mxu0  ;;  %v3588_v50 = vadd.f32 %v3587_v1, %v3569_v12 }
 0x182   :  { %v3571_v18 = vadd.f32 %v3570_v54, %v3552_v56 }
 0x187   :  { %v3603_v3 = vpop.f32.mrf.mxu2 }
 0x188   :  { %v3589_v63 = vpop.f32.mrf.mxu1  ;;  %v3604_v46 = vadd.f32 %v3603_v3, %v3585_v4 }
 0x189   :  { %v3590_v7 = vadd.f32 %v3589_v63, %v3571_v18 }
 0x18f   :  { %v3606_v5 = vpop.f32.mrf.mxu2 }
 0x190   :  { %v3607_v36 = vadd.f32 %v3606_v5, %v3588_v50 }
 0x195   :  { %v3620_v38 = vpop.f32.mrf.mxu3 }
 0x196   :  { %v3621_v21 = vadd.f32 %v3620_v38, %v3602_v41 }
 0x197   :  { %v3608_v52 = vpop.f32.mrf.mxu2 }
 0x198   :  { %v3609_v38 = vadd.f32 %v3608_v52, %v3590_v7 }
 0x19d   :  { %v3622_v59 = vpop.f32.mrf.mxu3 }
 0x19e   :  { %v3623_v30 = vadd.f32 %v3622_v59, %v3604_v46 }
 0x1a5   :  { %v3625_v27 = vpop.f32.mrf.mxu3  ;;  %v3639_v45 = vpop.f32.mrf.mxu0 }
 0x1a6   :  { %v3640_v28 = vadd.f32 %v3639_v45, %v3621_v21  ;;  %v3626_v53 = vadd.f32 %v3625_v27, %v3607_v36 }
 0x1ad   :  { %v3627_v35 = vpop.f32.mrf.mxu3  ;;  %v3641_v14 = vpop.f32.mrf.mxu0 }
 0x1ae   :  { %v3642_v48 = vadd.f32 %v3641_v14, %v3623_v30  ;;  %v3628_v43 = vadd.f32 %v3627_v35, %v3609_v38 }
 0x1b5   :  { %v3644_v25 = vpop.f32.mrf.mxu0 }
 0x1b6   :  { %v3645_v61 = vadd.f32 %v3644_v25, %v3626_v53 }
 0x1bb   :  { %v3658_v0 = vpop.f32.mrf.mxu1 }
 0x1bc   :  { %v3659_v58 = vadd.f32 %v3658_v0, %v3640_v28 }
 0x1bd   :  { %v3646_v59 = vpop.f32.mrf.mxu0 }
 0x1be   :  { %v3647_v54 = vadd.f32 %v3646_v59, %v3628_v43 }
 0x1c3   :  { %v3660_v8 = vpop.f32.mrf.mxu1 }
 0x1c4   :  { %v3661_v62 = vadd.f32 %v3660_v8, %v3642_v48 }
 0x1cb   :  { %v3663_v19 = vpop.f32.mrf.mxu1 }
 0x1cc   :  { %v3664_v6 = vadd.f32 %v3663_v19, %v3645_v61 }
 0x1d3   :  { %v3665_v40 = vpop.f32.mrf.mxu1 }
 0x1d4   :  { %v3666_v44 = vadd.f32 %v3665_v40, %v3647_v54 }
 0x1d7   :  { %v3677_v33 = vpop.f32.mrf.mxu2 }
 0x1d8   :  { %v3678_v55 = vadd.f32 %v3677_v33, %v3659_v58 }
 0x1df   :  { %v3679_v42 = vpop.f32.mrf.mxu2 }
 0x1e0   :  { %v3680_v2 = vadd.f32 %v3679_v42, %v3661_v62 }
 0x1e7   :  { %v3682_v37 = vpop.f32.mrf.mxu2 }
 0x1e8   :  { %v3683_v5 = vadd.f32 %v3682_v37, %v3664_v6 }
 0x1ed   :  { %v3696_v15 = vpop.f32.mrf.mxu3 }
 0x1ee   :  { %v3697_v11 = vadd.f32 %v3696_v15, %v3678_v55 }
 0x1ef   :  { %v3684_v9 = vpop.f32.mrf.mxu2 }
 0x1f0   :  { %v3710_v20 = vmul.f32 0.2, %v3697_v11  ;;  %vm3706_vm9 = vcmp.gt.f32.partialorder %v3697_v11, 0.0  ;;  %v3685_v27 = vadd.f32 %v3684_v9, %v3666_v44 }
 0x1f2   :  { %v3714_v51 = vsel %vm3706_vm9, %v3697_v11, %v3710_v20 }
 0x1f5   :  { %v3698_v60 = vpop.f32.mrf.mxu3 }
 0x1f6   :  { %v3699_v22 = vadd.f32 %v3698_v60, %v3680_v2 }
 0x1f8   :  { %vm3707_vm10 = vcmp.gt.f32.partialorder %v3699_v22, 0.0  ;;  %v3711_v31 = vmul.f32 0.2, %v3699_v22 }
 0x1fa   :  { %v3715_v3 = vsel %vm3707_vm10, %v3699_v22, %v3711_v31 }
 0x1fb   :  { %v4653_v24 = vpack.c.bf16 %v3715_v3, %v3714_v51 }
 0x1fd   :  { %4654 = vst [vmem:[%s6099_s3] sm:$0xff] %v4653_v24   ;;  %v3701_v1 = vpop.f32.mrf.mxu3 }
 0x1fe   :  { %v3702_v63 = vadd.f32 %v3701_v1, %v3683_v5 }
 0x200   :  { %v3712_v13 = vmul.f32 0.2, %v3702_v63  ;;  %vm3708_vm11 = vcmp.gt.f32.partialorder %v3702_v63, 0.0 }
 0x202   :  { %v3716_v0 = vsel %vm3708_vm11, %v3702_v63, %v3712_v13 }
 0x205   :  { %v3703_v10 = vpop.f32.mrf.mxu3 }
 0x206   :  { %v3704_v45 = vadd.f32 %v3703_v10, %v3685_v27 }
 0x208   :  { %vm3709_vm12 = vcmp.gt.f32.partialorder %v3704_v45, 0.0  ;;  %v3713_v52 = vmul.f32 0.2, %v3704_v45 }
 0x20a   :  { %v3717_v16 = vsel %vm3709_vm12, %v3704_v45, %v3713_v52 }
 0x20b   :  { %v4658_v49 = vpack.c.bf16 %v3717_v16, %v3716_v0 }
 0x20d   :  { %4660 = vst [vmem:[%s6099_s3 + $0x8] sm:$0xff] %v4658_v49  }

// kernel: tf_discriminator_forward.8
= control target key start
LH: loop header
LB: loop body
LE: loop exit
PB: predicated region body
PF: predicated region fallthrough
CT: control target
= control target key end

     0   :  { %vm97_vm0 = vsmask.f32 256  ;;  %vm98_vm1 = vsmask.f32 1284  ;;  %vm100_vm3 = vsmask.f32 2312  ;;  %s4107_s1 = inlined_call_operand.vmem [shape: bf16[2048,128], index: 1, kind: input, shape index: {}]   ;;  %s4108_s0 = inlined_call_operand.vmem [shape: bf16[2,4,3,3,128], index: 0, kind: input, shape index: {}]   ;;  %s4109_s2 = inlined_call_operand.vmem [shape: f32[1,128], index: 2, kind: input, shape index: {}]   ;;  %s4110_s3 = inlined_call_operand.vmem [shape: bf16[1,8,128], index: 3, kind: output, shape index: {}]  }
   0x1   :  { %v3058_v0 = vld [vmem:[%s4107_s1 + $0x38] sm:$0xff]  ;;  %v3057_v2 = vld [vmem:[%s4107_s1 + $0x30] sm:$0xff]  ;;  %v3056_v8 = vld [vmem:[%s4107_s1 + $0x28] sm:$0xff]  ;;  %vm32_vm4 = vcmask 1041408   ;;  %vm77_vm5 = vcmask 1041409   ;;  %vm79_vm8 = vcmask 1043459  }
   0x2   :  { %v3066_v1 = vld [vmem:[%s4107_s1 + $0x78] sm:$0xff]  ;;  %2230 = vmatpush.bf16.msra.mxu0 %v3058_v0  ;;  %v3065_v3 = vld [vmem:[%s4107_s1 + $0x70] sm:$0xff]  ;;  %v3064_v9 = vld [vmem:[%s4107_s1 + $0x68] sm:$0xff]  ;;  %vm102_vm7 = vsmask.f32 3340  ;;  %vm68_vm9 = vcmask 1040384  }
   0x3   :  { %2243 = vmatpush.bf16.msra.mxu1 %v3066_v1  ;;  %v3074_v4 = vld [vmem:[%s4107_s1 + $0xb8] sm:$0xff]  ;;  %v3073_v6 = vld [vmem:[%s4107_s1 + $0xb0] sm:$0xff]  ;;  %v3072_v10 = vld [vmem:[%s4107_s1 + $0xa8] sm:$0xff]  ;;  %vm72_vm10 = vcmask 1042434   ;;  %vm104_vm12 = vsmask.f32 4368 }
   0x4   :  { %v3082_v5 = vld [vmem:[%s4107_s1 + $0xf8] sm:$0xff]  ;;  %2256 = vmatpush.bf16.msra.mxu2 %v3074_v4  ;;  %v3081_v7 = vld [vmem:[%s4107_s1 + $0xf0] sm:$0xff]  ;;  %v3080_v11 = vld [vmem:[%s4107_s1 + $0xe8] sm:$0xff]  ;;  %vm81_vm13 = vcmask 1042433   ;;  %vm106_vm15 = vsmask.f32 5396 }
   0x5   :  { %2269 = vmatpush.bf16.msra.mxu3 %v3082_v5  ;;  %v3055_v12 = vld [vmem:[%s4107_s1 + $0x20] sm:$0xff]  ;;  %v3054_v18 = vld [vmem:[%s4107_s1 + $0x18] sm:$0xff]  ;;  %v3053_v22 = vld [vmem:[%s4107_s1 + $0x10] sm:$0xff] }
   0x6   :  { %2231 = vmatpush.bf16.msra.mxu0 %v3057_v2  ;;  %v3063_v13 = vld [vmem:[%s4107_s1 + $0x60] sm:$0xff]  ;;  %v3062_v19 = vld [vmem:[%s4107_s1 + $0x58] sm:$0xff]  ;;  %v3061_v23 = vld [vmem:[%s4107_s1 + $0x50] sm:$0xff] }
   0x7   :  { %2244 = vmatpush.bf16.msra.mxu1 %v3065_v3  ;;  %v3071_v14 = vld [vmem:[%s4107_s1 + $0xa0] sm:$0xff]  ;;  %v3070_v20 = vld [vmem:[%s4107_s1 + $0x98] sm:$0xff]  ;;  %v3069_v24 = vld [vmem:[%s4107_s1 + $0x90] sm:$0xff] }
   0x8   :  { %2257 = vmatpush.bf16.msra.mxu2 %v3073_v6  ;;  %v3079_v15 = vld [vmem:[%s4107_s1 + $0xe0] sm:$0xff]  ;;  %v3078_v21 = vld [vmem:[%s4107_s1 + $0xd8] sm:$0xff]  ;;  %v3077_v25 = vld [vmem:[%s4107_s1 + $0xd0] sm:$0xff] }
   0x9   :  { %2270 = vmatpush.bf16.msra.mxu3 %v3081_v7  ;;  %v14_v16 = vld [vmem:[%s4108_s0] sm:$0x1]  ;;  %v15_v17 = vld [vmem:[%s4108_s0 + $0x2] sm:$0x1]  ;;  %v3052_v26 = vld [vmem:[%s4107_s1 + $0x8] sm:$0xff] }
   0xa   :  { %2232 = vmatpush.bf16.msra.mxu0 %v3056_v8  ;;  %20 = vst [vmem:[#allocation1] ss:$9 sm:$0xff] %v14_v16  ;;  %v3060_v27 = vld [vmem:[%s4107_s1 + $0x48] sm:$0xff]  ;;  %v2447_v28 = vld [vmem:[%s4108_s0 + $0x18] sm:$0x1]  ;;  %v3051_v30 = vld [vmem:[%s4107_s1] sm:$0xff] }
   0xb   :  { %2245 = vmatpush.bf16.msra.mxu1 %v3064_v9  ;;  %23 = vst [vmem:[#allocation1 + $0x1] ss:$9 sm:$0xff] %v15_v17  ;;  %v2448_v29 = vld [vmem:[%s4108_s0 + $0x1a] sm:$0x1]  ;;  %v3059_v32 = vld [vmem:[%s4107_s1 + $0x40] sm:$0xff]  ;;  %v3068_v33 = vld [vmem:[%s4107_s1 + $0x88] sm:$0xff] }
   0xc   :  { %2258 = vmatpush.bf16.msra.mxu2 %v3072_v10  ;;  %v3076_v34 = vld [vmem:[%s4107_s1 + $0xc8] sm:$0xff]  ;;  %v3090_v35 = vld [vmem:[%s4107_s1 + $0x138] sm:$0xff]  ;;  %v3067_v37 = vld [vmem:[%s4107_s1 + $0x80] sm:$0xff] }
   0xd   :  { %2271 = vmatpush.bf16.msra.mxu3 %v3080_v11  ;;  %v3098_v36 = vld [vmem:[%s4107_s1 + $0x178] sm:$0xff]  ;;  %v3089_v38 = vld [vmem:[%s4107_s1 + $0x130] sm:$0xff]  ;;  %v3075_v40 = vld [vmem:[%s4107_s1 + $0xc0] sm:$0xff] }
   0xe   :  { %2233 = vmatpush.bf16.msra.mxu0 %v3055_v12  ;;  %v3097_v39 = vld [vmem:[%s4107_s1 + $0x170] sm:$0xff]  ;;  %v58_v41 = vld [vmem:[%s4108_s0] sm:$0x3]  ;;  %vm3323_vm2 = vmor %vm97_vm0, %vm98_vm1  ;;  %vm108_vm1 = vsmask.f32 6424 }
   0xf   :  { %2246 = vmatpush.bf16.msra.mxu1 %v3063_v13  ;;  %v3106_v43 = vld [vmem:[%s4107_s1 + $0x1b8] sm:$0xff]  ;;  %v59_v45 = vld [vmem:[%s4108_s0 + $0x2] sm:$0x3]  ;;  %v2449_v46 = vld [vmem:[%s4108_s0 + $0x6] sm:$0x1]  ;;  %v62_v48 = vrot.slane %v58_v41, 1 }
  0x10   :  { %2259 = vmatpush.bf16.msra.mxu2 %v3071_v14  ;;  %v3114_v44 = vld [vmem:[%s4107_s1 + $0x1f8] sm:$0xff]  ;;  %v2450_v47 = vld [vmem:[%s4108_s0 + $0x8] sm:$0x1]  ;;  %v63_v49 = vrot.slane %v58_v41, 2  ;;  %v64_v50 = vrot.slane %v58_v41, 3  ;;  %vm3345_vm6 = vmor %vm3323_vm2, %vm100_vm3  ;;  %v65_v54 = vrot.slane %v59_v45, 1 }
  0x11   :  { %2272 = vmatpush.bf16.msra.mxu3 %v3079_v15  ;;  %v3088_v52 = vld [vmem:[%s4107_s1 + $0x128] sm:$0xff]  ;;  %v66_v55 = vrot.slane %v59_v45, 2  ;;  %v67_v56 = vrot.slane %v59_v45, 3  ;;  %v3105_v58 = vld [vmem:[%s4107_s1 + $0x1b0] sm:$0xff]  ;;  %vm3365_vm11 = vmor %vm3345_vm6, %vm102_vm7  ;;  %v78_v62 = vsel %vm77_vm5, %v58_v41, %v62_v48  ;;  %v71_v6 = vsel %vm68_vm9, %v58_v41, %v62_v48 }
  0x12   :  { %2234 = vmatpush.bf16.msra.mxu0 %v3054_v18  ;;  %v24_v31 = vld [vmem:[#allocation1] sm:$0xff]  ;;  %v3096_v57 = vld [vmem:[%s4107_s1 + $0x168] sm:$0xff]  ;;  %v3113_v59 = vld [vmem:[%s4107_s1 + $0x1f0] sm:$0xff]  ;;  %v80_v63 = vsel %vm79_vm8, %v63_v49, %v64_v50  ;;  %v92_v0 = vsel %vm77_vm5, %v59_v45, %v65_v54  ;;  %v75_v7 = vsel %vm72_vm10, %v63_v49, %v64_v50  ;;  %v87_v11 = vsel %vm68_vm9, %v59_v45, %v65_v54 }
  0x13   :  { %2247 = vmatpush.bf16.msra.mxu1 %v3062_v19  ;;  %27 = vst [vmem:[#allocation1 + $0x2] ss:$9 sm:$0xff] %v2447_v28  ;;  %v93_v1 = vsel %vm79_vm8, %v66_v55, %v67_v56  ;;  %v3376_v2 = vld [vmem:[%s4108_s0 + $0x18] sm:$0x3]  ;;  %v3381_v3 = vld [vmem:[%s4108_s0 + $0x1a] sm:$0x3]  ;;  %vm105_vm14 = vmor %vm3365_vm11, %vm104_vm12  ;;  %v82_v10 = vsel %vm81_vm13, %v78_v62, %v80_v63  ;;  %v90_v12 = vsel %vm72_vm10, %v66_v55, %v67_v56 }
  0x14   :  { %2260 = vmatpush.bf16.msra.mxu2 %v3070_v20  ;;  %30 = vst [vmem:[#allocation1 + $0x3] ss:$9 sm:$0xff] %v2448_v29  ;;  %v3104_v4 = vld [vmem:[%s4107_s1 + $0x1a8] sm:$0xff]  ;;  %v3087_v8 = vld [vmem:[%s4107_s1 + $0x120] sm:$0xff]  ;;  %v2451_v13 = vld [vmem:[%s4108_s0 + $0x1e] sm:$0x1]  ;;  %v94_v14 = vsel %vm81_vm13, %v92_v0, %v93_v1  ;;  %v76_v29 = vsel %vm32_vm4, %v71_v6, %v75_v7 }
  0x15   :  { %2273 = vmatpush.bf16.msra.mxu3 %v3078_v21  ;;  %v3112_v5 = vld [vmem:[%s4107_s1 + $0x1e8] sm:$0xff]  ;;  %v3095_v9 = vld [vmem:[%s4107_s1 + $0x160] sm:$0xff]  ;;  %v132_v15 = vrot.slane %v3376_v2, 1  ;;  %v133_v16 = vrot.slane %v3376_v2, 2  ;;  %v134_v17 = vrot.slane %v3376_v2, 3  ;;  %vm3410_vm0 = vmor %vm105_vm14, %vm106_vm15  ;;  %v135_v19 = vrot.slane %v3381_v3, 1 }
  0x16   :  { %2235 = vmatpush.bf16.msra.mxu0 %v3053_v22  ;;  %v136_v20 = vrot.slane %v3381_v3, 2  ;;  %v137_v21 = vrot.slane %v3381_v3, 3  ;;  %v2452_v22 = vld [vmem:[%s4108_s0 + $0x20] sm:$0x1]  ;;  %vm3437_vm2 = vmor %vm3410_vm0, %vm108_vm1  ;;  %vm110_vm3 = vsmask.f32 7452 }
  0x17   :  { %2248 = vmatpush.bf16.msra.mxu1 %v3061_v23  ;;  %v3103_v23 = vld [vmem:[%s4107_s1 + $0x1a0] sm:$0xff]  ;;  %v3093_v42 = vld [vmem:[%s4107_s1 + $0x150] sm:$0xff]  ;;  %vm3462_vm6 = vmor %vm3437_vm2, %vm110_vm3  ;;  %v140_v45 = vsel %vm68_vm9, %v3376_v2, %v132_v15  ;;  %v152_v50 = vsel %vm68_vm9, %v3381_v3, %v135_v19 }
  0x18   :  { %2261 = vmatpush.bf16.msra.mxu2 %v3069_v24  ;;  %v3111_v24 = vld [vmem:[%s4107_s1 + $0x1e0] sm:$0xff]  ;;  %v155_v51 = vsel %vm72_vm10, %v136_v20, %v137_v21  ;;  %v3109_v54 = vld [vmem:[%s4107_s1 + $0x1d0] sm:$0xff]  ;;  %v3092_v61 = vld [vmem:[%s4107_s1 + $0x148] sm:$0xff] }
  0x19   :  { %2274 = vmatpush.bf16.msra.mxu3 %v3077_v25  ;;  %v84_v25 = vrot.slane %v82_v10, 1  ;;  %v2459_v48 = vld [vmem:[%s4108_s0 + $0x6] sm:$0x3]  ;;  %v156_v62 = vsel %vm32_vm4, %v152_v50, %v155_v51  ;;  %v2463_v18 = vld [vmem:[%s4108_s0 + $0x1e] sm:$0x3] }
  0x1a   :  { %2236 = vmatpush.bf16.msra.mxu0 %v3052_v26  ;;  %v3086_v26 = vld [vmem:[%s4107_s1 + $0x118] sm:$0xff]  ;;  %v199_v0 = vrot.slane %v2459_v48, 2  ;;  %v200_v1 = vrot.slane %v2459_v48, 3 }
  0x1b   :  { %2249 = vmatpush.bf16.msra.mxu1 %v3060_v27  ;;  %v31_v53 = vld [vmem:[#allocation1] sm:$0xff]  ;;  %v3094_v27 = vld [vmem:[%s4107_s1 + $0x158] sm:$0xff]  ;;  %v117_v41 = vshll.u32 %v84_v25, 16 }
  0x1c   :  { %2262 = vmatpush.bf16.msra.mxu2 %v3068_v33  ;;  %v33_v60 = vsel %vm32_vm4, %v24_v31, %v31_v53  ;;  %43 = vst [vmem:[#allocation1] ss:$9 sm:$0xff] %v2449_v46  ;;  %v96_v31 = vrot.slane %v94_v14, 1  ;;  %v145_v33 = vsel %vm77_vm5, %v3376_v2, %v132_v15  ;;  %v143_v46 = vsel %vm72_vm10, %v133_v16, %v134_v17  ;;  %v3101_v53 = vld [vmem:[%s4107_s1 + $0x190] sm:$0xff] }
  0x1d   :  { %2275 = vmatpush.bf16.msra.mxu3 %v3076_v34  ;;  %35 = vst [vmem:[#allocation2] sm:$0xf] %v33_v60  ;;  %v146_v34 = vsel %vm79_vm8, %v133_v16, %v134_v17  ;;  %v144_v56 = vsel %vm32_vm4, %v140_v45, %v143_v46  ;;  %v3084_v60 = vld [vmem:[%s4107_s1 + $0x108] sm:$0xff]  ;;  %v212_v17 = vsel %vm79_vm8, %v199_v0, %v200_v1 }
  0x1e   :  { %2237 = vmatpush.bf16.msra.mxu0 %v3051_v30  ;;  %46 = vst [vmem:[#allocation1 + $0x1] ss:$9 sm:$0xff] %v2450_v47  ;;  %v91_v30 = vsel %vm32_vm4, %v87_v11, %v90_v12  ;;  %v147_v47 = vsel %vm81_vm13, %v145_v33, %v146_v34  ;;  %v125_v49 = vshll.u32 %v96_v31, 16  ;;  %v162_v10 = vshrl.u32 %v144_v56, 16  ;;  %v3083_v12 = vld [vmem:[%s4107_s1 + $0x100] sm:$0xff]  ;;  %v3129_v56 = vld [vmem:[%s4107_s1 + $0x270] sm:$0xff] }
  0x1f   :  { %2250 = vmatpush.bf16.msra.mxu1 %v3059_v32  ;;  %v170_v11 = vshrl.u32 %v156_v62, 16  ;;  %v249_v34 = vrot.slane %v2463_v18, 2 }
  0x20   :  { %2263 = vmatpush.bf16.msra.mxu2 %v3067_v37  ;;  %v3085_v37 = vld [vmem:[%s4107_s1 + $0x110] sm:$0xff] }
  0x21   :  { %2276 = vmatpush.bf16.msra.mxu3 %v3075_v40  ;;  %v112_v40 = vshrl.u32 %v76_v29, 16 }
  0x22   :  { %2282 = vmatpush.bf16.msrb.mxu0 %v3090_v35  ;;  %v157_v35 = vsel %vm77_vm5, %v3381_v3, %v135_v19 }
  0x23   :  { %2295 = vmatpush.bf16.msrb.mxu1 %v3098_v36  ;;  %v158_v36 = vsel %vm79_vm8, %v136_v20, %v137_v21  ;;  %v119_v55 = vsel %vm3462_vm6, %v112_v40, %v117_v41  ;;  %v209_v20 = vsel %vm72_vm10, %v199_v0, %v200_v1 }
  0x24   :  { %2308 = vmatpush.bf16.msrb.mxu2 %v3106_v43 }
  0x25   :  { %2321 = vmatpush.bf16.msrb.mxu3 %v3114_v44  ;;  %v47_v28 = vld [vmem:[#allocation1] sm:$0xff]  ;;  %v120_v44 = vshrl.u32 %v91_v30, 16 }
  0x26   :  { %2283 = vmatpush.bf16.msrb.mxu0 %v3089_v38  ;;  %50 = vst [vmem:[#allocation1 + $0x2] ss:$9 sm:$0xff] %v2451_v13  ;;  %v3102_v38 = vld [vmem:[%s4107_s1 + $0x198] sm:$0xff]  ;;  %v3091_v13 = vld [vmem:[%s4107_s1 + $0x140] sm:$0xff] }
  0x27   :  { %2296 = vmatpush.bf16.msrb.mxu1 %v3097_v39  ;;  %53 = vst [vmem:[#allocation1 + $0x3] ss:$9 sm:$0xff] %v2452_v22  ;;  %v3110_v39 = vld [vmem:[%s4107_s1 + $0x1d8] sm:$0xff]  ;;  %v127_v3 = vsel %vm3462_vm6, %v120_v44, %v125_v49 }
  0x28   :  { %2309 = vmatpush.bf16.msrb.mxu2 %v3105_v58  ;;  %v2460_v58 = vld [vmem:[%s4108_s0 + $0x8] sm:$0x3]  ;;  %v3130_v44 = vld [vmem:[%s4107_s1 + $0x278] sm:$0xff] }
  0x29   :  { %2322 = vmatpush.bf16.msrb.mxu3 %v3113_v59  ;;  %v198_v59 = vrot.slane %v2459_v48, 1  ;;  %v202_v6 = vrot.slane %v2460_v58, 2  ;;  %v203_v7 = vrot.slane %v2460_v58, 3 }
  0x2a   :  { %2284 = vmatpush.bf16.msrb.mxu0 %v3088_v52  ;;  %v159_v52 = vsel %vm81_vm13, %v157_v35, %v158_v36  ;;  %v250_v35 = vrot.slane %v2463_v18, 3 }
  0x2b   :  { %2297 = vmatpush.bf16.msrb.mxu1 %v3096_v57  ;;  %v149_v57 = vrot.slane %v147_v47, 1  ;;  %v161_v63 = vrot.slane %v159_v52, 1  ;;  %v211_v16 = vsel %vm77_vm5, %v2459_v48, %v198_v59  ;;  %v206_v19 = vsel %vm68_vm9, %v2459_v48, %v198_v59 }
  0x2c   :  { %2310 = vmatpush.bf16.msrb.mxu2 %v3104_v4  ;;  %v224_v22 = vsel %vm79_vm8, %v202_v6, %v203_v7  ;;  %v221_v30 = vsel %vm72_vm10, %v202_v6, %v203_v7  ;;  %v262_v52 = vsel %vm79_vm8, %v249_v34, %v250_v35  ;;  %v259_v62 = vsel %vm72_vm10, %v249_v34, %v250_v35  ;;  %v2470_v34 = vld [vmem:[%s4108_s0 + $0x26] sm:$0x1] }
  0x2d   :  { %2323 = vmatpush.bf16.msrb.mxu3 %v3112_v5  ;;  %v201_v5 = vrot.slane %v2460_v58, 1  ;;  %v167_v14 = vshll.u32 %v149_v57, 16  ;;  %v175_v15 = vshll.u32 %v161_v63, 16 }
  0x2e   :  { %2285 = vmatpush.bf16.msrb.mxu0 %v3087_v8  ;;  %v54_v2 = vld [vmem:[#allocation1] sm:$0xff]  ;;  %v3100_v8 = vld [vmem:[%s4107_s1 + $0x188] sm:$0xff] }
  0x2f   :  { %2298 = vmatpush.bf16.msrb.mxu1 %v3095_v9  ;;  %v55_v4 = vsel %vm32_vm4, %v47_v28, %v54_v2  ;;  %179 = vst [vmem:[#allocation1] ss:$9 sm:$0xff] %v119_v55  ;;  %v3108_v9 = vld [vmem:[%s4107_s1 + $0x1c8] sm:$0xff]  ;;  %v223_v21 = vsel %vm77_vm5, %v2460_v58, %v201_v5  ;;  %v169_v25 = vsel %vm3462_vm6, %v162_v10, %v167_v14  ;;  %v3121_v55 = vld [vmem:[%s4107_s1 + $0x230] sm:$0xff]  ;;  %v3099_v10 = vld [vmem:[%s4107_s1 + $0x180] sm:$0xff] }
  0x30   :  { %2311 = vmatpush.bf16.msrb.mxu2 %v3103_v23  ;;  %57 = vst [vmem:[#allocation2 + $0x4] sm:$0xf] %v55_v4  ;;  %v213_v23 = vsel %vm81_vm13, %v211_v16, %v212_v17  ;;  %v210_v28 = vsel %vm32_vm4, %v206_v19, %v209_v20  ;;  %v218_v29 = vsel %vm68_vm9, %v2460_v58, %v201_v5  ;;  %v3120_v2 = vld [vmem:[%s4107_s1 + $0x228] sm:$0xff]  ;;  %v3127_v14 = vld [vmem:[%s4107_s1 + $0x260] sm:$0xff]  ;;  %v3118_v20 = vld [vmem:[%s4107_s1 + $0x218] sm:$0xff] }
  0x31   :  { %2324 = vmatpush.bf16.msrb.mxu3 %v3111_v24  ;;  %182 = vst [vmem:[#allocation1 + $0x1] ss:$9 sm:$0xff] %v127_v3  ;;  %v2464_v24 = vld [vmem:[%s4108_s0 + $0x20] sm:$0x3]  ;;  %v225_v31 = vsel %vm81_vm13, %v223_v21, %v224_v22  ;;  %v215_v33 = vrot.slane %v213_v23, 1  ;;  %v222_v48 = vsel %vm32_vm4, %v218_v29, %v221_v30  ;;  %v228_v49 = vshrl.u32 %v210_v28, 16 }
  0x32   :  { %2286 = vmatpush.bf16.msrb.mxu0 %v3086_v26  ;;  %v177_v26 = vsel %vm3462_vm6, %v170_v11, %v175_v15  ;;  %v251_v36 = vrot.slane %v2464_v24, 1  ;;  %v252_v40 = vrot.slane %v2464_v24, 2  ;;  %v253_v41 = vrot.slane %v2464_v24, 3  ;;  %v3128_v3 = vld [vmem:[%s4107_s1 + $0x268] sm:$0xff]  ;;  %v3126_v21 = vld [vmem:[%s4107_s1 + $0x258] sm:$0xff] }
  0x33   :  { %2299 = vmatpush.bf16.msrb.mxu1 %v3094_v27  ;;  %v248_v27 = vrot.slane %v2463_v18, 1  ;;  %v227_v45 = vrot.slane %v225_v31, 1  ;;  %v233_v50 = vshll.u32 %v215_v33, 16  ;;  %v236_v57 = vshrl.u32 %v222_v48, 16  ;;  %v2467_v28 = vld [vmem:[%s4108_s0 + $0xc] sm:$0x1] }
  0x34   :  { %2312 = vmatpush.bf16.msrb.mxu2 %v3102_v38  ;;  %v268_v0 = vsel %vm68_vm9, %v2464_v24, %v251_v36  ;;  %v271_v1 = vsel %vm72_vm10, %v252_v40, %v253_v41  ;;  %v2468_v30 = vld [vmem:[%s4108_s0 + $0xe] sm:$0x1]  ;;  %v2472_v48 = vld [vmem:[%s4108_s0 + $0x14] sm:$0x1] }
  0x35   :  { %2325 = vmatpush.bf16.msrb.mxu3 %v3110_v39  ;;  %v261_v51 = vsel %vm77_vm5, %v2463_v18, %v248_v27  ;;  %v241_v58 = vshll.u32 %v227_v45, 16  ;;  %v272_v11 = vsel %vm32_vm4, %v268_v0, %v271_v1  ;;  %v2475_v45 = vld [vmem:[%s4108_s0 + $0xc] sm:$0x3]  ;;  %v3143_v0 = vld [vmem:[%s4107_s1 + $0x2e0] sm:$0xff] }
  0x36   :  { %2287 = vmatpush.bf16.msrb.mxu0 %v3085_v37  ;;  %v263_v59 = vsel %vm81_vm13, %v261_v51, %v262_v52  ;;  %v286_v17 = vshrl.u32 %v272_v11, 16  ;;  %v360_v51 = vrot.slane %v2475_v45, 3  ;;  %v3136_v52 = vld [vmem:[%s4107_s1 + $0x2a8] sm:$0xff] }
  0x37   :  { %2300 = vmatpush.bf16.msrb.mxu1 %v3093_v42  ;;  %v1139_v32 = vld [vmem:[#allocation2] sm:$0xff]  ;;  %v3122_v42 = vld [vmem:[%s4107_s1 + $0x238] sm:$0xff]  ;;  %v243_v5 = vsel %vm3462_vm6, %v236_v57, %v241_v58  ;;  %v265_v6 = vrot.slane %v263_v59, 1  ;;  %v3115_v59 = vld [vmem:[%s4107_s1 + $0x200] sm:$0xff] }
  0x38   :  { %2313 = vmatpush.bf16.msrb.mxu2 %v3101_v53  ;;  %v1414_v37 = vunpack.c.l.b16 %v1139_v32  ;;  %v1415_v38 = vunpack.c.h.b16 %v1139_v32  ;;  %v183_v39 = vld [vmem:[#allocation1] sm:$0xff]  ;;  %v273_v53 = vsel %vm77_vm5, %v2464_v24, %v251_v36  ;;  %v3117_v24 = vld [vmem:[%s4107_s1 + $0x210] sm:$0xff] }
  0x39   :  { %2326 = vmatpush.bf16.msrb.mxu3 %v3109_v54  ;;  %186 = vst [vmem:[#allocation1 + $0x2] ss:$9 sm:$0xff] %v169_v25  ;;  %v274_v54 = vsel %vm79_vm8, %v252_v40, %v253_v41  ;;  %v283_v16 = vshll.u32 %v265_v6, 16  ;;  %v3125_v25 = vld [vmem:[%s4107_s1 + $0x250] sm:$0xff]  ;;  %v2469_v32 = vld [vmem:[%s4108_s0 + $0x24] sm:$0x1] }
  0x3a   :  { %2288 = vmatpush.bf16.msrb.mxu0 %v3084_v60  ;;  %v1430_v46 = vpack.c.b16 %v1414_v37, %v1414_v37  ;;  %v1431_v47 = vpack.c.b16 %v1415_v38, %v1415_v38  ;;  %189 = vst [vmem:[#allocation1 + $0x3] ss:$9 sm:$0xff] %v177_v26  ;;  %v235_v60 = vsel %vm3462_vm6, %v228_v49, %v233_v50  ;;  %v3116_v26 = vld [vmem:[%s4107_s1 + $0x208] sm:$0xff]  ;;  %v3138_v38 = vld [vmem:[%s4107_s1 + $0x2b8] sm:$0xff]  ;;  %v358_v49 = vrot.slane %v2475_v45, 1 }
  0x3b   :  { %2301 = vmatpush.bf16.msrb.mxu1 %v3092_v61  ;;  %v256_v61 = vsel %vm68_vm9, %v2463_v18, %v248_v27  ;;  %v275_v63 = vsel %vm81_vm13, %v273_v53, %v274_v54  ;;  %v3124_v27 = vld [vmem:[%s4107_s1 + $0x248] sm:$0xff]  ;;  %v359_v50 = vrot.slane %v2475_v45, 2 }
  0x3c   :  { %2314 = vmatpush.bf16.msrb.mxu2 %v3100_v8  ;;  %2238 = vmatmul.bf16.vlgmr.msra.gmra.mxu0 %v1430_v46  ;;  %v260_v8 = vsel %vm32_vm4, %v256_v61, %v259_v62  ;;  %v2476_v46 = vld [vmem:[%s4108_s0 + $0xe] sm:$0x3]  ;;  %v371_v61 = vsel %vm77_vm5, %v2475_v45, %v358_v49 }
  0x3d   :  { %2327 = vmatpush.bf16.msrb.mxu3 %v3108_v9  ;;  %2251 = vmatmul.bf16.vlgmr.msra.gmra.mxu1 %v1431_v47  ;;  %v277_v9 = vrot.slane %v275_v63, 1  ;;  %v278_v15 = vshrl.u32 %v260_v8, 16  ;;  %v2471_v47 = vld [vmem:[%s4108_s0 + $0x12] sm:$0x1]  ;;  %v3144_v53 = vld [vmem:[%s4107_s1 + $0x2e8] sm:$0xff]  ;;  %v363_v57 = vrot.slane %v2476_v46, 3  ;;  %v372_v62 = vsel %vm79_vm8, %v359_v50, %v360_v51 }
  0x3e   :  { %2289 = vmatpush.bf16.msrb.mxu0 %v3083_v12  ;;  %v3107_v12 = vld [vmem:[%s4107_s1 + $0x1c0] sm:$0xff]  ;;  %v369_v6 = vsel %vm72_vm10, %v359_v50, %v360_v51 }
  0x3f   :  { %2302 = vmatpush.bf16.msrb.mxu1 %v3091_v13  ;;  %v3119_v13 = vld [vmem:[%s4107_s1 + $0x220] sm:$0xff]  ;;  %v291_v18 = vshll.u32 %v277_v9, 16  ;;  %v285_v19 = vsel %vm3462_vm6, %v278_v15, %v283_v16 }
  0x40   :  { %2315 = vmatpush.bf16.msrb.mxu2 %v3099_v10  ;;  %v3135_v63 = vld [vmem:[%s4107_s1 + $0x2a0] sm:$0xff] }
  0x41   :  { %v190_v4 = vld [vmem:[#allocation1] sm:$0xff]  ;;  %2328 = vmatpush.bf16.msrb.mxu3 %v3107_v12  ;;  %v293_v22 = vsel %vm3462_vm6, %v286_v17, %v291_v18  ;;  %v2474_v18 = vld [vmem:[%s4108_s0 + $0x2c] sm:$0x1] }
  0x42   :  { %2334 = vmatpush.bf16.msra.mxu0 %v3122_v42  ;;  %v191_v7 = vsel %vm32_vm4, %v183_v39, %v190_v4  ;;  %295 = vst [vmem:[#allocation1] ss:$9 sm:$0xff] %v235_v60  ;;  %v3146_v39 = vld [vmem:[%s4107_s1 + $0x2f8] sm:$0xff]  ;;  %v3137_v42 = vld [vmem:[%s4107_s1 + $0x2b0] sm:$0xff]  ;;  %v3123_v60 = vld [vmem:[%s4107_s1 + $0x240] sm:$0xff] }
  0x43   :  { %2347 = vmatpush.bf16.msra.mxu1 %v3130_v44  ;;  %193 = vst [vmem:[#allocation2 + $0x8] sm:$0xf] %v191_v7  ;;  %v3145_v44 = vld [vmem:[%s4107_s1 + $0x2f0] sm:$0xff]  ;;  %v2480_v4 = vld [vmem:[%s4108_s0 + $0x26] sm:$0x3]  ;;  %v373_v7 = vsel %vm81_vm13, %v371_v61, %v372_v62 }
  0x44   :  { %298 = vst [vmem:[#allocation1 + $0x1] ss:$9 sm:$0xff] %v243_v5  ;;  %v366_v5 = vsel %vm68_vm9, %v2475_v45, %v358_v49  ;;  %v411_v15 = vrot.slane %v2480_v4, 1  ;;  %v412_v16 = vrot.slane %v2480_v4, 2  ;;  %v413_v17 = vrot.slane %v2480_v4, 3 }
  0x46   :  { %2335 = vmatpush.bf16.msra.mxu0 %v3121_v55  ;;  %v361_v55 = vrot.slane %v2476_v46, 1 }
  0x47   :  { %2348 = vmatpush.bf16.msra.mxu1 %v3129_v56  ;;  %v362_v56 = vrot.slane %v2476_v46, 2 }
  0x48   :  { %v383_v1 = vsel %vm77_vm5, %v2476_v46, %v361_v55  ;;  %v378_v8 = vsel %vm68_vm9, %v2476_v46, %v361_v55 }
  0x49   :  { %v381_v9 = vsel %vm72_vm10, %v362_v56, %v363_v57 }
  0x4a   :  { %2336 = vmatpush.bf16.msra.mxu0 %v3120_v2  ;;  %v384_v2 = vsel %vm79_vm8, %v362_v56, %v363_v57 }
  0x4b   :  { %2349 = vmatpush.bf16.msra.mxu1 %v3128_v3  ;;  %v299_v23 = vld [vmem:[#allocation1] sm:$0xff]  ;;  %v385_v10 = vsel %vm81_vm13, %v383_v1, %v384_v2  ;;  %v2487_v2 = vld [vmem:[%s4108_s0 + $0x2a] sm:$0x3] }
  0x4c   :  { %302 = vst [vmem:[#allocation1 + $0x2] ss:$9 sm:$0xff] %v285_v19  ;;  %v2479_v3 = vld [vmem:[%s4108_s0 + $0x24] sm:$0x3]  ;;  %v375_v19 = vrot.slane %v373_v7, 1 }
  0x4d   :  { %305 = vst [vmem:[#allocation1 + $0x3] ss:$9 sm:$0xff] %v293_v22  ;;  %v408_v11 = vrot.slane %v2479_v3, 1  ;;  %v409_v12 = vrot.slane %v2479_v3, 2  ;;  %v387_v22 = vrot.slane %v385_v10, 1 }
  0x4e   :  { %2337 = vmatpush.bf16.msra.mxu0 %v3119_v13  ;;  %v2473_v13 = vld [vmem:[%s4108_s0 + $0x2a] sm:$0x1] }
  0x4f   :  { %2350 = vmatpush.bf16.msra.mxu1 %v3127_v14  ;;  %v410_v14 = vrot.slane %v2479_v3, 3 }
  0x52   :  { %2338 = vmatpush.bf16.msra.mxu0 %v3118_v20 }
  0x53   :  { %2351 = vmatpush.bf16.msra.mxu1 %v3126_v21  ;;  %v370_v21 = vsel %vm32_vm4, %v366_v5, %v369_v6 }
  0x54   :  { %v306_v29 = vld [vmem:[#allocation1] sm:$0xff] }
  0x55   :  { %v307_v31 = vsel %vm32_vm4, %v299_v23, %v306_v29  ;;  %317 = vst [vmem:[#allocation1] ss:$9 sm:$0xff] %v2467_v28  ;;  %v382_v23 = vsel %vm32_vm4, %v378_v8, %v381_v9  ;;  %v388_v28 = vshrl.u32 %v370_v21, 16  ;;  %v393_v29 = vshll.u32 %v375_v19, 16  ;;  %v3154_v21 = vld [vmem:[%s4107_s1 + $0x338] sm:$0xff] }
  0x56   :  { %2339 = vmatpush.bf16.msra.mxu0 %v3117_v24  ;;  %309 = vst [vmem:[#allocation2 + $0xc] sm:$0xf] %v307_v31  ;;  %v421_v24 = vsel %vm77_vm5, %v2479_v3, %v408_v11  ;;  %v396_v31 = vshrl.u32 %v382_v23, 16 }
  0x57   :  { %2352 = vmatpush.bf16.msra.mxu1 %v3125_v25  ;;  %320 = vst [vmem:[#allocation1 + $0x1] ss:$9 sm:$0xff] %v2468_v30  ;;  %v422_v25 = vsel %vm79_vm8, %v409_v12, %v410_v14  ;;  %v2483_v30 = vld [vmem:[%s4108_s0 + $0x12] sm:$0x3] }
  0x5a   :  { %2340 = vmatpush.bf16.msra.mxu0 %v3116_v26  ;;  %v433_v26 = vsel %vm77_vm5, %v2480_v4, %v411_v15 }
  0x5b   :  { %2353 = vmatpush.bf16.msra.mxu1 %v3124_v27  ;;  %v434_v27 = vsel %vm79_vm8, %v412_v16, %v413_v17 }
  0x5d   :  { %v1140_v33 = vld [vmem:[#allocation2 + $0x8] sm:$0xff] }
  0x5e   :  { %v1416_v35 = vunpack.c.l.b16 %v1140_v33  ;;  %v1417_v36 = vunpack.c.h.b16 %v1140_v33  ;;  %v321_v37 = vld [vmem:[#allocation1] sm:$0xff]  ;;  %2341 = vmatpush.bf16.msra.mxu0 %v3115_v59  ;;  %v416_v33 = vsel %vm68_vm9, %v2479_v3, %v408_v11  ;;  %v2488_v3 = vld [vmem:[%s4108_s0 + $0x2c] sm:$0x3] }
  0x5f   :  { %324 = vst [vmem:[#allocation1 + $0x2] ss:$9 sm:$0xff] %v2469_v32  ;;  %2354 = vmatpush.bf16.msra.mxu1 %v3123_v60  ;;  %v401_v32 = vshll.u32 %v387_v22, 16  ;;  %v528_v19 = vrot.slane %v2488_v3, 2  ;;  %v3162_v22 = vld [vmem:[%s4107_s1 + $0x378] sm:$0xff] }
  0x60   :  { %v1432_v40 = vpack.c.b16 %v1416_v35, %v1416_v35  ;;  %v1433_v41 = vpack.c.b16 %v1417_v36, %v1417_v36  ;;  %327 = vst [vmem:[#allocation1 + $0x3] ss:$9 sm:$0xff] %v2470_v34  ;;  %v419_v34 = vsel %vm72_vm10, %v409_v12, %v410_v14  ;;  %v423_v35 = vsel %vm81_vm13, %v421_v24, %v422_v25 }
  0x61   :  { %v428_v36 = vsel %vm68_vm9, %v2480_v4, %v411_v15  ;;  %v403_v45 = vsel %vm3462_vm6, %v396_v31, %v401_v32  ;;  %v425_v46 = vrot.slane %v423_v35, 1  ;;  %v420_v49 = vsel %vm32_vm4, %v416_v33, %v419_v34 }
  0x62   :  { %2264 = vmatmul.bf16.vlgmr.msra.gmra.mxu2 %v1432_v40  ;;  %2277 = vmatmul.bf16.vlgmr.msra.gmra.mxu3 %v1433_v41  ;;  %v474_v40 = vrot.slane %v2483_v30, 1  ;;  %v475_v41 = vrot.slane %v2483_v30, 2  ;;  %v438_v57 = vshrl.u32 %v420_v49, 16  ;;  %v524_v12 = vrot.slane %v2487_v2, 1  ;;  %v3134_v49 = vld [vmem:[%s4107_s1 + $0x298] sm:$0xff] }
  0x63   :  { %2360 = vmatpush.bf16.msra.mxu2 %v3138_v38  ;;  %2373 = vmatpush.bf16.msra.mxu3 %v3146_v39  ;;  %v431_v38 = vsel %vm72_vm10, %v412_v16, %v413_v17  ;;  %v2484_v39 = vld [vmem:[%s4108_s0 + $0x14] sm:$0x3]  ;;  %v526_v14 = vrot.slane %v2487_v2, 3  ;;  %v527_v15 = vrot.slane %v2488_v3, 1 }
  0x64   :  { %v432_v50 = vsel %vm32_vm4, %v428_v36, %v431_v38  ;;  %v477_v51 = vrot.slane %v2484_v39, 1  ;;  %v487_v55 = vsel %vm77_vm5, %v2483_v30, %v474_v40  ;;  %v482_v62 = vsel %vm68_vm9, %v2483_v30, %v474_v40 }
  0x65   :  { %v446_v59 = vshrl.u32 %v432_v50, 16  ;;  %v549_v31 = vsel %vm77_vm5, %v2488_v3, %v527_v15  ;;  %v544_v40 = vsel %vm68_vm9, %v2488_v3, %v527_v15  ;;  %v3153_v50 = vld [vmem:[%s4107_s1 + $0x330] sm:$0xff] }
  0x66   :  { %v494_v8 = vsel %vm68_vm9, %v2484_v39, %v477_v51 }
  0x67   :  { %2361 = vmatpush.bf16.msra.mxu2 %v3137_v42  ;;  %2374 = vmatpush.bf16.msra.mxu3 %v3145_v44  ;;  %v328_v54 = vld [vmem:[#allocation1] sm:$0xff]  ;;  %v476_v42 = vrot.slane %v2483_v30, 3  ;;  %v395_v44 = vsel %vm3462_vm6, %v388_v28, %v393_v29  ;;  %v537_v29 = vsel %vm77_vm5, %v2487_v2, %v524_v12 }
  0x68   :  { %v329_v58 = vsel %vm32_vm4, %v321_v37, %v328_v54  ;;  %339 = vst [vmem:[#allocation1] ss:$9 sm:$0xff] %v2471_v47  ;;  %v435_v37 = vsel %vm81_vm13, %v433_v26, %v434_v27  ;;  %v479_v54 = vrot.slane %v2484_v39, 3 }
  0x69   :  { %331 = vst [vmem:[#allocation2 + $0x10] sm:$0xf] %v329_v58  ;;  %v437_v47 = vrot.slane %v435_v37, 1  ;;  %v488_v56 = vsel %vm79_vm8, %v475_v41, %v476_v42  ;;  %v443_v58 = vshll.u32 %v425_v46, 16  ;;  %v532_v37 = vsel %vm68_vm9, %v2487_v2, %v524_v12 }
  0x6a   :  { %342 = vst [vmem:[#allocation1 + $0x1] ss:$9 sm:$0xff] %v2472_v48  ;;  %v489_v61 = vsel %vm81_vm13, %v487_v55, %v488_v56  ;;  %v3152_v55 = vld [vmem:[%s4107_s1 + $0x328] sm:$0xff] }
  0x6b   :  { %2362 = vmatpush.bf16.msra.mxu2 %v3136_v52  ;;  %2375 = vmatpush.bf16.msra.mxu3 %v3144_v53  ;;  %v478_v52 = vrot.slane %v2484_v39, 2  ;;  %v451_v60 = vshll.u32 %v437_v47, 16  ;;  %v445_v4 = vsel %vm3462_vm6, %v438_v57, %v443_v58  ;;  %v491_v6 = vrot.slane %v489_v61, 1  ;;  %v3141_v58 = vld [vmem:[%s4107_s1 + $0x2d0] sm:$0xff] }
  0x6d   :  { %v500_v1 = vsel %vm79_vm8, %v478_v52, %v479_v54  ;;  %v453_v5 = vsel %vm3462_vm6, %v446_v59, %v451_v60  ;;  %v497_v9 = vsel %vm72_vm10, %v478_v52, %v479_v54  ;;  %v509_v28 = vshll.u32 %v491_v6, 16  ;;  %v3133_v54 = vld [vmem:[%s4107_s1 + $0x290] sm:$0xff]  ;;  %v3160_v59 = vld [vmem:[%s4107_s1 + $0x368] sm:$0xff] }
  0x6e   :  { %v498_v26 = vsel %vm32_vm4, %v494_v8, %v497_v9  ;;  %v2493_v9 = vld [vmem:[%s4108_s0 + $0x1a] sm:$0x1] }
  0x6f   :  { %2363 = vmatpush.bf16.msra.mxu2 %v3135_v63  ;;  %2376 = vmatpush.bf16.msra.mxu3 %v3143_v0  ;;  %v485_v63 = vsel %vm72_vm10, %v475_v41, %v476_v42  ;;  %v499_v0 = vsel %vm77_vm5, %v2484_v39, %v477_v51  ;;  %v512_v33 = vshrl.u32 %v498_v26, 16  ;;  %v3142_v51 = vld [vmem:[%s4107_s1 + $0x2d8] sm:$0xff] }
  0x70   :  { %v486_v7 = vsel %vm32_vm4, %v482_v62, %v485_v63  ;;  %v501_v10 = vsel %vm81_vm13, %v499_v0, %v500_v1  ;;  %v3132_v62 = vld [vmem:[%s4107_s1 + $0x288] sm:$0xff]  ;;  %v3151_v63 = vld [vmem:[%s4107_s1 + $0x320] sm:$0xff] }
  0x71   :  { %v343_v20 = vld [vmem:[#allocation1] sm:$0xff]  ;;  %v503_v23 = vrot.slane %v501_v10, 1  ;;  %v504_v27 = vshrl.u32 %v486_v7, 16  ;;  %v3140_v1 = vld [vmem:[%s4107_s1 + $0x2c8] sm:$0xff] }
  0x72   :  { %346 = vst [vmem:[#allocation1 + $0x2] ss:$9 sm:$0xff] %v2473_v13  ;;  %v525_v13 = vrot.slane %v2487_v2, 2  ;;  %v3159_v2 = vld [vmem:[%s4107_s1 + $0x360] sm:$0xff] }
  0x73   :  { %349 = vst [vmem:[#allocation1 + $0x3] ss:$9 sm:$0xff] %v2474_v18  ;;  %v517_v34 = vshll.u32 %v503_v23, 16  ;;  %v511_v36 = vsel %vm3462_vm6, %v504_v27, %v509_v28  ;;  %2364 = vmatpush.bf16.msra.mxu2 %v3134_v49  ;;  %2377 = vmatpush.bf16.msra.mxu3 %v3142_v51  ;;  %v2492_v7 = vld [vmem:[%s4108_s0 + $0x4] sm:$0x1] }
  0x74   :  { %v538_v30 = vsel %vm79_vm8, %v525_v13, %v526_v14  ;;  %v535_v38 = vsel %vm72_vm10, %v525_v13, %v526_v14 }
  0x75   :  { %v539_v35 = vsel %vm81_vm13, %v537_v29, %v538_v30  ;;  %v536_v47 = vsel %vm32_vm4, %v532_v37, %v535_v38  ;;  %v3131_v29 = vld [vmem:[%s4107_s1 + $0x280] sm:$0xff]  ;;  %v3150_v30 = vld [vmem:[%s4107_s1 + $0x318] sm:$0xff] }
  0x76   :  { %v554_v56 = vshrl.u32 %v536_v47, 16  ;;  %v2503_v37 = vld [vmem:[%s4108_s0 + $0x1a] sm:$0x3]  ;;  %v2504_v38 = vld [vmem:[%s4108_s0 + $0x1c] sm:$0x3] }
  0x77   :  { %2365 = vmatpush.bf16.msra.mxu2 %v3133_v54  ;;  %2378 = vmatpush.bf16.msra.mxu3 %v3141_v58  ;;  %v685_v47 = vrot.slane %v2503_v37, 2  ;;  %v686_v49 = vrot.slane %v2503_v37, 3  ;;  %v688_v51 = vrot.slane %v2504_v38, 2 }
  0x7a   :  { %v350_v48 = vld [vmem:[#allocation1] sm:$0xff] }
  0x7b   :  { %v351_v53 = vsel %vm32_vm4, %v343_v20, %v350_v48  ;;  %455 = vst [vmem:[#allocation1] ss:$9 sm:$0xff] %v395_v44  ;;  %v529_v20 = vrot.slane %v2488_v3, 3  ;;  %v519_v44 = vsel %vm3462_vm6, %v512_v33, %v517_v34  ;;  %2366 = vmatpush.bf16.msra.mxu2 %v3132_v62  ;;  %2379 = vmatpush.bf16.msra.mxu3 %v3140_v1  ;;  %v2507_v1 = vld [vmem:[%s4108_s0 + $0x8] sm:$0x3] }
  0x7c   :  { %353 = vst [vmem:[#allocation2 + $0x14] sm:$0xf] %v351_v53  ;;  %v3161_v53 = vld [vmem:[%s4107_s1 + $0x370] sm:$0xff] }
  0x7d   :  { %458 = vst [vmem:[#allocation1 + $0x1] ss:$9 sm:$0xff] %v403_v45  ;;  %v550_v32 = vsel %vm79_vm8, %v528_v19, %v529_v20  ;;  %v547_v41 = vsel %vm72_vm10, %v528_v19, %v529_v20  ;;  %v541_v45 = vrot.slane %v539_v35, 1  ;;  %v2495_v19 = vld [vmem:[%s4108_s0 + $0x8] sm:$0x1] }
  0x7e   :  { %v551_v39 = vsel %vm81_vm13, %v549_v31, %v550_v32  ;;  %v548_v52 = vsel %vm32_vm4, %v544_v40, %v547_v41  ;;  %v3139_v31 = vld [vmem:[%s4107_s1 + $0x2c0] sm:$0xff]  ;;  %v3158_v32 = vld [vmem:[%s4107_s1 + $0x358] sm:$0xff] }
  0x7f   :  { %v553_v48 = vrot.slane %v551_v39, 1  ;;  %v559_v57 = vshll.u32 %v541_v45, 16  ;;  %v562_v60 = vshrl.u32 %v548_v52, 16  ;;  %2367 = vmatpush.bf16.msra.mxu2 %v3131_v29  ;;  %2380 = vmatpush.bf16.msra.mxu3 %v3139_v31  ;;  %v689_v52 = vrot.slane %v2504_v38, 3 }
  0x81   :  { %v567_v61 = vshll.u32 %v553_v48, 16  ;;  %v561_v0 = vsel %vm3462_vm6, %v554_v56, %v559_v57  ;;  %v2497_v48 = vld [vmem:[%s4108_s0 + $0x20] sm:$0x1]  ;;  %v710_v62 = vsel %vm79_vm8, %v688_v51, %v689_v52 }
  0x83   :  { %v1141_v11 = vld [vmem:[#allocation2 + $0x10] sm:$0xff]  ;;  %v569_v3 = vsel %vm3462_vm6, %v562_v60, %v567_v61  ;;  %v698_v60 = vsel %vm79_vm8, %v685_v47, %v686_v49 }
  0x84   :  { %v1418_v16 = vunpack.c.l.b16 %v1141_v11  ;;  %v1419_v17 = vunpack.c.h.b16 %v1141_v11  ;;  %v459_v18 = vld [vmem:[#allocation1] sm:$0xff]  ;;  %v2494_v11 = vld [vmem:[%s4108_s0 + $0x1c] sm:$0x1] }
  0x85   :  { %462 = vst [vmem:[#allocation1 + $0x2] ss:$9 sm:$0xff] %v445_v4 }
  0x86   :  { %v1434_v24 = vpack.c.b16 %v1418_v16, %v1418_v16  ;;  %v1435_v25 = vpack.c.b16 %v1419_v17, %v1419_v17  ;;  %465 = vst [vmem:[#allocation1 + $0x3] ss:$9 sm:$0xff] %v453_v5  ;;  %v2491_v5 = vld [vmem:[%s4108_s0 + $0x2] sm:$0x1] }
  0x87   :  { %v2499_v17 = vld [vmem:[%s4108_s0 + $0x2] sm:$0x3] }
  0x88   :  { %2290 = vmatmul.bf16.vlgmr.msrb.gmra.mxu0 %v1434_v24  ;;  %2303 = vmatmul.bf16.vlgmr.msrb.gmra.mxu1 %v1435_v25  ;;  %v634_v20 = vrot.slane %v2499_v17, 1  ;;  %v2496_v24 = vld [vmem:[%s4108_s0 + $0xa] sm:$0x1] }
  0x89   :  { %2386 = vmatpush.bf16.msrb.mxu0 %v3154_v21  ;;  %2399 = vmatpush.bf16.msrb.mxu1 %v3162_v22  ;;  %v635_v21 = vrot.slane %v2499_v17, 2  ;;  %v636_v22 = vrot.slane %v2499_v17, 3 }
  0x8a   :  { %v647_v33 = vsel %vm77_vm5, %v2499_v17, %v634_v20  ;;  %v642_v39 = vsel %vm68_vm9, %v2499_v17, %v634_v20 }
  0x8b   :  { %v648_v34 = vsel %vm79_vm8, %v635_v21, %v636_v22  ;;  %v645_v40 = vsel %vm72_vm10, %v635_v21, %v636_v22 }
  0x8c   :  { %v649_v41 = vsel %vm81_vm13, %v647_v33, %v648_v34  ;;  %v646_v56 = vsel %vm32_vm4, %v642_v39, %v645_v40 }
  0x8d   :  { %v466_v42 = vld [vmem:[#allocation1] sm:$0xff]  ;;  %2387 = vmatpush.bf16.msrb.mxu0 %v3153_v50  ;;  %2400 = vmatpush.bf16.msrb.mxu1 %v3161_v53  ;;  %v687_v50 = vrot.slane %v2504_v38, 1  ;;  %v651_v54 = vrot.slane %v649_v41, 1 }
  0x8e   :  { %v467_v46 = vsel %vm32_vm4, %v459_v18, %v466_v42  ;;  %571 = vst [vmem:[#allocation1] ss:$9 sm:$0xff] %v511_v36  ;;  %v2500_v18 = vld [vmem:[%s4108_s0 + $0x4] sm:$0x3]  ;;  %v2498_v53 = vld [vmem:[%s4108_s0 + $0x22] sm:$0x1] }
  0x8f   :  { %469 = vst [vmem:[#allocation2 + $0x18] sm:$0xf] %v467_v46  ;;  %v637_v25 = vrot.slane %v2500_v18, 1  ;;  %v638_v26 = vrot.slane %v2500_v18, 2  ;;  %v639_v27 = vrot.slane %v2500_v18, 3  ;;  %v684_v46 = vrot.slane %v2503_v37, 1 }
  0x90   :  { %574 = vst [vmem:[#allocation1 + $0x1] ss:$9 sm:$0xff] %v519_v44  ;;  %v709_v61 = vsel %vm77_vm5, %v2504_v38, %v687_v50 }
  0x91   :  { %2388 = vmatpush.bf16.msrb.mxu0 %v3152_v55  ;;  %2401 = vmatpush.bf16.msrb.mxu1 %v3160_v59  ;;  %v659_v35 = vsel %vm77_vm5, %v2500_v18, %v637_v25  ;;  %v660_v36 = vsel %vm79_vm8, %v638_v26, %v639_v27  ;;  %v654_v42 = vsel %vm68_vm9, %v2500_v18, %v637_v25 }
  0x92   :  { %v657_v44 = vsel %vm72_vm10, %v638_v26, %v639_v27  ;;  %v661_v45 = vsel %vm81_vm13, %v659_v35, %v660_v36  ;;  %v697_v59 = vsel %vm77_vm5, %v2503_v37, %v684_v46  ;;  %v2511_v36 = vld [vmem:[%s4108_s0 + $0x20] sm:$0x3] }
  0x93   :  { %v663_v57 = vrot.slane %v661_v45, 1  ;;  %v658_v58 = vsel %vm32_vm4, %v654_v42, %v657_v44 }
  0x95   :  { %2389 = vmatpush.bf16.msrb.mxu0 %v3151_v63  ;;  %2402 = vmatpush.bf16.msrb.mxu1 %v3159_v2  ;;  %v664_v63 = vshrl.u32 %v646_v56, 16  ;;  %v672_v2 = vshrl.u32 %v658_v58, 16 }
  0x97   :  { %v575_v4 = vld [vmem:[#allocation1] sm:$0xff] }
  0x98   :  { %578 = vst [vmem:[#allocation1 + $0x2] ss:$9 sm:$0xff] %v561_v0  ;;  %v669_v0 = vshll.u32 %v651_v54, 16 }
  0x99   :  { %581 = vst [vmem:[#allocation1 + $0x3] ss:$9 sm:$0xff] %v569_v3  ;;  %2390 = vmatpush.bf16.msrb.mxu0 %v3150_v30  ;;  %2403 = vmatpush.bf16.msrb.mxu1 %v3158_v32  ;;  %v677_v3 = vshll.u32 %v663_v57, 16 }
  0xa0   :  { %v582_v6 = vld [vmem:[#allocation1] sm:$0xff] }
  0xa1   :  { %v583_v8 = vsel %vm32_vm4, %v575_v4, %v582_v6  ;;  %593 = vst [vmem:[#allocation1] ss:$9 sm:$0xff] %v2491_v5  ;;  %v692_v4 = vsel %vm68_vm9, %v2503_v37, %v684_v46  ;;  %v695_v5 = vsel %vm72_vm10, %v685_v47, %v686_v49  ;;  %v699_v6 = vsel %vm81_vm13, %v697_v59, %v698_v60  ;;  %v2512_v37 = vld [vmem:[%s4108_s0 + $0x22] sm:$0x3] }
  0xa2   :  { %585 = vst [vmem:[#allocation2 + $0x1c] sm:$0xf] %v583_v8  ;;  %v711_v8 = vsel %vm81_vm13, %v709_v61, %v710_v62  ;;  %v800_v47 = vrot.slane %v2511_v36, 1  ;;  %v802_v49 = vrot.slane %v2511_v36, 3  ;;  %v804_v54 = vrot.slane %v2512_v37, 2 }
  0xa3   :  { %596 = vst [vmem:[#allocation1 + $0x1] ss:$9 sm:$0xff] %v2492_v7  ;;  %v704_v7 = vsel %vm68_vm9, %v2504_v38, %v687_v50  ;;  %v713_v17 = vrot.slane %v711_v8, 1  ;;  %v803_v50 = vrot.slane %v2512_v37, 1 }
  0xa4   :  { %v813_v62 = vsel %vm77_vm5, %v2511_v36, %v800_v47 }
  0xa5   :  { %v727_v30 = vshll.u32 %v713_v17, 16  ;;  %v3149_v17 = vld [vmem:[%s4107_s1 + $0x310] sm:$0xff] }
  0xa6   :  { %2391 = vmatpush.bf16.msrb.mxu0 %v3149_v17  ;;  %v2522_v17 = vld [vmem:[%s4108_s0 + $0x2e] sm:$0x1] }
  0xa9   :  { %v1142_v10 = vld [vmem:[#allocation2 + $0x18] sm:$0xff] }
  0xaa   :  { %v1420_v12 = vunpack.c.l.b16 %v1142_v10  ;;  %v1421_v13 = vunpack.c.h.b16 %v1142_v10  ;;  %v597_v14 = vld [vmem:[#allocation1] sm:$0xff]  ;;  %v2508_v10 = vld [vmem:[%s4108_s0 + $0xa] sm:$0x3] }
  0xab   :  { %600 = vst [vmem:[#allocation1 + $0x2] ss:$9 sm:$0xff] %v2493_v9  ;;  %v707_v9 = vsel %vm72_vm10, %v688_v51, %v689_v52  ;;  %v753_v21 = vrot.slane %v2508_v10, 1  ;;  %v754_v22 = vrot.slane %v2508_v10, 2 }
  0xac   :  { %v1436_v15 = vpack.c.b16 %v1420_v12, %v1420_v12  ;;  %v1437_v16 = vpack.c.b16 %v1421_v13, %v1421_v13  ;;  %603 = vst [vmem:[#allocation1 + $0x3] ss:$9 sm:$0xff] %v2494_v11  ;;  %v750_v11 = vrot.slane %v2507_v1, 1  ;;  %v751_v12 = vrot.slane %v2507_v1, 2 }
  0xad   :  { %v752_v13 = vrot.slane %v2507_v1, 3  ;;  %v708_v20 = vsel %vm32_vm4, %v704_v7, %v707_v9  ;;  %v775_v34 = vsel %vm77_vm5, %v2508_v10, %v753_v21  ;;  %v770_v42 = vsel %vm68_vm9, %v2508_v10, %v753_v21  ;;  %v3156_v21 = vld [vmem:[%s4107_s1 + $0x348] sm:$0xff] }
  0xae   :  { %2316 = vmatmul.bf16.vlgmr.msrb.gmra.mxu2 %v1436_v15  ;;  %2329 = vmatmul.bf16.vlgmr.msrb.gmra.mxu3 %v1437_v16  ;;  %v679_v15 = vsel %vm3462_vm6, %v672_v2, %v677_v3  ;;  %v701_v16 = vrot.slane %v699_v6, 1  ;;  %v763_v25 = vsel %vm77_vm5, %v2507_v1, %v750_v11  ;;  %v722_v29 = vshrl.u32 %v708_v20, 16  ;;  %v3148_v20 = vld [vmem:[%s4107_s1 + $0x308] sm:$0xff] }
  0xaf   :  { %v764_v26 = vsel %vm79_vm8, %v751_v12, %v752_v13  ;;  %v758_v32 = vsel %vm68_vm9, %v2507_v1, %v750_v11  ;;  %v761_v33 = vsel %vm72_vm10, %v751_v12, %v752_v13  ;;  %v808_v6 = vsel %vm68_vm9, %v2511_v36, %v800_v47  ;;  %2392 = vmatpush.bf16.msrb.mxu0 %v3148_v20  ;;  %v3167_v20 = vld [vmem:[%s4107_s1 + $0x3a0] sm:$0xff] }
  0xb0   :  { %v765_v31 = vsel %vm81_vm13, %v763_v25, %v764_v26  ;;  %v729_v39 = vsel %vm3462_vm6, %v722_v29, %v727_v30  ;;  %v762_v41 = vsel %vm32_vm4, %v758_v32, %v761_v33  ;;  %v820_v9 = vsel %vm68_vm9, %v2512_v37, %v803_v50  ;;  %v3147_v26 = vld [vmem:[%s4107_s1 + $0x300] sm:$0xff]  ;;  %v2516_v33 = vld [vmem:[%s4108_s0 + $0x10] sm:$0x1] }
  0xb1   :  { %v767_v40 = vrot.slane %v765_v31, 1  ;;  %v780_v60 = vshrl.u32 %v762_v41, 16  ;;  %v2515_v31 = vld [vmem:[%s4108_s0 + $0xe] sm:$0x1] }
  0xb3   :  { %v604_v23 = vld [vmem:[#allocation1] sm:$0xff]  ;;  %v785_v61 = vshll.u32 %v767_v40, 16  ;;  %2393 = vmatpush.bf16.msrb.mxu0 %v3147_v26 }
  0xb4   :  { %v605_v28 = vsel %vm32_vm4, %v597_v14, %v604_v23  ;;  %615 = vst [vmem:[#allocation1] ss:$9 sm:$0xff] %v2495_v19  ;;  %v671_v14 = vsel %vm3462_vm6, %v664_v63, %v669_v0  ;;  %v696_v19 = vsel %vm32_vm4, %v692_v4, %v695_v5  ;;  %v825_v0 = vsel %vm77_vm5, %v2512_v37, %v803_v50  ;;  %v2520_v50 = vld [vmem:[%s4108_s0 + $0x16] sm:$0x1] }
  0xb5   :  { %607 = vst [vmem:[#allocation2 + $0x20] sm:$0xf] %v605_v28  ;;  %v714_v27 = vshrl.u32 %v696_v19, 16  ;;  %v719_v28 = vshll.u32 %v701_v16, 16  ;;  %v787_v5 = vsel %vm3462_vm6, %v780_v60, %v785_v61 }
  0xb6   :  { %618 = vst [vmem:[#allocation1 + $0x1] ss:$9 sm:$0xff] %v2496_v24  ;;  %v755_v24 = vrot.slane %v2508_v10, 3 }
  0xb7   :  { %v721_v38 = vsel %vm3462_vm6, %v714_v27, %v719_v28  ;;  %v3155_v27 = vld [vmem:[%s4107_s1 + $0x340] sm:$0xff] }
  0xb8   :  { %v776_v35 = vsel %vm79_vm8, %v754_v22, %v755_v24  ;;  %v773_v44 = vsel %vm72_vm10, %v754_v22, %v755_v24 }
  0xb9   :  { %v777_v45 = vsel %vm81_vm13, %v775_v34, %v776_v35  ;;  %v774_v59 = vsel %vm32_vm4, %v770_v42, %v773_v44  ;;  %v2517_v35 = vld [vmem:[%s4108_s0 + $0x26] sm:$0x1]  ;;  %v2523_v44 = vld [vmem:[%s4108_s0 + $0xe] sm:$0x3] }
  0xba   :  { %v779_v56 = vrot.slane %v777_v45, 1  ;;  %v788_v2 = vshrl.u32 %v774_v59, 16  ;;  %v2524_v45 = vld [vmem:[%s4108_s0 + $0x10] sm:$0x3]  ;;  %v910_v47 = vrot.slane %v2523_v44, 1 }
  0xbb   :  { %v3177_v59 = vld [vmem:[%s4107_s1 + $0x3f0] sm:$0xff] }
  0xbc   :  { %v793_v3 = vshll.u32 %v779_v56, 16  ;;  %v915_v56 = vrot.slane %v2524_v45, 3  ;;  %v923_v60 = vsel %vm77_vm5, %v2523_v44, %v910_v47 }
  0xbd   :  { %v619_v55 = vld [vmem:[#allocation1] sm:$0xff] }
  0xbe   :  { %622 = vst [vmem:[#allocation1 + $0x2] ss:$9 sm:$0xff] %v2497_v48  ;;  %v801_v48 = vrot.slane %v2511_v36, 2  ;;  %v795_v12 = vsel %vm3462_vm6, %v788_v2, %v793_v3  ;;  %v2528_v2 = vld [vmem:[%s4108_s0 + $0x28] sm:$0x3] }
  0xbf   :  { %625 = vst [vmem:[#allocation1 + $0x3] ss:$9 sm:$0xff] %v2498_v53  ;;  %v3168_v3 = vld [vmem:[%s4107_s1 + $0x3a8] sm:$0xff] }
  0xc0   :  { %v814_v63 = vsel %vm79_vm8, %v801_v48, %v802_v49  ;;  %v811_v7 = vsel %vm72_vm10, %v801_v48, %v802_v49  ;;  %v911_v48 = vrot.slane %v2523_v44, 2  ;;  %v912_v49 = vrot.slane %v2523_v44, 3 }
  0xc1   :  { %v815_v4 = vsel %vm81_vm13, %v813_v62, %v814_v63 }
  0xc2   :  { %v817_v13 = vrot.slane %v815_v4, 1  ;;  %v924_v61 = vsel %vm79_vm8, %v911_v48, %v912_v49  ;;  %v3176_v4 = vld [vmem:[%s4107_s1 + $0x3e8] sm:$0xff] }
  0xc6   :  { %v626_v18 = vld [vmem:[#allocation1] sm:$0xff] }
  0xc7   :  { %v627_v23 = vsel %vm32_vm4, %v619_v55, %v626_v18  ;;  %731 = vst [vmem:[#allocation1] ss:$9 sm:$0xff] %v671_v14  ;;  %v805_v55 = vrot.slane %v2512_v37, 3  ;;  %v3157_v18 = vld [vmem:[%s4107_s1 + $0x350] sm:$0xff]  ;;  %v2518_v37 = vld [vmem:[%s4108_s0 + $0x28] sm:$0x1] }
  0xc8   :  { %629 = vst [vmem:[#allocation2 + $0x24] sm:$0xf] %v627_v23  ;;  %2404 = vmatpush.bf16.msrb.mxu1 %v3157_v18  ;;  %v835_v23 = vshll.u32 %v817_v13, 16 }
  0xc9   :  { %734 = vst [vmem:[#allocation1 + $0x1] ss:$9 sm:$0xff] %v679_v15  ;;  %v826_v1 = vsel %vm79_vm8, %v804_v54, %v805_v55  ;;  %v823_v10 = vsel %vm72_vm10, %v804_v54, %v805_v55  ;;  %v812_v15 = vsel %vm32_vm4, %v808_v6, %v811_v7  ;;  %v913_v54 = vrot.slane %v2524_v45, 1 }
  0xca   :  { %v827_v8 = vsel %vm81_vm13, %v825_v0, %v826_v1  ;;  %v824_v19 = vsel %vm32_vm4, %v820_v9, %v823_v10  ;;  %v830_v22 = vshrl.u32 %v812_v15, 16  ;;  %v914_v55 = vrot.slane %v2524_v45, 2  ;;  %v2527_v0 = vld [vmem:[%s4108_s0 + $0x26] sm:$0x3] }
  0xcb   :  { %v829_v16 = vrot.slane %v827_v8, 1  ;;  %v838_v24 = vshrl.u32 %v824_v19, 16  ;;  %v935_v62 = vsel %vm77_vm5, %v2524_v45, %v913_v54  ;;  %v925_v1 = vsel %vm81_vm13, %v923_v60, %v924_v61 }
  0xcc   :  { %2405 = vmatpush.bf16.msrb.mxu1 %v3156_v21  ;;  %v837_v28 = vsel %vm3462_vm6, %v830_v22, %v835_v23  ;;  %v936_v63 = vsel %vm79_vm8, %v914_v55, %v915_v56  ;;  %v921_v6 = vsel %vm72_vm10, %v911_v48, %v912_v49  ;;  %v930_v7 = vsel %vm68_vm9, %v2524_v45, %v913_v54  ;;  %v3175_v21 = vld [vmem:[%s4107_s1 + $0x3e0] sm:$0xff]  ;;  %v3165_v48 = vld [vmem:[%s4107_s1 + $0x390] sm:$0xff] }
  0xcd   :  { %v843_v25 = vshll.u32 %v829_v16, 16  ;;  %v933_v8 = vsel %vm72_vm10, %v914_v55, %v915_v56  ;;  %v937_v9 = vsel %vm81_vm13, %v935_v62, %v936_v63  ;;  %v960_v10 = vrot.slane %v2527_v0, 1  ;;  %v3173_v49 = vld [vmem:[%s4107_s1 + $0x3d0] sm:$0xff] }
  0xce   :  { %v962_v13 = vrot.slane %v2527_v0, 3  ;;  %v964_v15 = vrot.slane %v2528_v2, 2  ;;  %v965_v16 = vrot.slane %v2528_v2, 3  ;;  %v927_v18 = vrot.slane %v925_v1, 1  ;;  %v3172_v1 = vld [vmem:[%s4107_s1 + $0x3c8] sm:$0xff] }
  0xcf   :  { %v1143_v46 = vld [vmem:[#allocation2 + $0x20] sm:$0xff]  ;;  %v845_v29 = vsel %vm3462_vm6, %v838_v24, %v843_v25  ;;  %v939_v23 = vrot.slane %v937_v9, 1  ;;  %v934_v24 = vsel %vm32_vm4, %v930_v7, %v933_v8  ;;  %v973_v25 = vsel %vm77_vm5, %v2527_v0, %v960_v10 }
  0xd0   :  { %v1422_v51 = vunpack.c.l.b16 %v1143_v46  ;;  %v1423_v52 = vunpack.c.h.b16 %v1143_v46  ;;  %v735_v53 = vld [vmem:[#allocation1] sm:$0xff]  ;;  %2406 = vmatpush.bf16.msrb.mxu1 %v3155_v27  ;;  %v2519_v46 = vld [vmem:[%s4108_s0 + $0x14] sm:$0x1]  ;;  %v2535_v9 = vld [vmem:[%s4108_s0 + $0x2c] sm:$0x3] }
  0xd1   :  { %738 = vst [vmem:[#allocation1 + $0x2] ss:$9 sm:$0xff] %v721_v38 }
  0xd2   :  { %v1438_v57 = vpack.c.b16 %v1422_v51, %v1422_v51  ;;  %v1439_v58 = vpack.c.b16 %v1423_v52, %v1423_v52  ;;  %741 = vst [vmem:[#allocation1 + $0x3] ss:$9 sm:$0xff] %v729_v39  ;;  %v3170_v52 = vld [vmem:[%s4107_s1 + $0x3b8] sm:$0xff] }
  0xd3   :  { %2412 = vmatpush.bf16.msrb.mxu2 %v3170_v52 }
  0xd4   :  { %2342 = vmatmul.bf16.vlgmr.msra.gmra.mxu0 %v1438_v57  ;;  %2355 = vmatmul.bf16.vlgmr.msra.gmra.mxu1 %v1439_v58  ;;  %v3169_v58 = vld [vmem:[%s4107_s1 + $0x3b0] sm:$0xff] }
  0xd7   :  { %2413 = vmatpush.bf16.msrb.mxu2 %v3169_v58 }
  0xd9   :  { %v742_v11 = vld [vmem:[#allocation1] sm:$0xff] }
  0xda   :  { %v743_v14 = vsel %vm32_vm4, %v735_v53, %v742_v11  ;;  %847 = vst [vmem:[#allocation1] ss:$9 sm:$0xff] %v787_v5  ;;  %v3178_v53 = vld [vmem:[%s4107_s1 + $0x3f8] sm:$0xff]  ;;  %v918_v5 = vsel %vm68_vm9, %v2523_v44, %v910_v47  ;;  %v961_v11 = vrot.slane %v2527_v0, 2 }
  0xdb   :  { %745 = vst [vmem:[#allocation2 + $0x28] sm:$0xf] %v743_v14  ;;  %2425 = vmatpush.bf16.msrb.mxu3 %v3178_v53  ;;  %v963_v14 = vrot.slane %v2528_v2, 1  ;;  %2414 = vmatpush.bf16.msrb.mxu2 %v3168_v3  ;;  %v922_v22 = vsel %vm32_vm4, %v918_v5, %v921_v6 }
  0xdc   :  { %850 = vst [vmem:[#allocation1 + $0x1] ss:$9 sm:$0xff] %v795_v12  ;;  %v2521_v12 = vld [vmem:[%s4108_s0 + $0x2c] sm:$0x1]  ;;  %v974_v26 = vsel %vm79_vm8, %v961_v11, %v962_v13 }
  0xdd   :  { %v985_v27 = vsel %vm77_vm5, %v2528_v2, %v963_v14 }
  0xdf   :  { %2426 = vmatpush.bf16.msrb.mxu3 %v3177_v59  ;;  %2415 = vmatpush.bf16.msrb.mxu2 %v3167_v20 }
  0xe3   :  { %v851_v30 = vld [vmem:[#allocation1] sm:$0xff]  ;;  %2427 = vmatpush.bf16.msrb.mxu3 %v3176_v4 }
  0xe4   :  { %854 = vst [vmem:[#allocation1 + $0x2] ss:$9 sm:$0xff] %v837_v28  ;;  %v986_v28 = vsel %vm79_vm8, %v964_v15, %v965_v16 }
  0xe5   :  { %857 = vst [vmem:[#allocation1 + $0x3] ss:$9 sm:$0xff] %v845_v29  ;;  %v940_v29 = vshrl.u32 %v922_v22, 16  ;;  %v1077_v22 = vrot.slane %v2535_v9, 2 }
  0xe7   :  { %2428 = vmatpush.bf16.msrb.mxu3 %v3175_v21  ;;  %v1076_v21 = vrot.slane %v2535_v9, 1 }
  0xec   :  { %v858_v32 = vld [vmem:[#allocation1] sm:$0xff] }
  0xed   :  { %v859_v34 = vsel %vm32_vm4, %v851_v30, %v858_v32  ;;  %869 = vst [vmem:[#allocation1] ss:$9 sm:$0xff] %v2515_v31  ;;  %v945_v30 = vshll.u32 %v927_v18, 16  ;;  %v2531_v31 = vld [vmem:[%s4108_s0 + $0x14] sm:$0x3]  ;;  %v3166_v32 = vld [vmem:[%s4107_s1 + $0x398] sm:$0xff] }
  0xee   :  { %861 = vst [vmem:[#allocation2 + $0x2c] sm:$0xf] %v859_v34  ;;  %v948_v34 = vshrl.u32 %v934_v24, 16  ;;  %v1026_v44 = vrot.slane %v2531_v31, 1  ;;  %v1027_v45 = vrot.slane %v2531_v31, 2  ;;  %2416 = vmatpush.bf16.msrb.mxu2 %v3166_v32 }
  0xef   :  { %872 = vst [vmem:[#allocation1 + $0x1] ss:$9 sm:$0xff] %v2516_v33  ;;  %v3174_v33 = vld [vmem:[%s4107_s1 + $0x3d8] sm:$0xff]  ;;  %v947_v47 = vsel %vm3462_vm6, %v940_v29, %v945_v30 }
  0xf0   :  { %2429 = vmatpush.bf16.msrb.mxu3 %v3174_v33  ;;  %v1039_v60 = vsel %vm77_vm5, %v2531_v31, %v1026_v44  ;;  %v1034_v5 = vsel %vm68_vm9, %v2531_v31, %v1026_v44 }
  0xf2   :  { %2417 = vmatpush.bf16.msrb.mxu2 %v3165_v48 }
  0xf4   :  { %2430 = vmatpush.bf16.msrb.mxu3 %v3173_v49 }
  0xf5   :  { %v1144_v36 = vld [vmem:[#allocation2 + $0x28] sm:$0xff] }
  0xf6   :  { %v1424_v38 = vunpack.c.l.b16 %v1144_v36  ;;  %v1425_v39 = vunpack.c.h.b16 %v1144_v36  ;;  %v873_v40 = vld [vmem:[#allocation1] sm:$0xff]  ;;  %v968_v36 = vsel %vm68_vm9, %v2527_v0, %v960_v10  ;;  %v3164_v0 = vld [vmem:[%s4107_s1 + $0x388] sm:$0xff] }
  0xf7   :  { %876 = vst [vmem:[#allocation1 + $0x2] ss:$9 sm:$0xff] %v2517_v35  ;;  %v953_v35 = vshll.u32 %v939_v23, 16  ;;  %v2536_v10 = vld [vmem:[%s4108_s0 + $0x2e] sm:$0x3]  ;;  %2418 = vmatpush.bf16.msrb.mxu2 %v3164_v0  ;;  %v1078_v23 = vrot.slane %v2535_v9, 3 }
  0xf8   :  { %v1440_v41 = vpack.c.b16 %v1424_v38, %v1424_v38  ;;  %v1441_v42 = vpack.c.b16 %v1425_v39, %v1425_v39  ;;  %879 = vst [vmem:[#allocation1 + $0x3] ss:$9 sm:$0xff] %v2518_v37  ;;  %v971_v37 = vsel %vm72_vm10, %v961_v11, %v962_v13  ;;  %v975_v38 = vsel %vm81_vm13, %v973_v25, %v974_v26  ;;  %v3163_v11 = vld [vmem:[%s4107_s1 + $0x380] sm:$0xff] }
  0xf9   :  { %v980_v39 = vsel %vm68_vm9, %v2528_v2, %v963_v14  ;;  %v955_v55 = vsel %vm3462_vm6, %v948_v34, %v953_v35  ;;  %2431 = vmatpush.bf16.msrb.mxu3 %v3172_v1  ;;  %v1079_v24 = vrot.slane %v2536_v10, 1  ;;  %v1081_v29 = vrot.slane %v2536_v10, 3 }
  0xfa   :  { %2368 = vmatmul.bf16.vlgmr.msra.gmra.mxu2 %v1440_v41  ;;  %2381 = vmatmul.bf16.vlgmr.msra.gmra.mxu3 %v1441_v42  ;;  %v987_v41 = vsel %vm81_vm13, %v985_v27, %v986_v28  ;;  %v2532_v42 = vld [vmem:[%s4108_s0 + $0x16] sm:$0x3]  ;;  %v1080_v28 = vrot.slane %v2536_v10, 2 }
  0xfb   :  { %v989_v53 = vrot.slane %v987_v41, 1  ;;  %v1029_v56 = vrot.slane %v2532_v42, 1  ;;  %v1031_v59 = vrot.slane %v2532_v42, 3  ;;  %2419 = vmatpush.bf16.msrb.mxu2 %v3163_v11  ;;  %v1096_v48 = vsel %vm68_vm9, %v2536_v10, %v1079_v24 }
  0xfc   :  { %v1099_v49 = vsel %vm72_vm10, %v1080_v28, %v1081_v29 }
  0xfd   :  { %v1003_v3 = vshll.u32 %v989_v53, 16  ;;  %v1051_v7 = vsel %vm77_vm5, %v2532_v42, %v1029_v56 }
  0xff   :  { %v880_v51 = vld [vmem:[#allocation1] sm:$0xff] }
 0x100   :  { %v881_v57 = vsel %vm32_vm4, %v873_v40, %v880_v51  ;;  %891 = vst [vmem:[#allocation1] ss:$9 sm:$0xff] %v2519_v46  ;;  %v983_v40 = vsel %vm72_vm10, %v964_v15, %v965_v16  ;;  %v1028_v46 = vrot.slane %v2531_v31, 3  ;;  %v977_v51 = vrot.slane %v975_v38, 1 }
 0x101   :  { %883 = vst [vmem:[#allocation2 + $0x30] sm:$0xf] %v881_v57  ;;  %v984_v52 = vsel %vm32_vm4, %v980_v39, %v983_v40  ;;  %v1030_v57 = vrot.slane %v2532_v42, 2  ;;  %v1101_v38 = vsel %vm77_vm5, %v2536_v10, %v1079_v24  ;;  %v1102_v39 = vsel %vm79_vm8, %v1080_v28, %v1081_v29 }
 0x102   :  { %894 = vst [vmem:[#allocation1 + $0x1] ss:$9 sm:$0xff] %v2520_v50  ;;  %v972_v50 = vsel %vm32_vm4, %v968_v36, %v971_v37  ;;  %v1040_v61 = vsel %vm79_vm8, %v1027_v45, %v1028_v46  ;;  %v998_v63 = vshrl.u32 %v984_v52, 16  ;;  %v995_v2 = vshll.u32 %v977_v51, 16 }
 0x103   :  { %v990_v62 = vshrl.u32 %v972_v50, 16  ;;  %v1041_v4 = vsel %vm81_vm13, %v1039_v60, %v1040_v61  ;;  %v1037_v6 = vsel %vm72_vm10, %v1027_v45, %v1028_v46  ;;  %v1052_v8 = vsel %vm79_vm8, %v1030_v57, %v1031_v59  ;;  %v2265_v60 = vpop.f32.mrf.mxu2  ;;  %v2278_v61 = vpop.f32.mrf.mxu3 }
 0x104   :  { %v1005_v14 = vsel %vm3462_vm6, %v998_v63, %v1003_v3  ;;  %v1043_v15 = vrot.slane %v1041_v4, 1  ;;  %v1038_v16 = vsel %vm32_vm4, %v1034_v5, %v1037_v6  ;;  %v1049_v18 = vsel %vm72_vm10, %v1030_v57, %v1031_v59  ;;  %v2239_v57 = vpop.f32.mrf.mxu0 }
 0x105   :  { %v997_v13 = vsel %vm3462_vm6, %v990_v62, %v995_v2  ;;  %v1056_v34 = vshrl.u32 %v1038_v16, 16  ;;  %v1089_v36 = vsel %vm77_vm5, %v2535_v9, %v1076_v21  ;;  %v1090_v37 = vsel %vm79_vm8, %v1077_v22, %v1078_v23 }
 0x106   :  { %v1061_v35 = vshll.u32 %v1043_v15, 16  ;;  %v1084_v45 = vsel %vm68_vm9, %v2535_v9, %v1076_v21  ;;  %v1087_v46 = vsel %vm72_vm10, %v1077_v22, %v1078_v23  ;;  %v1100_v59 = vsel %vm32_vm4, %v1096_v48, %v1099_v49 }
 0x107   :  { %v1114_v1 = vshrl.u32 %v1100_v59, 16 }
 0x108   :  { %v1063_v44 = vsel %vm3462_vm6, %v1056_v34, %v1061_v35 }
 0x109   :  { %v895_v19 = vld [vmem:[#allocation1] sm:$0xff] }
 0x10a   :  { %898 = vst [vmem:[#allocation1 + $0x2] ss:$9 sm:$0xff] %v2521_v12  ;;  %v3171_v12 = vld [vmem:[%s4107_s1 + $0x3c0] sm:$0xff] }
 0x10b   :  { %901 = vst [vmem:[#allocation1 + $0x3] ss:$9 sm:$0xff] %v2522_v17  ;;  %v1046_v17 = vsel %vm68_vm9, %v2532_v42, %v1029_v56  ;;  %2432 = vmatpush.bf16.msrb.mxu3 %v3171_v12  ;;  %v1091_v42 = vsel %vm81_vm13, %v1089_v36, %v1090_v37  ;;  %v3179_v56 = vld [vmem:[%s4109_s2] ss:$0 sm:$0xff]  ;;  %v2267_v11 = vpop.f32.mrf.mxu2  ;;  %v2280_v12 = vpop.f32.mrf.mxu3 }
 0x10c   :  { %v1050_v33 = vsel %vm32_vm4, %v1046_v17, %v1049_v18  ;;  %v1093_v52 = vrot.slane %v1091_v42, 1  ;;  %v2240_v62 = vadd.f32 %v3179_v56, %v2239_v57 }
 0x10d   :  { %v1064_v40 = vshrl.u32 %v1050_v33, 16 }
 0x10e   :  { %v1111_v0 = vshll.u32 %v1093_v52, 16 }
 0x112   :  { %v902_v54 = vld [vmem:[#allocation1] sm:$0xff] }
 0x113   :  { %v903_v58 = vsel %vm32_vm4, %v895_v19, %v902_v54  ;;  %1007 = vst [vmem:[#allocation1] ss:$9 sm:$0xff] %v947_v47  ;;  %v1053_v19 = vsel %vm81_vm13, %v1051_v7, %v1052_v8  ;;  %v1103_v47 = vsel %vm81_vm13, %v1101_v38, %v1102_v39  ;;  %v1088_v54 = vsel %vm32_vm4, %v1084_v45, %v1087_v46  ;;  %v2241_v7 = vpop.f32.mrf.mxu0 }
 0x114   :  { %905 = vst [vmem:[#allocation2 + $0x34] sm:$0xf] %v903_v58  ;;  %v1055_v30 = vrot.slane %v1053_v19, 1  ;;  %v2252_v58 = vpop.f32.mrf.mxu1  ;;  %v1106_v63 = vshrl.u32 %v1088_v54, 16 }
 0x115   :  { %1010 = vst [vmem:[#allocation1 + $0x1] ss:$9 sm:$0xff] %v955_v55  ;;  %v1105_v55 = vrot.slane %v1103_v47, 1  ;;  %v2253_v3 = vadd.f32 %v2252_v58, %v2240_v62 }
 0x116   :  { %v1069_v41 = vshll.u32 %v1055_v30, 16  ;;  %v1113_v5 = vsel %vm3462_vm6, %v1106_v63, %v1111_v0 }
 0x117   :  { %v1119_v2 = vshll.u32 %v1105_v55, 16  ;;  %v2266_v4 = vadd.f32 %v2265_v60, %v2253_v3 }
 0x118   :  { %v1071_v51 = vsel %vm3462_vm6, %v1064_v40, %v1069_v41 }
 0x119   :  { %v1121_v6 = vsel %vm3462_vm6, %v1114_v1, %v1119_v2  ;;  %v2279_v9 = vadd.f32 %v2278_v61, %v2266_v4 }
 0x11b   :  { %v1145_v20 = vld [vmem:[#allocation2 + $0x30] sm:$0xff] }
 0x11c   :  { %v1426_v25 = vunpack.c.l.b16 %v1145_v20  ;;  %v1427_v26 = vunpack.c.h.b16 %v1145_v20  ;;  %v1011_v27 = vld [vmem:[#allocation1] sm:$0xff]  ;;  %v2254_v8 = vpop.f32.mrf.mxu1 }
 0x11d   :  { %1014 = vst [vmem:[#allocation1 + $0x2] ss:$9 sm:$0xff] %v997_v13  ;;  %v2291_v13 = vpop.f32.mrf.mxu0 }
 0x11e   :  { %v1442_v31 = vpack.c.b16 %v1426_v25, %v1426_v25  ;;  %v1443_v32 = vpack.c.b16 %v1427_v26, %v1427_v26  ;;  %1017 = vst [vmem:[#allocation1 + $0x3] ss:$9 sm:$0xff] %v1005_v14  ;;  %v2292_v15 = vadd.f32 %v2291_v13, %v2279_v9 }
 0x120   :  { %2394 = vmatmul.bf16.vlgmr.msrb.gmra.mxu0 %v1442_v31  ;;  %2407 = vmatmul.bf16.vlgmr.msrb.gmra.mxu1 %v1443_v32 }
 0x124   :  { %v2304_v14 = vpop.f32.mrf.mxu1 }
 0x125   :  { %v1018_v50 = vld [vmem:[#allocation1] sm:$0xff]  ;;  %v2305_v20 = vadd.f32 %v2304_v14, %v2292_v15  ;;  %v2293_v22 = vpop.f32.mrf.mxu0 }
 0x126   :  { %v1019_v53 = vsel %vm32_vm4, %v1011_v27, %v1018_v50  ;;  %1123 = vst [vmem:[#allocation1] ss:$9 sm:$0xff] %v1063_v44 }
 0x127   :  { %1021 = vst [vmem:[#allocation2 + $0x38] sm:$0xf] %v1019_v53 }
 0x128   :  { %1126 = vst [vmem:[#allocation1 + $0x1] ss:$9 sm:$0xff] %v1071_v51 }
 0x12c   :  { %v2306_v23 = vpop.f32.mrf.mxu1 }
 0x12f   :  { %v1127_v10 = vld [vmem:[#allocation1] sm:$0xff] }
 0x130   :  { %1130 = vst [vmem:[#allocation1 + $0x2] ss:$9 sm:$0xff] %v1113_v5 }
 0x131   :  { %1133 = vst [vmem:[#allocation1 + $0x3] ss:$9 sm:$0xff] %v1121_v6  ;;  %v2317_v16 = vpop.f32.mrf.mxu2  ;;  %v2330_v17 = vpop.f32.mrf.mxu3 }
 0x132   :  { %v2318_v43 = vadd.f32 %v2317_v16, %v2305_v20 }
 0x134   :  { %v2331_v21 = vadd.f32 %v2330_v17, %v2318_v43 }
 0x138   :  { %v1134_v18 = vld [vmem:[#allocation1] sm:$0xff] }
 0x139   :  { %v1135_v19 = vsel %vm32_vm4, %v1127_v10, %v1134_v18  ;;  %v2319_v24 = vpop.f32.mrf.mxu2  ;;  %v2332_v25 = vpop.f32.mrf.mxu3 }
 0x13a   :  { %1137 = vst [vmem:[#allocation2 + $0x3c] sm:$0xf] %v1135_v19 }
 0x141   :  { %v1146_v26 = vld [vmem:[#allocation2 + $0x38] sm:$0xff] }
 0x142   :  { %v1428_v27 = vunpack.c.l.b16 %v1146_v26  ;;  %v1429_v28 = vunpack.c.h.b16 %v1146_v26 }
 0x144   :  { %v1444_v29 = vpack.c.b16 %v1428_v27, %v1428_v27  ;;  %v1445_v30 = vpack.c.b16 %v1429_v28, %v1429_v28 }
 0x146   :  { %2420 = vmatmul.bf16.vlgmr.msrb.gmra.mxu2 %v1444_v29  ;;  %2433 = vmatmul.bf16.vlgmr.msrb.gmra.mxu3 %v1445_v30 }
 0x151   :  { %v2343_v31 = vpop.f32.mrf.mxu0  ;;  %v2356_v32 = vpop.f32.mrf.mxu1 }
 0x152   :  { %v2344_v33 = vadd.f32 %v2343_v31, %v2331_v21 }
 0x154   :  { %v2357_v34 = vadd.f32 %v2356_v32, %v2344_v33 }
 0x159   :  { %v2345_v35 = vpop.f32.mrf.mxu0  ;;  %v2358_v36 = vpop.f32.mrf.mxu1 }
 0x17d   :  { %v2369_v37 = vpop.f32.mrf.mxu2  ;;  %v2382_v38 = vpop.f32.mrf.mxu3 }
 0x17e   :  { %v2370_v39 = vadd.f32 %v2369_v37, %v2357_v34 }
 0x180   :  { %v2383_v40 = vadd.f32 %v2382_v38, %v2370_v39 }
 0x185   :  { %v2371_v41 = vpop.f32.mrf.mxu2  ;;  %v2384_v42 = vpop.f32.mrf.mxu3 }
 0x19d   :  { %v2395_v44 = vpop.f32.mrf.mxu0  ;;  %v2408_v45 = vpop.f32.mrf.mxu1 }
 0x19e   :  { %v2396_v48 = vadd.f32 %v2395_v44, %v2383_v40 }
 0x1a0   :  { %v2409_v49 = vadd.f32 %v2408_v45, %v2396_v48 }
 0x1a5   :  { %v2397_v46 = vpop.f32.mrf.mxu0  ;;  %v2410_v47 = vpop.f32.mrf.mxu1 }
 0x1c9   :  { %v2421_v50 = vpop.f32.mrf.mxu2  ;;  %v2434_v51 = vpop.f32.mrf.mxu3 }
 0x1ca   :  { %v2422_v52 = vadd.f32 %v2421_v50, %v2409_v49 }
 0x1cc   :  { %v2435_v53 = vadd.f32 %v2434_v51, %v2422_v52 }
 0x1ce   :  { %vm2438_vm4 = vcmp.gt.f32.partialorder %v2435_v53, 0.0  ;;  %v2439_v54 = vmul.f32 0.2, %v2435_v53 }
 0x1d0   :  { %v2440_v55 = vsel %vm2438_vm4, %v2435_v53, %v2439_v54 }
 0x1d1   :  { %v2441_v56 = vpack.c.bf16 %v2440_v55, %v2440_v55  ;;  %v2423_v57 = vpop.f32.mrf.mxu2  ;;  %v2436_v58 = vpop.f32.mrf.mxu3 }
 0x1d3   :  { %2442 = vst [vmem:[%s4110_s3] sm:$0xf] %v2441_v56 }

// kernel: tf_discriminator_forward.9
= control target key start
LH: loop header
LB: loop body
LE: loop exit
PB: predicated region body
PF: predicated region fallthrough
CT: control target
= control target key end

     0   :  { %vm25_vm0 = vcmask 1040384   ;;  %vm26_vm1 = vsmask.f32 256  ;;  %vm287_vm3 = vcmask 1041408   ;;  %vm289_vm4 = vcmask 1045508   ;;  %s616_s0 = inlined_call_operand.vmem [shape: bf16[2,4,2,2,128], index: 0, kind: input, shape index: {}]   ;;  %s617_s2 = inlined_call_operand.<no memory space> [shape: f32[1,1], index: 2, kind: input, shape index: {}]   ;;  %s618_s1 = inlined_call_operand.vmem [shape: bf16[1,2048], index: 1, kind: input, shape index: {}]   ;;  %s619_s3 = inlined_call_operand.vmem [shape: f32[1,2,1], index: 3, kind: output, shape index: {}]  }
   0x1   :  { %v8_v0 = vstv %s617_s2  ;;  %v394_v1 = vld [vmem:[%s616_s0 + $0x8] sm:$0x1]  ;;  %v396_v2 = vld [vmem:[%s616_s0 + $0xa] sm:$0x1]  ;;  %v16_v3 = vld [vmem:[%s616_s0] sm:$0x1] }
   0x2   :  { %9 = vst [vmem:[#allocation3] sm:$0x1] %v8_v0  ;;  %vm456_vm2 = vmand %vm25_vm0, %vm26_vm1  ;;  %v42_v8 = vld [vmem:[%s616_s0] sm:$0x1]  ;;  %v395_v9 = vld [vmem:[%s616_s0 + $0x2] sm:$0x1] }
   0x3   :  { %20 = vst [vmem:[#allocation1] ss:$9 sm:$0xff] %v394_v1  ;;  %v398_v13 = vld [vmem:[%s616_s0 + $0x2] sm:$0x1]  ;;  %v397_v14 = vld [vmem:[%s616_s0 + $0x8] sm:$0x1] }
   0x4   :  { %v401_v18 = vld [vmem:[%s616_s0 + $0xc] sm:$0x1]  ;;  %v399_v19 = vld [vmem:[%s616_s0 + $0xa] sm:$0x1]  ;;  %v403_v23 = vld [vmem:[%s616_s0 + $0xe] sm:$0x1] }
   0x5   :  { %v400_v24 = vld [vmem:[%s616_s0 + $0x4] sm:$0x1]  ;;  %v402_v29 = vld [vmem:[%s616_s0 + $0x6] sm:$0x1]  ;;  %v405_v34 = vld [vmem:[%s616_s0 + $0xc] sm:$0x1] }
   0x6   :  { %v404_v28 = vld [vmem:[%s616_s0 + $0x4] sm:$0x1]  ;;  %v406_v33 = vld [vmem:[%s616_s0 + $0x6] sm:$0x1]  ;;  %v409_v38 = vld [vmem:[%s616_s0 + $0x9] sm:$0x1] }
   0x7   :  { %v407_v39 = vld [vmem:[%s616_s0 + $0xe] sm:$0x1]  ;;  %v411_v43 = vld [vmem:[%s616_s0 + $0xb] sm:$0x1]  ;;  %v408_v44 = vld [vmem:[%s616_s0 + $0x1] sm:$0x1] }
   0x8   :  { %v412_v48 = vld [vmem:[%s616_s0 + $0x1] sm:$0x1]  ;;  %v410_v49 = vld [vmem:[%s616_s0 + $0x3] sm:$0x1]  ;;  %v413_v54 = vld [vmem:[%s616_s0 + $0x9] sm:$0x1] }
   0x9   :  { %v414_v53 = vld [vmem:[%s616_s0 + $0x3] sm:$0x1]  ;;  %v417_v58 = vld [vmem:[%s616_s0 + $0xd] sm:$0x1]  ;;  %v415_v60 = vld [vmem:[%s616_s0 + $0xb] sm:$0x1] }
   0xa   :  { %v21_v4 = vld [vmem:[#allocation1] sm:$0xff]  ;;  %vm291_vm5 = vcmask 1043456   ;;  %vm388_vm6 = vcmask 1024  }
   0xb   :  { %v22_v6 = vshll.u32 %v21_v4, 16  ;;  %35 = vst [vmem:[#allocation1] ss:$9 sm:$0xff] %v396_v2  ;;  %v195_v59 = vld [vmem:[%s618_s1] sm:$0xff]  ;;  %v419_v4 = vld [vmem:[%s616_s0 + $0xf] sm:$0x1] }
   0xc   :  { %v198_v62 = vunpack.c.h.bf16 %v195_v59 }
   0xd   :  { %v28_v7 = vsel %vm456_vm2, %v16_v3, %v22_v6  ;;  %v197_v6 = vunpack.c.l.bf16 %v195_v59 }
   0xe   :  { %29 = vst [vmem:[#allocation2] sm:$0x1] %v28_v7  ;;  %v216_v1 = vperm.slane %v198_v62, 2  ;;  %v217_v2 = vperm.slane %v198_v62, 4  ;;  %v218_v3 = vperm.slane %v198_v62, 6 }
   0xf   :  { %v416_v7 = vld [vmem:[%s616_s0 + $0x5] sm:$0x1] }
  0x12   :  { %v36_v10 = vld [vmem:[#allocation1] sm:$0xff] }
  0x13   :  { %v37_v11 = vshll.u32 %v36_v10, 16  ;;  %45 = vst [vmem:[#allocation1] ss:$9 sm:$0xff] %v42_v8  ;;  %v248_v10 = vperm.slane %v216_v1, 0 }
  0x15   :  { %v40_v12 = vsel %vm456_vm2, %v395_v9, %v37_v11  ;;  %v215_v9 = vperm.slane %v198_v62, 0  ;;  %v249_v11 = vperm.slane %v217_v2, 0 }
  0x16   :  { %41 = vst [vmem:[#allocation2 + $0x1] sm:$0x1] %v40_v12  ;;  %v250_v12 = vperm.slane %v218_v3, 0 }
  0x1a   :  { %v46_v15 = vld [vmem:[#allocation1] sm:$0xff] }
  0x1b   :  { %v47_v16 = vshrl.u32 %v46_v15, 16  ;;  %55 = vst [vmem:[#allocation1] ss:$9 sm:$0xff] %v398_v13 }
  0x1d   :  { %v50_v17 = vsel %vm456_vm2, %v47_v16, %v397_v14  ;;  %v212_v14 = vperm.slane %v197_v6, 2  ;;  %v213_v16 = vperm.slane %v197_v6, 4 }
  0x1e   :  { %51 = vst [vmem:[#allocation2 + $0x2] sm:$0x1] %v50_v17  ;;  %v214_v17 = vperm.slane %v197_v6, 6 }
  0x22   :  { %v56_v20 = vld [vmem:[#allocation1] sm:$0xff] }
  0x23   :  { %v57_v21 = vshrl.u32 %v56_v20, 16  ;;  %67 = vst [vmem:[#allocation1] ss:$9 sm:$0xff] %v401_v18  ;;  %v247_v18 = vperm.slane %v215_v9, 0  ;;  %v279_v20 = vrot.slane %v249_v11, 4 }
  0x25   :  { %v60_v22 = vsel %vm456_vm2, %v57_v21, %v399_v19  ;;  %v278_v19 = vrot.slane %v248_v10, 6  ;;  %v280_v21 = vrot.slane %v250_v12, 2 }
  0x26   :  { %61 = vst [vmem:[#allocation2 + $0x3] sm:$0x1] %v60_v22  ;;  %v420_v22 = vld [vmem:[%s616_s0 + $0x5] sm:$0x1] }
  0x2a   :  { %v68_v25 = vld [vmem:[#allocation1] sm:$0xff] }
  0x2b   :  { %v69_v26 = vshll.u32 %v68_v25, 16  ;;  %79 = vst [vmem:[#allocation1] ss:$9 sm:$0xff] %v403_v23  ;;  %v211_v23 = vperm.slane %v197_v6, 0  ;;  %v245_v25 = vperm.slane %v213_v16, 0 }
  0x2d   :  { %v72_v27 = vsel %vm456_vm2, %v400_v24, %v69_v26  ;;  %v244_v24 = vperm.slane %v212_v14, 0  ;;  %v246_v26 = vperm.slane %v214_v17, 0 }
  0x2e   :  { %73 = vst [vmem:[#allocation2 + $0x4] sm:$0x1] %v72_v27  ;;  %v418_v27 = vld [vmem:[%s616_s0 + $0x7] sm:$0x1] }
  0x32   :  { %v80_v30 = vld [vmem:[#allocation1] sm:$0xff] }
  0x33   :  { %v81_v31 = vshll.u32 %v80_v30, 16  ;;  %89 = vst [vmem:[#allocation1] ss:$9 sm:$0xff] %v404_v28  ;;  %v294_v30 = vsel %vm289_vm4, %v279_v20, %v280_v21 }
  0x35   :  { %v84_v32 = vsel %vm456_vm2, %v402_v29, %v81_v31  ;;  %v293_v29 = vsel %vm287_vm3, %v247_v18, %v278_v19 }
  0x36   :  { %85 = vst [vmem:[#allocation2 + $0x5] sm:$0x1] %v84_v32 }
  0x3a   :  { %v90_v35 = vld [vmem:[#allocation1] sm:$0xff] }
  0x3b   :  { %v91_v36 = vshrl.u32 %v90_v35, 16  ;;  %99 = vst [vmem:[#allocation1] ss:$9 sm:$0xff] %v406_v33  ;;  %v275_v35 = vrot.slane %v244_v24, 6 }
  0x3d   :  { %v94_v37 = vsel %vm456_vm2, %v91_v36, %v405_v34  ;;  %v243_v34 = vperm.slane %v211_v23, 0 }
  0x3e   :  { %95 = vst [vmem:[#allocation2 + $0x6] sm:$0x1] %v94_v37  ;;  %v276_v37 = vrot.slane %v245_v25, 4 }
  0x42   :  { %v100_v40 = vld [vmem:[#allocation1] sm:$0xff] }
  0x43   :  { %v101_v41 = vshrl.u32 %v100_v40, 16  ;;  %111 = vst [vmem:[#allocation1] ss:$9 sm:$0xff] %v409_v38  ;;  %v277_v38 = vrot.slane %v246_v26, 2  ;;  %v196_v40 = vld [vmem:[%s618_s1 + $0x8] sm:$0xff] }
  0x45   :  { %v104_v42 = vsel %vm456_vm2, %v101_v41, %v407_v39  ;;  %v295_v39 = vsel %vm291_vm5, %v293_v29, %v294_v30  ;;  %v422_v41 = vld [vmem:[%s616_s0 + $0x7] sm:$0x1] }
  0x46   :  { %105 = vst [vmem:[#allocation2 + $0x7] sm:$0x1] %v104_v42 }
  0x4a   :  { %v112_v45 = vld [vmem:[#allocation1] sm:$0xff] }
  0x4b   :  { %v113_v46 = vshll.u32 %v112_v45, 16  ;;  %123 = vst [vmem:[#allocation1] ss:$9 sm:$0xff] %v411_v43  ;;  %v199_v43 = vunpack.c.l.bf16 %v196_v40  ;;  %v290_v45 = vsel %vm289_vm4, %v276_v37, %v277_v38 }
  0x4d   :  { %v116_v47 = vsel %vm456_vm2, %v408_v44, %v113_v46  ;;  %v201_v32 = vld [vmem:[#allocation2] sm:$0xff]  ;;  %v288_v44 = vsel %vm287_vm3, %v243_v34, %v275_v35 }
  0x4e   :  { %117 = vst [vmem:[#allocation2 + $0x8] sm:$0x1] %v116_v47  ;;  %v204_v33 = vunpack.c.h.bf16 %v201_v32  ;;  %v421_v46 = vld [vmem:[%s616_s0 + $0xd] sm:$0x1] }
  0x50   :  { %v307_v42 = vmul.f32 %v295_v39, %v204_v33 }
  0x52   :  { %v124_v50 = vld [vmem:[#allocation1] sm:$0xff] }
  0x53   :  { %v125_v51 = vshll.u32 %v124_v50, 16  ;;  %133 = vst [vmem:[#allocation1] ss:$9 sm:$0xff] %v412_v48  ;;  %v200_v48 = vunpack.c.h.bf16 %v196_v40  ;;  %v203_v50 = vunpack.c.l.bf16 %v201_v32 }
  0x55   :  { %v128_v52 = vsel %vm456_vm2, %v410_v49, %v125_v51  ;;  %v292_v51 = vsel %vm291_vm5, %v288_v44, %v290_v45  ;;  %v223_v2 = vperm.slane %v200_v48, 0 }
  0x56   :  { %129 = vst [vmem:[#allocation2 + $0x9] sm:$0x1] %v128_v52  ;;  %v306_v59 = vmul.f32 %v292_v51, %v203_v50 }
  0x5a   :  { %v134_v55 = vld [vmem:[#allocation1] sm:$0xff] }
  0x5b   :  { %v135_v56 = vshrl.u32 %v134_v55, 16  ;;  %143 = vst [vmem:[#allocation1] ss:$9 sm:$0xff] %v414_v53  ;;  %v220_v53 = vperm.slane %v199_v43, 2  ;;  %v222_v55 = vperm.slane %v199_v43, 6 }
  0x5d   :  { %v138_v57 = vsel %vm456_vm2, %v135_v56, %v413_v54  ;;  %v221_v54 = vperm.slane %v199_v43, 4  ;;  %v224_v56 = vperm.slane %v200_v48, 2  ;;  %v252_v62 = vperm.slane %v220_v53, 0 }
  0x5e   :  { %139 = vst [vmem:[#allocation2 + $0xa] sm:$0x1] %v138_v57  ;;  %v225_v57 = vperm.slane %v200_v48, 4 }
  0x5f   :  { %v256_v3 = vperm.slane %v224_v56, 0  ;;  %v281_v10 = vrot.slane %v252_v62, 6 }
  0x61   :  { %v284_v14 = vrot.slane %v256_v3, 6 }
  0x62   :  { %v144_v61 = vld [vmem:[#allocation1] sm:$0xff] }
  0x63   :  { %v145_v63 = vshrl.u32 %v144_v61, 16  ;;  %155 = vst [vmem:[#allocation1] ss:$9 sm:$0xff] %v417_v58  ;;  %v226_v58 = vperm.slane %v200_v48, 6  ;;  %v423_v61 = vld [vmem:[%s616_s0 + $0xf] sm:$0x1] }
  0x65   :  { %v148_v0 = vsel %vm456_vm2, %v145_v63, %v415_v60  ;;  %v219_v60 = vperm.slane %v199_v43, 0  ;;  %v253_v63 = vperm.slane %v221_v54, 0  ;;  %v258_v6 = vperm.slane %v226_v58, 0 }
  0x66   :  { %149 = vst [vmem:[#allocation2 + $0xb] sm:$0x1] %v148_v0  ;;  %v254_v0 = vperm.slane %v222_v55, 0 }
  0x67   :  { %v282_v11 = vrot.slane %v253_v63, 4  ;;  %v286_v16 = vrot.slane %v258_v6, 2 }
  0x68   :  { %v283_v12 = vrot.slane %v254_v0, 2 }
  0x6a   :  { %v156_v8 = vld [vmem:[#allocation1] sm:$0xff]  ;;  %v297_v18 = vsel %vm289_vm4, %v282_v11, %v283_v12  ;;  %v194_v11 = vld [vmem:[#allocation3] sm:$0x1] }
  0x6b   :  { %v157_v13 = vshll.u32 %v156_v8, 16  ;;  %167 = vst [vmem:[#allocation1] ss:$9 sm:$0xff] %v419_v4  ;;  %v257_v4 = vperm.slane %v225_v57, 0  ;;  %v251_v8 = vperm.slane %v219_v60, 0  ;;  %v385_v12 = vperm.slane %v194_v11, 0 }
  0x6d   :  { %v160_v15 = vsel %vm456_vm2, %v416_v7, %v157_v13  ;;  %v255_v13 = vperm.slane %v223_v2, 0  ;;  %v296_v17 = vsel %vm287_vm3, %v251_v8, %v281_v10 }
  0x6e   :  { %161 = vst [vmem:[#allocation2 + $0xc] sm:$0x1] %v160_v15  ;;  %v285_v15 = vrot.slane %v257_v4, 4 }
  0x6f   :  { %v299_v19 = vsel %vm287_vm3, %v255_v13, %v284_v14 }
  0x70   :  { %v300_v20 = vsel %vm289_vm4, %v285_v15, %v286_v16 }
  0x71   :  { %v301_v29 = vsel %vm291_vm5, %v299_v19, %v300_v20 }
  0x72   :  { %v168_v28 = vld [vmem:[#allocation1] sm:$0xff] }
  0x73   :  { %v169_v31 = vshll.u32 %v168_v28, 16  ;;  %177 = vst [vmem:[#allocation1] ss:$9 sm:$0xff] %v420_v22  ;;  %v298_v28 = vsel %vm291_vm5, %v296_v17, %v297_v18 }
  0x75   :  { %v172_v36 = vsel %vm456_vm2, %v418_v27, %v169_v31 }
  0x76   :  { %173 = vst [vmem:[#allocation2 + $0xd] sm:$0x1] %v172_v36 }
  0x7a   :  { %v178_v47 = vld [vmem:[#allocation1] sm:$0xff] }
  0x7b   :  { %v179_v49 = vshrl.u32 %v178_v47, 16  ;;  %187 = vst [vmem:[#allocation1] ss:$9 sm:$0xff] %v422_v41 }
  0x7c   :  { %316 = vst [vmem:[#allocation1 + $0x20] ss:$4 sm:$0xff] %v307_v42 }
  0x7d   :  { %v182_v52 = vsel %vm456_vm2, %v179_v49, %v421_v46 }
  0x7e   :  { %183 = vst [vmem:[#allocation2 + $0xe] sm:$0x1] %v182_v52 }
  0x82   :  { %v188_v1 = vld [vmem:[#allocation1] sm:$0xff] }
  0x83   :  { %v189_v7 = vshrl.u32 %v188_v1, 16  ;;  %314 = vst [vmem:[#allocation1] ss:$4 sm:$0xff] %v306_v59  ;;  %v321_v30 = vld.sshfl [vmem:[#allocation1 + $0x20] sm:$0xff pattern:$0x73625140] }
  0x84   :  { %v322_v35 = vld.sshfl [vmem:[#allocation1 + $0x28] sm:$0xff pattern:$0x73625140]  ;;  %v358_v39 = vsel %vm287_vm3, %v321_v30, 0.0 }
  0x85   :  { %v192_v9 = vsel %vm456_vm2, %v189_v7, %v423_v61  ;;  %v323_v40 = vld.sshfl [vmem:[#allocation1 + $0x30] sm:$0xff pattern:$0x73625140]  ;;  %v324_v42 = vld.sshfl [vmem:[#allocation1 + $0x38] sm:$0xff pattern:$0x73625140] }
  0x86   :  { %193 = vst [vmem:[#allocation2 + $0xf] sm:$0x1] %v192_v9  ;;  %v360_v43 = vsel %vm287_vm3, %v322_v35, 0.0  ;;  %v362_v45 = vsel %vm287_vm3, %v323_v40, 0.0  ;;  %v364_v48 = vsel %vm287_vm3, %v324_v42, 0.0 }
  0x8a   :  { %v317_v21 = vld.sshfl [vmem:[#allocation1] sm:$0xff pattern:$0x73625140]  ;;  %v318_v22 = vld.sshfl [vmem:[#allocation1 + $0x8] sm:$0xff pattern:$0x73625140] }
  0x8b   :  { %v319_v5 = vld.sshfl [vmem:[#allocation1 + $0x10] sm:$0xff pattern:$0x73625140]  ;;  %v320_v23 = vld.sshfl [vmem:[#allocation1 + $0x18] sm:$0xff pattern:$0x73625140] }
  0x8c   :  { %v351_v24 = vsel %vm287_vm3, %v317_v21, 0.0  ;;  %v352_v25 = vsel %vm287_vm3, %v318_v22, 0.0  ;;  %v354_v26 = vsel %vm287_vm3, %v319_v5, 0.0  ;;  %v356_v34 = vsel %vm287_vm3, %v320_v23, 0.0 }
  0x8d   :  { %v202_v27 = vld [vmem:[#allocation2 + $0x8] sm:$0xff]  ;;  %v353_v31 = vadd.f32 %v352_v25, %v351_v24 }
  0x8e   :  { %v205_v32 = vunpack.c.l.bf16 %v202_v27  ;;  %v206_v33 = vunpack.c.h.bf16 %v202_v27 }
  0x8f   :  { %v355_v36 = vadd.f32 %v354_v26, %v353_v31 }
  0x90   :  { %v308_v37 = vmul.f32 %v298_v28, %v205_v32  ;;  %v309_v38 = vmul.f32 %v301_v29, %v206_v33 }
  0x91   :  { %v357_v41 = vadd.f32 %v356_v34, %v355_v36 }
  0x92   :  { %325 = vst [vmem:[#allocation1] ss:$4 sm:$0xff] %v308_v37 }
  0x93   :  { %326 = vst [vmem:[#allocation1 + $0x20] ss:$4 sm:$0xff] %v309_v38  ;;  %v359_v44 = vadd.f32 %v358_v39, %v357_v41 }
  0x95   :  { %v361_v46 = vadd.f32 %v360_v43, %v359_v44 }
  0x97   :  { %v363_v47 = vadd.f32 %v362_v45, %v361_v46 }
  0x99   :  { %v327_v49 = vld.sshfl [vmem:[#allocation1] sm:$0xff pattern:$0x73625140]  ;;  %v328_v50 = vld.sshfl [vmem:[#allocation1 + $0x8] sm:$0xff pattern:$0x73625140]  ;;  %v365_v51 = vadd.f32 %v364_v48, %v363_v47 }
  0x9a   :  { %v329_v52 = vld.sshfl [vmem:[#allocation1 + $0x10] sm:$0xff pattern:$0x73625140]  ;;  %v366_v53 = vsel %vm287_vm3, %v327_v49, 0.0  ;;  %v368_v54 = vsel %vm287_vm3, %v328_v50, 0.0 }
  0x9b   :  { %v330_v55 = vld.sshfl [vmem:[#allocation1 + $0x18] sm:$0xff pattern:$0x73625140]  ;;  %v367_v56 = vadd.f32 %v366_v53, %v365_v51  ;;  %v370_v57 = vsel %vm287_vm3, %v329_v52, 0.0 }
  0x9c   :  { %v331_v58 = vld.sshfl [vmem:[#allocation1 + $0x20] sm:$0xff pattern:$0x73625140]  ;;  %v372_v60 = vsel %vm287_vm3, %v330_v55, 0.0 }
  0x9d   :  { %v369_v59 = vadd.f32 %v368_v54, %v367_v56  ;;  %v332_v61 = vld.sshfl [vmem:[#allocation1 + $0x28] sm:$0xff pattern:$0x73625140]  ;;  %v374_v63 = vsel %vm287_vm3, %v331_v58, 0.0 }
  0x9e   :  { %v333_v0 = vld.sshfl [vmem:[#allocation1 + $0x30] sm:$0xff pattern:$0x73625140]  ;;  %v376_v2 = vsel %vm287_vm3, %v332_v61, 0.0 }
  0x9f   :  { %v371_v62 = vadd.f32 %v370_v57, %v369_v59  ;;  %v334_v3 = vld.sshfl [vmem:[#allocation1 + $0x38] sm:$0xff pattern:$0x73625140]  ;;  %v378_v6 = vsel %vm287_vm3, %v333_v0, 0.0 }
  0xa0   :  { %v380_v8 = vsel %vm287_vm3, %v334_v3, 0.0 }
  0xa1   :  { %v373_v1 = vadd.f32 %v372_v60, %v371_v62 }
  0xa3   :  { %v375_v4 = vadd.f32 %v374_v63, %v373_v1 }
  0xa5   :  { %v377_v7 = vadd.f32 %v376_v2, %v375_v4 }
  0xa7   :  { %v379_v9 = vadd.f32 %v378_v6, %v377_v7 }
  0xa9   :  { %v381_v10 = vadd.f32 %v380_v8, %v379_v9 }
  0xab   :  { %382 = vadd.xlane.f32.xlu0 %v381_v10 }
 0x11e   :  { %v383_v13 = vpop.xlane.xlu0 %382 }
 0x11f   :  { %v387_v14 = vadd.f32 %v385_v12, %v383_v13 }
 0x121   :  { %389 = vst.msk [vmem:[%s619_s3] sm:$0x3] %vm388_vm6, %v387_v14 }

</bundles_post_ra>
